<compile_context>
chip_gen: v5e
topology: v5e:2x2
jax: 0.10.0
libtpu: 0.0.40
codegen_flags: <defaults>
</compile_context>

<pallas_src>
import functools

import jax
import jax.numpy as jnp
from jax.experimental import pallas as pl
from jax.experimental.pallas import tpu as pltpu

_EPS = 1e-5


def _round_up(x, m):
    return ((x + m - 1) // m) * m


# ---------------------------------------------------------------------------
# Pallas kernel 1 (conv path): y = act((W_T @ P_T) * scale + bias)
#   W_T: (Cout, K) bf16   P_T: (K, TM) bf16   scale/bias: (Cout, 1) f32
#   output: (Cout, TM)  -> lane dimension is the M tile (lane-dense).
# ---------------------------------------------------------------------------
def _conv_mm_kernel(w_ref, p_ref, s_ref, b_ref, o_ref, *, relu):
    y = jnp.dot(w_ref[...], p_ref[...], preferred_element_type=jnp.float32)
    y = y * s_ref[...] + b_ref[...]
    if relu:
        y = jnp.maximum(y, 0.0)
    o_ref[...] = y.astype(o_ref.dtype)


def conv_matmul_T(wT, pT, scale, bias, relu, out_dtype):
    """Returns act((wT @ pT) * scale + bias) with shape (Cout_like, M)."""
    Nc, K = wT.shape
    K2, M = pT.shape
    assert K == K2
    Mpad = _round_up(M, 128)
    TM = 256 if Mpad % 256 == 0 else 128   # bigger M tiles; >=2 blocks when M>=512
    if Mpad != M:
        pT = jnp.pad(pT, ((0, 0), (0, Mpad - M)))

    out = pl.pallas_call(
        functools.partial(_conv_mm_kernel, relu=relu),
        out_shape=jax.ShapeDtypeStruct((Nc, Mpad), out_dtype),
        grid=(Mpad // TM,),
        in_specs=[
            pl.BlockSpec((Nc, K), lambda m: (0, 0)),   # weights, resident (K <= ~1k)
            pl.BlockSpec((K, TM), lambda m: (0, m)),   # bf16 patches, tiled over M
            pl.BlockSpec((Nc, 1), lambda m: (0, 0)),   # folded BN scale (per out chan)
            pl.BlockSpec((Nc, 1), lambda m: (0, 0)),   # folded BN bias
        ],
        out_specs=pl.BlockSpec((Nc, TM), lambda m: (0, m)),
        compiler_params=pltpu.CompilerParams(dimension_semantics=("parallel",)),
    )(wT, pT, scale, bias)
    return out if Mpad == M else out[:, :M]


# ---------------------------------------------------------------------------
# Pallas kernel 2 (linear path): y = act((X @ W) * scale + bias)
#   K-tiled grid + f32 VMEM accumulator; X rows padded only to 8.
# ---------------------------------------------------------------------------
def _lin_mm_kernel(x_ref, w_ref, s_ref, b_ref, o_ref, acc_ref, *, relu):
    @pl.when(pl.program_id(1) == 0)
    def _():
        acc_ref[...] = jnp.zeros_like(acc_ref)

    acc_ref[...] += jnp.dot(x_ref[...], w_ref[...],
                            preferred_element_type=jnp.float32)

    @pl.when(pl.program_id(1) == pl.num_programs(1) - 1)
    def _():
        y = acc_ref[...] * s_ref[...] + b_ref[...]
        if relu:
            y = jnp.maximum(y, 0.0)
        o_ref[...] = y.astype(o_ref.dtype)


def linear_affine(x, w, scale, bias, relu, out_dtype):
    Bt, K = x.shape
    K2, N = w.shape
    assert K == K2
    Mp = _round_up(max(Bt, 8), 8)
    Kpad = _round_up(K, 128)

    x = x.astype(jnp.bfloat16)
    if Mp != Bt or Kpad != K:
        x = jnp.pad(x, ((0, Mp - Bt), (0, Kpad - K)))
    if Kpad != K:
        w = jnp.pad(w, ((0, Kpad - K), (0, 0)))

    TK = 512 if Kpad % 512 == 0 else (256 if Kpad % 256 == 0 else 128)
    if N % 128 == 0:
        TN = 512 if N % 512 == 0 else (256 if N % 256 == 0 else 128)
    else:
        TN = N   # tiny heads (e.g. latent) run as a single full-width block

    out = pl.pallas_call(
        functools.partial(_lin_mm_kernel, relu=relu),
        out_shape=jax.ShapeDtypeStruct((Mp, N), out_dtype),
        grid=(N // TN, Kpad // TK),
        in_specs=[
            pl.BlockSpec((Mp, TK), lambda n, k: (0, k)),   # activations (bf16)
            pl.BlockSpec((TK, TN), lambda n, k: (k, n)),   # weights (bf16), K/N tiled
            pl.BlockSpec((1, TN), lambda n, k: (0, n)),    # folded BN scale
            pl.BlockSpec((1, TN), lambda n, k: (0, n)),    # folded BN / linear bias
        ],
        out_specs=pl.BlockSpec((Mp, TN), lambda n, k: (0, n)),
        scratch_shapes=[pltpu.VMEM((Mp, TN), jnp.float32)],
        compiler_params=pltpu.CompilerParams(
            dimension_semantics=("parallel", "arbitrary")),
    )(x, w, scale, bias)
    return out[:Bt]


# ---------------------------------------------------------------------------
# im2col glue (plain JAX), channels-outermost (C, B, H, W), bf16 patches.
# ---------------------------------------------------------------------------
def conv_patches_T(h, kh=4, kw=4, stride=2, pad=1):
    """h: (Cin, B, H, W) -> patches_T (Cin*kh*kw, B*Ho*Wo), K-order (ci,ky,kx)."""
    C, B, H, W = h.shape
    hp = jnp.pad(h, ((0, 0), (0, 0), (pad, pad), (pad, pad)))
    Ho = (H + 2 * pad - kh) // stride + 1
    Wo = (W + 2 * pad - kw) // stride + 1
    cols = []
    for ky in range(kh):
        for kx in range(kw):
            cols.append(hp[:, :, ky:ky + stride * Ho:stride,
                               kx:kx + stride * Wo:stride])
    p = jnp.stack(cols, axis=1)                       # (C, kh*kw, B, Ho, Wo)
    return p.reshape(C * kh * kw, B * Ho * Wo), (B, Ho, Wo)


def deconv_patches_T(h):
    """Stride-1 3x3 patches (pad 1) for the sub-pixel ConvTranspose rewrite.
    h: (Cin, B, H, W) -> (Cin*9, B*H*W), K-order (ci, dy, dx)."""
    C, B, H, W = h.shape
    hp = jnp.pad(h, ((0, 0), (0, 0), (1, 1), (1, 1)))
    cols = []
    for dy in range(3):
        for dx in range(3):
            cols.append(hp[:, :, dy:dy + H, dx:dx + W])
    p = jnp.stack(cols, axis=1)                       # (C, 9, B, H, W)
    return p.reshape(C * 9, B * H * W), (B, H, W)


def build_subpixel_deconv_weight(w):
    """PyTorch ConvTranspose2d(4, s=2, p=1) weight (Cin, Cout, 4, 4) -> the
    equivalent stride-1 3x3 conv weight (4*Cout, 9*Cin); N-order (py, px, co),
    K-order (ci, dy, dx).  out[2m+py, 2n+px] = sum_{dy,dx} x[m-1+dy, n-1+dx]*W."""
    cin, cout = w.shape[0], w.shape[1]
    # (phase, patch offset) -> original kernel tap (None entries stay zero)
    tap = {(0, 0): 3, (0, 1): 1, (1, 1): 2, (1, 2): 0}
    wt = jnp.zeros((2, 2, cout, cin, 3, 3), jnp.float32)
    for (py, dy), ky in tap.items():
        for (px, dx), kx in tap.items():
            wt = wt.at[py, px, :, :, dy, dx].set(w[:, :, ky, kx].T)
    return wt.reshape(4 * cout, cin * 9)


# ---------------------------------------------------------------------------
# Parameter init (deterministic, synthetic) with BatchNorm folded to scale/bias
# ---------------------------------------------------------------------------
def init_params(key, latent_size, multiplier, img_size, unc=False):
    m = multiplier
    fm = img_size // 16
    c16, c32, c64 = int(16 * m), int(32 * m), int(64 * m)
    out_channels = 2 if unc else 1
    keys = iter(jax.random.split(key, 64))

    def nrm(shape, std=0.05):
        return std * jax.random.normal(next(keys), shape, jnp.float32)

    def bn_fold(n, lin_bias=None):
        gamma = 1.0 + 0.1 * jax.random.normal(next(keys), (n,), jnp.float32)
        beta = 0.1 * jax.random.normal(next(keys), (n,), jnp.float32)
        mean = 0.05 * jax.random.normal(next(keys), (n,), jnp.float32)
        var = 1.0 + 0.2 * jax.random.uniform(next(keys), (n,), jnp.float32)
        scale = gamma / jnp.sqrt(var + _EPS)
        if lin_bias is None:
            bias = beta - mean * scale
        else:
            bias = (lin_bias - mean) * scale + beta
        return scale, bias

    params = {}

    # encoder: Conv2d(4,2,1,bias=False) + BN + ReLU, x4  (weights stored bf16,
    # pre-reshaped to (Cout, Cin*16); BN folded to per-channel (Cout,1) f32)
    enc = []
    for cin, cout in zip([1, c16, c32, c64], [c16, c32, c64, c64]):
        w = nrm((cout, cin, 4, 4))
        s, b = bn_fold(cout)
        enc.append((w.reshape(cout, cin * 16).astype(jnp.bfloat16),
                    s.reshape(cout, 1), b.reshape(cout, 1)))
    params["enc_convs"] = enc

    feat = c64 * fm * fm
    # linear_enc: Linear(feat,2048)+BN+ReLU, Linear(2048,latent)
    w1, b1 = nrm((feat, 2048)), nrm((2048,))
    s1, bb1 = bn_fold(2048, lin_bias=b1)
    w2, b2 = nrm((2048, latent_size)), nrm((latent_size,))
    params["lin_enc"] = [
        (w1.astype(jnp.bfloat16), s1.reshape(1, -1), bb1.reshape(1, -1)),
        (w2.astype(jnp.bfloat16), jnp.ones((1, latent_size), jnp.float32),
         b2.reshape(1, -1)),
    ]
    # linear_dec: Linear(latent,2048)+BN+ReLU, Linear(2048,feat)
    w3, b3 = nrm((latent_size, 2048)), nrm((2048,))
    s3, bb3 = bn_fold(2048, lin_bias=b3)
    w4, b4 = nrm((2048, feat)), nrm((feat,))
    params["lin_dec"] = [
        (w3.astype(jnp.bfloat16), s3.reshape(1, -1), bb3.reshape(1, -1)),
        (w4.astype(jnp.bfloat16), jnp.ones((1, feat), jnp.float32),
         b4.reshape(1, -1)),
    ]

    # decoder: ConvTranspose2d(4,2,1,bias=False) (+BN+ReLU on first 3),
    # rewritten as sub-pixel 3x3 convs: weight (4*Cout, 9*Cin) bf16, BN tiled x4.
    dec = []
    dec_chans = [c64, c64, c32, c16, out_channels]
    for idx, (cin, cout) in enumerate(zip(dec_chans[:-1], dec_chans[1:])):
        w = nrm((cin, cout, 4, 4))
        if idx < 3:
            s, b = bn_fold(cout)
        else:
            s, b = jnp.ones((cout,), jnp.float32), jnp.zeros((cout,), jnp.float32)
        wT = build_subpixel_deconv_weight(w).astype(jnp.bfloat16)
        dec.append((wT,
                    jnp.tile(s, 4).reshape(4 * cout, 1),
                    jnp.tile(b, 4).reshape(4 * cout, 1)))
    params["dec_convs"] = dec
    return params


# ---------------------------------------------------------------------------
# Forward pass (matches AE.forward: feature -> decode)
# ---------------------------------------------------------------------------
def ae_forward(x, params, unc=False):
    B = x.shape[0]
    # channels-outermost (C, B, H, W) activations in bf16, end-to-end
    h = x.transpose(1, 0, 2, 3).astype(jnp.bfloat16)

    # ---- encoder ----
    for (wT, s, b) in params["enc_convs"]:
        pT, (Bb, Ho, Wo) = conv_patches_T(h, kh=4, kw=4, stride=2, pad=1)
        y = conv_matmul_T(wT, pT, s, b, relu=True, out_dtype=jnp.bfloat16)
        h = y.reshape(-1, Bb, Ho, Wo)                 # (Cout, B, Ho, Wo)

    # flatten in PyTorch NCHW order: (B, C*fm*fm)
    flat = h.transpose(1, 0, 2, 3).reshape(B, -1)
    (w1, s1, b1), (w2, s2, b2) = params["lin_enc"]
    flat = linear_affine(flat, w1, s1, b1, relu=True, out_dtype=jnp.bfloat16)
    lat = linear_affine(flat, w2, s2, b2, relu=False, out_dtype=jnp.bfloat16)

    # ---- decoder ----
    (w3, s3, b3), (w4, s4, b4) = params["lin_dec"]
    h2 = linear_affine(lat, w3, s3, b3, relu=True, out_dtype=jnp.bfloat16)
    h2 = linear_affine(h2, w4, s4, b4, relu=False, out_dtype=jnp.bfloat16)

    c64 = params["dec_convs"][0][0].shape[1] // 9     # Cin of first deconv
    feat = h2.shape[1]
    fm = int(round((feat // c64) ** 0.5))
    h = h2.reshape(B, c64, fm, fm).transpose(1, 0, 2, 3)   # (C, B, fm, fm)

    n_dec = len(params["dec_convs"])
    for idx, (wT, s, b) in enumerate(params["dec_convs"]):
        last = idx == n_dec - 1
        pT, (Bb, H, W) = deconv_patches_T(h)
        out_dtype = jnp.float32 if last else jnp.bfloat16
        y = conv_matmul_T(wT, pT, s, b, relu=not last, out_dtype=out_dtype)
        cout = wT.shape[0] // 4
        # depth-to-space: (py,px,co,b,h,w) -> (co,b,2h,2w)
        y = y.reshape(2, 2, cout, Bb, H, W)
        h = y.transpose(2, 3, 4, 0, 5, 1).reshape(cout, Bb, 2 * H, 2 * W)

    out = h.transpose(1, 0, 2, 3)                     # back to NCHW, f32
    if unc:
        a, c = jnp.split(out, 2, axis=1)              # torch .chunk(2, 1)
        return a, c
    return out


if __name__ == "__main__":
    key = jax.random.PRNGKey(0)
    pkey, xkey = jax.random.split(key)

    latent_size, multiplier, img_size = 32, 1, 32     # small shapes; fm = 2
    params = init_params(pkey, latent_size, multiplier, img_size, unc=False)

    x = jax.random.normal(xkey, (2, 1, img_size, img_size), jnp.float32)
    fwd = jax.jit(functools.partial(ae_forward, unc=False))
    out = fwd(x, params)
    out = jax.block_until_ready(out)

    assert out.shape == (2, 1, img_size, img_size), out.shape
    assert bool(jnp.all(jnp.isfinite(out)))
    print("KERNEL_OK")
</pallas_src>

<mosaic_0001>
module attributes {stable_mosaic.version = 11 : i64} {
  func.func @_conv_mm_kernel(%arg0: i32, %arg1: memref<16x16xbf16, #tpu.memory_space<vmem>>, %arg2: memref<16x256xbf16, #tpu.memory_space<vmem>>, %arg3: memref<16x1xf32, #tpu.memory_space<vmem>>, %arg4: memref<16x1xf32, #tpu.memory_space<vmem>>, %arg5: memref<16x256xbf16, #tpu.memory_space<vmem>>) attributes {dimension_semantics = [#tpu.dimension_semantics<parallel>], iteration_bounds = array<i64: 2>, scalar_prefetch = 0 : i64, scratch_operands = 0 : i64, tpu.core_type = #tpu.core_type<tc>, window_params = [{pipeline_mode = #tpu.pipeline_mode<synchronous>, transform_indices = @transform_0, window_bounds = array<i64: 16, 16>}, {transform_indices = @transform_1, window_bounds = array<i64: 16, 256>}, {pipeline_mode = #tpu.pipeline_mode<synchronous>, transform_indices = @transform_2, window_bounds = array<i64: 16, 1>}, {pipeline_mode = #tpu.pipeline_mode<synchronous>, transform_indices = @transform_3, window_bounds = array<i64: 16, 1>}, {transform_indices = @transform_4, window_bounds = array<i64: 16, 256>}]} {
    %c0 = arith.constant 0 : index
    %c0_0 = arith.constant 0 : index
    %0 = vector.load %arg1[%c0, %c0_0] : memref<16x16xbf16, #tpu.memory_space<vmem>>, vector<16x16xbf16>
    %c0_1 = arith.constant 0 : index
    %c0_2 = arith.constant 0 : index
    %1 = vector.load %arg2[%c0_1, %c0_2] : memref<16x256xbf16, #tpu.memory_space<vmem>>, vector<16x256xbf16>
    %cst = arith.constant dense<0.000000e+00> : vector<16x256xf32>
    %2 = tpu.matmul %0, %1, %cst {dimension_numbers = #tpu.dot_dimension_numbers<[1], [0], [0], [1], [0, 0, 1, 1], [], []>} : vector<16x16xbf16>, vector<16x256xbf16>, vector<16x256xf32> -> vector<16x256xf32>
    %c0_3 = arith.constant 0 : index
    %c0_4 = arith.constant 0 : index
    %3 = vector.load %arg3[%c0_3, %c0_4] : memref<16x1xf32, #tpu.memory_space<vmem>>, vector<16x1xf32>
    %4 = vector.broadcast %3 : vector<16x1xf32> to vector<16x256xf32>
    %5 = arith.mulf %2, %4 : vector<16x256xf32>
    %c0_5 = arith.constant 0 : index
    %c0_6 = arith.constant 0 : index
    %6 = vector.load %arg4[%c0_5, %c0_6] : memref<16x1xf32, #tpu.memory_space<vmem>>, vector<16x1xf32>
    %7 = vector.broadcast %6 : vector<16x1xf32> to vector<16x256xf32>
    %8 = arith.addf %5, %7 : vector<16x256xf32>
    %cst_7 = arith.constant 0.000000e+00 : f32
    %9 = vector.broadcast %cst_7 : f32 to vector<16x256xf32>
    %10 = arith.maximumf %8, %9 : vector<16x256xf32>
    %11 = arith.truncf %10 : vector<16x256xf32> to vector<16x256xbf16>
    %c0_8 = arith.constant 0 : index
    %c0_9 = arith.constant 0 : index
    %12 = vector.load %arg5[%c0_8, %c0_9] : memref<16x256xbf16, #tpu.memory_space<vmem>>, vector<16x256xbf16>
    tpu.vector_store %arg5[%c0_8, %c0_9], %11 {strides = array<i32>} : memref<16x256xbf16, #tpu.memory_space<vmem>>, vector<16x256xbf16>,
    return
  }
  func.func @transform_0(%arg0: i32) -> (i32, i32) {
    %c0_i32 = arith.constant 0 : i32
    %c0_i32_0 = arith.constant 0 : i32
    %c0_i32_1 = arith.constant 0 : i32
    return %c0_i32, %c0_i32_0 : i32, i32
  }
  func.func @transform_1(%arg0: i32) -> (i32, i32) {
    %c0_i32 = arith.constant 0 : i32
    %c0_i32_0 = arith.constant 0 : i32
    return %c0_i32, %arg0 : i32, i32
  }
  func.func @transform_2(%arg0: i32) -> (i32, i32) {
    %c0_i32 = arith.constant 0 : i32
    %c0_i32_0 = arith.constant 0 : i32
    %c0_i32_1 = arith.constant 0 : i32
    return %c0_i32, %c0_i32_0 : i32, i32
  }
  func.func @transform_3(%arg0: i32) -> (i32, i32) {
    %c0_i32 = arith.constant 0 : i32
    %c0_i32_0 = arith.constant 0 : i32
    %c0_i32_1 = arith.constant 0 : i32
    return %c0_i32, %c0_i32_0 : i32, i32
  }
  func.func @transform_4(%arg0: i32) -> (i32, i32) {
    %c0_i32 = arith.constant 0 : i32
    %c0_i32_0 = arith.constant 0 : i32
    return %c0_i32, %arg0 : i32, i32
  }
}

module attributes {stable_mosaic.version = 11 : i64} {
  func.func @_conv_mm_kernel(%arg0: i32, %arg1: memref<32x256xbf16, #tpu.memory_space<vmem>>, %arg2: memref<256x128xbf16, #tpu.memory_space<vmem>>, %arg3: memref<32x1xf32, #tpu.memory_space<vmem>>, %arg4: memref<32x1xf32, #tpu.memory_space<vmem>>, %arg5: memref<32x128xbf16, #tpu.memory_space<vmem>>) attributes {dimension_semantics = [#tpu.dimension_semantics<parallel>], iteration_bounds = array<i64: 1>, scalar_prefetch = 0 : i64, scratch_operands = 0 : i64, tpu.core_type = #tpu.core_type<tc>, window_params = [{pipeline_mode = #tpu.pipeline_mode<synchronous>, transform_indices = @transform_0, window_bounds = array<i64: 32, 256>}, {transform_indices = @transform_1, window_bounds = array<i64: 256, 128>}, {pipeline_mode = #tpu.pipeline_mode<synchronous>, transform_indices = @transform_2, window_bounds = array<i64: 32, 1>}, {pipeline_mode = #tpu.pipeline_mode<synchronous>, transform_indices = @transform_3, window_bounds = array<i64: 32, 1>}, {transform_indices = @transform_4, window_bounds = array<i64: 32, 128>}]} {
    %c0 = arith.constant 0 : index
    %c0_0 = arith.constant 0 : index
    %0 = vector.load %arg1[%c0, %c0_0] : memref<32x256xbf16, #tpu.memory_space<vmem>>, vector<32x256xbf16>
    %c0_1 = arith.constant 0 : index
    %c0_2 = arith.constant 0 : index
    %1 = vector.load %arg2[%c0_1, %c0_2] : memref<256x128xbf16, #tpu.memory_space<vmem>>, vector<256x128xbf16>
    %cst = arith.constant dense<0.000000e+00> : vector<32x128xf32>
    %2 = tpu.matmul %0, %1, %cst {dimension_numbers = #tpu.dot_dimension_numbers<[1], [0], [0], [1], [0, 0, 1, 1], [], []>} : vector<32x256xbf16>, vector<256x128xbf16>, vector<32x128xf32> -> vector<32x128xf32>
    %c0_3 = arith.constant 0 : index
    %c0_4 = arith.constant 0 : index
    %3 = vector.load %arg3[%c0_3, %c0_4] : memref<32x1xf32, #tpu.memory_space<vmem>>, vector<32x1xf32>
    %4 = vector.broadcast %3 : vector<32x1xf32> to vector<32x128xf32>
    %5 = arith.mulf %2, %4 : vector<32x128xf32>
    %c0_5 = arith.constant 0 : index
    %c0_6 = arith.constant 0 : index
    %6 = vector.load %arg4[%c0_5, %c0_6] : memref<32x1xf32, #tpu.memory_space<vmem>>, vector<32x1xf32>
    %7 = vector.broadcast %6 : vector<32x1xf32> to vector<32x128xf32>
    %8 = arith.addf %5, %7 : vector<32x128xf32>
    %cst_7 = arith.constant 0.000000e+00 : f32
    %9 = vector.broadcast %cst_7 : f32 to vector<32x128xf32>
    %10 = arith.maximumf %8, %9 : vector<32x128xf32>
    %11 = arith.truncf %10 : vector<32x128xf32> to vector<32x128xbf16>
    %c0_8 = arith.constant 0 : index
    %c0_9 = arith.constant 0 : index
    %12 = vector.load %arg5[%c0_8, %c0_9] : memref<32x128xbf16, #tpu.memory_space<vmem>>, vector<32x128xbf16>
    tpu.vector_store %arg5[%c0_8, %c0_9], %11 {strides = array<i32>} : memref<32x128xbf16, #tpu.memory_space<vmem>>, vector<32x128xbf16>,
    return
  }
  func.func @transform_0(%arg0: i32) -> (i32, i32) {
    %c0_i32 = arith.constant 0 : i32
    %c0_i32_0 = arith.constant 0 : i32
    %c0_i32_1 = arith.constant 0 : i32
    return %c0_i32, %c0_i32_0 : i32, i32
  }
  func.func @transform_1(%arg0: i32) -> (i32, i32) {
    %c0_i32 = arith.constant 0 : i32
    %c0_i32_0 = arith.constant 0 : i32
    return %c0_i32, %arg0 : i32, i32
  }
  func.func @transform_2(%arg0: i32) -> (i32, i32) {
    %c0_i32 = arith.constant 0 : i32
    %c0_i32_0 = arith.constant 0 : i32
    %c0_i32_1 = arith.constant 0 : i32
    return %c0_i32, %c0_i32_0 : i32, i32
  }
  func.func @transform_3(%arg0: i32) -> (i32, i32) {
    %c0_i32 = arith.constant 0 : i32
    %c0_i32_0 = arith.constant 0 : i32
    %c0_i32_1 = arith.constant 0 : i32
    return %c0_i32, %c0_i32_0 : i32, i32
  }
  func.func @transform_4(%arg0: i32) -> (i32, i32) {
    %c0_i32 = arith.constant 0 : i32
    %c0_i32_0 = arith.constant 0 : i32
    return %c0_i32, %arg0 : i32, i32
  }
}

module attributes {stable_mosaic.version = 11 : i64} {
  func.func @_conv_mm_kernel(%arg0: i32, %arg1: memref<64x512xbf16, #tpu.memory_space<vmem>>, %arg2: memref<512x128xbf16, #tpu.memory_space<vmem>>, %arg3: memref<64x1xf32, #tpu.memory_space<vmem>>, %arg4: memref<64x1xf32, #tpu.memory_space<vmem>>, %arg5: memref<64x128xbf16, #tpu.memory_space<vmem>>) attributes {dimension_semantics = [#tpu.dimension_semantics<parallel>], iteration_bounds = array<i64: 1>, scalar_prefetch = 0 : i64, scratch_operands = 0 : i64, tpu.core_type = #tpu.core_type<tc>, window_params = [{pipeline_mode = #tpu.pipeline_mode<synchronous>, transform_indices = @transform_0, window_bounds = array<i64: 64, 512>}, {transform_indices = @transform_1, window_bounds = array<i64: 512, 128>}, {pipeline_mode = #tpu.pipeline_mode<synchronous>, transform_indices = @transform_2, window_bounds = array<i64: 64, 1>}, {pipeline_mode = #tpu.pipeline_mode<synchronous>, transform_indices = @transform_3, window_bounds = array<i64: 64, 1>}, {transform_indices = @transform_4, window_bounds = array<i64: 64, 128>}]} {
    %c0 = arith.constant 0 : index
    %c0_0 = arith.constant 0 : index
    %0 = vector.load %arg1[%c0, %c0_0] : memref<64x512xbf16, #tpu.memory_space<vmem>>, vector<64x512xbf16>
    %c0_1 = arith.constant 0 : index
    %c0_2 = arith.constant 0 : index
    %1 = vector.load %arg2[%c0_1, %c0_2] : memref<512x128xbf16, #tpu.memory_space<vmem>>, vector<512x128xbf16>
    %cst = arith.constant dense<0.000000e+00> : vector<64x128xf32>
    %2 = tpu.matmul %0, %1, %cst {dimension_numbers = #tpu.dot_dimension_numbers<[1], [0], [0], [1], [0, 0, 1, 1], [], []>} : vector<64x512xbf16>, vector<512x128xbf16>, vector<64x128xf32> -> vector<64x128xf32>
    %c0_3 = arith.constant 0 : index
    %c0_4 = arith.constant 0 : index
    %3 = vector.load %arg3[%c0_3, %c0_4] : memref<64x1xf32, #tpu.memory_space<vmem>>, vector<64x1xf32>
    %4 = vector.broadcast %3 : vector<64x1xf32> to vector<64x128xf32>
    %5 = arith.mulf %2, %4 : vector<64x128xf32>
    %c0_5 = arith.constant 0 : index
    %c0_6 = arith.constant 0 : index
    %6 = vector.load %arg4[%c0_5, %c0_6] : memref<64x1xf32, #tpu.memory_space<vmem>>, vector<64x1xf32>
    %7 = vector.broadcast %6 : vector<64x1xf32> to vector<64x128xf32>
    %8 = arith.addf %5, %7 : vector<64x128xf32>
    %cst_7 = arith.constant 0.000000e+00 : f32
    %9 = vector.broadcast %cst_7 : f32 to vector<64x128xf32>
    %10 = arith.maximumf %8, %9 : vector<64x128xf32>
    %11 = arith.truncf %10 : vector<64x128xf32> to vector<64x128xbf16>
    %c0_8 = arith.constant 0 : index
    %c0_9 = arith.constant 0 : index
    %12 = vector.load %arg5[%c0_8, %c0_9] : memref<64x128xbf16, #tpu.memory_space<vmem>>, vector<64x128xbf16>
    tpu.vector_store %arg5[%c0_8, %c0_9], %11 {strides = array<i32>} : memref<64x128xbf16, #tpu.memory_space<vmem>>, vector<64x128xbf16>,
    return
  }
  func.func @transform_0(%arg0: i32) -> (i32, i32) {
    %c0_i32 = arith.constant 0 : i32
    %c0_i32_0 = arith.constant 0 : i32
    %c0_i32_1 = arith.constant 0 : i32
    return %c0_i32, %c0_i32_0 : i32, i32
  }
  func.func @transform_1(%arg0: i32) -> (i32, i32) {
    %c0_i32 = arith.constant 0 : i32
    %c0_i32_0 = arith.constant 0 : i32
    return %c0_i32, %arg0 : i32, i32
  }
  func.func @transform_2(%arg0: i32) -> (i32, i32) {
    %c0_i32 = arith.constant 0 : i32
    %c0_i32_0 = arith.constant 0 : i32
    %c0_i32_1 = arith.constant 0 : i32
    return %c0_i32, %c0_i32_0 : i32, i32
  }
  func.func @transform_3(%arg0: i32) -> (i32, i32) {
    %c0_i32 = arith.constant 0 : i32
    %c0_i32_0 = arith.constant 0 : i32
    %c0_i32_1 = arith.constant 0 : i32
    return %c0_i32, %c0_i32_0 : i32, i32
  }
  func.func @transform_4(%arg0: i32) -> (i32, i32) {
    %c0_i32 = arith.constant 0 : i32
    %c0_i32_0 = arith.constant 0 : i32
    return %c0_i32, %arg0 : i32, i32
  }
}

module attributes {stable_mosaic.version = 11 : i64} {
  func.func @_conv_mm_kernel(%arg0: i32, %arg1: memref<64x1024xbf16, #tpu.memory_space<vmem>>, %arg2: memref<1024x128xbf16, #tpu.memory_space<vmem>>, %arg3: memref<64x1xf32, #tpu.memory_space<vmem>>, %arg4: memref<64x1xf32, #tpu.memory_space<vmem>>, %arg5: memref<64x128xbf16, #tpu.memory_space<vmem>>) attributes {dimension_semantics = [#tpu.dimension_semantics<parallel>], iteration_bounds = array<i64: 1>, scalar_prefetch = 0 : i64, scratch_operands = 0 : i64, tpu.core_type = #tpu.core_type<tc>, window_params = [{pipeline_mode = #tpu.pipeline_mode<synchronous>, transform_indices = @transform_0, window_bounds = array<i64: 64, 1024>}, {transform_indices = @transform_1, window_bounds = array<i64: 1024, 128>}, {pipeline_mode = #tpu.pipeline_mode<synchronous>, transform_indices = @transform_2, window_bounds = array<i64: 64, 1>}, {pipeline_mode = #tpu.pipeline_mode<synchronous>, transform_indices = @transform_3, window_bounds = array<i64: 64, 1>}, {transform_indices = @transform_4, window_bounds = array<i64: 64, 128>}]} {
    %c0 = arith.constant 0 : index
    %c0_0 = arith.constant 0 : index
    %0 = vector.load %arg1[%c0, %c0_0] : memref<64x1024xbf16, #tpu.memory_space<vmem>>, vector<64x1024xbf16>
    %c0_1 = arith.constant 0 : index
    %c0_2 = arith.constant 0 : index
    %1 = vector.load %arg2[%c0_1, %c0_2] : memref<1024x128xbf16, #tpu.memory_space<vmem>>, vector<1024x128xbf16>
    %cst = arith.constant dense<0.000000e+00> : vector<64x128xf32>
    %2 = tpu.matmul %0, %1, %cst {dimension_numbers = #tpu.dot_dimension_numbers<[1], [0], [0], [1], [0, 0, 1, 1], [], []>} : vector<64x1024xbf16>, vector<1024x128xbf16>, vector<64x128xf32> -> vector<64x128xf32>
    %c0_3 = arith.constant 0 : index
    %c0_4 = arith.constant 0 : index
    %3 = vector.load %arg3[%c0_3, %c0_4] : memref<64x1xf32, #tpu.memory_space<vmem>>, vector<64x1xf32>
    %4 = vector.broadcast %3 : vector<64x1xf32> to vector<64x128xf32>
    %5 = arith.mulf %2, %4 : vector<64x128xf32>
    %c0_5 = arith.constant 0 : index
    %c0_6 = arith.constant 0 : index
    %6 = vector.load %arg4[%c0_5, %c0_6] : memref<64x1xf32, #tpu.memory_space<vmem>>, vector<64x1xf32>
    %7 = vector.broadcast %6 : vector<64x1xf32> to vector<64x128xf32>
    %8 = arith.addf %5, %7 : vector<64x128xf32>
    %cst_7 = arith.constant 0.000000e+00 : f32
    %9 = vector.broadcast %cst_7 : f32 to vector<64x128xf32>
    %10 = arith.maximumf %8, %9 : vector<64x128xf32>
    %11 = arith.truncf %10 : vector<64x128xf32> to vector<64x128xbf16>
    %c0_8 = arith.constant 0 : index
    %c0_9 = arith.constant 0 : index
    %12 = vector.load %arg5[%c0_8, %c0_9] : memref<64x128xbf16, #tpu.memory_space<vmem>>, vector<64x128xbf16>
    tpu.vector_store %arg5[%c0_8, %c0_9], %11 {strides = array<i32>} : memref<64x128xbf16, #tpu.memory_space<vmem>>, vector<64x128xbf16>,
    return
  }
  func.func @transform_0(%arg0: i32) -> (i32, i32) {
    %c0_i32 = arith.constant 0 : i32
    %c0_i32_0 = arith.constant 0 : i32
    %c0_i32_1 = arith.constant 0 : i32
    return %c0_i32, %c0_i32_0 : i32, i32
  }
  func.func @transform_1(%arg0: i32) -> (i32, i32) {
    %c0_i32 = arith.constant 0 : i32
    %c0_i32_0 = arith.constant 0 : i32
    return %c0_i32, %arg0 : i32, i32
  }
  func.func @transform_2(%arg0: i32) -> (i32, i32) {
    %c0_i32 = arith.constant 0 : i32
    %c0_i32_0 = arith.constant 0 : i32
    %c0_i32_1 = arith.constant 0 : i32
    return %c0_i32, %c0_i32_0 : i32, i32
  }
  func.func @transform_3(%arg0: i32) -> (i32, i32) {
    %c0_i32 = arith.constant 0 : i32
    %c0_i32_0 = arith.constant 0 : i32
    %c0_i32_1 = arith.constant 0 : i32
    return %c0_i32, %c0_i32_0 : i32, i32
  }
  func.func @transform_4(%arg0: i32) -> (i32, i32) {
    %c0_i32 = arith.constant 0 : i32
    %c0_i32_0 = arith.constant 0 : i32
    return %c0_i32, %arg0 : i32, i32
  }
}

module attributes {stable_mosaic.version = 11 : i64} {
  func.func @_lin_mm_kernel(%arg0: i32, %arg1: i32, %arg2: memref<8x256xbf16, #tpu.memory_space<vmem>>, %arg3: memref<256x512xbf16, #tpu.memory_space<vmem>>, %arg4: memref<1x512xf32, #tpu.memory_space<vmem>>, %arg5: memref<1x512xf32, #tpu.memory_space<vmem>>, %arg6: memref<8x512xbf16, #tpu.memory_space<vmem>>, %arg7: memref<8x512xf32, #tpu.memory_space<vmem>>) attributes {dimension_semantics = [#tpu.dimension_semantics<parallel>, #tpu.dimension_semantics<arbitrary>], iteration_bounds = array<i64: 4, 1>, scalar_prefetch = 0 : i64, scratch_operands = 1 : i64, tpu.core_type = #tpu.core_type<tc>, window_params = [{transform_indices = @transform_0, window_bounds = array<i64: 8, 256>}, {transform_indices = @transform_1, window_bounds = array<i64: 256, 512>}, {transform_indices = @transform_2, window_bounds = array<i64: 1, 512>}, {transform_indices = @transform_3, window_bounds = array<i64: 1, 512>}, {transform_indices = @transform_4, window_bounds = array<i64: 8, 512>}]} {
    %c0_i32 = arith.constant 0 : i32
    %0 = arith.cmpi eq, %arg1, %c0_i32 : i32
    %1 = arith.extui %0 : i1 to i32
    %c0_i32_0 = arith.constant 0 : i32
    %2 = arith.cmpi ne, %1, %c0_i32_0 : i32
    scf.if %2 {
      %cst_10 = arith.constant 0.000000e+00 : f32
      %12 = vector.broadcast %cst_10 : f32 to vector<8x512xf32>
      %c0_11 = arith.constant 0 : index
      %c0_12 = arith.constant 0 : index
      %13 = vector.load %arg7[%c0_11, %c0_12] : memref<8x512xf32, #tpu.memory_space<vmem>>, vector<8x512xf32>
      tpu.vector_store %arg7[%c0_11, %c0_12], %12 {strides = array<i32>} : memref<8x512xf32, #tpu.memory_space<vmem>>, vector<8x512xf32>,
    } else {
    }
    %c0 = arith.constant 0 : index
    %c0_1 = arith.constant 0 : index
    %3 = vector.load %arg7[%c0, %c0_1] : memref<8x512xf32, #tpu.memory_space<vmem>>, vector<8x512xf32>
    %c0_2 = arith.constant 0 : index
    %c0_3 = arith.constant 0 : index
    %4 = vector.load %arg2[%c0_2, %c0_3] : memref<8x256xbf16, #tpu.memory_space<vmem>>, vector<8x256xbf16>
    %c0_4 = arith.constant 0 : index
    %c0_5 = arith.constant 0 : index
    %5 = vector.load %arg3[%c0_4, %c0_5] : memref<256x512xbf16, #tpu.memory_space<vmem>>, vector<256x512xbf16>
    %cst = arith.constant dense<0.000000e+00> : vector<8x512xf32>
    %6 = tpu.matmul %4, %5, %cst {dimension_numbers = #tpu.dot_dimension_numbers<[1], [0], [0], [1], [0, 0, 1, 1], [], []>} : vector<8x256xbf16>, vector<256x512xbf16>, vector<8x512xf32> -> vector<8x512xf32>
    %7 = arith.addf %3, %6 : vector<8x512xf32>
    %c0_6 = arith.constant 0 : index
    %c0_7 = arith.constant 0 : index
    %8 = vector.load %arg7[%c0_6, %c0_7] : memref<8x512xf32, #tpu.memory_space<vmem>>, vector<8x512xf32>
    tpu.vector_store %arg7[%c0_6, %c0_7], %7 {strides = array<i32>} : memref<8x512xf32, #tpu.memory_space<vmem>>, vector<8x512xf32>,
    %c0_i32_8 = arith.constant 0 : i32
    %9 = arith.cmpi eq, %arg1, %c0_i32_8 : i32
    %10 = arith.extui %9 : i1 to i32
    %c0_i32_9 = arith.constant 0 : i32
    %11 = arith.cmpi ne, %10, %c0_i32_9 : i32
    scf.if %11 {
      %c0_10 = arith.constant 0 : index
      %c0_11 = arith.constant 0 : index
      %12 = vector.load %arg7[%c0_10, %c0_11] : memref<8x512xf32, #tpu.memory_space<vmem>>, vector<8x512xf32>
      %c0_12 = arith.constant 0 : index
      %c0_13 = arith.constant 0 : index
      %13 = vector.load %arg4[%c0_12, %c0_13] : memref<1x512xf32, #tpu.memory_space<vmem>>, vector<1x512xf32>
      %14 = vector.broadcast %13 : vector<1x512xf32> to vector<8x512xf32>
      %15 = arith.mulf %12, %14 : vector<8x512xf32>
      %c0_14 = arith.constant 0 : index
      %c0_15 = arith.constant 0 : index
      %16 = vector.load %arg5[%c0_14, %c0_15] : memref<1x512xf32, #tpu.memory_space<vmem>>, vector<1x512xf32>
      %17 = vector.broadcast %16 : vector<1x512xf32> to vector<8x512xf32>
      %18 = arith.addf %15, %17 : vector<8x512xf32>
      %cst_16 = arith.constant 0.000000e+00 : f32
      %19 = vector.broadcast %cst_16 : f32 to vector<8x512xf32>
      %20 = arith.maximumf %18, %19 : vector<8x512xf32>
      %21 = arith.truncf %20 : vector<8x512xf32> to vector<8x512xbf16>
      %c0_17 = arith.constant 0 : index
      %c0_18 = arith.constant 0 : index
      %22 = vector.load %arg6[%c0_17, %c0_18] : memref<8x512xbf16, #tpu.memory_space<vmem>>, vector<8x512xbf16>
      tpu.vector_store %arg6[%c0_17, %c0_18], %21 {strides = array<i32>} : memref<8x512xbf16, #tpu.memory_space<vmem>>, vector<8x512xbf16>,
    } else {
    }
    return
  }
  func.func @transform_0(%arg0: i32, %arg1: i32) -> (i32, i32) {
    %c0_i32 = arith.constant 0 : i32
    %c0_i32_0 = arith.constant 0 : i32
    return %c0_i32, %arg1 : i32, i32
  }
  func.func @transform_1(%arg0: i32, %arg1: i32) -> (i32, i32) {
    %c0_i32 = arith.constant 0 : i32
    return %arg1, %arg0 : i32, i32
  }
  func.func @transform_2(%arg0: i32, %arg1: i32) -> (i32, i32) {
    %c0_i32 = arith.constant 0 : i32
    %c0_i32_0 = arith.constant 0 : i32
    return %c0_i32, %arg0 : i32, i32
  }
  func.func @transform_3(%arg0: i32, %arg1: i32) -> (i32, i32) {
    %c0_i32 = arith.constant 0 : i32
    %c0_i32_0 = arith.constant 0 : i32
    return %c0_i32, %arg0 : i32, i32
  }
  func.func @transform_4(%arg0: i32, %arg1: i32) -> (i32, i32) {
    %c0_i32 = arith.constant 0 : i32
    %c0_i32_0 = arith.constant 0 : i32
    return %c0_i32, %arg0 : i32, i32
  }
}

module attributes {stable_mosaic.version = 11 : i64} {
  func.func @_lin_mm_kernel(%arg0: i32, %arg1: i32, %arg2: memref<8x512xbf16, #tpu.memory_space<vmem>>, %arg3: memref<512x32xbf16, #tpu.memory_space<vmem>>, %arg4: memref<1x32xf32, #tpu.memory_space<vmem>>, %arg5: memref<1x32xf32, #tpu.memory_space<vmem>>, %arg6: memref<8x32xbf16, #tpu.memory_space<vmem>>, %arg7: memref<8x32xf32, #tpu.memory_space<vmem>>) attributes {dimension_semantics = [#tpu.dimension_semantics<parallel>, #tpu.dimension_semantics<arbitrary>], iteration_bounds = array<i64: 1, 4>, scalar_prefetch = 0 : i64, scratch_operands = 1 : i64, tpu.core_type = #tpu.core_type<tc>, window_params = [{transform_indices = @transform_0, window_bounds = array<i64: 8, 512>}, {transform_indices = @transform_1, window_bounds = array<i64: 512, 32>}, {transform_indices = @transform_2, window_bounds = array<i64: 1, 32>}, {transform_indices = @transform_3, window_bounds = array<i64: 1, 32>}, {transform_indices = @transform_4, window_bounds = array<i64: 8, 32>}]} {
    %c0_i32 = arith.constant 0 : i32
    %0 = arith.cmpi eq, %arg1, %c0_i32 : i32
    %1 = arith.extui %0 : i1 to i32
    %c0_i32_0 = arith.constant 0 : i32
    %2 = arith.cmpi ne, %1, %c0_i32_0 : i32
    scf.if %2 {
      %cst_9 = arith.constant 0.000000e+00 : f32
      %12 = vector.broadcast %cst_9 : f32 to vector<8x32xf32>
      %c0_10 = arith.constant 0 : index
      %c0_11 = arith.constant 0 : index
      %13 = vector.load %arg7[%c0_10, %c0_11] : memref<8x32xf32, #tpu.memory_space<vmem>>, vector<8x32xf32>
      tpu.vector_store %arg7[%c0_10, %c0_11], %12 {strides = array<i32>} : memref<8x32xf32, #tpu.memory_space<vmem>>, vector<8x32xf32>,
    } else {
    }
    %c0 = arith.constant 0 : index
    %c0_1 = arith.constant 0 : index
    %3 = vector.load %arg7[%c0, %c0_1] : memref<8x32xf32, #tpu.memory_space<vmem>>, vector<8x32xf32>
    %c0_2 = arith.constant 0 : index
    %c0_3 = arith.constant 0 : index
    %4 = vector.load %arg2[%c0_2, %c0_3] : memref<8x512xbf16, #tpu.memory_space<vmem>>, vector<8x512xbf16>
    %c0_4 = arith.constant 0 : index
    %c0_5 = arith.constant 0 : index
    %5 = vector.load %arg3[%c0_4, %c0_5] : memref<512x32xbf16, #tpu.memory_space<vmem>>, vector<512x32xbf16>
    %cst = arith.constant dense<0.000000e+00> : vector<8x32xf32>
    %6 = tpu.matmul %4, %5, %cst {dimension_numbers = #tpu.dot_dimension_numbers<[1], [0], [0], [1], [0, 0, 1, 1], [], []>} : vector<8x512xbf16>, vector<512x32xbf16>, vector<8x32xf32> -> vector<8x32xf32>
    %7 = arith.addf %3, %6 : vector<8x32xf32>
    %c0_6 = arith.constant 0 : index
    %c0_7 = arith.constant 0 : index
    %8 = vector.load %arg7[%c0_6, %c0_7] : memref<8x32xf32, #tpu.memory_space<vmem>>, vector<8x32xf32>
    tpu.vector_store %arg7[%c0_6, %c0_7], %7 {strides = array<i32>} : memref<8x32xf32, #tpu.memory_space<vmem>>, vector<8x32xf32>,
    %c3_i32 = arith.constant 3 : i32
    %9 = arith.cmpi eq, %arg1, %c3_i32 : i32
    %10 = arith.extui %9 : i1 to i32
    %c0_i32_8 = arith.constant 0 : i32
    %11 = arith.cmpi ne, %10, %c0_i32_8 : i32
    scf.if %11 {
      %c0_9 = arith.constant 0 : index
      %c0_10 = arith.constant 0 : index
      %12 = vector.load %arg7[%c0_9, %c0_10] : memref<8x32xf32, #tpu.memory_space<vmem>>, vector<8x32xf32>
      %c0_11 = arith.constant 0 : index
      %c0_12 = arith.constant 0 : index
      %13 = vector.load %arg4[%c0_11, %c0_12] : memref<1x32xf32, #tpu.memory_space<vmem>>, vector<1x32xf32>
      %14 = vector.broadcast %13 : vector<1x32xf32> to vector<8x32xf32>
      %15 = arith.mulf %12, %14 : vector<8x32xf32>
      %c0_13 = arith.constant 0 : index
      %c0_14 = arith.constant 0 : index
      %16 = vector.load %arg5[%c0_13, %c0_14] : memref<1x32xf32, #tpu.memory_space<vmem>>, vector<1x32xf32>
      %17 = vector.broadcast %16 : vector<1x32xf32> to vector<8x32xf32>
      %18 = arith.addf %15, %17 : vector<8x32xf32>
      %19 = arith.truncf %18 : vector<8x32xf32> to vector<8x32xbf16>
      %c0_15 = arith.constant 0 : index
      %c0_16 = arith.constant 0 : index
      %20 = vector.load %arg6[%c0_15, %c0_16] : memref<8x32xbf16, #tpu.memory_space<vmem>>, vector<8x32xbf16>
      tpu.vector_store %arg6[%c0_15, %c0_16], %19 {strides = array<i32>} : memref<8x32xbf16, #tpu.memory_space<vmem>>, vector<8x32xbf16>,
    } else {
    }
    return
  }
  func.func @transform_0(%arg0: i32, %arg1: i32) -> (i32, i32) {
    %c0_i32 = arith.constant 0 : i32
    %c0_i32_0 = arith.constant 0 : i32
    return %c0_i32, %arg1 : i32, i32
  }
  func.func @transform_1(%arg0: i32, %arg1: i32) -> (i32, i32) {
    %c0_i32 = arith.constant 0 : i32
    return %arg1, %arg0 : i32, i32
  }
  func.func @transform_2(%arg0: i32, %arg1: i32) -> (i32, i32) {
    %c0_i32 = arith.constant 0 : i32
    %c0_i32_0 = arith.constant 0 : i32
    return %c0_i32, %arg0 : i32, i32
  }
  func.func @transform_3(%arg0: i32, %arg1: i32) -> (i32, i32) {
    %c0_i32 = arith.constant 0 : i32
    %c0_i32_0 = arith.constant 0 : i32
    return %c0_i32, %arg0 : i32, i32
  }
  func.func @transform_4(%arg0: i32, %arg1: i32) -> (i32, i32) {
    %c0_i32 = arith.constant 0 : i32
    %c0_i32_0 = arith.constant 0 : i32
    return %c0_i32, %arg0 : i32, i32
  }
}

module attributes {stable_mosaic.version = 11 : i64} {
  func.func @_lin_mm_kernel(%arg0: i32, %arg1: i32, %arg2: memref<8x512xbf16, #tpu.memory_space<vmem>>, %arg3: memref<512x256xbf16, #tpu.memory_space<vmem>>, %arg4: memref<1x256xf32, #tpu.memory_space<vmem>>, %arg5: memref<1x256xf32, #tpu.memory_space<vmem>>, %arg6: memref<8x256xbf16, #tpu.memory_space<vmem>>, %arg7: memref<8x256xf32, #tpu.memory_space<vmem>>) attributes {dimension_semantics = [#tpu.dimension_semantics<parallel>, #tpu.dimension_semantics<arbitrary>], iteration_bounds = array<i64: 1, 4>, scalar_prefetch = 0 : i64, scratch_operands = 1 : i64, tpu.core_type = #tpu.core_type<tc>, window_params = [{transform_indices = @transform_0, window_bounds = array<i64: 8, 512>}, {transform_indices = @transform_1, window_bounds = array<i64: 512, 256>}, {transform_indices = @transform_2, window_bounds = array<i64: 1, 256>}, {transform_indices = @transform_3, window_bounds = array<i64: 1, 256>}, {transform_indices = @transform_4, window_bounds = array<i64: 8, 256>}]} {
    %c0_i32 = arith.constant 0 : i32
    %0 = arith.cmpi eq, %arg1, %c0_i32 : i32
    %1 = arith.extui %0 : i1 to i32
    %c0_i32_0 = arith.constant 0 : i32
    %2 = arith.cmpi ne, %1, %c0_i32_0 : i32
    scf.if %2 {
      %cst_9 = arith.constant 0.000000e+00 : f32
      %12 = vector.broadcast %cst_9 : f32 to vector<8x256xf32>
      %c0_10 = arith.constant 0 : index
      %c0_11 = arith.constant 0 : index
      %13 = vector.load %arg7[%c0_10, %c0_11] : memref<8x256xf32, #tpu.memory_space<vmem>>, vector<8x256xf32>
      tpu.vector_store %arg7[%c0_10, %c0_11], %12 {strides = array<i32>} : memref<8x256xf32, #tpu.memory_space<vmem>>, vector<8x256xf32>,
    } else {
    }
    %c0 = arith.constant 0 : index
    %c0_1 = arith.constant 0 : index
    %3 = vector.load %arg7[%c0, %c0_1] : memref<8x256xf32, #tpu.memory_space<vmem>>, vector<8x256xf32>
    %c0_2 = arith.constant 0 : index
    %c0_3 = arith.constant 0 : index
    %4 = vector.load %arg2[%c0_2, %c0_3] : memref<8x512xbf16, #tpu.memory_space<vmem>>, vector<8x512xbf16>
    %c0_4 = arith.constant 0 : index
    %c0_5 = arith.constant 0 : index
    %5 = vector.load %arg3[%c0_4, %c0_5] : memref<512x256xbf16, #tpu.memory_space<vmem>>, vector<512x256xbf16>
    %cst = arith.constant dense<0.000000e+00> : vector<8x256xf32>
    %6 = tpu.matmul %4, %5, %cst {dimension_numbers = #tpu.dot_dimension_numbers<[1], [0], [0], [1], [0, 0, 1, 1], [], []>} : vector<8x512xbf16>, vector<512x256xbf16>, vector<8x256xf32> -> vector<8x256xf32>
    %7 = arith.addf %3, %6 : vector<8x256xf32>
    %c0_6 = arith.constant 0 : index
    %c0_7 = arith.constant 0 : index
    %8 = vector.load %arg7[%c0_6, %c0_7] : memref<8x256xf32, #tpu.memory_space<vmem>>, vector<8x256xf32>
    tpu.vector_store %arg7[%c0_6, %c0_7], %7 {strides = array<i32>} : memref<8x256xf32, #tpu.memory_space<vmem>>, vector<8x256xf32>,
    %c3_i32 = arith.constant 3 : i32
    %9 = arith.cmpi eq, %arg1, %c3_i32 : i32
    %10 = arith.extui %9 : i1 to i32
    %c0_i32_8 = arith.constant 0 : i32
    %11 = arith.cmpi ne, %10, %c0_i32_8 : i32
    scf.if %11 {
      %c0_9 = arith.constant 0 : index
      %c0_10 = arith.constant 0 : index
      %12 = vector.load %arg7[%c0_9, %c0_10] : memref<8x256xf32, #tpu.memory_space<vmem>>, vector<8x256xf32>
      %c0_11 = arith.constant 0 : index
      %c0_12 = arith.constant 0 : index
      %13 = vector.load %arg4[%c0_11, %c0_12] : memref<1x256xf32, #tpu.memory_space<vmem>>, vector<1x256xf32>
      %14 = vector.broadcast %13 : vector<1x256xf32> to vector<8x256xf32>
      %15 = arith.mulf %12, %14 : vector<8x256xf32>
      %c0_13 = arith.constant 0 : index
      %c0_14 = arith.constant 0 : index
      %16 = vector.load %arg5[%c0_13, %c0_14] : memref<1x256xf32, #tpu.memory_space<vmem>>, vector<1x256xf32>
      %17 = vector.broadcast %16 : vector<1x256xf32> to vector<8x256xf32>
      %18 = arith.addf %15, %17 : vector<8x256xf32>
      %19 = arith.truncf %18 : vector<8x256xf32> to vector<8x256xbf16>
      %c0_15 = arith.constant 0 : index
      %c0_16 = arith.constant 0 : index
      %20 = vector.load %arg6[%c0_15, %c0_16] : memref<8x256xbf16, #tpu.memory_space<vmem>>, vector<8x256xbf16>
      tpu.vector_store %arg6[%c0_15, %c0_16], %19 {strides = array<i32>} : memref<8x256xbf16, #tpu.memory_space<vmem>>, vector<8x256xbf16>,
    } else {
    }
    return
  }
  func.func @transform_0(%arg0: i32, %arg1: i32) -> (i32, i32) {
    %c0_i32 = arith.constant 0 : i32
    %c0_i32_0 = arith.constant 0 : i32
    return %c0_i32, %arg1 : i32, i32
  }
  func.func @transform_1(%arg0: i32, %arg1: i32) -> (i32, i32) {
    %c0_i32 = arith.constant 0 : i32
    return %arg1, %arg0 : i32, i32
  }
  func.func @transform_2(%arg0: i32, %arg1: i32) -> (i32, i32) {
    %c0_i32 = arith.constant 0 : i32
    %c0_i32_0 = arith.constant 0 : i32
    return %c0_i32, %arg0 : i32, i32
  }
  func.func @transform_3(%arg0: i32, %arg1: i32) -> (i32, i32) {
    %c0_i32 = arith.constant 0 : i32
    %c0_i32_0 = arith.constant 0 : i32
    return %c0_i32, %arg0 : i32, i32
  }
  func.func @transform_4(%arg0: i32, %arg1: i32) -> (i32, i32) {
    %c0_i32 = arith.constant 0 : i32
    %c0_i32_0 = arith.constant 0 : i32
    return %c0_i32, %arg0 : i32, i32
  }
}

module attributes {stable_mosaic.version = 11 : i64} {
  func.func @_lin_mm_kernel(%arg0: i32, %arg1: i32, %arg2: memref<8x128xbf16, #tpu.memory_space<vmem>>, %arg3: memref<128x512xbf16, #tpu.memory_space<vmem>>, %arg4: memref<1x512xf32, #tpu.memory_space<vmem>>, %arg5: memref<1x512xf32, #tpu.memory_space<vmem>>, %arg6: memref<8x512xbf16, #tpu.memory_space<vmem>>, %arg7: memref<8x512xf32, #tpu.memory_space<vmem>>) attributes {dimension_semantics = [#tpu.dimension_semantics<parallel>, #tpu.dimension_semantics<arbitrary>], iteration_bounds = array<i64: 4, 1>, scalar_prefetch = 0 : i64, scratch_operands = 1 : i64, tpu.core_type = #tpu.core_type<tc>, window_params = [{transform_indices = @transform_0, window_bounds = array<i64: 8, 128>}, {transform_indices = @transform_1, window_bounds = array<i64: 128, 512>}, {transform_indices = @transform_2, window_bounds = array<i64: 1, 512>}, {transform_indices = @transform_3, window_bounds = array<i64: 1, 512>}, {transform_indices = @transform_4, window_bounds = array<i64: 8, 512>}]} {
    %c0_i32 = arith.constant 0 : i32
    %0 = arith.cmpi eq, %arg1, %c0_i32 : i32
    %1 = arith.extui %0 : i1 to i32
    %c0_i32_0 = arith.constant 0 : i32
    %2 = arith.cmpi ne, %1, %c0_i32_0 : i32
    scf.if %2 {
      %cst_10 = arith.constant 0.000000e+00 : f32
      %12 = vector.broadcast %cst_10 : f32 to vector<8x512xf32>
      %c0_11 = arith.constant 0 : index
      %c0_12 = arith.constant 0 : index
      %13 = vector.load %arg7[%c0_11, %c0_12] : memref<8x512xf32, #tpu.memory_space<vmem>>, vector<8x512xf32>
      tpu.vector_store %arg7[%c0_11, %c0_12], %12 {strides = array<i32>} : memref<8x512xf32, #tpu.memory_space<vmem>>, vector<8x512xf32>,
    } else {
    }
    %c0 = arith.constant 0 : index
    %c0_1 = arith.constant 0 : index
    %3 = vector.load %arg7[%c0, %c0_1] : memref<8x512xf32, #tpu.memory_space<vmem>>, vector<8x512xf32>
    %c0_2 = arith.constant 0 : index
    %c0_3 = arith.constant 0 : index
    %4 = vector.load %arg2[%c0_2, %c0_3] : memref<8x128xbf16, #tpu.memory_space<vmem>>, vector<8x128xbf16>
    %c0_4 = arith.constant 0 : index
    %c0_5 = arith.constant 0 : index
    %5 = vector.load %arg3[%c0_4, %c0_5] : memref<128x512xbf16, #tpu.memory_space<vmem>>, vector<128x512xbf16>
    %cst = arith.constant dense<0.000000e+00> : vector<8x512xf32>
    %6 = tpu.matmul %4, %5, %cst {dimension_numbers = #tpu.dot_dimension_numbers<[1], [0], [0], [1], [0, 0, 1, 1], [], []>} : vector<8x128xbf16>, vector<128x512xbf16>, vector<8x512xf32> -> vector<8x512xf32>
    %7 = arith.addf %3, %6 : vector<8x512xf32>
    %c0_6 = arith.constant 0 : index
    %c0_7 = arith.constant 0 : index
    %8 = vector.load %arg7[%c0_6, %c0_7] : memref<8x512xf32, #tpu.memory_space<vmem>>, vector<8x512xf32>
    tpu.vector_store %arg7[%c0_6, %c0_7], %7 {strides = array<i32>} : memref<8x512xf32, #tpu.memory_space<vmem>>, vector<8x512xf32>,
    %c0_i32_8 = arith.constant 0 : i32
    %9 = arith.cmpi eq, %arg1, %c0_i32_8 : i32
    %10 = arith.extui %9 : i1 to i32
    %c0_i32_9 = arith.constant 0 : i32
    %11 = arith.cmpi ne, %10, %c0_i32_9 : i32
    scf.if %11 {
      %c0_10 = arith.constant 0 : index
      %c0_11 = arith.constant 0 : index
      %12 = vector.load %arg7[%c0_10, %c0_11] : memref<8x512xf32, #tpu.memory_space<vmem>>, vector<8x512xf32>
      %c0_12 = arith.constant 0 : index
      %c0_13 = arith.constant 0 : index
      %13 = vector.load %arg4[%c0_12, %c0_13] : memref<1x512xf32, #tpu.memory_space<vmem>>, vector<1x512xf32>
      %14 = vector.broadcast %13 : vector<1x512xf32> to vector<8x512xf32>
      %15 = arith.mulf %12, %14 : vector<8x512xf32>
      %c0_14 = arith.constant 0 : index
      %c0_15 = arith.constant 0 : index
      %16 = vector.load %arg5[%c0_14, %c0_15] : memref<1x512xf32, #tpu.memory_space<vmem>>, vector<1x512xf32>
      %17 = vector.broadcast %16 : vector<1x512xf32> to vector<8x512xf32>
      %18 = arith.addf %15, %17 : vector<8x512xf32>
      %cst_16 = arith.constant 0.000000e+00 : f32
      %19 = vector.broadcast %cst_16 : f32 to vector<8x512xf32>
      %20 = arith.maximumf %18, %19 : vector<8x512xf32>
      %21 = arith.truncf %20 : vector<8x512xf32> to vector<8x512xbf16>
      %c0_17 = arith.constant 0 : index
      %c0_18 = arith.constant 0 : index
      %22 = vector.load %arg6[%c0_17, %c0_18] : memref<8x512xbf16, #tpu.memory_space<vmem>>, vector<8x512xbf16>
      tpu.vector_store %arg6[%c0_17, %c0_18], %21 {strides = array<i32>} : memref<8x512xbf16, #tpu.memory_space<vmem>>, vector<8x512xbf16>,
    } else {
    }
    return
  }
  func.func @transform_0(%arg0: i32, %arg1: i32) -> (i32, i32) {
    %c0_i32 = arith.constant 0 : i32
    %c0_i32_0 = arith.constant 0 : i32
    return %c0_i32, %arg1 : i32, i32
  }
  func.func @transform_1(%arg0: i32, %arg1: i32) -> (i32, i32) {
    %c0_i32 = arith.constant 0 : i32
    return %arg1, %arg0 : i32, i32
  }
  func.func @transform_2(%arg0: i32, %arg1: i32) -> (i32, i32) {
    %c0_i32 = arith.constant 0 : i32
    %c0_i32_0 = arith.constant 0 : i32
    return %c0_i32, %arg0 : i32, i32
  }
  func.func @transform_3(%arg0: i32, %arg1: i32) -> (i32, i32) {
    %c0_i32 = arith.constant 0 : i32
    %c0_i32_0 = arith.constant 0 : i32
    return %c0_i32, %arg0 : i32, i32
  }
  func.func @transform_4(%arg0: i32, %arg1: i32) -> (i32, i32) {
    %c0_i32 = arith.constant 0 : i32
    %c0_i32_0 = arith.constant 0 : i32
    return %c0_i32, %arg0 : i32, i32
  }
}

module attributes {stable_mosaic.version = 11 : i64} {
  func.func @_conv_mm_kernel(%arg0: i32, %arg1: memref<256x576xbf16, #tpu.memory_space<vmem>>, %arg2: memref<576x128xbf16, #tpu.memory_space<vmem>>, %arg3: memref<256x1xf32, #tpu.memory_space<vmem>>, %arg4: memref<256x1xf32, #tpu.memory_space<vmem>>, %arg5: memref<256x128xbf16, #tpu.memory_space<vmem>>) attributes {dimension_semantics = [#tpu.dimension_semantics<parallel>], iteration_bounds = array<i64: 1>, scalar_prefetch = 0 : i64, scratch_operands = 0 : i64, tpu.core_type = #tpu.core_type<tc>, window_params = [{pipeline_mode = #tpu.pipeline_mode<synchronous>, transform_indices = @transform_0, window_bounds = array<i64: 256, 576>}, {transform_indices = @transform_1, window_bounds = array<i64: 576, 128>}, {pipeline_mode = #tpu.pipeline_mode<synchronous>, transform_indices = @transform_2, window_bounds = array<i64: 256, 1>}, {pipeline_mode = #tpu.pipeline_mode<synchronous>, transform_indices = @transform_3, window_bounds = array<i64: 256, 1>}, {transform_indices = @transform_4, window_bounds = array<i64: 256, 128>}]} {
    %c0 = arith.constant 0 : index
    %c0_0 = arith.constant 0 : index
    %0 = vector.load %arg1[%c0, %c0_0] : memref<256x576xbf16, #tpu.memory_space<vmem>>, vector<256x576xbf16>
    %c0_1 = arith.constant 0 : index
    %c0_2 = arith.constant 0 : index
    %1 = vector.load %arg2[%c0_1, %c0_2] : memref<576x128xbf16, #tpu.memory_space<vmem>>, vector<576x128xbf16>
    %cst = arith.constant dense<0.000000e+00> : vector<256x128xf32>
    %2 = tpu.matmul %0, %1, %cst {dimension_numbers = #tpu.dot_dimension_numbers<[1], [0], [0], [1], [0, 0, 1, 1], [], []>} : vector<256x576xbf16>, vector<576x128xbf16>, vector<256x128xf32> -> vector<256x128xf32>
    %c0_3 = arith.constant 0 : index
    %c0_4 = arith.constant 0 : index
    %3 = vector.load %arg3[%c0_3, %c0_4] : memref<256x1xf32, #tpu.memory_space<vmem>>, vector<256x1xf32>
    %4 = vector.broadcast %3 : vector<256x1xf32> to vector<256x128xf32>
    %5 = arith.mulf %2, %4 : vector<256x128xf32>
    %c0_5 = arith.constant 0 : index
    %c0_6 = arith.constant 0 : index
    %6 = vector.load %arg4[%c0_5, %c0_6] : memref<256x1xf32, #tpu.memory_space<vmem>>, vector<256x1xf32>
    %7 = vector.broadcast %6 : vector<256x1xf32> to vector<256x128xf32>
    %8 = arith.addf %5, %7 : vector<256x128xf32>
    %cst_7 = arith.constant 0.000000e+00 : f32
    %9 = vector.broadcast %cst_7 : f32 to vector<256x128xf32>
    %10 = arith.maximumf %8, %9 : vector<256x128xf32>
    %11 = arith.truncf %10 : vector<256x128xf32> to vector<256x128xbf16>
    %c0_8 = arith.constant 0 : index
    %c0_9 = arith.constant 0 : index
    %12 = vector.load %arg5[%c0_8, %c0_9] : memref<256x128xbf16, #tpu.memory_space<vmem>>, vector<256x128xbf16>
    tpu.vector_store %arg5[%c0_8, %c0_9], %11 {strides = array<i32>} : memref<256x128xbf16, #tpu.memory_space<vmem>>, vector<256x128xbf16>,
    return
  }
  func.func @transform_0(%arg0: i32) -> (i32, i32) {
    %c0_i32 = arith.constant 0 : i32
    %c0_i32_0 = arith.constant 0 : i32
    %c0_i32_1 = arith.constant 0 : i32
    return %c0_i32, %c0_i32_0 : i32, i32
  }
  func.func @transform_1(%arg0: i32) -> (i32, i32) {
    %c0_i32 = arith.constant 0 : i32
    %c0_i32_0 = arith.constant 0 : i32
    return %c0_i32, %arg0 : i32, i32
  }
  func.func @transform_2(%arg0: i32) -> (i32, i32) {
    %c0_i32 = arith.constant 0 : i32
    %c0_i32_0 = arith.constant 0 : i32
    %c0_i32_1 = arith.constant 0 : i32
    return %c0_i32, %c0_i32_0 : i32, i32
  }
  func.func @transform_3(%arg0: i32) -> (i32, i32) {
    %c0_i32 = arith.constant 0 : i32
    %c0_i32_0 = arith.constant 0 : i32
    %c0_i32_1 = arith.constant 0 : i32
    return %c0_i32, %c0_i32_0 : i32, i32
  }
  func.func @transform_4(%arg0: i32) -> (i32, i32) {
    %c0_i32 = arith.constant 0 : i32
    %c0_i32_0 = arith.constant 0 : i32
    return %c0_i32, %arg0 : i32, i32
  }
}

module attributes {stable_mosaic.version = 11 : i64} {
  func.func @_conv_mm_kernel(%arg0: i32, %arg1: memref<128x576xbf16, #tpu.memory_space<vmem>>, %arg2: memref<576x128xbf16, #tpu.memory_space<vmem>>, %arg3: memref<128x1xf32, #tpu.memory_space<vmem>>, %arg4: memref<128x1xf32, #tpu.memory_space<vmem>>, %arg5: memref<128x128xbf16, #tpu.memory_space<vmem>>) attributes {dimension_semantics = [#tpu.dimension_semantics<parallel>], iteration_bounds = array<i64: 1>, scalar_prefetch = 0 : i64, scratch_operands = 0 : i64, tpu.core_type = #tpu.core_type<tc>, window_params = [{pipeline_mode = #tpu.pipeline_mode<synchronous>, transform_indices = @transform_0, window_bounds = array<i64: 128, 576>}, {transform_indices = @transform_1, window_bounds = array<i64: 576, 128>}, {pipeline_mode = #tpu.pipeline_mode<synchronous>, transform_indices = @transform_2, window_bounds = array<i64: 128, 1>}, {pipeline_mode = #tpu.pipeline_mode<synchronous>, transform_indices = @transform_3, window_bounds = array<i64: 128, 1>}, {transform_indices = @transform_4, window_bounds = array<i64: 128, 128>}]} {
    %c0 = arith.constant 0 : index
    %c0_0 = arith.constant 0 : index
    %0 = vector.load %arg1[%c0, %c0_0] : memref<128x576xbf16, #tpu.memory_space<vmem>>, vector<128x576xbf16>
    %c0_1 = arith.constant 0 : index
    %c0_2 = arith.constant 0 : index
    %1 = vector.load %arg2[%c0_1, %c0_2] : memref<576x128xbf16, #tpu.memory_space<vmem>>, vector<576x128xbf16>
    %cst = arith.constant dense<0.000000e+00> : vector<128x128xf32>
    %2 = tpu.matmul %0, %1, %cst {dimension_numbers = #tpu.dot_dimension_numbers<[1], [0], [0], [1], [0, 0, 1, 1], [], []>} : vector<128x576xbf16>, vector<576x128xbf16>, vector<128x128xf32> -> vector<128x128xf32>
    %c0_3 = arith.constant 0 : index
    %c0_4 = arith.constant 0 : index
    %3 = vector.load %arg3[%c0_3, %c0_4] : memref<128x1xf32, #tpu.memory_space<vmem>>, vector<128x1xf32>
    %4 = vector.broadcast %3 : vector<128x1xf32> to vector<128x128xf32>
    %5 = arith.mulf %2, %4 : vector<128x128xf32>
    %c0_5 = arith.constant 0 : index
    %c0_6 = arith.constant 0 : index
    %6 = vector.load %arg4[%c0_5, %c0_6] : memref<128x1xf32, #tpu.memory_space<vmem>>, vector<128x1xf32>
    %7 = vector.broadcast %6 : vector<128x1xf32> to vector<128x128xf32>
    %8 = arith.addf %5, %7 : vector<128x128xf32>
    %cst_7 = arith.constant 0.000000e+00 : f32
    %9 = vector.broadcast %cst_7 : f32 to vector<128x128xf32>
    %10 = arith.maximumf %8, %9 : vector<128x128xf32>
    %11 = arith.truncf %10 : vector<128x128xf32> to vector<128x128xbf16>
    %c0_8 = arith.constant 0 : index
    %c0_9 = arith.constant 0 : index
    %12 = vector.load %arg5[%c0_8, %c0_9] : memref<128x128xbf16, #tpu.memory_space<vmem>>, vector<128x128xbf16>
    tpu.vector_store %arg5[%c0_8, %c0_9], %11 {strides = array<i32>} : memref<128x128xbf16, #tpu.memory_space<vmem>>, vector<128x128xbf16>,
    return
  }
  func.func @transform_0(%arg0: i32) -> (i32, i32) {
    %c0_i32 = arith.constant 0 : i32
    %c0_i32_0 = arith.constant 0 : i32
    %c0_i32_1 = arith.constant 0 : i32
    return %c0_i32, %c0_i32_0 : i32, i32
  }
  func.func @transform_1(%arg0: i32) -> (i32, i32) {
    %c0_i32 = arith.constant 0 : i32
    %c0_i32_0 = arith.constant 0 : i32
    return %c0_i32, %arg0 : i32, i32
  }
  func.func @transform_2(%arg0: i32) -> (i32, i32) {
    %c0_i32 = arith.constant 0 : i32
    %c0_i32_0 = arith.constant 0 : i32
    %c0_i32_1 = arith.constant 0 : i32
    return %c0_i32, %c0_i32_0 : i32, i32
  }
  func.func @transform_3(%arg0: i32) -> (i32, i32) {
    %c0_i32 = arith.constant 0 : i32
    %c0_i32_0 = arith.constant 0 : i32
    %c0_i32_1 = arith.constant 0 : i32
    return %c0_i32, %c0_i32_0 : i32, i32
  }
  func.func @transform_4(%arg0: i32) -> (i32, i32) {
    %c0_i32 = arith.constant 0 : i32
    %c0_i32_0 = arith.constant 0 : i32
    return %c0_i32, %arg0 : i32, i32
  }
}

module attributes {stable_mosaic.version = 11 : i64} {
  func.func @_conv_mm_kernel(%arg0: i32, %arg1: memref<64x288xbf16, #tpu.memory_space<vmem>>, %arg2: memref<288x128xbf16, #tpu.memory_space<vmem>>, %arg3: memref<64x1xf32, #tpu.memory_space<vmem>>, %arg4: memref<64x1xf32, #tpu.memory_space<vmem>>, %arg5: memref<64x128xbf16, #tpu.memory_space<vmem>>) attributes {dimension_semantics = [#tpu.dimension_semantics<parallel>], iteration_bounds = array<i64: 1>, scalar_prefetch = 0 : i64, scratch_operands = 0 : i64, tpu.core_type = #tpu.core_type<tc>, window_params = [{pipeline_mode = #tpu.pipeline_mode<synchronous>, transform_indices = @transform_0, window_bounds = array<i64: 64, 288>}, {transform_indices = @transform_1, window_bounds = array<i64: 288, 128>}, {pipeline_mode = #tpu.pipeline_mode<synchronous>, transform_indices = @transform_2, window_bounds = array<i64: 64, 1>}, {pipeline_mode = #tpu.pipeline_mode<synchronous>, transform_indices = @transform_3, window_bounds = array<i64: 64, 1>}, {transform_indices = @transform_4, window_bounds = array<i64: 64, 128>}]} {
    %c0 = arith.constant 0 : index
    %c0_0 = arith.constant 0 : index
    %0 = vector.load %arg1[%c0, %c0_0] : memref<64x288xbf16, #tpu.memory_space<vmem>>, vector<64x288xbf16>
    %c0_1 = arith.constant 0 : index
    %c0_2 = arith.constant 0 : index
    %1 = vector.load %arg2[%c0_1, %c0_2] : memref<288x128xbf16, #tpu.memory_space<vmem>>, vector<288x128xbf16>
    %cst = arith.constant dense<0.000000e+00> : vector<64x128xf32>
    %2 = tpu.matmul %0, %1, %cst {dimension_numbers = #tpu.dot_dimension_numbers<[1], [0], [0], [1], [0, 0, 1, 1], [], []>} : vector<64x288xbf16>, vector<288x128xbf16>, vector<64x128xf32> -> vector<64x128xf32>
    %c0_3 = arith.constant 0 : index
    %c0_4 = arith.constant 0 : index
    %3 = vector.load %arg3[%c0_3, %c0_4] : memref<64x1xf32, #tpu.memory_space<vmem>>, vector<64x1xf32>
    %4 = vector.broadcast %3 : vector<64x1xf32> to vector<64x128xf32>
    %5 = arith.mulf %2, %4 : vector<64x128xf32>
    %c0_5 = arith.constant 0 : index
    %c0_6 = arith.constant 0 : index
    %6 = vector.load %arg4[%c0_5, %c0_6] : memref<64x1xf32, #tpu.memory_space<vmem>>, vector<64x1xf32>
    %7 = vector.broadcast %6 : vector<64x1xf32> to vector<64x128xf32>
    %8 = arith.addf %5, %7 : vector<64x128xf32>
    %cst_7 = arith.constant 0.000000e+00 : f32
    %9 = vector.broadcast %cst_7 : f32 to vector<64x128xf32>
    %10 = arith.maximumf %8, %9 : vector<64x128xf32>
    %11 = arith.truncf %10 : vector<64x128xf32> to vector<64x128xbf16>
    %c0_8 = arith.constant 0 : index
    %c0_9 = arith.constant 0 : index
    %12 = vector.load %arg5[%c0_8, %c0_9] : memref<64x128xbf16, #tpu.memory_space<vmem>>, vector<64x128xbf16>
    tpu.vector_store %arg5[%c0_8, %c0_9], %11 {strides = array<i32>} : memref<64x128xbf16, #tpu.memory_space<vmem>>, vector<64x128xbf16>,
    return
  }
  func.func @transform_0(%arg0: i32) -> (i32, i32) {
    %c0_i32 = arith.constant 0 : i32
    %c0_i32_0 = arith.constant 0 : i32
    %c0_i32_1 = arith.constant 0 : i32
    return %c0_i32, %c0_i32_0 : i32, i32
  }
  func.func @transform_1(%arg0: i32) -> (i32, i32) {
    %c0_i32 = arith.constant 0 : i32
    %c0_i32_0 = arith.constant 0 : i32
    return %c0_i32, %arg0 : i32, i32
  }
  func.func @transform_2(%arg0: i32) -> (i32, i32) {
    %c0_i32 = arith.constant 0 : i32
    %c0_i32_0 = arith.constant 0 : i32
    %c0_i32_1 = arith.constant 0 : i32
    return %c0_i32, %c0_i32_0 : i32, i32
  }
  func.func @transform_3(%arg0: i32) -> (i32, i32) {
    %c0_i32 = arith.constant 0 : i32
    %c0_i32_0 = arith.constant 0 : i32
    %c0_i32_1 = arith.constant 0 : i32
    return %c0_i32, %c0_i32_0 : i32, i32
  }
  func.func @transform_4(%arg0: i32) -> (i32, i32) {
    %c0_i32 = arith.constant 0 : i32
    %c0_i32_0 = arith.constant 0 : i32
    return %c0_i32, %arg0 : i32, i32
  }
}

module attributes {stable_mosaic.version = 11 : i64} {
  func.func @_conv_mm_kernel(%arg0: i32, %arg1: memref<4x144xbf16, #tpu.memory_space<vmem>>, %arg2: memref<144x256xbf16, #tpu.memory_space<vmem>>, %arg3: memref<4x1xf32, #tpu.memory_space<vmem>>, %arg4: memref<4x1xf32, #tpu.memory_space<vmem>>, %arg5: memref<4x256xf32, #tpu.memory_space<vmem>>) attributes {dimension_semantics = [#tpu.dimension_semantics<parallel>], iteration_bounds = array<i64: 2>, scalar_prefetch = 0 : i64, scratch_operands = 0 : i64, tpu.core_type = #tpu.core_type<tc>, window_params = [{pipeline_mode = #tpu.pipeline_mode<synchronous>, transform_indices = @transform_0, window_bounds = array<i64: 4, 144>}, {transform_indices = @transform_1, window_bounds = array<i64: 144, 256>}, {pipeline_mode = #tpu.pipeline_mode<synchronous>, transform_indices = @transform_2, window_bounds = array<i64: 4, 1>}, {pipeline_mode = #tpu.pipeline_mode<synchronous>, transform_indices = @transform_3, window_bounds = array<i64: 4, 1>}, {transform_indices = @transform_4, window_bounds = array<i64: 4, 256>}]} {
    %c0 = arith.constant 0 : index
    %c0_0 = arith.constant 0 : index
    %0 = vector.load %arg1[%c0, %c0_0] : memref<4x144xbf16, #tpu.memory_space<vmem>>, vector<4x144xbf16>
    %c0_1 = arith.constant 0 : index
    %c0_2 = arith.constant 0 : index
    %1 = vector.load %arg2[%c0_1, %c0_2] : memref<144x256xbf16, #tpu.memory_space<vmem>>, vector<144x256xbf16>
    %cst = arith.constant dense<0.000000e+00> : vector<4x256xf32>
    %2 = tpu.matmul %0, %1, %cst {dimension_numbers = #tpu.dot_dimension_numbers<[1], [0], [0], [1], [0, 0, 1, 1], [], []>} : vector<4x144xbf16>, vector<144x256xbf16>, vector<4x256xf32> -> vector<4x256xf32>
    %c0_3 = arith.constant 0 : index
    %c0_4 = arith.constant 0 : index
    %3 = vector.load %arg3[%c0_3, %c0_4] : memref<4x1xf32, #tpu.memory_space<vmem>>, vector<4x1xf32>
    %4 = vector.broadcast %3 : vector<4x1xf32> to vector<4x256xf32>
    %5 = arith.mulf %2, %4 : vector<4x256xf32>
    %c0_5 = arith.constant 0 : index
    %c0_6 = arith.constant 0 : index
    %6 = vector.load %arg4[%c0_5, %c0_6] : memref<4x1xf32, #tpu.memory_space<vmem>>, vector<4x1xf32>
    %7 = vector.broadcast %6 : vector<4x1xf32> to vector<4x256xf32>
    %8 = arith.addf %5, %7 : vector<4x256xf32>
    %c0_7 = arith.constant 0 : index
    %c0_8 = arith.constant 0 : index
    %9 = vector.load %arg5[%c0_7, %c0_8] : memref<4x256xf32, #tpu.memory_space<vmem>>, vector<4x256xf32>
    tpu.vector_store %arg5[%c0_7, %c0_8], %8 {strides = array<i32>} : memref<4x256xf32, #tpu.memory_space<vmem>>, vector<4x256xf32>,
    return
  }
  func.func @transform_0(%arg0: i32) -> (i32, i32) {
    %c0_i32 = arith.constant 0 : i32
    %c0_i32_0 = arith.constant 0 : i32
    %c0_i32_1 = arith.constant 0 : i32
    return %c0_i32, %c0_i32_0 : i32, i32
  }
  func.func @transform_1(%arg0: i32) -> (i32, i32) {
    %c0_i32 = arith.constant 0 : i32
    %c0_i32_0 = arith.constant 0 : i32
    return %c0_i32, %arg0 : i32, i32
  }
  func.func @transform_2(%arg0: i32) -> (i32, i32) {
    %c0_i32 = arith.constant 0 : i32
    %c0_i32_0 = arith.constant 0 : i32
    %c0_i32_1 = arith.constant 0 : i32
    return %c0_i32, %c0_i32_0 : i32, i32
  }
  func.func @transform_3(%arg0: i32) -> (i32, i32) {
    %c0_i32 = arith.constant 0 : i32
    %c0_i32_0 = arith.constant 0 : i32
    %c0_i32_1 = arith.constant 0 : i32
    return %c0_i32, %c0_i32_0 : i32, i32
  }
  func.func @transform_4(%arg0: i32) -> (i32, i32) {
    %c0_i32 = arith.constant 0 : i32
    %c0_i32_0 = arith.constant 0 : i32
    return %c0_i32, %arg0 : i32, i32
  }
}

</mosaic_0001>

<bundles_post_ra>
// kernel: ae_forward.12
= control target key start
LH: loop header
LB: loop body
LE: loop exit
PB: predicated region body
PF: predicated region fallthrough
CT: control target
= control target key end

     0   :  { %9 = vsyncpa [#allocation3], 0  ;;  %s621_s15 = smov 0   ;;  %s623_s16 = smov 0   ;;  %s721_s0 = inlined_call_operand.hbm [shape: bf16[16,16], index: 0, kind: input, shape index: {}]   ;;  %s722_s1 = inlined_call_operand.vmem [shape: bf16[16,512], index: 1, kind: input, shape index: {}]   ;;  %s723_s2 = inlined_call_operand.vmem [shape: f32[16,1], index: 2, kind: input, shape index: {}]   ;;  %s724_s3 = inlined_call_operand.vmem [shape: f32[16,1], index: 3, kind: input, shape index: {}]   ;;  %s725_s4 = inlined_call_operand.vmem [shape: bf16[16,512], index: 4, kind: output, shape index: {}]  }
   0x1   :  { %s625_s17 = smov 0  }
   0x2 LB: > { %s637_s18 = sadd.s32 4294967295, %s590_s17   ;;  %s640_s19 = sadd.s32 1, %s590_s17   ;;  %s590_s17 = sphi %s625_s17, %s731_s17   ;;  %s586_s16 = sphi %s623_s16, %s730_s16   ;;  %s582_s15 = sphi %s621_s15, %s729_s15  }
   0x3   : > { %s40_s20 = ssub.s32 %s590_s17, %s640_s19  ;;  %s43_s21 = sadd.s32 1, %s586_s16 }
   0x4   : > { %p41_p0 = scmp.eq.s32.totalorder %s40_s20, 0  ;;  %p50_p1 = scmp.ne.s32.totalorder %s586_s16, %s582_s15 }
   0x5   : > { %p51_p2 = scmp.eq.s32.totalorder %s590_s17, 0  ;;  %p122_p3 = scmp.eq.s32.totalorder %s637_s18, 1 }
   0x6   : > { %s650_s22 = scalar_select %p41_p0, %s586_s16, %s43_s21  }
   0x7   : > { %p652_p4 = por %p51_p2, %p50_p1  ;;  %p656_p5 = por %p122_p3, %p50_p1 }
   0x8   : > { %p460_p6 = scmp.ge.s32.totalorder %s590_s17, 1  ;;  %p135_p7 = scmp.lt.s32.totalorder %s590_s17, 3 }
   0x9   : > { %p502_p8 = scmp.eq.s32.totalorder %s637_s18, 0  ;;  %s146_s28 = sshll.u32 %s721_s0, 4  ;;  %s147_s28 = int_to_ptr.hbm [resolvable:$true] %s146_s28 }
   0xa   : > { %p663_p9 = pnand %p460_p6, %p135_p7  ;;  %s592_s29 = smov [#allocation2]  }
   0xb   : > { %s148_s30 = sshll.u32 %s592_s29, 4  ;;  %s593_s5 = smov 64   ;;  %s149_s30 = int_to_ptr.vmem [resolvable:$true] %s148_s30 }
   0xc   : > { %p498_p10 = pneg %p663_p9  ;;  %s594_s6 = smov 4  }
   0xd   : > { %p462_p12 = scmp.ge.s32.totalorder %s590_s17, 2 }
   0xe   : > { %p499_p11 = pnand %p502_p8, %p498_p10 }
   0xf   : > { %164 = sbr.rel (%p462_p12) target bundleno = 26 (0x1a), region = 28 }
  0x10   : > { %501 = dma.hbm_to_vmem [thread:$0]  (!%p499_p11), %s147_s28, 128, %s149_s30, [#allocation3], %s593_s5, %s593_s5, %s594_s6  }
  0x14   : > { %167 = sbr.rel (!%p652_p4) target bundleno = 26 (0x1a), region = 32  ;;  %s169_s7 = sand.u32 (%p652_p4), 1, %s586_s16  }
  0x15   : > { %s489_s8 = sshll.u32 (%p652_p4), %s590_s17, 3  ;;  %s463_s9 = sshll.u32 (%p652_p4), %s169_s7, 4 }
  0x16   : > { %s174_s12 = scalar_lea.vmem (%p652_p4), %s722_s1, %s489_s8  ;;  %s171_s13 = scalar_lea.vmem (%p652_p4), [#allocation4], %s463_s9 }
  0x17   : > { %v205_v0 = vld [vmem:[%s174_s12] sm:$0xff] (%p652_p4)  ;;  %v207_v1 = vld [vmem:[%s174_s12 + $0x10] sm:$0xff] (%p652_p4) }
  0x18   : > { %206 = vst [vmem:[%s171_s13] sm:$0xff] (%p652_p4), %v205_v0 }
  0x19   : > { %208 = vst [vmem:[%s171_s13 + $0x8] sm:$0xff] %v207_v1 }
  0x1a PF: > { %217 = sbr.rel (%p663_p9) target bundleno = 193 (0xc1), region = 70 }
  0x1f   : > { %577 = dma.done.wait (%p502_p8), [#allocation3], 128  }
  0x20   : > { %579 = vsyncadd (%p502_p8), [#allocation3], 4294967168  ;;  %s225_s14 = sand.u32 1, %s582_s15   ;;  %v595_v2 = vmov 0   ;;  %v303_v8 = vld [vmem:[%s723_s2] sm:$0xff]  ;;  %vm271_vm0 = vcmask 130048  }
  0x21   : > { %s689_s17 = sshll.u32 %s225_s14, 4  ;;  %532 = vset.pattern.permute.xlu0 %v595_v2  ;;  %533 = vset.pattern.permute.xlu1 %v595_v2  ;;  %v490_v10 = vld [vmem:[#allocation2] sm:$0xff]  ;;  %v304_v12 = vld [vmem:[%s723_s2 + $0x8] sm:$0xff]  ;;  %s493_s5 = sshll.u32 (%p656_p5), %s637_s18, 3 }
  0x22   : > { %s227_s20 = scalar_lea.vmem [#allocation4], %s689_s17  ;;  %307 = vperm.xlu0 %532, %v303_v8   ;;  %v319_v11 = vld [vmem:[%s724_s3] sm:$0xff]  ;;  %v320_v13 = vld [vmem:[%s724_s3 + $0x8] sm:$0xff]  ;;  %s248_s30 = scalar_lea.vmem [#allocation5], %s689_s17 }
  0x23   : > { %v476_v3 = vld [vmem:[%s227_s20] sm:$0xf]  ;;  %v492_v4 = vld [vmem:[%s227_s20 + $0x4] sm:$0xf0]  ;;  %v491_v5 = vld [vmem:[%s227_s20 + $0x4] sm:$0xf]  ;;  %323 = vperm.xlu1 %533, %v319_v11   ;;  %s352_s8 = scalar_lea.vmem (%p656_p5), %s725_s4, %s493_s5 }
  0x24   : > { %v477_v6 = vor.u32 %v492_v4, %v476_v3  ;;  %v478_v7 = vld [vmem:[%s227_s20 + $0x8] sm:$0xf0] }
  0x25   : > { %v481_v9 = vor.u32 %v491_v5, %v478_v7 }
  0x26   : > { %282 = vmatpush.bf16.msra.mxu0 %v477_v6 }
  0x27   : > { %296 = vmatpush.bf16.msra.mxu1 %v481_v9 }
  0x29   : > { %482 = vmatmul.msk.bf16.vlgmr.msra.gmra.mxu0 %vm271_vm0, %v490_v10 }
  0x2a   : > { %483 = vmatmul.msk.bf16.vlgmr.msra.gmra.mxu1 %vm271_vm0, %v490_v10  ;;  %312 = vperm.xlu0 %532, %v304_v12  }
  0x2b   : > { %328 = vperm.xlu1 %533, %v320_v13  }
  0x94   : > { %v308_v14 = vpop.permute.xlu0 %307 }
  0x95   : > { %v324_v15 = vpop.permute.xlu1 %323 }
  0x9c   : > { %v313_v24 = vpop.permute.xlu0 %312 }
  0x9d   : > { %v329_v29 = vpop.permute.xlu1 %328 }
  0xa6   : > { %v284_v16 = vpop.f32.mrf.mxu0 }
  0xa7   : > { %v315_v17 = vmul.f32 %v308_v14, %v284_v16  ;;  %v298_v18 = vpop.f32.mrf.mxu1 }
  0xa8   : > { %v316_v19 = vmul.f32 %v308_v14, %v298_v18 }
  0xa9   : > { %v331_v20 = vadd.f32 %v324_v15, %v315_v17 }
  0xaa   : > { %v332_v21 = vadd.f32 %v324_v15, %v316_v19 }
  0xab   : > { %v335_v22 = vmax.f32 %v331_v20, 0.0 }
  0xac   : > { %v336_v23 = vmax.f32 %v332_v21, 0.0 }
  0xae   : > { %v339_v25 = vpack.c.bf16 %v336_v23, %v335_v22  ;;  %v286_v26 = vpop.f32.mrf.mxu0 }
  0xaf   : > { %v317_v27 = vmul.f32 %v313_v24, %v286_v26  ;;  %v300_v28 = vpop.f32.mrf.mxu1 }
  0xb0   : > { %341 = vst [vmem:[%s248_s30] sm:$0xff] %v339_v25  ;;  %v318_v30 = vmul.f32 %v313_v24, %v300_v28 }
  0xb1   : > { %v333_v31 = vadd.f32 %v329_v29, %v317_v27 }
  0xb2   : > { %v334_v32 = vadd.f32 %v329_v29, %v318_v30 }
  0xb3   : > { %v337_v33 = vmax.f32 %v333_v31, 0.0 }
  0xb4   : > { %v338_v34 = vmax.f32 %v334_v32, 0.0  ;;  %349 = sbr.rel (!%p656_p5) target bundleno = 193 (0xc1), region = 82 }
  0xb6   : > { %v340_v35 = vpack.c.bf16 %v338_v34, %v337_v33 }
  0xb7   : > { %v383_v36 = vld [vmem:[%s248_s30] sm:$0xff] (%p656_p5) }
  0xb8   : > { %342 = vst [vmem:[%s248_s30 + $0x8] sm:$0xff] %v340_v35 }
  0xb9   : > { %384 = vst [vmem:[%s352_s8] sm:$0xff] %v383_v36 }
  0xbf   : > { %v385_v37 = vld [vmem:[%s248_s30 + $0x8] sm:$0xff] }
  0xc0   : > { %386 = vst [vmem:[%s352_s8 + $0x10] sm:$0xff] %v385_v37 }
  0xc1 PF: > { %p12_p13 = scmp.ge.s32.totalorder %s640_s19, 4   ;;  %s729_s15 = smov %s586_s16 }
  0xc2   : > { %s730_s16 = smov %s650_s22  ;;  %s731_s17 = smov %s640_s19 }
  0xc3   :  { %14 = sbr.rel (!%p12_p13) target bundleno = 2 (0x2), region = 152 }
  0xc8   :  { %402 = vsyncpa [#allocation3], 1 }
  0xc9   :  { %404 = vsyncpa [#allocation3 + $0x1], 1 }

// kernel: ae_forward.13
= control target key start
LH: loop header
LB: loop body
LE: loop exit
PB: predicated region body
PF: predicated region fallthrough
CT: control target
= control target key end

     0   :  { %v410_v2 = vmov 0   ;;  %s538_s1 = inlined_call_operand.vmem [shape: bf16[256,128], index: 1, kind: input, shape index: {}]   ;;  %s539_s2 = inlined_call_operand.vmem [shape: f32[32,1], index: 2, kind: input, shape index: {}]   ;;  %s540_s3 = inlined_call_operand.vmem [shape: f32[32,1], index: 3, kind: input, shape index: {}]   ;;  %s541_s0 = inlined_call_operand.vmem [shape: bf16[32,256], index: 0, kind: input, shape index: {}]   ;;  %s542_s4 = inlined_call_operand.vmem [shape: bf16[32,128], index: 4, kind: output, shape index: {}]  }
   0x1   :  { %v370_v0 = vld [vmem:[%s538_s1 + $0x38] sm:$0xff]  ;;  %408 = vset.pattern.permute.xlu1 %v410_v2  ;;  %407 = vset.pattern.permute.xlu0 %v410_v2  ;;  %v369_v3 = vld [vmem:[%s538_s1 + $0x30] sm:$0xff]  ;;  %v207_v6 = vld [vmem:[%s539_s2] sm:$0xff] }
   0x2   :  { %v378_v1 = vld [vmem:[%s538_s1 + $0x78] sm:$0xff]  ;;  %409 = vset.pattern.permute.xlu2 %v410_v2  ;;  %169 = vmatpush.bf16.msra.mxu0 %v370_v0  ;;  %v377_v4 = vld [vmem:[%s538_s1 + $0x70] sm:$0xff]  ;;  %v368_v7 = vld [vmem:[%s538_s1 + $0x28] sm:$0xff] }
   0x3   :  { %390 = vmatpush.bf16.msra.mxu2 %v370_v0  ;;  %188 = vmatpush.bf16.msra.mxu1 %v378_v1  ;;  %v209_v5 = vld [vmem:[%s539_s2 + $0x10] sm:$0xff]  ;;  %v376_v8 = vld [vmem:[%s538_s1 + $0x68] sm:$0xff]  ;;  %v367_v9 = vld [vmem:[%s538_s1 + $0x20] sm:$0xff] }
   0x4   :  { %398 = vmatpush.bf16.msra.mxu3 %v378_v1  ;;  %223 = vperm.xlu1 %408, %v209_v5   ;;  %v210_v10 = vld [vmem:[%s539_s2 + $0x18] sm:$0xff]  ;;  %v235_v11 = vld [vmem:[%s540_s3] sm:$0xff]  ;;  %v208_v13 = vld [vmem:[%s539_s2 + $0x8] sm:$0xff] }
   0x5   :  { %213 = vperm.xlu0 %407, %v207_v6   ;;  %v375_v12 = vld [vmem:[%s538_s1 + $0x60] sm:$0xff]  ;;  %241 = vperm.xlu2 %409, %v235_v11   ;;  %v366_v14 = vld [vmem:[%s538_s1 + $0x18] sm:$0xff]  ;;  %v236_v16 = vld [vmem:[%s540_s3 + $0x8] sm:$0xff] }
   0x6   :  { %170 = vmatpush.bf16.msra.mxu0 %v369_v3  ;;  %v374_v15 = vld [vmem:[%s538_s1 + $0x58] sm:$0xff]  ;;  %v365_v17 = vld [vmem:[%s538_s1 + $0x10] sm:$0xff]  ;;  %v364_v21 = vld [vmem:[%s538_s1 + $0x8] sm:$0xff] }
   0x7   :  { %391 = vmatpush.bf16.msra.mxu2 %v369_v3  ;;  %189 = vmatpush.bf16.msra.mxu1 %v377_v4  ;;  %v238_v18 = vld [vmem:[%s540_s3 + $0x18] sm:$0xff]  ;;  %v373_v19 = vld [vmem:[%s538_s1 + $0x50] sm:$0xff]  ;;  %v372_v22 = vld [vmem:[%s538_s1 + $0x48] sm:$0xff] }
   0x8   :  { %399 = vmatpush.bf16.msra.mxu3 %v377_v4  ;;  %v237_v20 = vld [vmem:[%s540_s3 + $0x10] sm:$0xff]  ;;  %v363_v23 = vld [vmem:[%s538_s1] sm:$0xff]  ;;  %v360_v26 = vld [vmem:[%s541_s0 + $0x4] sm:$0xf0] }
   0x9   :  { %v371_v24 = vld [vmem:[%s538_s1 + $0x40] sm:$0xff]  ;;  %v289_v27 = vld [vmem:[%s541_s0 + $0x10] sm:$0xf]  ;;  %v362_v28 = vld [vmem:[%s541_s0 + $0x14] sm:$0xf0] }
   0xa   :  { %171 = vmatpush.bf16.msra.mxu0 %v368_v7  ;;  %v281_v25 = vld [vmem:[%s541_s0] sm:$0xf]  ;;  %v359_v29 = vld [vmem:[%s541_s0 + $0x4] sm:$0xf]  ;;  %v283_v30 = vld [vmem:[%s541_s0 + $0x8] sm:$0xf0]  ;;  %v290_v34 = vor.u32 %v362_v28, %v289_v27 }
   0xb   :  { %392 = vmatpush.bf16.msra.mxu2 %v368_v7  ;;  %190 = vmatpush.bf16.msra.mxu1 %v376_v8  ;;  %v361_v31 = vld [vmem:[%s541_s0 + $0x14] sm:$0xf]  ;;  %v291_v32 = vld [vmem:[%s541_s0 + $0x18] sm:$0xf0]  ;;  %v282_v33 = vor.u32 %v360_v26, %v281_v25  ;;  %v286_v35 = vor.u32 %v359_v29, %v283_v30 }
   0xc   :  { %400 = vmatpush.bf16.msra.mxu3 %v376_v8  ;;  %228 = vperm.xlu1 %408, %v210_v10   ;;  %v294_v36 = vor.u32 %v361_v31, %v291_v32 }
   0xd   :  { %218 = vperm.xlu0 %407, %v208_v13   ;;  %246 = vperm.xlu2 %409, %v236_v16  }
   0xe   :  { %172 = vmatpush.bf16.msra.mxu0 %v367_v9 }
   0xf   :  { %393 = vmatpush.bf16.msra.mxu2 %v367_v9  ;;  %191 = vmatpush.bf16.msra.mxu1 %v375_v12 }
  0x10   :  { %401 = vmatpush.bf16.msra.mxu3 %v375_v12 }
  0x12   :  { %173 = vmatpush.bf16.msra.mxu0 %v366_v14 }
  0x13   :  { %394 = vmatpush.bf16.msra.mxu2 %v366_v14  ;;  %192 = vmatpush.bf16.msra.mxu1 %v374_v15 }
  0x14   :  { %402 = vmatpush.bf16.msra.mxu3 %v374_v15  ;;  %256 = vperm.xlu1 %408, %v238_v18  }
  0x15   :  { %251 = vperm.xlu0 %407, %v237_v20  }
  0x16   :  { %174 = vmatpush.bf16.msra.mxu0 %v365_v17 }
  0x17   :  { %395 = vmatpush.bf16.msra.mxu2 %v365_v17  ;;  %193 = vmatpush.bf16.msra.mxu1 %v373_v19 }
  0x18   :  { %403 = vmatpush.bf16.msra.mxu3 %v373_v19 }
  0x1a   :  { %175 = vmatpush.bf16.msra.mxu0 %v364_v21 }
  0x1b   :  { %396 = vmatpush.bf16.msra.mxu2 %v364_v21  ;;  %194 = vmatpush.bf16.msra.mxu1 %v372_v22 }
  0x1c   :  { %404 = vmatpush.bf16.msra.mxu3 %v372_v22 }
  0x1e   :  { %176 = vmatpush.bf16.msra.mxu0 %v363_v23 }
  0x1f   :  { %397 = vmatpush.bf16.msra.mxu2 %v363_v23  ;;  %195 = vmatpush.bf16.msra.mxu1 %v371_v24 }
  0x20   :  { %405 = vmatpush.bf16.msra.mxu3 %v371_v24 }
  0x21   :  { %177 = vmatmul.bf16.vlgmr.msra.gmra.mxu0 %v282_v33 }
  0x22   :  { %182 = vmatmul.bf16.vlgmr.msra.gmra.mxu2 %v290_v34  ;;  %196 = vmatmul.bf16.vlgmr.msra.gmra.mxu1 %v286_v35 }
  0x23   :  { %201 = vmatmul.bf16.vlgmr.msra.gmra.mxu3 %v294_v36 }
  0x5f   :  { %v242_v41 = vpop.permute.xlu2 %241 }
  0x67   :  { %v247_v54 = vpop.permute.xlu2 %246 }
  0x76   :  { %v224_v38 = vpop.permute.xlu1 %223 }
  0x77   :  { %v214_v37 = vpop.permute.xlu0 %213 }
  0x7e   :  { %v229_v48 = vpop.permute.xlu1 %228 }
  0x7f   :  { %v219_v44 = vpop.permute.xlu0 %218 }
  0x86   :  { %v257_v2 = vpop.permute.xlu1 %256 }
  0x87   :  { %v252_v62 = vpop.permute.xlu0 %251 }
  0x9e   :  { %v178_v39 = vpop.f32.mrf.mxu0 }
  0x9f   :  { %v197_v40 = vpop.f32.mrf.mxu1 }
  0xa0   :  { %v198_v42 = vadd.f32 %v197_v40, %v178_v39 }
  0xa2   :  { %v231_v46 = vmul.f32 %v214_v37, %v198_v42 }
  0xa4   :  { %v259_v52 = vadd.f32 %v242_v41, %v231_v46 }
  0xa5   :  { %v183_v43 = vpop.f32.mrf.mxu2 }
  0xa6   :  { %v202_v45 = vpop.f32.mrf.mxu3  ;;  %v180_v47 = vpop.f32.mrf.mxu0  ;;  %v263_v59 = vmax.f32 %v259_v52, 0.0 }
  0xa7   :  { %v199_v49 = vpop.f32.mrf.mxu1  ;;  %v203_v50 = vadd.f32 %v202_v45, %v183_v43 }
  0xa8   :  { %v200_v51 = vadd.f32 %v199_v49, %v180_v47 }
  0xa9   :  { %v233_v55 = vmul.f32 %v224_v38, %v203_v50 }
  0xaa   :  { %v232_v53 = vmul.f32 %v219_v44, %v200_v51 }
  0xab   :  { %v261_v63 = vadd.f32 %v252_v62, %v233_v55 }
  0xac   :  { %v260_v56 = vadd.f32 %v247_v54, %v232_v53 }
  0xad   :  { %v185_v57 = vpop.f32.mrf.mxu2  ;;  %v265_v4 = vmax.f32 %v261_v63, 0.0 }
  0xae   :  { %v204_v58 = vpop.f32.mrf.mxu3  ;;  %v264_v60 = vmax.f32 %v260_v56, 0.0 }
  0xaf   :  { %v205_v61 = vadd.f32 %v204_v58, %v185_v57 }
  0xb0   :  { %v382_v0 = vpack.c.bf16 %v264_v60, %v263_v59 }
  0xb1   :  { %v234_v1 = vmul.f32 %v229_v48, %v205_v61 }
  0xb2   :  { %383 = vst [vmem:[%s542_s4] sm:$0xff] %v382_v0  }
  0xb3   :  { %v262_v3 = vadd.f32 %v257_v2, %v234_v1 }
  0xb5   :  { %v266_v5 = vmax.f32 %v262_v3, 0.0 }
  0xb7   :  { %v387_v6 = vpack.c.bf16 %v266_v5, %v265_v4 }
  0xb9   :  { %389 = vst [vmem:[%s542_s4 + $0x8] sm:$0xff] %v387_v6  }

// kernel: ae_forward.14
= control target key start
LH: loop header
LB: loop body
LE: loop exit
PB: predicated region body
PF: predicated region fallthrough
CT: control target
= control target key end

     0   :  { %v892_v3 = vmov 0   ;;  %s1182_s1 = inlined_call_operand.vmem [shape: bf16[512,128], index: 1, kind: input, shape index: {}]   ;;  %s1183_s2 = inlined_call_operand.vmem [shape: f32[64,1], index: 2, kind: input, shape index: {}]   ;;  %s1184_s0 = inlined_call_operand.vmem [shape: bf16[64,512], index: 0, kind: input, shape index: {}]   ;;  %s1185_s3 = inlined_call_operand.vmem [shape: f32[64,1], index: 3, kind: input, shape index: {}]   ;;  %s1186_s4 = inlined_call_operand.vmem [shape: bf16[64,128], index: 4, kind: output, shape index: {}]  }
   0x1   :  { %v840_v0 = vld [vmem:[%s1182_s1 + $0x38] sm:$0xff]  ;;  %889 = vset.pattern.permute.xlu0 %v892_v3  ;;  %890 = vset.pattern.permute.xlu1 %v892_v3  ;;  %v839_v5 = vld [vmem:[%s1182_s1 + $0x30] sm:$0xff]  ;;  %v838_v9 = vld [vmem:[%s1182_s1 + $0x28] sm:$0xff] }
   0x2   :  { %v848_v1 = vld [vmem:[%s1182_s1 + $0x78] sm:$0xff]  ;;  %891 = vset.pattern.permute.xlu2 %v892_v3  ;;  %369 = vmatpush.bf16.msra.mxu0 %v840_v0  ;;  %v847_v6 = vld [vmem:[%s1182_s1 + $0x70] sm:$0xff]  ;;  %v846_v10 = vld [vmem:[%s1182_s1 + $0x68] sm:$0xff] }
   0x3   :  { %v856_v2 = vld [vmem:[%s1182_s1 + $0xb8] sm:$0xff]  ;;  %398 = vmatpush.bf16.msra.mxu1 %v848_v1  ;;  %v855_v7 = vld [vmem:[%s1182_s1 + $0xb0] sm:$0xff]  ;;  %v854_v11 = vld [vmem:[%s1182_s1 + $0xa8] sm:$0xff] }
   0x4   :  { %v864_v4 = vld [vmem:[%s1182_s1 + $0xf8] sm:$0xff]  ;;  %427 = vmatpush.bf16.msra.mxu2 %v856_v2  ;;  %v863_v8 = vld [vmem:[%s1182_s1 + $0xf0] sm:$0xff]  ;;  %v862_v12 = vld [vmem:[%s1182_s1 + $0xe8] sm:$0xff] }
   0x5   :  { %456 = vmatpush.bf16.msra.mxu3 %v864_v4  ;;  %v837_v13 = vld [vmem:[%s1182_s1 + $0x20] sm:$0xff]  ;;  %v836_v18 = vld [vmem:[%s1182_s1 + $0x18] sm:$0xff]  ;;  %v487_v20 = vld [vmem:[%s1183_s2 + $0x10] sm:$0xff] }
   0x6   :  { %370 = vmatpush.bf16.msra.mxu0 %v839_v5  ;;  %v845_v14 = vld [vmem:[%s1182_s1 + $0x60] sm:$0xff]  ;;  %v844_v19 = vld [vmem:[%s1182_s1 + $0x58] sm:$0xff]  ;;  %505 = vperm.xlu1 %890, %v487_v20   ;;  %v486_v23 = vld [vmem:[%s1183_s2 + $0x8] sm:$0xff] }
   0x7   :  { %399 = vmatpush.bf16.msra.mxu1 %v847_v6  ;;  %v485_v15 = vld [vmem:[%s1183_s2] sm:$0xff]  ;;  %v852_v21 = vld [vmem:[%s1182_s1 + $0x98] sm:$0xff]  ;;  %v835_v24 = vld [vmem:[%s1182_s1 + $0x10] sm:$0xff] }
   0x8   :  { %428 = vmatpush.bf16.msra.mxu2 %v855_v7  ;;  %v853_v16 = vld [vmem:[%s1182_s1 + $0xa0] sm:$0xff]  ;;  %495 = vperm.xlu0 %889, %v485_v15   ;;  %v860_v22 = vld [vmem:[%s1182_s1 + $0xd8] sm:$0xff]  ;;  %v843_v25 = vld [vmem:[%s1182_s1 + $0x50] sm:$0xff] }
   0x9   :  { %457 = vmatpush.bf16.msra.mxu3 %v863_v8  ;;  %v861_v17 = vld [vmem:[%s1182_s1 + $0xe0] sm:$0xff]  ;;  %v851_v27 = vld [vmem:[%s1182_s1 + $0x90] sm:$0xff]  ;;  %v488_v29 = vld [vmem:[%s1183_s2 + $0x18] sm:$0xff] }
   0xa   :  { %371 = vmatpush.bf16.msra.mxu0 %v838_v9  ;;  %v489_v26 = vld [vmem:[%s1183_s2 + $0x20] sm:$0xff]  ;;  %v859_v28 = vld [vmem:[%s1182_s1 + $0xd0] sm:$0xff]  ;;  %v834_v30 = vld [vmem:[%s1182_s1 + $0x8] sm:$0xff] }
   0xb   :  { %400 = vmatpush.bf16.msra.mxu1 %v846_v10  ;;  %515 = vperm.xlu2 %891, %v489_v26   ;;  %v842_v31 = vld [vmem:[%s1182_s1 + $0x48] sm:$0xff]  ;;  %v833_v34 = vld [vmem:[%s1182_s1] sm:$0xff]  ;;  %v819_v39 = vld [vmem:[%s1184_s0 + $0xc] sm:$0xf0] }
   0xc   :  { %429 = vmatpush.bf16.msra.mxu2 %v854_v11  ;;  %v850_v32 = vld [vmem:[%s1182_s1 + $0x88] sm:$0xff]  ;;  %v841_v35 = vld [vmem:[%s1182_s1 + $0x40] sm:$0xff]  ;;  %v491_v40 = vld [vmem:[%s1183_s2 + $0x30] sm:$0xff] }
   0xd   :  { %458 = vmatpush.bf16.msra.mxu3 %v862_v12  ;;  %v858_v33 = vld [vmem:[%s1182_s1 + $0xc8] sm:$0xff]  ;;  %v849_v36 = vld [vmem:[%s1182_s1 + $0x80] sm:$0xff]  ;;  %v629_v42 = vld [vmem:[%s1184_s0 + $0x10] sm:$0xf0] }
   0xe   :  { %372 = vmatpush.bf16.msra.mxu0 %v837_v13  ;;  %510 = vperm.xlu1 %890, %v488_v29   ;;  %v857_v37 = vld [vmem:[%s1182_s1 + $0xc0] sm:$0xff]  ;;  %v635_v43 = vld [vmem:[%s1184_s0 + $0x8] sm:$0xf]  ;;  %v820_v44 = vld [vmem:[%s1184_s0 + $0x14] sm:$0xf0] }
   0xf   :  { %401 = vmatpush.bf16.msra.mxu1 %v845_v14  ;;  %v627_v38 = vld [vmem:[%s1184_s0] sm:$0xf]  ;;  %v817_v41 = vld [vmem:[%s1184_s0 + $0x4] sm:$0xf]  ;;  %v818_v45 = vld [vmem:[%s1184_s0 + $0xc] sm:$0xf]  ;;  %v636_v50 = vor.u32 %v820_v44, %v635_v43 }
  0x10   :  { %430 = vmatpush.bf16.msra.mxu2 %v853_v16  ;;  %500 = vperm.xlu0 %889, %v486_v23   ;;  %v637_v46 = vld [vmem:[%s1184_s0 + $0x18] sm:$0xf0]  ;;  %v628_v47 = vor.u32 %v819_v39, %v627_v38  ;;  %v632_v48 = vor.u32 %v817_v41, %v629_v42  ;;  %v542_v52 = vld [vmem:[%s1185_s3 + $0x8] sm:$0xff]  ;;  %v543_v54 = vld [vmem:[%s1185_s3 + $0x10] sm:$0xff] }
  0x11   :  { %459 = vmatpush.bf16.msra.mxu3 %v861_v17  ;;  %v492_v49 = vld [vmem:[%s1183_s2 + $0x38] sm:$0xff]  ;;  %v640_v51 = vor.u32 %v818_v45, %v637_v46  ;;  %v490_v53 = vld [vmem:[%s1183_s2 + $0x28] sm:$0xff]  ;;  %v541_v55 = vld [vmem:[%s1185_s3] sm:$0xff] }
  0x12   :  { %373 = vmatpush.bf16.msra.mxu0 %v836_v18  ;;  %v643_v56 = vld [vmem:[%s1184_s0 + $0x20] sm:$0xf]  ;;  %v823_v57 = vld [vmem:[%s1184_s0 + $0x2c] sm:$0xf0]  ;;  %v821_v59 = vld [vmem:[%s1184_s0 + $0x24] sm:$0xf] }
  0x13   :  { %402 = vmatpush.bf16.msra.mxu1 %v844_v19  ;;  %520 = vperm.xlu2 %891, %v490_v53   ;;  %v545_v58 = vld [vmem:[%s1185_s3 + $0x20] sm:$0xff]  ;;  %v645_v60 = vld [vmem:[%s1184_s0 + $0x30] sm:$0xf0]  ;;  %v651_v61 = vld [vmem:[%s1184_s0 + $0x28] sm:$0xf]  ;;  %v644_v1 = vor.u32 %v823_v57, %v643_v56 }
  0x14   :  { %431 = vmatpush.bf16.msra.mxu2 %v852_v21  ;;  %v824_v62 = vld [vmem:[%s1184_s0 + $0x34] sm:$0xf0]  ;;  %v822_v63 = vld [vmem:[%s1184_s0 + $0x2c] sm:$0xf]  ;;  %v653_v0 = vld [vmem:[%s1184_s0 + $0x38] sm:$0xf0]  ;;  %v648_v2 = vor.u32 %v821_v59, %v645_v60 }
  0x15   :  { %460 = vmatpush.bf16.msra.mxu3 %v860_v22  ;;  %v546_v3 = vld [vmem:[%s1185_s3 + $0x28] sm:$0xff]  ;;  %v652_v4 = vor.u32 %v824_v62, %v651_v61  ;;  %v656_v5 = vor.u32 %v822_v63, %v653_v0  ;;  %v548_v6 = vld [vmem:[%s1185_s3 + $0x38] sm:$0xff]  ;;  %v547_v8 = vld [vmem:[%s1185_s3 + $0x30] sm:$0xff] }
  0x16   :  { %374 = vmatpush.bf16.msra.mxu0 %v835_v24  ;;  %530 = vperm.xlu1 %890, %v492_v49   ;;  %v544_v7 = vld [vmem:[%s1185_s3 + $0x18] sm:$0xff]  ;;  %v659_v9 = vld [vmem:[%s1184_s0 + $0x40] sm:$0xf]  ;;  %v827_v10 = vld [vmem:[%s1184_s0 + $0x4c] sm:$0xf0] }
  0x17   :  { %403 = vmatpush.bf16.msra.mxu1 %v843_v25  ;;  %v825_v11 = vld [vmem:[%s1184_s0 + $0x44] sm:$0xf]  ;;  %v661_v12 = vld [vmem:[%s1184_s0 + $0x50] sm:$0xf0]  ;;  %v667_v13 = vld [vmem:[%s1184_s0 + $0x48] sm:$0xf]  ;;  %v660_v17 = vor.u32 %v827_v10, %v659_v9 }
  0x18   :  { %432 = vmatpush.bf16.msra.mxu2 %v851_v27  ;;  %525 = vperm.xlu0 %889, %v491_v40   ;;  %v828_v14 = vld [vmem:[%s1184_s0 + $0x54] sm:$0xf0]  ;;  %v826_v15 = vld [vmem:[%s1184_s0 + $0x4c] sm:$0xf]  ;;  %v669_v16 = vld [vmem:[%s1184_s0 + $0x58] sm:$0xf0]  ;;  %v664_v18 = vor.u32 %v825_v11, %v661_v12 }
  0x19   :  { %461 = vmatpush.bf16.msra.mxu3 %v859_v28  ;;  %v668_v19 = vor.u32 %v828_v14, %v667_v13  ;;  %v672_v20 = vor.u32 %v826_v15, %v669_v16  ;;  %v675_v21 = vld [vmem:[%s1184_s0 + $0x60] sm:$0xf]  ;;  %v831_v22 = vld [vmem:[%s1184_s0 + $0x6c] sm:$0xf0]  ;;  %v829_v23 = vld [vmem:[%s1184_s0 + $0x64] sm:$0xf] }
  0x1a   :  { %375 = vmatpush.bf16.msra.mxu0 %v834_v30  ;;  %v677_v24 = vld [vmem:[%s1184_s0 + $0x70] sm:$0xf0]  ;;  %v683_v25 = vld [vmem:[%s1184_s0 + $0x68] sm:$0xf]  ;;  %v832_v26 = vld [vmem:[%s1184_s0 + $0x74] sm:$0xf0]  ;;  %v676_v29 = vor.u32 %v831_v22, %v675_v21 }
  0x1b   :  { %404 = vmatpush.bf16.msra.mxu1 %v842_v31  ;;  %551 = vperm.xlu2 %891, %v541_v55   ;;  %v830_v27 = vld [vmem:[%s1184_s0 + $0x6c] sm:$0xf]  ;;  %v685_v28 = vld [vmem:[%s1184_s0 + $0x78] sm:$0xf0]  ;;  %v680_v30 = vor.u32 %v829_v23, %v677_v24  ;;  %v684_v31 = vor.u32 %v832_v26, %v683_v25 }
  0x1c   :  { %433 = vmatpush.bf16.msra.mxu2 %v850_v32  ;;  %v688_v32 = vor.u32 %v830_v27, %v685_v28 }
  0x1d   :  { %462 = vmatpush.bf16.msra.mxu3 %v858_v33 }
  0x1e   :  { %376 = vmatpush.bf16.msra.mxu0 %v833_v34  ;;  %561 = vperm.xlu1 %890, %v543_v54  }
  0x1f   :  { %405 = vmatpush.bf16.msra.mxu1 %v841_v35 }
  0x20   :  { %434 = vmatpush.bf16.msra.mxu2 %v849_v36  ;;  %556 = vperm.xlu0 %889, %v542_v52  }
  0x21   :  { %463 = vmatpush.bf16.msra.mxu3 %v857_v37  ;;  %377 = vmatmul.bf16.vlgmr.msra.gmra.mxu0 %v628_v47 }
  0x22   :  { %406 = vmatmul.bf16.vlgmr.msra.gmra.mxu1 %v632_v48 }
  0x23   :  { %435 = vmatmul.bf16.vlgmr.msra.gmra.mxu2 %v636_v50  ;;  %566 = vperm.xlu2 %891, %v544_v7  }
  0x24   :  { %464 = vmatmul.bf16.vlgmr.msra.gmra.mxu3 %v640_v51 }
  0x26   :  { %576 = vperm.xlu1 %890, %v546_v3  }
  0x28   :  { %571 = vperm.xlu0 %889, %v545_v58  }
  0x2b   :  { %581 = vperm.xlu2 %891, %v547_v8  }
  0x30   :  { %586 = vperm.xlu0 %889, %v548_v6  }
  0x31   :  { %382 = vmatmul.bf16.gmra.mxu0 %v644_v1 }
  0x32   :  { %411 = vmatmul.bf16.gmra.mxu1 %v648_v2 }
  0x33   :  { %440 = vmatmul.bf16.gmra.mxu2 %v652_v4 }
  0x34   :  { %469 = vmatmul.bf16.gmra.mxu3 %v656_v5 }
  0x41   :  { %387 = vmatmul.bf16.gmra.mxu0 %v660_v17 }
  0x42   :  { %416 = vmatmul.bf16.gmra.mxu1 %v664_v18 }
  0x43   :  { %445 = vmatmul.bf16.gmra.mxu2 %v668_v19 }
  0x44   :  { %474 = vmatmul.bf16.gmra.mxu3 %v672_v20 }
  0x51   :  { %392 = vmatmul.bf16.gmra.mxu0 %v676_v29 }
  0x52   :  { %421 = vmatmul.bf16.gmra.mxu1 %v680_v30 }
  0x53   :  { %450 = vmatmul.bf16.gmra.mxu2 %v684_v31 }
  0x54   :  { %479 = vmatmul.bf16.gmra.mxu3 %v688_v32 }
  0x65   :  { %v1158_v34 = vpop.permute.xlu2 %515 }
  0x6d   :  { %v1160_v40 = vpop.permute.xlu2 %520 }
  0x75   :  { %v552_v56 = vpop.permute.xlu2 %551 }
  0x78   :  { %v506_v38 = vpop.permute.xlu1 %505 }
  0x7a   :  { %v496_v33 = vpop.permute.xlu0 %495 }
  0x7d   :  { %v567_v21 = vpop.permute.xlu2 %566 }
  0x80   :  { %v511_v48 = vpop.permute.xlu1 %510 }
  0x82   :  { %v501_v37 = vpop.permute.xlu0 %500 }
  0x88   :  { %v1164_v63 = vpop.permute.xlu1 %530 }
  0x8a   :  { %v1162_v46 = vpop.permute.xlu0 %525 }
  0x90   :  { %v562_v16 = vpop.permute.xlu1 %561 }
  0x92   :  { %v557_v61 = vpop.permute.xlu0 %556 }
  0x9e   :  { %v378_v35 = vpop.f32.mrf.mxu0 }
  0x9f   :  { %v407_v36 = vpop.f32.mrf.mxu1 }
  0xa0   :  { %v408_v39 = vadd.f32 %v407_v36, %v378_v35 }
  0xa6   :  { %v436_v41 = vpop.f32.mrf.mxu2  ;;  %v380_v44 = vpop.f32.mrf.mxu0 }
  0xa7   :  { %v465_v42 = vpop.f32.mrf.mxu3  ;;  %v437_v43 = vadd.f32 %v436_v41, %v408_v39  ;;  %v409_v45 = vpop.f32.mrf.mxu1 }
  0xa8   :  { %v410_v49 = vadd.f32 %v409_v45, %v380_v44 }
  0xa9   :  { %v466_v47 = vadd.f32 %v465_v42, %v437_v43  ;;  %v572_v42 = vpop.permute.xlu0 %571 }
  0xab   :  { %v533_v52 = vmul.f32 %v496_v33, %v466_v47  ;;  %v577_v47 = vpop.permute.xlu1 %576 }
  0xad   :  { %v589_v58 = vadd.f32 %v552_v56, %v533_v52 }
  0xae   :  { %v438_v50 = vpop.f32.mrf.mxu2  ;;  %v383_v54 = vpop.f32.mrf.mxu0 }
  0xaf   :  { %v467_v51 = vpop.f32.mrf.mxu3  ;;  %v439_v53 = vadd.f32 %v438_v50, %v410_v49  ;;  %v412_v55 = vpop.f32.mrf.mxu1  ;;  %v597_v2 = vmax.f32 %v589_v58, 0.0 }
  0xb0   :  { %v413_v60 = vadd.f32 %v412_v55, %v383_v54 }
  0xb1   :  { %v468_v57 = vadd.f32 %v467_v51, %v439_v53 }
  0xb3   :  { %v534_v59 = vmul.f32 %v501_v37, %v468_v57 }
  0xb5   :  { %v590_v62 = vadd.f32 %v557_v61, %v534_v59 }
  0xb6   :  { %v441_v0 = vpop.f32.mrf.mxu2  ;;  %v385_v5 = vpop.f32.mrf.mxu0 }
  0xb7   :  { %v470_v1 = vpop.f32.mrf.mxu3  ;;  %v598_v3 = vmax.f32 %v590_v62, 0.0  ;;  %v442_v4 = vadd.f32 %v441_v0, %v413_v60  ;;  %v414_v6 = vpop.f32.mrf.mxu1 }
  0xb8   :  { %v415_v9 = vadd.f32 %v414_v6, %v385_v5  ;;  %v582_v62 = vpop.permute.xlu2 %581 }
  0xb9   :  { %v868_v7 = vpack.c.bf16 %v598_v3, %v597_v2  ;;  %v471_v8 = vadd.f32 %v470_v1, %v442_v4  ;;  %v587_v2 = vpop.permute.xlu0 %586 }
  0xbb   :  { %869 = vst [vmem:[%s1186_s4] sm:$0xff] %v868_v7   ;;  %v535_v12 = vmul.f32 %v506_v38, %v471_v8 }
  0xbd   :  { %v591_v18 = vadd.f32 %v562_v16, %v535_v12 }
  0xbe   :  { %v443_v10 = vpop.f32.mrf.mxu2  ;;  %v388_v14 = vpop.f32.mrf.mxu0 }
  0xbf   :  { %v472_v11 = vpop.f32.mrf.mxu3  ;;  %v444_v13 = vadd.f32 %v443_v10, %v415_v9  ;;  %v417_v15 = vpop.f32.mrf.mxu1  ;;  %v599_v25 = vmax.f32 %v591_v18, 0.0 }
  0xc0   :  { %v418_v20 = vadd.f32 %v417_v15, %v388_v14 }
  0xc1   :  { %v473_v17 = vadd.f32 %v472_v11, %v444_v13 }
  0xc3   :  { %v536_v19 = vmul.f32 %v511_v48, %v473_v17 }
  0xc5   :  { %v592_v22 = vadd.f32 %v567_v21, %v536_v19 }
  0xc6   :  { %v446_v23 = vpop.f32.mrf.mxu2  ;;  %v390_v28 = vpop.f32.mrf.mxu0 }
  0xc7   :  { %v475_v24 = vpop.f32.mrf.mxu3  ;;  %v600_v26 = vmax.f32 %v592_v22, 0.0  ;;  %v447_v27 = vadd.f32 %v446_v23, %v418_v20  ;;  %v419_v29 = vpop.f32.mrf.mxu1 }
  0xc8   :  { %v420_v32 = vadd.f32 %v419_v29, %v390_v28 }
  0xc9   :  { %v873_v30 = vpack.c.bf16 %v600_v26, %v599_v25  ;;  %v476_v31 = vadd.f32 %v475_v24, %v447_v27 }
  0xcb   :  { %885 = vst [vmem:[%s1186_s4 + $0x8] sm:$0xff] %v873_v30   ;;  %v537_v36 = vmul.f32 %v1158_v34, %v476_v31 }
  0xcd   :  { %v593_v43 = vadd.f32 %v572_v42, %v537_v36 }
  0xce   :  { %v448_v33 = vpop.f32.mrf.mxu2  ;;  %v393_v38 = vpop.f32.mrf.mxu0 }
  0xcf   :  { %v477_v35 = vpop.f32.mrf.mxu3  ;;  %v449_v37 = vadd.f32 %v448_v33, %v420_v32  ;;  %v422_v39 = vpop.f32.mrf.mxu1  ;;  %v601_v51 = vmax.f32 %v593_v43, 0.0 }
  0xd0   :  { %v423_v45 = vadd.f32 %v422_v39, %v393_v38 }
  0xd1   :  { %v478_v41 = vadd.f32 %v477_v35, %v449_v37 }
  0xd3   :  { %v538_v44 = vmul.f32 %v1160_v40, %v478_v41 }
  0xd5   :  { %v594_v48 = vadd.f32 %v577_v47, %v538_v44 }
  0xd6   :  { %v451_v49 = vpop.f32.mrf.mxu2  ;;  %v395_v55 = vpop.f32.mrf.mxu0 }
  0xd7   :  { %v480_v50 = vpop.f32.mrf.mxu3  ;;  %v602_v52 = vmax.f32 %v594_v48, 0.0  ;;  %v452_v53 = vadd.f32 %v451_v49, %v423_v45  ;;  %v424_v56 = vpop.f32.mrf.mxu1 }
  0xd8   :  { %v425_v57 = vadd.f32 %v424_v56, %v395_v55 }
  0xd9   :  { %v878_v54 = vpack.c.bf16 %v602_v52, %v601_v51  ;;  %v481_v34 = vadd.f32 %v480_v50, %v452_v53 }
  0xdb   :  { %886 = vst [vmem:[%s1186_s4 + $0x10] sm:$0xff] %v878_v54   ;;  %v539_v40 = vmul.f32 %v1162_v46, %v481_v34 }
  0xdd   :  { %v595_v0 = vadd.f32 %v582_v62, %v539_v40 }
  0xde   :  { %v453_v58 = vpop.f32.mrf.mxu2 }
  0xdf   :  { %v454_v59 = vadd.f32 %v453_v58, %v425_v57  ;;  %v482_v60 = vpop.f32.mrf.mxu3  ;;  %v603_v4 = vmax.f32 %v595_v0, 0.0 }
  0xe1   :  { %v483_v61 = vadd.f32 %v482_v60, %v454_v59 }
  0xe3   :  { %v540_v1 = vmul.f32 %v1164_v63, %v483_v61 }
  0xe5   :  { %v596_v3 = vadd.f32 %v587_v2, %v540_v1 }
  0xe7   :  { %v604_v5 = vmax.f32 %v596_v3, 0.0 }
  0xe9   :  { %v883_v6 = vpack.c.bf16 %v604_v5, %v603_v4 }
  0xeb   :  { %887 = vst [vmem:[%s1186_s4 + $0x18] sm:$0xff] %v883_v6  }

// kernel: ae_forward.15
= control target key start
LH: loop header
LB: loop body
LE: loop exit
PB: predicated region body
PF: predicated region fallthrough
CT: control target
= control target key end

     0   :  { %s2115_s1 = inlined_call_operand.vmem [shape: bf16[1024,128], index: 1, kind: input, shape index: {}]   ;;  %s2116_s0 = inlined_call_operand.vmem [shape: bf16[64,1024], index: 0, kind: input, shape index: {}]   ;;  %s2117_s2 = inlined_call_operand.vmem [shape: f32[64,1], index: 2, kind: input, shape index: {}]   ;;  %s2118_s3 = inlined_call_operand.vmem [shape: f32[64,1], index: 3, kind: input, shape index: {}]   ;;  %s2119_s4 = inlined_call_operand.vmem [shape: bf16[64,128], index: 4, kind: output, shape index: {}]  }
   0x1   :  { %v1516_v0 = vld [vmem:[%s2115_s1 + $0x38] sm:$0xff]  ;;  %v1515_v4 = vld [vmem:[%s2115_s1 + $0x30] sm:$0xff]  ;;  %v1514_v8 = vld [vmem:[%s2115_s1 + $0x28] sm:$0xff] }
   0x2   :  { %v1524_v1 = vld [vmem:[%s2115_s1 + $0x78] sm:$0xff]  ;;  %721 = vmatpush.bf16.msra.mxu0 %v1516_v0  ;;  %v1523_v5 = vld [vmem:[%s2115_s1 + $0x70] sm:$0xff]  ;;  %v1522_v9 = vld [vmem:[%s2115_s1 + $0x68] sm:$0xff] }
   0x3   :  { %v1532_v2 = vld [vmem:[%s2115_s1 + $0xb8] sm:$0xff]  ;;  %750 = vmatpush.bf16.msra.mxu1 %v1524_v1  ;;  %v1531_v6 = vld [vmem:[%s2115_s1 + $0xb0] sm:$0xff]  ;;  %v1530_v10 = vld [vmem:[%s2115_s1 + $0xa8] sm:$0xff] }
   0x4   :  { %v1540_v3 = vld [vmem:[%s2115_s1 + $0xf8] sm:$0xff]  ;;  %779 = vmatpush.bf16.msra.mxu2 %v1532_v2  ;;  %v1539_v7 = vld [vmem:[%s2115_s1 + $0xf0] sm:$0xff]  ;;  %v1538_v11 = vld [vmem:[%s2115_s1 + $0xe8] sm:$0xff] }
   0x5   :  { %808 = vmatpush.bf16.msra.mxu3 %v1540_v3  ;;  %v1513_v12 = vld [vmem:[%s2115_s1 + $0x20] sm:$0xff]  ;;  %v1512_v16 = vld [vmem:[%s2115_s1 + $0x18] sm:$0xff]  ;;  %v1511_v20 = vld [vmem:[%s2115_s1 + $0x10] sm:$0xff] }
   0x6   :  { %722 = vmatpush.bf16.msra.mxu0 %v1515_v4  ;;  %v1521_v13 = vld [vmem:[%s2115_s1 + $0x60] sm:$0xff]  ;;  %v1520_v17 = vld [vmem:[%s2115_s1 + $0x58] sm:$0xff]  ;;  %v1519_v21 = vld [vmem:[%s2115_s1 + $0x50] sm:$0xff] }
   0x7   :  { %751 = vmatpush.bf16.msra.mxu1 %v1523_v5  ;;  %v1529_v14 = vld [vmem:[%s2115_s1 + $0xa0] sm:$0xff]  ;;  %v1528_v18 = vld [vmem:[%s2115_s1 + $0x98] sm:$0xff]  ;;  %v1527_v22 = vld [vmem:[%s2115_s1 + $0x90] sm:$0xff] }
   0x8   :  { %780 = vmatpush.bf16.msra.mxu2 %v1531_v6  ;;  %v1537_v15 = vld [vmem:[%s2115_s1 + $0xe0] sm:$0xff]  ;;  %v1536_v19 = vld [vmem:[%s2115_s1 + $0xd8] sm:$0xff]  ;;  %v1535_v23 = vld [vmem:[%s2115_s1 + $0xd0] sm:$0xff] }
   0x9   :  { %809 = vmatpush.bf16.msra.mxu3 %v1539_v7  ;;  %v1510_v24 = vld [vmem:[%s2115_s1 + $0x8] sm:$0xff]  ;;  %v1509_v28 = vld [vmem:[%s2115_s1] sm:$0xff]  ;;  %v1564_v40 = vld [vmem:[%s2115_s1 + $0x1b8] sm:$0xff] }
   0xa   :  { %723 = vmatpush.bf16.msra.mxu0 %v1514_v8  ;;  %v1518_v25 = vld [vmem:[%s2115_s1 + $0x48] sm:$0xff]  ;;  %v1517_v29 = vld [vmem:[%s2115_s1 + $0x40] sm:$0xff]  ;;  %v1548_v41 = vld [vmem:[%s2115_s1 + $0x138] sm:$0xff] }
   0xb   :  { %752 = vmatpush.bf16.msra.mxu1 %v1522_v9  ;;  %v1526_v26 = vld [vmem:[%s2115_s1 + $0x88] sm:$0xff]  ;;  %v1525_v30 = vld [vmem:[%s2115_s1 + $0x80] sm:$0xff]  ;;  %v1572_v46 = vld [vmem:[%s2115_s1 + $0x1f8] sm:$0xff] }
   0xc   :  { %781 = vmatpush.bf16.msra.mxu2 %v1530_v10  ;;  %v1534_v27 = vld [vmem:[%s2115_s1 + $0xc8] sm:$0xff]  ;;  %v1533_v31 = vld [vmem:[%s2115_s1 + $0xc0] sm:$0xff]  ;;  %v1556_v47 = vld [vmem:[%s2115_s1 + $0x178] sm:$0xff] }
   0xd   :  { %810 = vmatpush.bf16.msra.mxu3 %v1538_v11  ;;  %v1095_v32 = vld [vmem:[%s2116_s0] sm:$0xf]  ;;  %v1477_v34 = vld [vmem:[%s2116_s0 + $0x4] sm:$0xf]  ;;  %v1103_v36 = vld [vmem:[%s2116_s0 + $0x8] sm:$0xf] }
   0xe   :  { %724 = vmatpush.bf16.msra.mxu0 %v1513_v12  ;;  %v1481_v33 = vld [vmem:[%s2116_s0 + $0x1c] sm:$0xf0]  ;;  %v1097_v35 = vld [vmem:[%s2116_s0 + $0x20] sm:$0xf0]  ;;  %v1482_v37 = vld [vmem:[%s2116_s0 + $0x24] sm:$0xf0] }
   0xf   :  { %753 = vmatpush.bf16.msra.mxu1 %v1521_v13  ;;  %v1478_v38 = vld [vmem:[%s2116_s0 + $0xc] sm:$0xf]  ;;  %v1096_v42 = vor.u32 %v1481_v33, %v1095_v32  ;;  %v1100_v43 = vor.u32 %v1477_v34, %v1097_v35  ;;  %v1104_v44 = vor.u32 %v1482_v37, %v1103_v36  ;;  %v1563_v48 = vld [vmem:[%s2115_s1 + $0x1b0] sm:$0xff]  ;;  %v1127_v56 = vld [vmem:[%s2116_s0 + $0x40] sm:$0xf] }
  0x10   :  { %782 = vmatpush.bf16.msra.mxu2 %v1529_v14  ;;  %v1105_v39 = vld [vmem:[%s2116_s0 + $0x28] sm:$0xf0]  ;;  %v1547_v49 = vld [vmem:[%s2115_s1 + $0x130] sm:$0xff]  ;;  %v1561_v57 = vld [vmem:[%s2115_s1 + $0x1a0] sm:$0xff] }
  0x11   :  { %811 = vmatpush.bf16.msra.mxu3 %v1537_v15  ;;  %v1108_v45 = vor.u32 %v1478_v38, %v1105_v39  ;;  %v1571_v50 = vld [vmem:[%s2115_s1 + $0x1f0] sm:$0xff]  ;;  %v1562_v52 = vld [vmem:[%s2115_s1 + $0x1a8] sm:$0xff]  ;;  %v1545_v58 = vld [vmem:[%s2115_s1 + $0x120] sm:$0xff] }
  0x12   :  { %725 = vmatpush.bf16.msra.mxu0 %v1512_v16  ;;  %v1555_v51 = vld [vmem:[%s2115_s1 + $0x170] sm:$0xff]  ;;  %v1546_v53 = vld [vmem:[%s2115_s1 + $0x128] sm:$0xff]  ;;  %v1489_v59 = vld [vmem:[%s2116_s0 + $0x5c] sm:$0xf0] }
  0x13   :  { %754 = vmatpush.bf16.msra.mxu1 %v1520_v17  ;;  %v1570_v54 = vld [vmem:[%s2115_s1 + $0x1e8] sm:$0xff]  ;;  %v1485_v60 = vld [vmem:[%s2116_s0 + $0x44] sm:$0xf]  ;;  %v1560_v4 = vld [vmem:[%s2115_s1 + $0x198] sm:$0xff]  ;;  %v1128_v6 = vor.u32 %v1489_v59, %v1127_v56 }
  0x14   :  { %783 = vmatpush.bf16.msra.mxu2 %v1528_v18  ;;  %v1554_v55 = vld [vmem:[%s2115_s1 + $0x168] sm:$0xff]  ;;  %v1129_v61 = vld [vmem:[%s2116_s0 + $0x60] sm:$0xf0]  ;;  %v1544_v5 = vld [vmem:[%s2115_s1 + $0x118] sm:$0xff] }
  0x15   :  { %812 = vmatpush.bf16.msra.mxu3 %v1536_v19  ;;  %v1135_v62 = vld [vmem:[%s2116_s0 + $0x48] sm:$0xf]  ;;  %v1486_v0 = vld [vmem:[%s2116_s0 + $0x4c] sm:$0xf]  ;;  %v1569_v2 = vld [vmem:[%s2115_s1 + $0x1e0] sm:$0xff]  ;;  %v1132_v7 = vor.u32 %v1485_v60, %v1129_v61  ;;  %v1600_v19 = vmov 0  }
  0x16   :  { %726 = vmatpush.bf16.msra.mxu0 %v1511_v20  ;;  %v1490_v63 = vld [vmem:[%s2116_s0 + $0x64] sm:$0xf0]  ;;  %v1137_v1 = vld [vmem:[%s2116_s0 + $0x68] sm:$0xf0]  ;;  %v1553_v3 = vld [vmem:[%s2115_s1 + $0x160] sm:$0xff]  ;;  %1597 = vset.pattern.permute.xlu0 %v1600_v19 }
  0x17   :  { %755 = vmatpush.bf16.msra.mxu1 %v1519_v21  ;;  %v1136_v8 = vor.u32 %v1490_v63, %v1135_v62  ;;  %v1140_v9 = vor.u32 %v1486_v0, %v1137_v1  ;;  %v1568_v10 = vld [vmem:[%s2115_s1 + $0x1d8] sm:$0xff]  ;;  %v1559_v12 = vld [vmem:[%s2115_s1 + $0x190] sm:$0xff]  ;;  %v1558_v16 = vld [vmem:[%s2115_s1 + $0x188] sm:$0xff]  ;;  %1598 = vset.pattern.permute.xlu1 %v1600_v19 }
  0x18   :  { %784 = vmatpush.bf16.msra.mxu2 %v1527_v22  ;;  %v1552_v11 = vld [vmem:[%s2115_s1 + $0x158] sm:$0xff]  ;;  %v1543_v13 = vld [vmem:[%s2115_s1 + $0x110] sm:$0xff]  ;;  %v1542_v17 = vld [vmem:[%s2115_s1 + $0x108] sm:$0xff]  ;;  %1599 = vset.pattern.permute.xlu2 %v1600_v19 }
  0x19   :  { %813 = vmatpush.bf16.msra.mxu3 %v1535_v23  ;;  %v1567_v14 = vld [vmem:[%s2115_s1 + $0x1d0] sm:$0xff]  ;;  %v953_v18 = vld [vmem:[%s2117_s2] sm:$0xff]  ;;  %v1566_v20 = vld [vmem:[%s2115_s1 + $0x1c8] sm:$0xff] }
  0x1a   :  { %727 = vmatpush.bf16.msra.mxu0 %v1510_v24  ;;  %v1551_v15 = vld [vmem:[%s2115_s1 + $0x150] sm:$0xff]  ;;  %963 = vperm.xlu0 %1597, %v953_v18   ;;  %v1550_v21 = vld [vmem:[%s2115_s1 + $0x148] sm:$0xff]  ;;  %v1159_v22 = vld [vmem:[%s2116_s0 + $0x80] sm:$0xf] }
  0x1b   :  { %756 = vmatpush.bf16.msra.mxu1 %v1518_v25  ;;  %v1557_v23 = vld [vmem:[%s2115_s1 + $0x180] sm:$0xff]  ;;  %v954_v38 = vld [vmem:[%s2117_s2 + $0x8] sm:$0xff]  ;;  %v955_v39 = vld [vmem:[%s2117_s2 + $0x10] sm:$0xff] }
  0x1c   :  { %785 = vmatpush.bf16.msra.mxu2 %v1526_v26  ;;  %v1541_v24 = vld [vmem:[%s2115_s1 + $0x100] sm:$0xff]  ;;  %973 = vperm.xlu1 %1598, %v955_v39   ;;  %v960_v56 = vld [vmem:[%s2117_s2 + $0x38] sm:$0xff]  ;;  %v1483_v59 = vld [vmem:[%s2116_s0 + $0x2c] sm:$0xf0] }
  0x1d   :  { %814 = vmatpush.bf16.msra.mxu3 %v1534_v27  ;;  %v1497_v25 = vld [vmem:[%s2116_s0 + $0x9c] sm:$0xf0]  ;;  %v1493_v26 = vld [vmem:[%s2116_s0 + $0x84] sm:$0xf]  ;;  %v1479_v60 = vld [vmem:[%s2116_s0 + $0x14] sm:$0xf] }
  0x1e   :  { %728 = vmatpush.bf16.msra.mxu0 %v1509_v28  ;;  %v1161_v27 = vld [vmem:[%s2116_s0 + $0xa0] sm:$0xf0]  ;;  %v1167_v28 = vld [vmem:[%s2116_s0 + $0x88] sm:$0xf]  ;;  %v1160_v34 = vor.u32 %v1497_v25, %v1159_v22  ;;  %v1113_v61 = vld [vmem:[%s2116_s0 + $0x30] sm:$0xf0] }
  0x1f   :  { %757 = vmatpush.bf16.msra.mxu1 %v1517_v29  ;;  %v1498_v29 = vld [vmem:[%s2116_s0 + $0xa4] sm:$0xf0]  ;;  %v1565_v32 = vld [vmem:[%s2115_s1 + $0x1c0] sm:$0xff]  ;;  %v1164_v35 = vor.u32 %v1493_v26, %v1161_v27  ;;  %v1119_v62 = vld [vmem:[%s2116_s0 + $0x18] sm:$0xf] }
  0x20   :  { %786 = vmatpush.bf16.msra.mxu2 %v1525_v30  ;;  %v1494_v30 = vld [vmem:[%s2116_s0 + $0x8c] sm:$0xf]  ;;  %v1549_v33 = vld [vmem:[%s2115_s1 + $0x140] sm:$0xff]  ;;  %v1168_v36 = vor.u32 %v1498_v29, %v1167_v28  ;;  %v1484_v63 = vld [vmem:[%s2116_s0 + $0x34] sm:$0xf0] }
  0x21   :  { %815 = vmatpush.bf16.msra.mxu3 %v1533_v31  ;;  %729 = vmatmul.bf16.vlgmr.msra.gmra.mxu0 %v1096_v42  ;;  %v1169_v31 = vld [vmem:[%s2116_s0 + $0xa8] sm:$0xf0]  ;;  %v1505_v42 = vld [vmem:[%s2116_s0 + $0xdc] sm:$0xf0]  ;;  %v1480_v0 = vld [vmem:[%s2116_s0 + $0x1c] sm:$0xf] }
  0x22   :  { %837 = vmatpush.bf16.msrb.mxu0 %v1548_v41  ;;  %758 = vmatmul.bf16.vlgmr.msra.gmra.mxu1 %v1100_v43  ;;  %v1172_v37 = vor.u32 %v1494_v30, %v1169_v31  ;;  %v1191_v41 = vld [vmem:[%s2116_s0 + $0xc0] sm:$0xf]  ;;  %v1501_v43 = vld [vmem:[%s2116_s0 + $0xc4] sm:$0xf]  ;;  %v1121_v1 = vld [vmem:[%s2116_s0 + $0x38] sm:$0xf0] }
  0x23   :  { %787 = vmatmul.bf16.vlgmr.msra.gmra.mxu2 %v1104_v44  ;;  %866 = vmatpush.bf16.msrb.mxu1 %v1556_v47  ;;  %v1193_v44 = vld [vmem:[%s2116_s0 + $0xe0] sm:$0xf0]  ;;  %v1502_v47 = vld [vmem:[%s2116_s0 + $0xcc] sm:$0xf]  ;;  %v1153_v18 = vld [vmem:[%s2116_s0 + $0x78] sm:$0xf0] }
  0x24   :  { %895 = vmatpush.bf16.msrb.mxu2 %v1564_v40  ;;  %816 = vmatmul.bf16.vlgmr.msra.gmra.mxu3 %v1108_v45  ;;  %v959_v40 = vld [vmem:[%s2117_s2 + $0x30] sm:$0xff]  ;;  %v1199_v45 = vld [vmem:[%s2116_s0 + $0xc8] sm:$0xf]  ;;  %v1183_v27 = vld [vmem:[%s2116_s0 + $0x98] sm:$0xf] }
  0x25   :  { %924 = vmatpush.bf16.msrb.mxu3 %v1572_v46  ;;  %968 = vperm.xlu0 %1597, %v954_v38   ;;  %v1506_v46 = vld [vmem:[%s2116_s0 + $0xe4] sm:$0xf0]  ;;  %v1495_v25 = vld [vmem:[%s2116_s0 + $0x94] sm:$0xf]  ;;  %v1500_v28 = vld [vmem:[%s2116_s0 + $0xb4] sm:$0xf0] }
  0x26   :  { %838 = vmatpush.bf16.msrb.mxu0 %v1547_v49  ;;  %v1192_v49 = vor.u32 %v1505_v42, %v1191_v41  ;;  %v1177_v26 = vld [vmem:[%s2116_s0 + $0xb0] sm:$0xf0]  ;;  %v1496_v29 = vld [vmem:[%s2116_s0 + $0x9c] sm:$0xf]  ;;  %v1507_v38 = vld [vmem:[%s2116_s0 + $0xec] sm:$0xf0] }
  0x27   :  { %867 = vmatpush.bf16.msrb.mxu1 %v1555_v51  ;;  %v1200_v51 = vor.u32 %v1506_v46, %v1199_v45  ;;  %v1185_v30 = vld [vmem:[%s2116_s0 + $0xb8] sm:$0xf0]  ;;  %v1503_v39 = vld [vmem:[%s2116_s0 + $0xd4] sm:$0xf]  ;;  %v1215_v41 = vld [vmem:[%s2116_s0 + $0xd8] sm:$0xf] }
  0x28   :  { %896 = vmatpush.bf16.msrb.mxu2 %v1563_v48  ;;  %v1201_v48 = vld [vmem:[%s2116_s0 + $0xe8] sm:$0xf0]  ;;  %v1508_v42 = vld [vmem:[%s2116_s0 + $0xf4] sm:$0xf0] }
  0x29   :  { %925 = vmatpush.bf16.msrb.mxu3 %v1571_v50  ;;  %v1196_v50 = vor.u32 %v1501_v43, %v1193_v44  ;;  %v1504_v43 = vld [vmem:[%s2116_s0 + $0xdc] sm:$0xf] }
  0x2a   :  { %839 = vmatpush.bf16.msrb.mxu0 %v1546_v53  ;;  %v956_v53 = vld [vmem:[%s2117_s2 + $0x18] sm:$0xff] }
  0x2b   :  { %868 = vmatpush.bf16.msrb.mxu1 %v1554_v55  ;;  %v957_v55 = vld [vmem:[%s2117_s2 + $0x20] sm:$0xff]  ;;  %978 = vperm.xlu1 %1598, %v956_v53   ;;  %v1217_v44 = vld [vmem:[%s2116_s0 + $0xf8] sm:$0xf0] }
  0x2c   :  { %897 = vmatpush.bf16.msrb.mxu2 %v1562_v52  ;;  %v1204_v52 = vor.u32 %v1502_v47, %v1201_v48  ;;  %983 = vperm.xlu2 %1599, %v957_v55   ;;  %v1216_v47 = vor.u32 %v1508_v42, %v1215_v41  ;;  %v1220_v48 = vor.u32 %v1504_v43, %v1217_v44 }
  0x2d   :  { %926 = vmatpush.bf16.msrb.mxu3 %v1570_v54  ;;  %993 = vperm.xlu0 %1597, %v959_v40   ;;  %v1010_v54 = vld [vmem:[%s2118_s3 + $0x8] sm:$0xff]  ;;  %v1209_v40 = vld [vmem:[%s2116_s0 + $0xf0] sm:$0xf0] }
  0x2e   :  { %840 = vmatpush.bf16.msrb.mxu0 %v1545_v58  ;;  %v1111_v58 = vld [vmem:[%s2116_s0 + $0x10] sm:$0xf]  ;;  %v1212_v46 = vor.u32 %v1503_v39, %v1209_v40 }
  0x2f   :  { %869 = vmatpush.bf16.msrb.mxu1 %v1553_v3  ;;  %v1116_v3 = vor.u32 %v1479_v60, %v1113_v61 }
  0x30   :  { %898 = vmatpush.bf16.msrb.mxu2 %v1561_v57  ;;  %v1013_v57 = vld [vmem:[%s2118_s3 + $0x20] sm:$0xff] }
  0x31   :  { %927 = vmatpush.bf16.msrb.mxu3 %v1569_v2  ;;  %734 = vmatmul.bf16.gmra.mxu0 %v1128_v6  ;;  %v1112_v2 = vor.u32 %v1483_v59, %v1111_v58  ;;  %v958_v6 = vld [vmem:[%s2117_s2 + $0x28] sm:$0xff] }
  0x32   :  { %841 = vmatpush.bf16.msrb.mxu0 %v1544_v5  ;;  %763 = vmatmul.bf16.gmra.mxu1 %v1132_v7  ;;  %v1124_v5 = vor.u32 %v1480_v0, %v1121_v1  ;;  %v1011_v7 = vld [vmem:[%s2118_s3 + $0x10] sm:$0xff] }
  0x33   :  { %792 = vmatmul.bf16.gmra.mxu2 %v1136_v8  ;;  %870 = vmatpush.bf16.msrb.mxu1 %v1552_v11  ;;  %v1016_v8 = vld [vmem:[%s2118_s3 + $0x38] sm:$0xff]  ;;  %v1143_v11 = vld [vmem:[%s2116_s0 + $0x50] sm:$0xf] }
  0x34   :  { %899 = vmatpush.bf16.msrb.mxu2 %v1560_v4  ;;  %821 = vmatmul.bf16.gmra.mxu3 %v1140_v9  ;;  %v1120_v4 = vor.u32 %v1484_v63, %v1119_v62  ;;  %v1009_v9 = vld [vmem:[%s2118_s3] sm:$0xff] }
  0x35   :  { %928 = vmatpush.bf16.msrb.mxu3 %v1568_v10  ;;  %1024 = vperm.xlu0 %1597, %v1010_v54   ;;  %v1014_v10 = vld [vmem:[%s2118_s3 + $0x28] sm:$0xff] }
  0x36   :  { %842 = vmatpush.bf16.msrb.mxu0 %v1543_v13  ;;  %998 = vperm.xlu1 %1598, %v960_v56   ;;  %v1487_v13 = vld [vmem:[%s2116_s0 + $0x54] sm:$0xf] }
  0x37   :  { %871 = vmatpush.bf16.msrb.mxu1 %v1551_v15  ;;  %988 = vperm.xlu2 %1599, %v958_v6   ;;  %v1151_v15 = vld [vmem:[%s2116_s0 + $0x58] sm:$0xf] }
  0x38   :  { %900 = vmatpush.bf16.msrb.mxu2 %v1559_v12  ;;  %v1491_v12 = vld [vmem:[%s2116_s0 + $0x6c] sm:$0xf0] }
  0x39   :  { %929 = vmatpush.bf16.msrb.mxu3 %v1567_v14  ;;  %v1145_v14 = vld [vmem:[%s2116_s0 + $0x70] sm:$0xf0]  ;;  %v1144_v19 = vor.u32 %v1491_v12, %v1143_v11 }
  0x3a   :  { %843 = vmatpush.bf16.msrb.mxu0 %v1542_v17  ;;  %v1488_v17 = vld [vmem:[%s2116_s0 + $0x5c] sm:$0xf] }
  0x3b   :  { %872 = vmatpush.bf16.msrb.mxu1 %v1550_v21  ;;  %v1156_v22 = vor.u32 %v1488_v17, %v1153_v18 }
  0x3c   :  { %901 = vmatpush.bf16.msrb.mxu2 %v1558_v16  ;;  %v1492_v16 = vld [vmem:[%s2116_s0 + $0x74] sm:$0xf0] }
  0x3d   :  { %930 = vmatpush.bf16.msrb.mxu3 %v1566_v20  ;;  %1039 = vperm.xlu0 %1597, %v1013_v57   ;;  %v1148_v20 = vor.u32 %v1487_v13, %v1145_v14  ;;  %v1152_v21 = vor.u32 %v1492_v16, %v1151_v15 }
  0x3e   :  { %844 = vmatpush.bf16.msrb.mxu0 %v1541_v24  ;;  %1029 = vperm.xlu1 %1598, %v1011_v7   ;;  %v1499_v24 = vld [vmem:[%s2116_s0 + $0xac] sm:$0xf0] }
  0x3f   :  { %873 = vmatpush.bf16.msrb.mxu1 %v1549_v33  ;;  %1019 = vperm.xlu2 %1599, %v1009_v9   ;;  %v1184_v33 = vor.u32 %v1500_v28, %v1183_v27 }
  0x40   :  { %902 = vmatpush.bf16.msrb.mxu2 %v1557_v23  ;;  %v1175_v23 = vld [vmem:[%s2116_s0 + $0x90] sm:$0xf] }
  0x41   :  { %931 = vmatpush.bf16.msrb.mxu3 %v1565_v32  ;;  %739 = vmatmul.bf16.gmra.mxu0 %v1160_v34  ;;  %v1176_v31 = vor.u32 %v1499_v24, %v1175_v23  ;;  %v1180_v32 = vor.u32 %v1495_v25, %v1177_v26  ;;  %v1188_v34 = vor.u32 %v1496_v29, %v1185_v30 }
  0x42   :  { %768 = vmatmul.bf16.gmra.mxu1 %v1164_v35  ;;  %v1012_v35 = vld [vmem:[%s2118_s3 + $0x18] sm:$0xff] }
  0x43   :  { %797 = vmatmul.bf16.gmra.mxu2 %v1168_v36  ;;  %v1015_v36 = vld [vmem:[%s2118_s3 + $0x30] sm:$0xff] }
  0x44   :  { %826 = vmatmul.bf16.gmra.mxu3 %v1172_v37  ;;  %v1207_v37 = vld [vmem:[%s2116_s0 + $0xd0] sm:$0xf] }
  0x45   :  { %1054 = vperm.xlu0 %1597, %v1016_v8   ;;  %v1208_v45 = vor.u32 %v1507_v38, %v1207_v37 }
  0x46   :  { %1044 = vperm.xlu1 %1598, %v1014_v10  }
  0x47   :  { %1034 = vperm.xlu2 %1599, %v1012_v35  }
  0x4f   :  { %1049 = vperm.xlu2 %1599, %v1015_v36  }
  0x51   :  { %744 = vmatmul.bf16.gmra.mxu0 %v1192_v49 }
  0x52   :  { %773 = vmatmul.bf16.gmra.mxu1 %v1196_v50 }
  0x53   :  { %802 = vmatmul.bf16.gmra.mxu2 %v1200_v51 }
  0x54   :  { %831 = vmatmul.bf16.gmra.mxu3 %v1204_v52 }
  0x61   :  { %845 = vmatmul.bf16.vlgmr.msrb.gmra.mxu0 %v1112_v2 }
  0x62   :  { %874 = vmatmul.bf16.vlgmr.msrb.gmra.mxu1 %v1116_v3 }
  0x63   :  { %903 = vmatmul.bf16.vlgmr.msrb.gmra.mxu2 %v1120_v4 }
  0x64   :  { %932 = vmatmul.bf16.vlgmr.msrb.gmra.mxu3 %v1124_v5 }
  0x71   :  { %850 = vmatmul.bf16.gmra.mxu0 %v1144_v19 }
  0x72   :  { %879 = vmatmul.bf16.gmra.mxu1 %v1148_v20 }
  0x73   :  { %908 = vmatmul.bf16.gmra.mxu2 %v1152_v21 }
  0x74   :  { %937 = vmatmul.bf16.gmra.mxu3 %v1156_v22 }
  0x81   :  { %855 = vmatmul.bf16.gmra.mxu0 %v1176_v31 }
  0x82   :  { %884 = vmatmul.bf16.gmra.mxu1 %v1180_v32 }
  0x83   :  { %913 = vmatmul.bf16.gmra.mxu2 %v1184_v33 }
  0x84   :  { %942 = vmatmul.bf16.gmra.mxu3 %v1188_v34 }
  0x86   :  { %v2076_v28 = vpop.permute.xlu2 %983 }
  0x8c   :  { %v964_v21 = vpop.permute.xlu0 %963 }
  0x8e   :  { %v974_v36 = vpop.permute.xlu1 %973 }
  0x91   :  { %860 = vmatmul.bf16.gmra.mxu0 %v1208_v45  ;;  %v2082_v39 = vpop.permute.xlu2 %988 }
  0x92   :  { %889 = vmatmul.bf16.gmra.mxu1 %v1212_v46 }
  0x93   :  { %918 = vmatmul.bf16.gmra.mxu2 %v1216_v47 }
  0x94   :  { %947 = vmatmul.bf16.gmra.mxu3 %v1220_v48 }
  0x97   :  { %v969_v33 = vpop.permute.xlu0 %968 }
  0x9e   :  { %v730_v49 = vpop.f32.mrf.mxu0 }
  0x9f   :  { %v759_v50 = vpop.f32.mrf.mxu1  ;;  %v2084_v47 = vpop.permute.xlu0 %993 }
  0xa0   :  { %v760_v51 = vadd.f32 %v759_v50, %v730_v49  ;;  %v979_v49 = vpop.permute.xlu1 %978 }
  0xa6   :  { %v788_v52 = vpop.f32.mrf.mxu2  ;;  %v732_v55 = vpop.f32.mrf.mxu0 }
  0xa7   :  { %v817_v53 = vpop.f32.mrf.mxu3  ;;  %v789_v54 = vadd.f32 %v788_v52, %v760_v51  ;;  %v761_v56 = vpop.f32.mrf.mxu1 }
  0xa8   :  { %v762_v34 = vadd.f32 %v761_v56, %v732_v55 }
  0xa9   :  { %v818_v57 = vadd.f32 %v817_v53, %v789_v54 }
  0xae   :  { %v790_v58 = vpop.f32.mrf.mxu2  ;;  %v735_v60 = vpop.f32.mrf.mxu0 }
  0xaf   :  { %v819_v59 = vpop.f32.mrf.mxu3  ;;  %v764_v61 = vpop.f32.mrf.mxu1  ;;  %v791_v37 = vadd.f32 %v790_v58, %v762_v34 }
  0xb0   :  { %v765_v62 = vadd.f32 %v764_v61, %v735_v60 }
  0xb1   :  { %v820_v42 = vadd.f32 %v819_v59, %v791_v37 }
  0xb6   :  { %v793_v63 = vpop.f32.mrf.mxu2  ;;  %v737_v2 = vpop.f32.mrf.mxu0 }
  0xb7   :  { %v822_v0 = vpop.f32.mrf.mxu3  ;;  %v794_v1 = vadd.f32 %v793_v63, %v765_v62  ;;  %v766_v3 = vpop.f32.mrf.mxu1 }
  0xb8   :  { %v767_v58 = vadd.f32 %v766_v3, %v737_v2 }
  0xb9   :  { %v823_v4 = vadd.f32 %v822_v0, %v794_v1  ;;  %v1025_v0 = vpop.permute.xlu0 %1024 }
  0xbe   :  { %v795_v5 = vpop.f32.mrf.mxu2  ;;  %v740_v7 = vpop.f32.mrf.mxu0 }
  0xbf   :  { %v2058_v6 = vpop.f32.mrf.mxu3  ;;  %v769_v8 = vpop.f32.mrf.mxu1  ;;  %v796_v59 = vadd.f32 %v795_v5, %v767_v58 }
  0xc0   :  { %v770_v9 = vadd.f32 %v769_v8, %v740_v7  ;;  %v2086_v8 = vpop.permute.xlu1 %998 }
  0xc6   :  { %v798_v10 = vpop.f32.mrf.mxu2  ;;  %v2060_v13 = vpop.f32.mrf.mxu0 }
  0xc7   :  { %v827_v11 = vpop.f32.mrf.mxu3  ;;  %v799_v12 = vadd.f32 %v798_v10, %v770_v9  ;;  %v2062_v14 = vpop.f32.mrf.mxu1 }
  0xc8   :  { %v772_v34 = vadd.f32 %v2062_v14, %v2060_v13 }
  0xc9   :  { %v2064_v15 = vadd.f32 %v827_v11, %v799_v12  ;;  %v825_v11 = vadd.f32 %v2058_v6, %v796_v59  ;;  %v1030_v6 = vpop.permute.xlu1 %1029 }
  0xce   :  { %v2066_v16 = vpop.f32.mrf.mxu2  ;;  %v745_v18 = vpop.f32.mrf.mxu0 }
  0xcf   :  { %v2068_v17 = vpop.f32.mrf.mxu3  ;;  %v774_v19 = vpop.f32.mrf.mxu1 }
  0xd0   :  { %v775_v20 = vadd.f32 %v774_v19, %v745_v18 }
  0xd6   :  { %v803_v22 = vpop.f32.mrf.mxu2  ;;  %v2070_v25 = vpop.f32.mrf.mxu0 }
  0xd7   :  { %v832_v23 = vpop.f32.mrf.mxu3  ;;  %v804_v24 = vadd.f32 %v803_v22, %v775_v20  ;;  %v2072_v26 = vpop.f32.mrf.mxu1 }
  0xd9   :  { %v2074_v27 = vadd.f32 %v832_v23, %v804_v24 }
  0xde   :  { %v2078_v29 = vpop.f32.mrf.mxu2  ;;  %v846_v31 = vpop.f32.mrf.mxu0 }
  0xdf   :  { %v2080_v30 = vpop.f32.mrf.mxu3  ;;  %v875_v32 = vpop.f32.mrf.mxu1  ;;  %v847_v35 = vadd.f32 %v846_v31, %v818_v57 }
  0xe0   :  { %v1020_v57 = vpop.permute.xlu2 %1019 }
  0xe1   :  { %v876_v38 = vadd.f32 %v875_v32, %v847_v35 }
  0xe6   :  { %v904_v40 = vpop.f32.mrf.mxu2  ;;  %v848_v44 = vpop.f32.mrf.mxu0 }
  0xe7   :  { %v933_v41 = vpop.f32.mrf.mxu3  ;;  %v905_v43 = vadd.f32 %v904_v40, %v876_v38  ;;  %v877_v45 = vpop.f32.mrf.mxu1  ;;  %v849_v46 = vadd.f32 %v848_v44, %v820_v42  ;;  %v801_v38 = vadd.f32 %v2066_v16, %v772_v34 }
  0xe8   :  { %v1035_v42 = vpop.permute.xlu2 %1034 }
  0xe9   :  { %v934_v48 = vadd.f32 %v933_v41, %v905_v43  ;;  %v878_v50 = vadd.f32 %v877_v45, %v849_v46 }
  0xeb   :  { %v1001_v53 = vmul.f32 %v964_v21, %v934_v48 }
  0xed   :  { %v1057_v62 = vadd.f32 %v1020_v57, %v1001_v53 }
  0xee   :  { %v906_v51 = vpop.f32.mrf.mxu2  ;;  %v851_v55 = vpop.f32.mrf.mxu0 }
  0xef   :  { %v935_v52 = vpop.f32.mrf.mxu3  ;;  %v907_v54 = vadd.f32 %v906_v51, %v878_v50  ;;  %v880_v56 = vpop.f32.mrf.mxu1  ;;  %v852_v61 = vadd.f32 %v851_v55, %v823_v4  ;;  %v1065_v12 = vmax.f32 %v1057_v62, 0.0 }
  0xf1   :  { %v936_v60 = vadd.f32 %v935_v52, %v907_v54  ;;  %v881_v7 = vadd.f32 %v880_v56, %v852_v61  ;;  %v1040_v61 = vpop.permute.xlu0 %1039 }
  0xf3   :  { %v1002_v63 = vmul.f32 %v969_v33, %v936_v60 }
  0xf5   :  { %v1058_v1 = vadd.f32 %v1025_v0, %v1002_v63 }
  0xf6   :  { %v909_v9 = vpop.f32.mrf.mxu2  ;;  %v853_v20 = vpop.f32.mrf.mxu0 }
  0xf7   :  { %v938_v10 = vpop.f32.mrf.mxu3  ;;  %v1066_v18 = vmax.f32 %v1058_v1, 0.0  ;;  %v910_v19 = vadd.f32 %v909_v9, %v881_v7  ;;  %v882_v21 = vpop.f32.mrf.mxu1  ;;  %v854_v3 = vadd.f32 %v853_v20, %v825_v11 }
  0xf8   :  { %v1045_v1 = vpop.permute.xlu1 %1044 }
  0xf9   :  { %v1576_v2 = vpack.c.bf16 %v1066_v18, %v1065_v12  ;;  %v939_v4 = vadd.f32 %v938_v10, %v910_v19  ;;  %v883_v5 = vadd.f32 %v882_v21, %v854_v3 }
  0xfb   :  { %1577 = vst [vmem:[%s2119_s4] sm:$0xff] %v1576_v2   ;;  %v1003_v24 = vmul.f32 %v974_v36, %v939_v4  ;;  %v830_v36 = vadd.f32 %v2068_v17, %v801_v38  ;;  %v777_v17 = vadd.f32 %v2072_v26, %v2070_v25 }
  0xfd   :  { %v1059_v40 = vadd.f32 %v1030_v6, %v1003_v24  ;;  %v806_v62 = vadd.f32 %v2078_v29, %v777_v17  ;;  %v1055_v24 = vpop.permute.xlu0 %1054 }
  0xfe   :  { %v911_v22 = vpop.f32.mrf.mxu2  ;;  %v856_v32 = vpop.f32.mrf.mxu0 }
  0xff   :  { %v940_v23 = vpop.f32.mrf.mxu3  ;;  %v912_v31 = vadd.f32 %v911_v22, %v883_v5  ;;  %v885_v33 = vpop.f32.mrf.mxu1  ;;  %v857_v37 = vadd.f32 %v856_v32, %v2064_v15  ;;  %v1067_v48 = vmax.f32 %v1059_v40, 0.0  ;;  %v835_v11 = vadd.f32 %v2080_v30, %v806_v62 }
 0x100   :  { %v1050_v30 = vpop.permute.xlu2 %1049 }
 0x101   :  { %v941_v35 = vadd.f32 %v940_v23, %v912_v31  ;;  %v886_v44 = vadd.f32 %v885_v33, %v857_v37 }
 0x103   :  { %v1004_v41 = vmul.f32 %v979_v49, %v941_v35 }
 0x105   :  { %v1060_v43 = vadd.f32 %v1035_v42, %v1004_v41 }
 0x106   :  { %v914_v45 = vpop.f32.mrf.mxu2  ;;  %v858_v52 = vpop.f32.mrf.mxu0 }
 0x107   :  { %v943_v46 = vpop.f32.mrf.mxu3  ;;  %v1068_v50 = vmax.f32 %v1060_v43, 0.0  ;;  %v915_v51 = vadd.f32 %v914_v45, %v886_v44  ;;  %v887_v53 = vpop.f32.mrf.mxu1  ;;  %v859_v14 = vadd.f32 %v858_v52, %v830_v36 }
 0x109   :  { %v1581_v13 = vpack.c.bf16 %v1068_v50, %v1067_v48  ;;  %v944_v15 = vadd.f32 %v943_v46, %v915_v51  ;;  %v888_v16 = vadd.f32 %v887_v53, %v859_v14 }
 0x10b   :  { %1593 = vst [vmem:[%s2119_s4 + $0x8] sm:$0xff] %v1581_v13   ;;  %v1005_v55 = vmul.f32 %v2076_v28, %v944_v15 }
 0x10d   :  { %v1061_v63 = vadd.f32 %v1040_v61, %v1005_v55 }
 0x10e   :  { %v916_v49 = vpop.f32.mrf.mxu2  ;;  %v861_v57 = vpop.f32.mrf.mxu0 }
 0x10f   :  { %v945_v54 = vpop.f32.mrf.mxu3  ;;  %v917_v56 = vadd.f32 %v916_v49, %v888_v16  ;;  %v862_v60 = vadd.f32 %v861_v57, %v2074_v27  ;;  %v890_v59 = vpop.f32.mrf.mxu1  ;;  %v1069_v12 = vmax.f32 %v1061_v63, 0.0 }
 0x111   :  { %v946_v58 = vadd.f32 %v945_v54, %v917_v56  ;;  %v891_v9 = vadd.f32 %v890_v59, %v862_v60 }
 0x113   :  { %v1006_v0 = vmul.f32 %v2082_v39, %v946_v58 }
 0x115   :  { %v1062_v7 = vadd.f32 %v1045_v1, %v1006_v0 }
 0x116   :  { %v919_v10 = vpop.f32.mrf.mxu2  ;;  %v863_v26 = vpop.f32.mrf.mxu0 }
 0x117   :  { %v948_v28 = vpop.f32.mrf.mxu3  ;;  %v1070_v18 = vmax.f32 %v1062_v7, 0.0  ;;  %v920_v25 = vadd.f32 %v919_v10, %v891_v9  ;;  %v864_v27 = vadd.f32 %v863_v26, %v835_v11  ;;  %v892_v20 = vpop.f32.mrf.mxu1 }
 0x119   :  { %v1586_v19 = vpack.c.bf16 %v1070_v18, %v1069_v12  ;;  %v949_v29 = vadd.f32 %v948_v28, %v920_v25  ;;  %v893_v39 = vadd.f32 %v892_v20, %v864_v27 }
 0x11b   :  { %1594 = vst [vmem:[%s2119_s4 + $0x10] sm:$0xff] %v1586_v19   ;;  %v1007_v2 = vmul.f32 %v2084_v47, %v949_v29 }
 0x11d   :  { %v1063_v22 = vadd.f32 %v1050_v30, %v1007_v2 }
 0x11e   :  { %v921_v21 = vpop.f32.mrf.mxu2 }
 0x11f   :  { %v922_v3 = vadd.f32 %v921_v21, %v893_v39  ;;  %v950_v4 = vpop.f32.mrf.mxu3  ;;  %v1071_v32 = vmax.f32 %v1063_v22, 0.0 }
 0x121   :  { %v951_v5 = vadd.f32 %v950_v4, %v922_v3 }
 0x123   :  { %v1008_v23 = vmul.f32 %v2086_v8, %v951_v5 }
 0x125   :  { %v1064_v31 = vadd.f32 %v1055_v24, %v1008_v23 }
 0x127   :  { %v1072_v33 = vmax.f32 %v1064_v31, 0.0 }
 0x129   :  { %v1591_v6 = vpack.c.bf16 %v1072_v33, %v1071_v32 }
 0x12b   :  { %1595 = vst [vmem:[%s2119_s4 + $0x18] sm:$0xff] %v1591_v6  }

// kernel: ae_forward.16
= control target key start
LH: loop header
LB: loop body
LE: loop exit
PB: predicated region body
PF: predicated region fallthrough
CT: control target
= control target key end

     0   :  { %s1532_s15 = smov 0   ;;  %s1534_s16 = smov 0   ;;  %s1880_s0 = inlined_call_operand.vmem [shape: bf16[8,256], index: 0, kind: input, shape index: {}]   ;;  %s1881_s1 = inlined_call_operand.vmem [shape: bf16[256,2048], index: 1, kind: input, shape index: {}]   ;;  %s1882_s2 = inlined_call_operand.vmem [shape: f32[1,2048], index: 2, kind: input, shape index: {}]   ;;  %s1883_s3 = inlined_call_operand.vmem [shape: f32[1,2048], index: 3, kind: input, shape index: {}]   ;;  %s1884_s4 = inlined_call_operand.vmem [shape: bf16[8,2048], index: 4, kind: output, shape index: {}]  }
   0x1   :  { %s1536_s17 = smov 0   ;;  %s1538_s18 = smov 0  }
   0x2   :  { %s1540_s19 = smov 0  }
   0x3 LB: > { %s26_s20 = sadd.s32 1, %s1501_s18  ;;  %p68_p1 = scmp.ne.s32.totalorder %s1493_s16, %s1489_s15  ;;  %s1505_s19 = sphi %s1540_s19, %s14_s19   ;;  %s1501_s18 = sphi %s1538_s18, %s1888_s18   ;;  %s1497_s17 = sphi %s1536_s17, %s1887_s17   ;;  %s1493_s16 = sphi %s1534_s16, %s1886_s16   ;;  %s1489_s15 = sphi %s1532_s15, %s1885_s15  }
   0x4   : > { %p28_p0 = scmp.ge.s32.totalorder %s26_s20, 4  ;;  %p69_p2 = scmp.eq.s32.totalorder %s1505_s19, 0 }
   0x5   : > { %s61_s22 = sadd.s32 1, %s1493_s16  ;;  %p1094_p5 = scmp.ge.s32.totalorder %s1505_s19, 4 }
   0x6   : > { %s1890_s20 = smov (%p28_p0, %s26_s20), 0  ;;  %p70_p3 = por %p69_p2, %p68_p1 }
   0x7   : > { %s57_s21 = ssub.s32 %s1501_s18, %s1890_s20  ;;  %181 = sbr.rel (%p1094_p5) target bundleno = 80 (0x50), region = 20 }
   0x8   : > { %p59_p4 = scmp.eq.s32.totalorder %s57_s21, 0 }
   0xa   : > { %s1567_s23 = scalar_select %p59_p4, %s1493_s16, %s61_s22  }
   0xc   : > { %184 = sbr.rel (!%p70_p3) target bundleno = 80 (0x50), region = 24  ;;  %s186_s24 = sand.u32 (%p70_p3), 1, %s1493_s16  }
   0xd   : > { %s1362_s25 = sshll.u32 (%p70_p3), %s1501_s18, 4  ;;  %s1095_s26 = sshll.u32 (%p70_p3), %s186_s24, 9 }
   0xe   : > { %s1575_s29 = scalar_lea.vmem (%p70_p3), %s1881_s1, %s1362_s25  ;;  %s1580_s30 = scalar_lea.vmem (%p70_p3), [#allocation3], %s1095_s26 }
   0xf   : > { %v207_v0 = vld [vmem:[%s1575_s29] sm:$0xff] (%p70_p3)  ;;  %v209_v1 = vld [vmem:[%s1575_s29 + $0x8] sm:$0xff] (%p70_p3) }
  0x10   : > { %v211_v2 = vld [vmem:[%s1575_s29 + $0x40] sm:$0xff] (%p70_p3)  ;;  %208 = vst [vmem:[%s1580_s30] sm:$0xff] (%p70_p3), %v207_v0  ;;  %v213_v3 = vld [vmem:[%s1575_s29 + $0x48] sm:$0xff] (%p70_p3) }
  0x11   : > { %210 = vst [vmem:[%s1580_s30 + $0x8] sm:$0xff] %v209_v1  ;;  %v215_v4 = vld [vmem:[%s1575_s29 + $0x80] sm:$0xff]  ;;  %v217_v5 = vld [vmem:[%s1575_s29 + $0x88] sm:$0xff] }
  0x12   : > { %212 = vst [vmem:[%s1580_s30 + $0x10] sm:$0xff] %v211_v2  ;;  %v219_v6 = vld [vmem:[%s1575_s29 + $0xc0] sm:$0xff]  ;;  %v221_v7 = vld [vmem:[%s1575_s29 + $0xc8] sm:$0xff] }
  0x13   : > { %214 = vst [vmem:[%s1580_s30 + $0x18] sm:$0xff] %v213_v3  ;;  %v223_v8 = vld [vmem:[%s1575_s29 + $0x100] sm:$0xff]  ;;  %v225_v9 = vld [vmem:[%s1575_s29 + $0x108] sm:$0xff] }
  0x14   : > { %216 = vst [vmem:[%s1580_s30 + $0x20] sm:$0xff] %v215_v4  ;;  %v227_v10 = vld [vmem:[%s1575_s29 + $0x140] sm:$0xff]  ;;  %v229_v11 = vld [vmem:[%s1575_s29 + $0x148] sm:$0xff] }
  0x15   : > { %218 = vst [vmem:[%s1580_s30 + $0x28] sm:$0xff] %v217_v5  ;;  %v231_v12 = vld [vmem:[%s1575_s29 + $0x180] sm:$0xff]  ;;  %v233_v13 = vld [vmem:[%s1575_s29 + $0x188] sm:$0xff] }
  0x16   : > { %220 = vst [vmem:[%s1580_s30 + $0x30] sm:$0xff] %v219_v6  ;;  %v235_v14 = vld [vmem:[%s1575_s29 + $0x1c0] sm:$0xff]  ;;  %v237_v15 = vld [vmem:[%s1575_s29 + $0x1c8] sm:$0xff] }
  0x17   : > { %222 = vst [vmem:[%s1580_s30 + $0x38] sm:$0xff] %v221_v7  ;;  %v239_v16 = vld [vmem:[%s1575_s29 + $0x200] sm:$0xff]  ;;  %v241_v17 = vld [vmem:[%s1575_s29 + $0x208] sm:$0xff] }
  0x18   : > { %224 = vst [vmem:[%s1580_s30 + $0x40] sm:$0xff] %v223_v8  ;;  %v243_v18 = vld [vmem:[%s1575_s29 + $0x240] sm:$0xff]  ;;  %v245_v19 = vld [vmem:[%s1575_s29 + $0x248] sm:$0xff] }
  0x19   : > { %226 = vst [vmem:[%s1580_s30 + $0x48] sm:$0xff] %v225_v9  ;;  %v247_v20 = vld [vmem:[%s1575_s29 + $0x280] sm:$0xff]  ;;  %v249_v21 = vld [vmem:[%s1575_s29 + $0x288] sm:$0xff] }
  0x1a   : > { %228 = vst [vmem:[%s1580_s30 + $0x50] sm:$0xff] %v227_v10  ;;  %v251_v22 = vld [vmem:[%s1575_s29 + $0x2c0] sm:$0xff]  ;;  %v253_v23 = vld [vmem:[%s1575_s29 + $0x2c8] sm:$0xff] }
  0x1b   : > { %230 = vst [vmem:[%s1580_s30 + $0x58] sm:$0xff] %v229_v11  ;;  %v255_v24 = vld [vmem:[%s1575_s29 + $0x300] sm:$0xff]  ;;  %v257_v25 = vld [vmem:[%s1575_s29 + $0x308] sm:$0xff] }
  0x1c   : > { %232 = vst [vmem:[%s1580_s30 + $0x60] sm:$0xff] %v231_v12  ;;  %v259_v26 = vld [vmem:[%s1575_s29 + $0x340] sm:$0xff]  ;;  %v261_v27 = vld [vmem:[%s1575_s29 + $0x348] sm:$0xff] }
  0x1d   : > { %234 = vst [vmem:[%s1580_s30 + $0x68] sm:$0xff] %v233_v13  ;;  %v263_v28 = vld [vmem:[%s1575_s29 + $0x380] sm:$0xff]  ;;  %v265_v29 = vld [vmem:[%s1575_s29 + $0x388] sm:$0xff] }
  0x1e   : > { %236 = vst [vmem:[%s1580_s30 + $0x70] sm:$0xff] %v235_v14  ;;  %v267_v30 = vld [vmem:[%s1575_s29 + $0x3c0] sm:$0xff]  ;;  %v269_v31 = vld [vmem:[%s1575_s29 + $0x3c8] sm:$0xff] }
  0x1f   : > { %238 = vst [vmem:[%s1580_s30 + $0x78] sm:$0xff] %v237_v15  ;;  %v271_v32 = vld [vmem:[%s1575_s29 + $0x400] sm:$0xff]  ;;  %v273_v33 = vld [vmem:[%s1575_s29 + $0x408] sm:$0xff] }
  0x20   : > { %240 = vst [vmem:[%s1580_s30 + $0x80] sm:$0xff] %v239_v16  ;;  %v275_v34 = vld [vmem:[%s1575_s29 + $0x440] sm:$0xff]  ;;  %v277_v35 = vld [vmem:[%s1575_s29 + $0x448] sm:$0xff] }
  0x21   : > { %242 = vst [vmem:[%s1580_s30 + $0x88] sm:$0xff] %v241_v17  ;;  %v279_v36 = vld [vmem:[%s1575_s29 + $0x480] sm:$0xff]  ;;  %v281_v37 = vld [vmem:[%s1575_s29 + $0x488] sm:$0xff] }
  0x22   : > { %244 = vst [vmem:[%s1580_s30 + $0x90] sm:$0xff] %v243_v18  ;;  %v283_v38 = vld [vmem:[%s1575_s29 + $0x4c0] sm:$0xff]  ;;  %v285_v39 = vld [vmem:[%s1575_s29 + $0x4c8] sm:$0xff] }
  0x23   : > { %246 = vst [vmem:[%s1580_s30 + $0x98] sm:$0xff] %v245_v19  ;;  %v287_v40 = vld [vmem:[%s1575_s29 + $0x500] sm:$0xff]  ;;  %v289_v41 = vld [vmem:[%s1575_s29 + $0x508] sm:$0xff] }
  0x24   : > { %248 = vst [vmem:[%s1580_s30 + $0xa0] sm:$0xff] %v247_v20  ;;  %v291_v42 = vld [vmem:[%s1575_s29 + $0x540] sm:$0xff]  ;;  %v293_v43 = vld [vmem:[%s1575_s29 + $0x548] sm:$0xff] }
  0x25   : > { %250 = vst [vmem:[%s1580_s30 + $0xa8] sm:$0xff] %v249_v21  ;;  %v295_v44 = vld [vmem:[%s1575_s29 + $0x580] sm:$0xff]  ;;  %v297_v45 = vld [vmem:[%s1575_s29 + $0x588] sm:$0xff] }
  0x26   : > { %252 = vst [vmem:[%s1580_s30 + $0xb0] sm:$0xff] %v251_v22  ;;  %v299_v46 = vld [vmem:[%s1575_s29 + $0x5c0] sm:$0xff]  ;;  %v301_v47 = vld [vmem:[%s1575_s29 + $0x5c8] sm:$0xff] }
  0x27   : > { %254 = vst [vmem:[%s1580_s30 + $0xb8] sm:$0xff] %v253_v23  ;;  %v303_v48 = vld [vmem:[%s1575_s29 + $0x600] sm:$0xff]  ;;  %v305_v49 = vld [vmem:[%s1575_s29 + $0x608] sm:$0xff] }
  0x28   : > { %256 = vst [vmem:[%s1580_s30 + $0xc0] sm:$0xff] %v255_v24  ;;  %v307_v50 = vld [vmem:[%s1575_s29 + $0x640] sm:$0xff]  ;;  %v309_v51 = vld [vmem:[%s1575_s29 + $0x648] sm:$0xff] }
  0x29   : > { %258 = vst [vmem:[%s1580_s30 + $0xc8] sm:$0xff] %v257_v25  ;;  %v311_v52 = vld [vmem:[%s1575_s29 + $0x680] sm:$0xff]  ;;  %v313_v53 = vld [vmem:[%s1575_s29 + $0x688] sm:$0xff] }
  0x2a   : > { %260 = vst [vmem:[%s1580_s30 + $0xd0] sm:$0xff] %v259_v26  ;;  %v315_v54 = vld [vmem:[%s1575_s29 + $0x6c0] sm:$0xff]  ;;  %v317_v55 = vld [vmem:[%s1575_s29 + $0x6c8] sm:$0xff] }
  0x2b   : > { %262 = vst [vmem:[%s1580_s30 + $0xd8] sm:$0xff] %v261_v27  ;;  %v319_v56 = vld [vmem:[%s1575_s29 + $0x700] sm:$0xff]  ;;  %v321_v57 = vld [vmem:[%s1575_s29 + $0x708] sm:$0xff] }
  0x2c   : > { %264 = vst [vmem:[%s1580_s30 + $0xe0] sm:$0xff] %v263_v28  ;;  %v323_v58 = vld [vmem:[%s1575_s29 + $0x740] sm:$0xff]  ;;  %v325_v59 = vld [vmem:[%s1575_s29 + $0x748] sm:$0xff] }
  0x2d   : > { %266 = vst [vmem:[%s1580_s30 + $0xe8] sm:$0xff] %v265_v29  ;;  %v327_v60 = vld [vmem:[%s1575_s29 + $0x780] sm:$0xff]  ;;  %v329_v61 = vld [vmem:[%s1575_s29 + $0x788] sm:$0xff] }
  0x2e   : > { %268 = vst [vmem:[%s1580_s30 + $0xf0] sm:$0xff] %v267_v30  ;;  %v331_v62 = vld [vmem:[%s1575_s29 + $0x7c0] sm:$0xff]  ;;  %v333_v63 = vld [vmem:[%s1575_s29 + $0x7c8] sm:$0xff] }
  0x2f   : > { %270 = vst [vmem:[%s1580_s30 + $0xf8] sm:$0xff] %v269_v31 }
  0x30   : > { %272 = vst [vmem:[%s1580_s30 + $0x100] sm:$0xff] %v271_v32 }
  0x31   : > { %274 = vst [vmem:[%s1580_s30 + $0x108] sm:$0xff] %v273_v33 }
  0x32   : > { %276 = vst [vmem:[%s1580_s30 + $0x110] sm:$0xff] %v275_v34 }
  0x33   : > { %278 = vst [vmem:[%s1580_s30 + $0x118] sm:$0xff] %v277_v35 }
  0x34   : > { %280 = vst [vmem:[%s1580_s30 + $0x120] sm:$0xff] %v279_v36 }
  0x35   : > { %282 = vst [vmem:[%s1580_s30 + $0x128] sm:$0xff] %v281_v37 }
  0x36   : > { %284 = vst [vmem:[%s1580_s30 + $0x130] sm:$0xff] %v283_v38 }
  0x37   : > { %286 = vst [vmem:[%s1580_s30 + $0x138] sm:$0xff] %v285_v39 }
  0x38   : > { %288 = vst [vmem:[%s1580_s30 + $0x140] sm:$0xff] %v287_v40 }
  0x39   : > { %290 = vst [vmem:[%s1580_s30 + $0x148] sm:$0xff] %v289_v41 }
  0x3a   : > { %292 = vst [vmem:[%s1580_s30 + $0x150] sm:$0xff] %v291_v42 }
  0x3b   : > { %294 = vst [vmem:[%s1580_s30 + $0x158] sm:$0xff] %v293_v43 }
  0x3c   : > { %296 = vst [vmem:[%s1580_s30 + $0x160] sm:$0xff] %v295_v44 }
  0x3d   : > { %298 = vst [vmem:[%s1580_s30 + $0x168] sm:$0xff] %v297_v45 }
  0x3e   : > { %300 = vst [vmem:[%s1580_s30 + $0x170] sm:$0xff] %v299_v46 }
  0x3f   : > { %302 = vst [vmem:[%s1580_s30 + $0x178] sm:$0xff] %v301_v47 }
  0x40   : > { %304 = vst [vmem:[%s1580_s30 + $0x180] sm:$0xff] %v303_v48 }
  0x41   : > { %306 = vst [vmem:[%s1580_s30 + $0x188] sm:$0xff] %v305_v49 }
  0x42   : > { %308 = vst [vmem:[%s1580_s30 + $0x190] sm:$0xff] %v307_v50 }
  0x43   : > { %310 = vst [vmem:[%s1580_s30 + $0x198] sm:$0xff] %v309_v51 }
  0x44   : > { %312 = vst [vmem:[%s1580_s30 + $0x1a0] sm:$0xff] %v311_v52 }
  0x45   : > { %314 = vst [vmem:[%s1580_s30 + $0x1a8] sm:$0xff] %v313_v53 }
  0x46   : > { %316 = vst [vmem:[%s1580_s30 + $0x1b0] sm:$0xff] %v315_v54 }
  0x47   : > { %318 = vst [vmem:[%s1580_s30 + $0x1b8] sm:$0xff] %v317_v55 }
  0x48   : > { %320 = vst [vmem:[%s1580_s30 + $0x1c0] sm:$0xff] %v319_v56 }
  0x49   : > { %322 = vst [vmem:[%s1580_s30 + $0x1c8] sm:$0xff] %v321_v57 }
  0x4a   : > { %324 = vst [vmem:[%s1580_s30 + $0x1d0] sm:$0xff] %v323_v58 }
  0x4b   : > { %326 = vst [vmem:[%s1580_s30 + $0x1d8] sm:$0xff] %v325_v59 }
  0x4c   : > { %328 = vst [vmem:[%s1580_s30 + $0x1e0] sm:$0xff] %v327_v60 }
  0x4d   : > { %330 = vst [vmem:[%s1580_s30 + $0x1e8] sm:$0xff] %v329_v61 }
  0x4e   : > { %332 = vst [vmem:[%s1580_s30 + $0x1f0] sm:$0xff] %v331_v62 }
  0x4f   : > { %334 = vst [vmem:[%s1580_s30 + $0x1f8] sm:$0xff] %v333_v63 }
  0x50 PF: > { %p1098_p6 = scmp.ge.s32.totalorder %s1505_s19, 1  ;;  %p355_p7 = scmp.lt.s32.totalorder %s1505_s19, 5 }
  0x52   : > { %p356_p8 = pnand %p1098_p6, %p355_p7 }
  0x53   : > { %s362_s5 = sand.u32 (!%p356_p8), 1, %s1489_s15   ;;  %s1100_s10 = sshll.u32 (!%p356_p8), %s1497_s17, 2 }
  0x54   : > { %359 = sbr.rel (%p356_p8) target bundleno = 300 (0x12c), region = 55  ;;  %s1099_s6 = sshll.u32 (!%p356_p8), %s362_s5, 9 }
  0x55   : > { %s1710_s7 = scalar_lea.vmem (!%p356_p8), [#allocation3], %s1099_s6  ;;  %p409_p9 = scmp.lt.s32.totalorder (!%p356_p8), %s1100_s10, 15 }
  0x59   : > { %v1218_v0 = vld [vmem:[%s1710_s7 + $0xe0] sm:$0xf]  ;;  %v1393_v1 = vld [vmem:[%s1710_s7 + $0xec] sm:$0xf0]  ;;  %v1391_v5 = vld [vmem:[%s1710_s7 + $0xe4] sm:$0xf] }
  0x5a   : > { %v1346_v2 = vld [vmem:[%s1710_s7 + $0x1e0] sm:$0xf]  ;;  %v1219_v3 = vor.u32 %v1393_v1, %v1218_v0  ;;  %v1425_v4 = vld [vmem:[%s1710_s7 + $0x1ec] sm:$0xf0]  ;;  %v1220_v6 = vld [vmem:[%s1710_s7 + $0xf0] sm:$0xf0] }
  0x5b   : > { %v1347_v7 = vor.u32 %v1425_v4, %v1346_v2  ;;  %v1223_v8 = vor.u32 %v1391_v5, %v1220_v6  ;;  %v1423_v9 = vld [vmem:[%s1710_s7 + $0x1e4] sm:$0xf]  ;;  %v1348_v10 = vld [vmem:[%s1710_s7 + $0x1f0] sm:$0xf0]  ;;  %v1202_v11 = vld [vmem:[%s1710_s7 + $0xc0] sm:$0xf] }
  0x5c   : > { %828 = vmatpush.bf16.msra.mxu0 %v1219_v3  ;;  %v1351_v12 = vor.u32 %v1423_v9, %v1348_v10  ;;  %v1389_v13 = vld [vmem:[%s1710_s7 + $0xcc] sm:$0xf0]  ;;  %v1330_v14 = vld [vmem:[%s1710_s7 + $0x1c0] sm:$0xf]  ;;  %v1387_v18 = vld [vmem:[%s1710_s7 + $0xc4] sm:$0xf] }
  0x5d   : > { %v1421_v15 = vld [vmem:[%s1710_s7 + $0x1cc] sm:$0xf0]  ;;  %841 = vmatpush.bf16.msra.mxu1 %v1347_v7  ;;  %854 = vmatpush.bf16.msra.mxu2 %v1223_v8  ;;  %v1203_v16 = vor.u32 %v1389_v13, %v1202_v11  ;;  %v1204_v19 = vld [vmem:[%s1710_s7 + $0xd0] sm:$0xf0]  ;;  %v1419_v20 = vld [vmem:[%s1710_s7 + $0x1c4] sm:$0xf] }
  0x5e   : > { %v1331_v17 = vor.u32 %v1421_v15, %v1330_v14  ;;  %867 = vmatpush.bf16.msra.mxu3 %v1351_v12  ;;  %v1207_v21 = vor.u32 %v1387_v18, %v1204_v19  ;;  %v1332_v22 = vld [vmem:[%s1710_s7 + $0x1d0] sm:$0xf0]  ;;  %v1186_v23 = vld [vmem:[%s1710_s7 + $0xa0] sm:$0xf]  ;;  %v1385_v24 = vld [vmem:[%s1710_s7 + $0xac] sm:$0xf0] }
  0x5f   : > { %v1335_v25 = vor.u32 %v1419_v20, %v1332_v22  ;;  %v1314_v26 = vld [vmem:[%s1710_s7 + $0x1a0] sm:$0xf]  ;;  %v1417_v27 = vld [vmem:[%s1710_s7 + $0x1ac] sm:$0xf0]  ;;  %v1383_v28 = vld [vmem:[%s1710_s7 + $0xa4] sm:$0xf]  ;;  %v1187_v29 = vor.u32 %v1385_v24, %v1186_v23 }
  0x60   : > { %829 = vmatpush.bf16.msra.mxu0 %v1203_v16  ;;  %v1188_v30 = vld [vmem:[%s1710_s7 + $0xb0] sm:$0xf0]  ;;  %v1415_v31 = vld [vmem:[%s1710_s7 + $0x1a4] sm:$0xf]  ;;  %v1315_v33 = vor.u32 %v1417_v27, %v1314_v26  ;;  %v1170_v35 = vld [vmem:[%s1710_s7 + $0x80] sm:$0xf] }
  0x61   : > { %v1316_v32 = vld [vmem:[%s1710_s7 + $0x1b0] sm:$0xf0]  ;;  %842 = vmatpush.bf16.msra.mxu1 %v1331_v17  ;;  %855 = vmatpush.bf16.msra.mxu2 %v1207_v21  ;;  %v1191_v34 = vor.u32 %v1383_v28, %v1188_v30  ;;  %v1381_v36 = vld [vmem:[%s1710_s7 + $0x8c] sm:$0xf0]  ;;  %v1298_v37 = vld [vmem:[%s1710_s7 + $0x180] sm:$0xf] }
  0x62   : > { %868 = vmatpush.bf16.msra.mxu3 %v1335_v25  ;;  %v1319_v38 = vor.u32 %v1415_v31, %v1316_v32  ;;  %v1413_v39 = vld [vmem:[%s1710_s7 + $0x18c] sm:$0xf0]  ;;  %v1379_v40 = vld [vmem:[%s1710_s7 + $0x84] sm:$0xf]  ;;  %v1172_v41 = vld [vmem:[%s1710_s7 + $0x90] sm:$0xf0]  ;;  %v1171_v44 = vor.u32 %v1381_v36, %v1170_v35 }
  0x63   : > { %v1411_v42 = vld [vmem:[%s1710_s7 + $0x184] sm:$0xf]  ;;  %v1300_v43 = vld [vmem:[%s1710_s7 + $0x190] sm:$0xf0]  ;;  %v1299_v45 = vor.u32 %v1413_v39, %v1298_v37  ;;  %v1175_v46 = vor.u32 %v1379_v40, %v1172_v41  ;;  %v1154_v47 = vld [vmem:[%s1710_s7 + $0x60] sm:$0xf] }
  0x64   : > { %830 = vmatpush.bf16.msra.mxu0 %v1187_v29  ;;  %v1377_v48 = vld [vmem:[%s1710_s7 + $0x6c] sm:$0xf0]  ;;  %v1282_v49 = vld [vmem:[%s1710_s7 + $0x160] sm:$0xf]  ;;  %v1303_v50 = vor.u32 %v1411_v42, %v1300_v43  ;;  %v1375_v52 = vld [vmem:[%s1710_s7 + $0x64] sm:$0xf] }
  0x65   : > { %843 = vmatpush.bf16.msra.mxu1 %v1315_v33  ;;  %856 = vmatpush.bf16.msra.mxu2 %v1191_v34  ;;  %v1409_v51 = vld [vmem:[%s1710_s7 + $0x16c] sm:$0xf0]  ;;  %v1156_v53 = vld [vmem:[%s1710_s7 + $0x70] sm:$0xf0]  ;;  %v1407_v54 = vld [vmem:[%s1710_s7 + $0x164] sm:$0xf]  ;;  %v1155_v56 = vor.u32 %v1377_v48, %v1154_v47 }
  0x66   : > { %869 = vmatpush.bf16.msra.mxu3 %v1319_v38  ;;  %v1284_v55 = vld [vmem:[%s1710_s7 + $0x170] sm:$0xf0]  ;;  %v1283_v57 = vor.u32 %v1409_v51, %v1282_v49  ;;  %v1159_v58 = vor.u32 %v1375_v52, %v1156_v53  ;;  %v1138_v59 = vld [vmem:[%s1710_s7 + $0x40] sm:$0xf]  ;;  %v1373_v60 = vld [vmem:[%s1710_s7 + $0x4c] sm:$0xf0] }
  0x67   : > { %v1266_v61 = vld [vmem:[%s1710_s7 + $0x140] sm:$0xf]  ;;  %v1287_v62 = vor.u32 %v1407_v54, %v1284_v55  ;;  %v1405_v63 = vld [vmem:[%s1710_s7 + $0x14c] sm:$0xf0]  ;;  %v1371_v0 = vld [vmem:[%s1710_s7 + $0x44] sm:$0xf]  ;;  %v1139_v4 = vor.u32 %v1373_v60, %v1138_v59 }
  0x68   : > { %831 = vmatpush.bf16.msra.mxu0 %v1171_v44  ;;  %v1140_v1 = vld [vmem:[%s1710_s7 + $0x50] sm:$0xf0]  ;;  %v1403_v2 = vld [vmem:[%s1710_s7 + $0x144] sm:$0xf]  ;;  %v1267_v5 = vor.u32 %v1405_v63, %v1266_v61  ;;  %v1122_v7 = vld [vmem:[%s1710_s7 + $0x20] sm:$0xf] }
  0x69   : > { %844 = vmatpush.bf16.msra.mxu1 %v1299_v45  ;;  %857 = vmatpush.bf16.msra.mxu2 %v1175_v46  ;;  %v1268_v3 = vld [vmem:[%s1710_s7 + $0x150] sm:$0xf0]  ;;  %v1143_v6 = vor.u32 %v1371_v0, %v1140_v1  ;;  %v1369_v8 = vld [vmem:[%s1710_s7 + $0x2c] sm:$0xf0]  ;;  %v1250_v9 = vld [vmem:[%s1710_s7 + $0x120] sm:$0xf] }
  0x6a   : > { %870 = vmatpush.bf16.msra.mxu3 %v1303_v50  ;;  %v1271_v10 = vor.u32 %v1403_v2, %v1268_v3  ;;  %v1401_v11 = vld [vmem:[%s1710_s7 + $0x12c] sm:$0xf0]  ;;  %v1367_v12 = vld [vmem:[%s1710_s7 + $0x24] sm:$0xf]  ;;  %v1124_v13 = vld [vmem:[%s1710_s7 + $0x30] sm:$0xf0]  ;;  %v1123_v16 = vor.u32 %v1369_v8, %v1122_v7 }
  0x6b   : > { %v1399_v14 = vld [vmem:[%s1710_s7 + $0x124] sm:$0xf]  ;;  %v1252_v15 = vld [vmem:[%s1710_s7 + $0x130] sm:$0xf0]  ;;  %v1106_v17 = vld [vmem:[%s1710_s7] sm:$0xf]  ;;  %v1251_v20 = vor.u32 %v1401_v11, %v1250_v9  ;;  %v1127_v21 = vor.u32 %v1367_v12, %v1124_v13 }
  0x6c   : > { %832 = vmatpush.bf16.msra.mxu0 %v1155_v56  ;;  %v1365_v18 = vld [vmem:[%s1710_s7 + $0xc] sm:$0xf0]  ;;  %v1234_v19 = vld [vmem:[%s1710_s7 + $0x100] sm:$0xf]  ;;  %v1363_v23 = vld [vmem:[%s1710_s7 + $0x4] sm:$0xf]  ;;  %v1255_v25 = vor.u32 %v1399_v14, %v1252_v15 }
  0x6d   : > { %845 = vmatpush.bf16.msra.mxu1 %v1283_v57  ;;  %858 = vmatpush.bf16.msra.mxu2 %v1159_v58  ;;  %v1397_v22 = vld [vmem:[%s1710_s7 + $0x10c] sm:$0xf0]  ;;  %v1108_v24 = vld [vmem:[%s1710_s7 + $0x10] sm:$0xf0]  ;;  %v1395_v26 = vld [vmem:[%s1710_s7 + $0x104] sm:$0xf]  ;;  %v1107_v32 = vor.u32 %v1365_v18, %v1106_v17 }
  0x6e   : > { %871 = vmatpush.bf16.msra.mxu3 %v1287_v62  ;;  %v1236_v27 = vld [vmem:[%s1710_s7 + $0x110] sm:$0xf0]  ;;  %v1226_v28 = vld [vmem:[%s1710_s7 + $0xe8] sm:$0xf]  ;;  %v1394_v29 = vld [vmem:[%s1710_s7 + $0xf4] sm:$0xf0]  ;;  %v1235_v37 = vor.u32 %v1397_v22, %v1234_v19  ;;  %v1111_v38 = vor.u32 %v1363_v23, %v1108_v24 }
  0x6f   : > { %v1354_v30 = vld [vmem:[%s1710_s7 + $0x1e8] sm:$0xf]  ;;  %v436_v31 = vld [vmem:[%s1880_s0] sm:$0xff]  ;;  %v1426_v33 = vld [vmem:[%s1710_s7 + $0x1f4] sm:$0xf0]  ;;  %v1239_v42 = vor.u32 %v1395_v26, %v1236_v27  ;;  %v1227_v43 = vor.u32 %v1394_v29, %v1226_v28  ;;  %s1892_s10 = smov (!%p409_p9, %s1100_s10), 15 }
  0x70   : > { %833 = vmatpush.bf16.msra.mxu0 %v1139_v4  ;;  %v1392_v34 = vld [vmem:[%s1710_s7 + $0xec] sm:$0xf]  ;;  %v1228_v35 = vld [vmem:[%s1710_s7 + $0xf8] sm:$0xf0]  ;;  %v502_v36 = vunpack.c.l.b16 %v436_v31  ;;  %v503_v41 = vunpack.c.h.b16 %v436_v31  ;;  %v1355_v44 = vor.u32 %v1426_v33, %v1354_v30  ;;  %v1210_v46 = vld [vmem:[%s1710_s7 + $0xc8] sm:$0xf]  ;;  %s411_s13 = scalar_lea.vmem %s1882_s2, %s1892_s10  ;;  %s416_s21 = scalar_lea.vmem %s1883_s3, %s1892_s10 }
  0x71   : > { %846 = vmatpush.bf16.msra.mxu1 %v1267_v5  ;;  %859 = vmatpush.bf16.msra.mxu2 %v1143_v6  ;;  %v1424_v39 = vld [vmem:[%s1710_s7 + $0x1ec] sm:$0xf]  ;;  %v1356_v40 = vld [vmem:[%s1710_s7 + $0x1f8] sm:$0xf0]  ;;  %v1231_v45 = vor.u32 %v1392_v34, %v1228_v35  ;;  %v1390_v47 = vld [vmem:[%s1710_s7 + $0xd4] sm:$0xf0] }
  0x72   : > { %872 = vmatpush.bf16.msra.mxu3 %v1271_v10  ;;  %v1338_v48 = vld [vmem:[%s1710_s7 + $0x1c8] sm:$0xf]  ;;  %v1359_v49 = vor.u32 %v1424_v39, %v1356_v40  ;;  %v1422_v50 = vld [vmem:[%s1710_s7 + $0x1d4] sm:$0xf0]  ;;  %v1388_v51 = vld [vmem:[%s1710_s7 + $0xcc] sm:$0xf]  ;;  %v1793_v53 = vpack.c.b16 %v502_v36, %v502_v36  ;;  %v1797_v56 = vpack.c.b16 %v503_v41, %v503_v41  ;;  %v1211_v57 = vor.u32 %v1390_v47, %v1210_v46 }
  0x73   : > { %v1212_v52 = vld [vmem:[%s1710_s7 + $0xd8] sm:$0xf0]  ;;  %v1420_v54 = vld [vmem:[%s1710_s7 + $0x1cc] sm:$0xf]  ;;  %v1339_v58 = vor.u32 %v1422_v50, %v1338_v48  ;;  %v1194_v60 = vld [vmem:[%s1710_s7 + $0xa8] sm:$0xf] }
  0x74   : > { %834 = vmatpush.bf16.msra.mxu0 %v1123_v16  ;;  %v1340_v55 = vld [vmem:[%s1710_s7 + $0x1d8] sm:$0xf0]  ;;  %v1215_v59 = vor.u32 %v1388_v51, %v1212_v52  ;;  %v1386_v61 = vld [vmem:[%s1710_s7 + $0xb4] sm:$0xf0]  ;;  %v1322_v62 = vld [vmem:[%s1710_s7 + $0x1a8] sm:$0xf] }
  0x75   : > { %847 = vmatpush.bf16.msra.mxu1 %v1251_v20  ;;  %860 = vmatpush.bf16.msra.mxu2 %v1127_v21  ;;  %v1343_v63 = vor.u32 %v1420_v54, %v1340_v55  ;;  %v1418_v0 = vld [vmem:[%s1710_s7 + $0x1b4] sm:$0xf0]  ;;  %v1384_v1 = vld [vmem:[%s1710_s7 + $0xac] sm:$0xf]  ;;  %v1196_v2 = vld [vmem:[%s1710_s7 + $0xb8] sm:$0xf0]  ;;  %v1195_v5 = vor.u32 %v1386_v61, %v1194_v60 }
  0x76   : > { %873 = vmatpush.bf16.msra.mxu3 %v1255_v25  ;;  %v1416_v3 = vld [vmem:[%s1710_s7 + $0x1ac] sm:$0xf]  ;;  %v1324_v4 = vld [vmem:[%s1710_s7 + $0x1b8] sm:$0xf0]  ;;  %v1323_v6 = vor.u32 %v1418_v0, %v1322_v62  ;;  %v1199_v7 = vor.u32 %v1384_v1, %v1196_v2  ;;  %v1178_v8 = vld [vmem:[%s1710_s7 + $0x88] sm:$0xf] }
  0x77   : > { %v1382_v9 = vld [vmem:[%s1710_s7 + $0x94] sm:$0xf0]  ;;  %v1306_v10 = vld [vmem:[%s1710_s7 + $0x188] sm:$0xf]  ;;  %v1327_v11 = vor.u32 %v1416_v3, %v1324_v4  ;;  %v1380_v13 = vld [vmem:[%s1710_s7 + $0x8c] sm:$0xf] }
  0x78   : > { %835 = vmatpush.bf16.msra.mxu0 %v1107_v32  ;;  %v1414_v12 = vld [vmem:[%s1710_s7 + $0x194] sm:$0xf0]  ;;  %v1180_v14 = vld [vmem:[%s1710_s7 + $0x98] sm:$0xf0]  ;;  %v1412_v15 = vld [vmem:[%s1710_s7 + $0x18c] sm:$0xf]  ;;  %v1179_v17 = vor.u32 %v1382_v9, %v1178_v8 }
  0x79   : > { %848 = vmatpush.bf16.msra.mxu1 %v1235_v37  ;;  %861 = vmatpush.bf16.msra.mxu2 %v1111_v38  ;;  %v1308_v16 = vld [vmem:[%s1710_s7 + $0x198] sm:$0xf0]  ;;  %v1307_v18 = vor.u32 %v1414_v12, %v1306_v10  ;;  %v1183_v19 = vor.u32 %v1380_v13, %v1180_v14  ;;  %v1162_v20 = vld [vmem:[%s1710_s7 + $0x68] sm:$0xf]  ;;  %v1378_v21 = vld [vmem:[%s1710_s7 + $0x74] sm:$0xf0] }
  0x7a   : > { %874 = vmatpush.bf16.msra.mxu3 %v1239_v42  ;;  %v1290_v22 = vld [vmem:[%s1710_s7 + $0x168] sm:$0xf]  ;;  %v1311_v23 = vor.u32 %v1412_v15, %v1308_v16  ;;  %v1410_v24 = vld [vmem:[%s1710_s7 + $0x174] sm:$0xf0]  ;;  %v1376_v25 = vld [vmem:[%s1710_s7 + $0x6c] sm:$0xf]  ;;  %v1163_v29 = vor.u32 %v1378_v21, %v1162_v20 }
  0x7b   : > { %836 = vmatmul.bf16.vlgmr.msra.gmra.mxu0 %v1793_v53  ;;  %v1164_v26 = vld [vmem:[%s1710_s7 + $0x78] sm:$0xf0]  ;;  %v1408_v27 = vld [vmem:[%s1710_s7 + $0x16c] sm:$0xf]  ;;  %v1291_v30 = vor.u32 %v1410_v24, %v1290_v22  ;;  %v1146_v32 = vld [vmem:[%s1710_s7 + $0x48] sm:$0xf] }
  0x7c   : > { %880 = vmatpush.bf16.msrb.mxu0 %v1227_v43  ;;  %862 = vmatmul.bf16.vlgmr.msra.gmra.mxu2 %v1793_v53  ;;  %v1292_v28 = vld [vmem:[%s1710_s7 + $0x178] sm:$0xf0]  ;;  %v1167_v31 = vor.u32 %v1376_v25, %v1164_v26  ;;  %v1374_v33 = vld [vmem:[%s1710_s7 + $0x54] sm:$0xf0]  ;;  %v1274_v34 = vld [vmem:[%s1710_s7 + $0x148] sm:$0xf] }
  0x7d   : > { %893 = vmatpush.bf16.msrb.mxu1 %v1355_v44  ;;  %906 = vmatpush.bf16.msrb.mxu2 %v1231_v45  ;;  %v1295_v35 = vor.u32 %v1408_v27, %v1292_v28  ;;  %v1406_v36 = vld [vmem:[%s1710_s7 + $0x154] sm:$0xf0]  ;;  %v1372_v37 = vld [vmem:[%s1710_s7 + $0x4c] sm:$0xf]  ;;  %v1148_v38 = vld [vmem:[%s1710_s7 + $0x58] sm:$0xf0]  ;;  %v1147_v41 = vor.u32 %v1374_v33, %v1146_v32 }
  0x7e   : > { %919 = vmatpush.bf16.msrb.mxu3 %v1359_v49  ;;  %849 = vmatmul.bf16.vlgmr.msra.gmra.mxu1 %v1797_v56  ;;  %v1404_v39 = vld [vmem:[%s1710_s7 + $0x14c] sm:$0xf]  ;;  %v1276_v40 = vld [vmem:[%s1710_s7 + $0x158] sm:$0xf0]  ;;  %v1275_v42 = vor.u32 %v1406_v36, %v1274_v34  ;;  %v1151_v43 = vor.u32 %v1372_v37, %v1148_v38  ;;  %v1130_v44 = vld [vmem:[%s1710_s7 + $0x28] sm:$0xf] }
  0x7f   : > { %875 = vmatmul.bf16.vlgmr.msra.gmra.mxu3 %v1797_v56  ;;  %v1370_v45 = vld [vmem:[%s1710_s7 + $0x34] sm:$0xf0]  ;;  %v1258_v46 = vld [vmem:[%s1710_s7 + $0x128] sm:$0xf]  ;;  %v1279_v47 = vor.u32 %v1404_v39, %v1276_v40  ;;  %v1368_v49 = vld [vmem:[%s1710_s7 + $0x2c] sm:$0xf] }
  0x80   : > { %881 = vmatpush.bf16.msrb.mxu0 %v1211_v57  ;;  %v1402_v48 = vld [vmem:[%s1710_s7 + $0x134] sm:$0xf0]  ;;  %v1132_v50 = vld [vmem:[%s1710_s7 + $0x38] sm:$0xf0]  ;;  %v1400_v51 = vld [vmem:[%s1710_s7 + $0x12c] sm:$0xf]  ;;  %v1131_v54 = vor.u32 %v1370_v45, %v1130_v44 }
  0x81   : > { %894 = vmatpush.bf16.msrb.mxu1 %v1339_v58  ;;  %907 = vmatpush.bf16.msrb.mxu2 %v1215_v59  ;;  %v1260_v52 = vld [vmem:[%s1710_s7 + $0x138] sm:$0xf0]  ;;  %v1259_v55 = vor.u32 %v1402_v48, %v1258_v46  ;;  %v1135_v57 = vor.u32 %v1368_v49, %v1132_v50  ;;  %v1114_v58 = vld [vmem:[%s1710_s7 + $0x8] sm:$0xf]  ;;  %v1366_v59 = vld [vmem:[%s1710_s7 + $0x14] sm:$0xf0] }
  0x82   : > { %920 = vmatpush.bf16.msrb.mxu3 %v1343_v63  ;;  %v1242_v60 = vld [vmem:[%s1710_s7 + $0x108] sm:$0xf]  ;;  %v1263_v61 = vor.u32 %v1400_v51, %v1260_v52  ;;  %v1398_v62 = vld [vmem:[%s1710_s7 + $0x114] sm:$0xf0]  ;;  %v1364_v63 = vld [vmem:[%s1710_s7 + $0xc] sm:$0xf]  ;;  %v1115_v3 = vor.u32 %v1366_v59, %v1114_v58 }
  0x83   : > { %v1116_v0 = vld [vmem:[%s1710_s7 + $0x18] sm:$0xf0]  ;;  %v1396_v1 = vld [vmem:[%s1710_s7 + $0x10c] sm:$0xf]  ;;  %v1243_v4 = vor.u32 %v1398_v62, %v1242_v60  ;;  %v961_v10 = vld [vmem:[%s416_s21] sm:$0xf] }
  0x84   : > { %882 = vmatpush.bf16.msrb.mxu0 %v1195_v5  ;;  %v1244_v2 = vld [vmem:[%s1710_s7 + $0x118] sm:$0xf0]  ;;  %v1119_v5 = vor.u32 %v1364_v63, %v1116_v0  ;;  %s1103_s17 = sshll.u32 %s1892_s10, 2  ;;  %v965_v33 = vperm.slane %v961_v10, 2  ;;  %v966_v40 = vperm.slane %v961_v10, 3 }
  0x85   : > { %895 = vmatpush.bf16.msrb.mxu1 %v1323_v6  ;;  %908 = vmatpush.bf16.msrb.mxu2 %v1199_v7  ;;  %v1247_v6 = vor.u32 %v1396_v1, %v1244_v2  ;;  %v947_v7 = vld [vmem:[%s411_s13] sm:$0xf]  ;;  %s422_s25 = scalar_lea.vmem %s1884_s4, %s1103_s17 }
  0x86   : > { %921 = vmatpush.bf16.msrb.mxu3 %v1327_v11  ;;  %v949_v9 = vperm.slane %v947_v7, 0  ;;  %v950_v14 = vperm.slane %v947_v7, 1 }
  0x88   : > { %883 = vmatpush.bf16.msrb.mxu0 %v1179_v17 }
  0x89   : > { %896 = vmatpush.bf16.msrb.mxu1 %v1307_v18  ;;  %909 = vmatpush.bf16.msrb.mxu2 %v1183_v19  ;;  %v964_v18 = vperm.slane %v961_v10, 1 }
  0x8a   : > { %922 = vmatpush.bf16.msrb.mxu3 %v1311_v23 }
  0x8c   : > { %884 = vmatpush.bf16.msrb.mxu0 %v1163_v29 }
  0x8d   : > { %897 = vmatpush.bf16.msrb.mxu1 %v1291_v30  ;;  %910 = vmatpush.bf16.msrb.mxu2 %v1167_v31  ;;  %v951_v30 = vperm.slane %v947_v7, 2 }
  0x8e   : > { %923 = vmatpush.bf16.msrb.mxu3 %v1295_v35  ;;  %v952_v35 = vperm.slane %v947_v7, 3 }
  0x90   : > { %885 = vmatpush.bf16.msrb.mxu0 %v1147_v41 }
  0x91   : > { %898 = vmatpush.bf16.msrb.mxu1 %v1275_v42  ;;  %911 = vmatpush.bf16.msrb.mxu2 %v1151_v43 }
  0x92   : > { %924 = vmatpush.bf16.msrb.mxu3 %v1279_v47 }
  0x94   : > { %886 = vmatpush.bf16.msrb.mxu0 %v1131_v54 }
  0x95   : > { %899 = vmatpush.bf16.msrb.mxu1 %v1259_v55  ;;  %912 = vmatpush.bf16.msrb.mxu2 %v1135_v57 }
  0x96   : > { %925 = vmatpush.bf16.msrb.mxu3 %v1263_v61 }
  0x98   : > { %887 = vmatpush.bf16.msrb.mxu0 %v1115_v3 }
  0x99   : > { %900 = vmatpush.bf16.msrb.mxu1 %v1243_v4  ;;  %913 = vmatpush.bf16.msrb.mxu2 %v1119_v5 }
  0x9a   : > { %926 = vmatpush.bf16.msrb.mxu3 %v1247_v6 }
  0x9b   : > { %888 = vmatmul.bf16.vlgmr.msrb.gmra.mxu0 %v1793_v53 }
  0x9c   : > { %901 = vmatmul.bf16.vlgmr.msrb.gmra.mxu1 %v1797_v56  ;;  %914 = vmatmul.bf16.vlgmr.msrb.gmra.mxu2 %v1793_v53  ;;  %v963_v53 = vperm.slane %v961_v10, 0 }
  0x9d   : > { %927 = vmatmul.bf16.vlgmr.msrb.gmra.mxu3 %v1797_v56 }
  0xf8   : > { %v837_v8 = vpop.f32.mrf.mxu0 }
  0xfb   : > { %v850_v11 = vpop.f32.mrf.mxu1 }
  0xfc   : > { %v851_v12 = vadd.f32 %v850_v11, %v837_v8 }
  0xfe   : > { %v957_v13 = vmul.f32 %v949_v9, %v851_v12 }
  0xff   : > { %v863_v56 = vpop.f32.mrf.mxu2 }
 0x100   : > { %v971_v16 = vadd.f32 %v963_v53, %v957_v13  ;;  %v839_v19 = vpop.f32.mrf.mxu0 }
 0x102   : > { %v876_v15 = vpop.f32.mrf.mxu3  ;;  %v975_v22 = vmax.f32 %v971_v16, 0.0 }
 0x103   : > { %v877_v17 = vadd.f32 %v876_v15, %v863_v56  ;;  %v852_v21 = vpop.f32.mrf.mxu1 }
 0x105   : > { %v958_v20 = vmul.f32 %v950_v14, %v877_v17 }
 0x107   : > { %v972_v23 = vadd.f32 %v964_v18, %v958_v20  ;;  %v865_v25 = vpop.f32.mrf.mxu2 }
 0x109   : > { %v976_v24 = vmax.f32 %v972_v23, 0.0 }
 0x10a   : > { %v878_v26 = vpop.f32.mrf.mxu3 }
 0x10b   : > { %v979_v27 = vpack.c.bf16 %v976_v24, %v975_v22 }
 0x10d   : > { %981 = vst [vmem:[%s422_s25] sm:$0xff] %v979_v27 }
 0x118   : > { %v889_v28 = vpop.f32.mrf.mxu0 }
 0x119   : > { %v902_v29 = vpop.f32.mrf.mxu1 }
 0x11a   : > { %v903_v31 = vadd.f32 %v902_v29, %v889_v28 }
 0x11c   : > { %v959_v32 = vmul.f32 %v951_v30, %v903_v31 }
 0x11e   : > { %v973_v38 = vadd.f32 %v965_v33, %v959_v32 }
 0x11f   : > { %v915_v34 = vpop.f32.mrf.mxu2 }
 0x120   : > { %v928_v36 = vpop.f32.mrf.mxu3  ;;  %v891_v37 = vpop.f32.mrf.mxu0  ;;  %v977_v43 = vmax.f32 %v973_v38, 0.0 }
 0x121   : > { %v929_v39 = vadd.f32 %v928_v36, %v915_v34  ;;  %v904_v41 = vpop.f32.mrf.mxu1 }
 0x123   : > { %v960_v42 = vmul.f32 %v952_v35, %v929_v39 }
 0x125   : > { %v974_v44 = vadd.f32 %v966_v40, %v960_v42 }
 0x127   : > { %v978_v45 = vmax.f32 %v974_v44, 0.0  ;;  %v917_v46 = vpop.f32.mrf.mxu2 }
 0x128   : > { %v930_v47 = vpop.f32.mrf.mxu3 }
 0x129   : > { %v980_v48 = vpack.c.bf16 %v978_v45, %v977_v43 }
 0x12b   : > { %982 = vst [vmem:[%s422_s25 + $0x8] sm:$0xff] %v980_v48 }
 0x12c PF: > { %s14_s19 = sadd.s32 1, %s1505_s19   ;;  %s1885_s15 = smov %s1493_s16 }
 0x12d   : > { %p11_p10 = scmp.ge.s32.totalorder %s14_s19, 6   ;;  %s1886_s16 = smov %s1567_s23 }
 0x12e   : > { %s1887_s17 = smov %s1501_s18  ;;  %s1888_s18 = smov %s1890_s20 }
 0x12f   :  { %13 = sbr.rel (!%p11_p10) target bundleno = 3 (0x3), region = 111 }

// kernel: ae_forward.17
= control target key start
LH: loop header
LB: loop body
LE: loop exit
PB: predicated region body
PF: predicated region fallthrough
CT: control target
= control target key end

     0   :  { %s973_s15 = smov 0   ;;  %s975_s16 = smov 0   ;;  %s1059_s0 = inlined_call_operand.vmem [shape: bf16[8,2048], index: 0, kind: input, shape index: {}]   ;;  %s1060_s1 = inlined_call_operand.vmem [shape: bf16[2048,32], index: 1, kind: input, shape index: {}]   ;;  %s1061_s2 = inlined_call_operand.vmem [shape: f32[1,32], index: 2, kind: input, shape index: {}]   ;;  %s1062_s3 = inlined_call_operand.vmem [shape: f32[1,32], index: 3, kind: input, shape index: {}]   ;;  %s1063_s4 = inlined_call_operand.vmem [shape: bf16[8,32], index: 4, kind: output, shape index: {}]  }
   0x1   :  { %s977_s17 = smov 0  }
   0x2 LB: > { %s23_s18 = sadd.s32 1, %s941_s16  ;;  %p726_p0 = scmp.ge.s32.totalorder %s945_s17, 1  ;;  %s945_s17 = sphi %s977_s17, %s14_s17   ;;  %s941_s16 = sphi %s975_s16, %s1065_s16   ;;  %s937_s15 = sphi %s973_s15, %s1064_s15  }
   0x3   : > { %p24_p1 = scmp.ge.s32.totalorder %s23_s18, 4  ;;  %p207_p2 = scmp.lt.s32.totalorder %s945_s17, 5 }
   0x5   : > { %s1067_s18 = smov (%p24_p1, %s23_s18), 0  ;;  %p208_p3 = pnand %p726_p0, %p207_p2 }
   0x6   : > { %s727_s19 = sshll.u32 (!%p208_p3), %s937_s15, 2  ;;  %s729_s20 = sshll.u32 (!%p208_p3), %s937_s15, 6 }
   0x7   : > { %211 = sbr.rel (%p208_p3) target bundleno = 209 (0xd1), region = 36  ;;  %p247_p4 = scmp.lt.s32.totalorder (!%p208_p3), %s727_s19, 15 }
   0x8   : > { %p253_p5 = scmp.lt.s32.totalorder (!%p208_p3), %s729_s20, 255  ;;  %p731_p6 = scmp.ne.s32.totalorder (!%p208_p3), %s937_s15, 0 }
   0xc   : > { %s1069_s19 = smov (!%p247_p4, %s727_s19), 15  ;;  %s1071_s20 = smov (!%p253_p5, %s729_s20), 255 }
   0xd   : > { %s728_s21 = sshll.u32 %s1069_s19, 2  ;;  %s730_s25 = sshll.u32 %s1071_s20, 2 }
   0xe   : > { %s998_s24 = scalar_lea.vmem %s1059_s0, %s728_s21  ;;  %s1003_s28 = scalar_lea.vmem %s1060_s1, %s730_s25 }
   0xf   : > { %274 = sbr.rel (%p731_p6) target bundleno = 22 (0x16), region = 40 }
  0x14   : > { %vm275_vm0 = vcmask 261120   ;;  %v947_v0 = vmov 0.0  }
  0x15   : > { %276 = vst.msk [vmem:[#allocation2] sm:$0xff] %vm275_vm0, %v947_v0 }
  0x16 PF: > { %v871_v1 = vld [vmem:[%s1003_s28 + $0x38] sm:$0xff]  ;;  %v870_v5 = vld [vmem:[%s1003_s28 + $0x30] sm:$0xff]  ;;  %v869_v9 = vld [vmem:[%s1003_s28 + $0x28] sm:$0xff]  ;;  %vm603_vm1 = vcmask 261120   ;;  %p860_p7 = scmp.ne.s32.totalorder %s937_s15, 3 }
  0x17   : > { %v879_v2 = vld [vmem:[%s1003_s28 + $0x78] sm:$0xff]  ;;  %550 = vmatpush.bf16.msra.mxu0 %v871_v1  ;;  %v878_v6 = vld [vmem:[%s1003_s28 + $0x70] sm:$0xff]  ;;  %v877_v10 = vld [vmem:[%s1003_s28 + $0x68] sm:$0xff] }
  0x18   : > { %v887_v3 = vld [vmem:[%s1003_s28 + $0xb8] sm:$0xff]  ;;  %563 = vmatpush.bf16.msra.mxu1 %v879_v2  ;;  %v886_v7 = vld [vmem:[%s1003_s28 + $0xb0] sm:$0xff]  ;;  %v885_v11 = vld [vmem:[%s1003_s28 + $0xa8] sm:$0xff] }
  0x19   : > { %v895_v4 = vld [vmem:[%s1003_s28 + $0xf8] sm:$0xff]  ;;  %576 = vmatpush.bf16.msra.mxu2 %v887_v3  ;;  %v894_v8 = vld [vmem:[%s1003_s28 + $0xf0] sm:$0xff]  ;;  %v893_v12 = vld [vmem:[%s1003_s28 + $0xe8] sm:$0xff] }
  0x1a   : > { %589 = vmatpush.bf16.msra.mxu3 %v895_v4  ;;  %v868_v13 = vld [vmem:[%s1003_s28 + $0x20] sm:$0xff]  ;;  %v867_v17 = vld [vmem:[%s1003_s28 + $0x18] sm:$0xff]  ;;  %v866_v21 = vld [vmem:[%s1003_s28 + $0x10] sm:$0xff] }
  0x1b   : > { %551 = vmatpush.bf16.msra.mxu0 %v870_v5  ;;  %v876_v14 = vld [vmem:[%s1003_s28 + $0x60] sm:$0xff]  ;;  %v875_v18 = vld [vmem:[%s1003_s28 + $0x58] sm:$0xff]  ;;  %v874_v22 = vld [vmem:[%s1003_s28 + $0x50] sm:$0xff] }
  0x1c   : > { %564 = vmatpush.bf16.msra.mxu1 %v878_v6  ;;  %v884_v15 = vld [vmem:[%s1003_s28 + $0xa0] sm:$0xff]  ;;  %v883_v19 = vld [vmem:[%s1003_s28 + $0x98] sm:$0xff]  ;;  %v882_v23 = vld [vmem:[%s1003_s28 + $0x90] sm:$0xff] }
  0x1d   : > { %577 = vmatpush.bf16.msra.mxu2 %v886_v7  ;;  %v892_v16 = vld [vmem:[%s1003_s28 + $0xe0] sm:$0xff]  ;;  %v891_v20 = vld [vmem:[%s1003_s28 + $0xd8] sm:$0xff]  ;;  %v890_v24 = vld [vmem:[%s1003_s28 + $0xd0] sm:$0xff] }
  0x1e   : > { %590 = vmatpush.bf16.msra.mxu3 %v894_v8  ;;  %v865_v25 = vld [vmem:[%s1003_s28 + $0x8] sm:$0xff]  ;;  %v278_v27 = vld [vmem:[%s998_s24] sm:$0xff] }
  0x1f   : > { %552 = vmatpush.bf16.msra.mxu0 %v869_v9  ;;  %v873_v26 = vld [vmem:[%s1003_s28 + $0x48] sm:$0xff]  ;;  %v346_v31 = vunpack.c.l.b16 %v278_v27  ;;  %v347_v32 = vunpack.c.h.b16 %v278_v27  ;;  %v864_v33 = vld [vmem:[%s1003_s28] sm:$0xff] }
  0x20   : > { %565 = vmatpush.bf16.msra.mxu1 %v877_v10  ;;  %v881_v28 = vld [vmem:[%s1003_s28 + $0x88] sm:$0xff]  ;;  %v872_v34 = vld [vmem:[%s1003_s28 + $0x40] sm:$0xff] }
  0x21   : > { %578 = vmatpush.bf16.msra.mxu2 %v885_v11  ;;  %v889_v29 = vld [vmem:[%s1003_s28 + $0xc8] sm:$0xff]  ;;  %v880_v37 = vld [vmem:[%s1003_s28 + $0x80] sm:$0xff]  ;;  %v350_v39 = vpack.c.b16 %v346_v31, %v346_v31  ;;  %v351_v40 = vpack.c.b16 %v347_v32, %v347_v32 }
  0x22   : > { %591 = vmatpush.bf16.msra.mxu3 %v893_v12  ;;  %v279_v30 = vld [vmem:[%s998_s24 + $0x8] sm:$0xff]  ;;  %v888_v38 = vld [vmem:[%s1003_s28 + $0xc0] sm:$0xff] }
  0x23   : > { %553 = vmatpush.bf16.msra.mxu0 %v868_v13  ;;  %v348_v35 = vunpack.c.l.b16 %v279_v30  ;;  %v349_v36 = vunpack.c.h.b16 %v279_v30  ;;  %v277_v51 = vld [vmem:[#allocation2] sm:$0xff] }
  0x24   : > { %566 = vmatpush.bf16.msra.mxu1 %v876_v14 }
  0x25   : > { %579 = vmatpush.bf16.msra.mxu2 %v884_v15  ;;  %v352_v41 = vpack.c.b16 %v348_v35, %v348_v35  ;;  %v353_v42 = vpack.c.b16 %v349_v36, %v349_v36 }
  0x26   : > { %592 = vmatpush.bf16.msra.mxu3 %v892_v16 }
  0x27   : > { %554 = vmatpush.bf16.msra.mxu0 %v867_v17 }
  0x28   : > { %567 = vmatpush.bf16.msra.mxu1 %v875_v18 }
  0x29   : > { %580 = vmatpush.bf16.msra.mxu2 %v883_v19 }
  0x2a   : > { %593 = vmatpush.bf16.msra.mxu3 %v891_v20 }
  0x2b   : > { %555 = vmatpush.bf16.msra.mxu0 %v866_v21 }
  0x2c   : > { %568 = vmatpush.bf16.msra.mxu1 %v874_v22 }
  0x2d   : > { %581 = vmatpush.bf16.msra.mxu2 %v882_v23 }
  0x2e   : > { %594 = vmatpush.bf16.msra.mxu3 %v890_v24 }
  0x2f   : > { %556 = vmatpush.bf16.msra.mxu0 %v865_v25 }
  0x30   : > { %569 = vmatpush.bf16.msra.mxu1 %v873_v26 }
  0x31   : > { %582 = vmatpush.bf16.msra.mxu2 %v881_v28 }
  0x32   : > { %595 = vmatpush.bf16.msra.mxu3 %v889_v29 }
  0x33   : > { %557 = vmatpush.bf16.msra.mxu0 %v864_v33 }
  0x34   : > { %570 = vmatpush.bf16.msra.mxu1 %v872_v34 }
  0x35   : > { %583 = vmatpush.bf16.msra.mxu2 %v880_v37 }
  0x36   : > { %596 = vmatpush.bf16.msra.mxu3 %v888_v38  ;;  %558 = vmatmul.bf16.vlgmr.msra.gmra.mxu0 %v350_v39 }
  0x37   : > { %571 = vmatmul.bf16.vlgmr.msra.gmra.mxu1 %v351_v40 }
  0x38   : > { %584 = vmatmul.bf16.vlgmr.msra.gmra.mxu2 %v352_v41 }
  0x39   : > { %597 = vmatmul.bf16.vlgmr.msra.gmra.mxu3 %v353_v42 }
  0xb3   : > { %v559_v43 = vpop.f32.mrf.mxu0 }
  0xb4   : > { %v572_v44 = vpop.f32.mrf.mxu1 }
  0xb5   : > { %v573_v45 = vadd.f32 %v572_v44, %v559_v43 }
  0xbb   : > { %v585_v46 = vpop.f32.mrf.mxu2  ;;  %v561_v49 = vpop.f32.mrf.mxu0 }
  0xbc   : > { %v598_v47 = vpop.f32.mrf.mxu3  ;;  %v586_v48 = vadd.f32 %v585_v46, %v573_v45  ;;  %v574_v50 = vpop.f32.mrf.mxu1 }
  0xbe   : > { %v599_v52 = vadd.f32 %v598_v47, %v586_v48 }
  0xc0   : > { %v602_v53 = vadd.f32 %v599_v52, %v277_v51  ;;  %608 = sbr.rel (%p860_p7) target bundleno = 209 (0xd1), region = 44 }
  0xc2   : > { %604 = vst.msk [vmem:[#allocation2] sm:$0xff] %vm603_vm1, %v602_v53 }
  0xc3   : > { %v587_v54 = vpop.f32.mrf.mxu2 }
  0xc4   : > { %v600_v55 = vpop.f32.mrf.mxu3 }
  0xc5   : > { %v921_v57 = vld [vmem:[%s1061_s2] ss:$0 sm:$0xff]  ;;  %vm621_vm2 = vcmask 257024  }
  0xc6   : > { %v922_v58 = vld [vmem:[%s1062_s3] ss:$0 sm:$0xff] }
  0xc9   : > { %v609_v56 = vld [vmem:[#allocation2] sm:$0xff] }
  0xca   : > { %v614_v59 = vmul.f32 %v921_v57, %v609_v56 }
  0xcc   : > { %v619_v60 = vadd.f32 %v922_v58, %v614_v59 }
  0xce   : > { %v620_v61 = vpack.c.bf16 %v619_v60, %v619_v60 }
  0xd0   : > { %622 = vst.msk [vmem:[%s1063_s4] sm:$0xf] %vm621_vm2, %v620_v61 }
  0xd1 PF: > { %s14_s17 = sadd.s32 1, %s945_s17   ;;  %s1064_s15 = smov %s941_s16 }
  0xd2   : > { %p11_p8 = scmp.ge.s32.totalorder %s14_s17, 6   ;;  %s1065_s16 = smov %s1067_s18 }
  0xd4   :  { %13 = sbr.rel (!%p11_p8) target bundleno = 2 (0x2), region = 83 }

// kernel: ae_forward.18
= control target key start
LH: loop header
LB: loop body
LE: loop exit
PB: predicated region body
PF: predicated region fallthrough
CT: control target
= control target key end

     0   :  { %s1052_s15 = smov 0   ;;  %s1054_s16 = smov 0   ;;  %s1260_s0 = inlined_call_operand.vmem [shape: bf16[8,128], index: 0, kind: input, shape index: {}]   ;;  %s1261_s1 = inlined_call_operand.vmem [shape: bf16[128,2048], index: 1, kind: input, shape index: {}]   ;;  %s1262_s2 = inlined_call_operand.vmem [shape: f32[1,2048], index: 2, kind: input, shape index: {}]   ;;  %s1263_s3 = inlined_call_operand.vmem [shape: f32[1,2048], index: 3, kind: input, shape index: {}]   ;;  %s1264_s4 = inlined_call_operand.vmem [shape: bf16[8,2048], index: 4, kind: output, shape index: {}]  }
   0x1   :  { %s1056_s17 = smov 0   ;;  %s1058_s18 = smov 0  }
   0x2   :  { %s1060_s19 = smov 0  }
   0x3 LB: > { %s26_s20 = sadd.s32 1, %s1021_s18  ;;  %p68_p1 = scmp.ne.s32.totalorder %s1013_s16, %s1009_s15  ;;  %s1025_s19 = sphi %s1060_s19, %s14_s19   ;;  %s1021_s18 = sphi %s1058_s18, %s1268_s18   ;;  %s1017_s17 = sphi %s1056_s17, %s1267_s17   ;;  %s1013_s16 = sphi %s1054_s16, %s1266_s16   ;;  %s1009_s15 = sphi %s1052_s15, %s1265_s15  }
   0x4   : > { %p28_p0 = scmp.ge.s32.totalorder %s26_s20, 4  ;;  %p69_p2 = scmp.eq.s32.totalorder %s1025_s19, 0 }
   0x5   : > { %s61_s22 = sadd.s32 1, %s1013_s16  ;;  %p774_p5 = scmp.ge.s32.totalorder %s1025_s19, 4 }
   0x6   : > { %s1270_s20 = smov (%p28_p0, %s26_s20), 0  ;;  %p70_p3 = por %p69_p2, %p68_p1 }
   0x7   : > { %s57_s21 = ssub.s32 %s1021_s18, %s1270_s20  ;;  %179 = sbr.rel (%p774_p5) target bundleno = 48 (0x30), region = 20 }
   0x8   : > { %p59_p4 = scmp.eq.s32.totalorder %s57_s21, 0 }
   0xa   : > { %s1087_s23 = scalar_select %p59_p4, %s1013_s16, %s61_s22  }
   0xc   : > { %182 = sbr.rel (!%p70_p3) target bundleno = 48 (0x30), region = 24  ;;  %s184_s24 = sand.u32 (%p70_p3), 1, %s1013_s16  }
   0xd   : > { %s914_s25 = sshll.u32 (%p70_p3), %s1021_s18, 4  ;;  %s775_s26 = sshll.u32 (%p70_p3), %s184_s24, 8 }
   0xe   : > { %s1095_s29 = scalar_lea.vmem (%p70_p3), %s1261_s1, %s914_s25  ;;  %s1100_s30 = scalar_lea.vmem (%p70_p3), [#allocation3], %s775_s26 }
   0xf   : > { %v205_v0 = vld [vmem:[%s1095_s29] sm:$0xff] (%p70_p3)  ;;  %v207_v1 = vld [vmem:[%s1095_s29 + $0x8] sm:$0xff] (%p70_p3) }
  0x10   : > { %v209_v2 = vld [vmem:[%s1095_s29 + $0x40] sm:$0xff] (%p70_p3)  ;;  %206 = vst [vmem:[%s1100_s30] sm:$0xff] (%p70_p3), %v205_v0  ;;  %v211_v3 = vld [vmem:[%s1095_s29 + $0x48] sm:$0xff] (%p70_p3) }
  0x11   : > { %208 = vst [vmem:[%s1100_s30 + $0x8] sm:$0xff] %v207_v1  ;;  %v213_v4 = vld [vmem:[%s1095_s29 + $0x80] sm:$0xff]  ;;  %v215_v5 = vld [vmem:[%s1095_s29 + $0x88] sm:$0xff] }
  0x12   : > { %210 = vst [vmem:[%s1100_s30 + $0x10] sm:$0xff] %v209_v2  ;;  %v217_v6 = vld [vmem:[%s1095_s29 + $0xc0] sm:$0xff]  ;;  %v219_v7 = vld [vmem:[%s1095_s29 + $0xc8] sm:$0xff] }
  0x13   : > { %212 = vst [vmem:[%s1100_s30 + $0x18] sm:$0xff] %v211_v3  ;;  %v221_v8 = vld [vmem:[%s1095_s29 + $0x100] sm:$0xff]  ;;  %v223_v9 = vld [vmem:[%s1095_s29 + $0x108] sm:$0xff] }
  0x14   : > { %214 = vst [vmem:[%s1100_s30 + $0x20] sm:$0xff] %v213_v4  ;;  %v225_v10 = vld [vmem:[%s1095_s29 + $0x140] sm:$0xff]  ;;  %v227_v11 = vld [vmem:[%s1095_s29 + $0x148] sm:$0xff] }
  0x15   : > { %216 = vst [vmem:[%s1100_s30 + $0x28] sm:$0xff] %v215_v5  ;;  %v229_v12 = vld [vmem:[%s1095_s29 + $0x180] sm:$0xff]  ;;  %v231_v13 = vld [vmem:[%s1095_s29 + $0x188] sm:$0xff] }
  0x16   : > { %218 = vst [vmem:[%s1100_s30 + $0x30] sm:$0xff] %v217_v6  ;;  %v233_v14 = vld [vmem:[%s1095_s29 + $0x1c0] sm:$0xff]  ;;  %v235_v15 = vld [vmem:[%s1095_s29 + $0x1c8] sm:$0xff] }
  0x17   : > { %220 = vst [vmem:[%s1100_s30 + $0x38] sm:$0xff] %v219_v7  ;;  %v237_v16 = vld [vmem:[%s1095_s29 + $0x200] sm:$0xff]  ;;  %v239_v17 = vld [vmem:[%s1095_s29 + $0x208] sm:$0xff] }
  0x18   : > { %222 = vst [vmem:[%s1100_s30 + $0x40] sm:$0xff] %v221_v8  ;;  %v241_v18 = vld [vmem:[%s1095_s29 + $0x240] sm:$0xff]  ;;  %v243_v19 = vld [vmem:[%s1095_s29 + $0x248] sm:$0xff] }
  0x19   : > { %224 = vst [vmem:[%s1100_s30 + $0x48] sm:$0xff] %v223_v9  ;;  %v245_v20 = vld [vmem:[%s1095_s29 + $0x280] sm:$0xff]  ;;  %v247_v21 = vld [vmem:[%s1095_s29 + $0x288] sm:$0xff] }
  0x1a   : > { %226 = vst [vmem:[%s1100_s30 + $0x50] sm:$0xff] %v225_v10  ;;  %v249_v22 = vld [vmem:[%s1095_s29 + $0x2c0] sm:$0xff]  ;;  %v251_v23 = vld [vmem:[%s1095_s29 + $0x2c8] sm:$0xff] }
  0x1b   : > { %228 = vst [vmem:[%s1100_s30 + $0x58] sm:$0xff] %v227_v11  ;;  %v253_v24 = vld [vmem:[%s1095_s29 + $0x300] sm:$0xff]  ;;  %v255_v25 = vld [vmem:[%s1095_s29 + $0x308] sm:$0xff] }
  0x1c   : > { %230 = vst [vmem:[%s1100_s30 + $0x60] sm:$0xff] %v229_v12  ;;  %v257_v26 = vld [vmem:[%s1095_s29 + $0x340] sm:$0xff]  ;;  %v259_v27 = vld [vmem:[%s1095_s29 + $0x348] sm:$0xff] }
  0x1d   : > { %232 = vst [vmem:[%s1100_s30 + $0x68] sm:$0xff] %v231_v13  ;;  %v261_v28 = vld [vmem:[%s1095_s29 + $0x380] sm:$0xff]  ;;  %v263_v29 = vld [vmem:[%s1095_s29 + $0x388] sm:$0xff] }
  0x1e   : > { %234 = vst [vmem:[%s1100_s30 + $0x70] sm:$0xff] %v233_v14  ;;  %v265_v30 = vld [vmem:[%s1095_s29 + $0x3c0] sm:$0xff]  ;;  %v267_v31 = vld [vmem:[%s1095_s29 + $0x3c8] sm:$0xff] }
  0x1f   : > { %236 = vst [vmem:[%s1100_s30 + $0x78] sm:$0xff] %v235_v15 }
  0x20   : > { %238 = vst [vmem:[%s1100_s30 + $0x80] sm:$0xff] %v237_v16 }
  0x21   : > { %240 = vst [vmem:[%s1100_s30 + $0x88] sm:$0xff] %v239_v17 }
  0x22   : > { %242 = vst [vmem:[%s1100_s30 + $0x90] sm:$0xff] %v241_v18 }
  0x23   : > { %244 = vst [vmem:[%s1100_s30 + $0x98] sm:$0xff] %v243_v19 }
  0x24   : > { %246 = vst [vmem:[%s1100_s30 + $0xa0] sm:$0xff] %v245_v20 }
  0x25   : > { %248 = vst [vmem:[%s1100_s30 + $0xa8] sm:$0xff] %v247_v21 }
  0x26   : > { %250 = vst [vmem:[%s1100_s30 + $0xb0] sm:$0xff] %v249_v22 }
  0x27   : > { %252 = vst [vmem:[%s1100_s30 + $0xb8] sm:$0xff] %v251_v23 }
  0x28   : > { %254 = vst [vmem:[%s1100_s30 + $0xc0] sm:$0xff] %v253_v24 }
  0x29   : > { %256 = vst [vmem:[%s1100_s30 + $0xc8] sm:$0xff] %v255_v25 }
  0x2a   : > { %258 = vst [vmem:[%s1100_s30 + $0xd0] sm:$0xff] %v257_v26 }
  0x2b   : > { %260 = vst [vmem:[%s1100_s30 + $0xd8] sm:$0xff] %v259_v27 }
  0x2c   : > { %262 = vst [vmem:[%s1100_s30 + $0xe0] sm:$0xff] %v261_v28 }
  0x2d   : > { %264 = vst [vmem:[%s1100_s30 + $0xe8] sm:$0xff] %v263_v29 }
  0x2e   : > { %266 = vst [vmem:[%s1100_s30 + $0xf0] sm:$0xff] %v265_v30 }
  0x2f   : > { %268 = vst [vmem:[%s1100_s30 + $0xf8] sm:$0xff] %v267_v31 }
  0x30 PF: > { %p778_p6 = scmp.ge.s32.totalorder %s1025_s19, 1  ;;  %p289_p7 = scmp.lt.s32.totalorder %s1025_s19, 5 }
  0x32   : > { %p290_p8 = pnand %p778_p6, %p289_p7 }
  0x33   : > { %s296_s5 = sand.u32 (!%p290_p8), 1, %s1009_s15   ;;  %s780_s10 = sshll.u32 (!%p290_p8), %s1017_s17, 2 }
  0x34   : > { %293 = sbr.rel (%p290_p8) target bundleno = 234 (0xea), region = 55  ;;  %s779_s6 = sshll.u32 (!%p290_p8), %s296_s5, 8 }
  0x35   : > { %s1166_s7 = scalar_lea.vmem (!%p290_p8), [#allocation3], %s779_s6  ;;  %p340_p9 = scmp.lt.s32.totalorder (!%p290_p8), %s780_s10, 15 }
  0x39   : > { %v898_v32 = vld [vmem:[%s1166_s7 + $0xe0] sm:$0xf]  ;;  %v945_v33 = vld [vmem:[%s1166_s7 + $0xec] sm:$0xf0]  ;;  %v943_v34 = vld [vmem:[%s1166_s7 + $0xe4] sm:$0xf] }
  0x3a   : > { %v899_v35 = vor.u32 %v945_v33, %v898_v32  ;;  %v900_v36 = vld [vmem:[%s1166_s7 + $0xf0] sm:$0xf0]  ;;  %v906_v37 = vld [vmem:[%s1166_s7 + $0xe8] sm:$0xf]  ;;  %v946_v38 = vld [vmem:[%s1166_s7 + $0xf4] sm:$0xf0] }
  0x3b   : > { %v903_v39 = vor.u32 %v943_v34, %v900_v36  ;;  %v907_v40 = vor.u32 %v946_v38, %v906_v37  ;;  %v944_v41 = vld [vmem:[%s1166_s7 + $0xec] sm:$0xf]  ;;  %v908_v42 = vld [vmem:[%s1166_s7 + $0xf8] sm:$0xf0]  ;;  %v882_v43 = vld [vmem:[%s1166_s7 + $0xc0] sm:$0xf] }
  0x3c   : > { %560 = vmatpush.bf16.msra.mxu0 %v899_v35  ;;  %v911_v44 = vor.u32 %v944_v41, %v908_v42  ;;  %v941_v45 = vld [vmem:[%s1166_s7 + $0xcc] sm:$0xf0]  ;;  %v939_v46 = vld [vmem:[%s1166_s7 + $0xc4] sm:$0xf]  ;;  %v884_v47 = vld [vmem:[%s1166_s7 + $0xd0] sm:$0xf0] }
  0x3d   : > { %573 = vmatpush.bf16.msra.mxu1 %v903_v39  ;;  %586 = vmatpush.bf16.msra.mxu2 %v907_v40  ;;  %v883_v48 = vor.u32 %v941_v45, %v882_v43  ;;  %v887_v49 = vor.u32 %v939_v46, %v884_v47  ;;  %v890_v50 = vld [vmem:[%s1166_s7 + $0xc8] sm:$0xf]  ;;  %v942_v51 = vld [vmem:[%s1166_s7 + $0xd4] sm:$0xf0]  ;;  %v940_v52 = vld [vmem:[%s1166_s7 + $0xcc] sm:$0xf] }
  0x3e   : > { %599 = vmatpush.bf16.msra.mxu3 %v911_v44  ;;  %v891_v53 = vor.u32 %v942_v51, %v890_v50  ;;  %v892_v54 = vld [vmem:[%s1166_s7 + $0xd8] sm:$0xf0]  ;;  %v866_v55 = vld [vmem:[%s1166_s7 + $0xa0] sm:$0xf]  ;;  %v937_v56 = vld [vmem:[%s1166_s7 + $0xac] sm:$0xf0] }
  0x3f   : > { %v895_v57 = vor.u32 %v940_v52, %v892_v54  ;;  %v935_v58 = vld [vmem:[%s1166_s7 + $0xa4] sm:$0xf]  ;;  %v868_v59 = vld [vmem:[%s1166_s7 + $0xb0] sm:$0xf0]  ;;  %v874_v60 = vld [vmem:[%s1166_s7 + $0xa8] sm:$0xf]  ;;  %v867_v61 = vor.u32 %v937_v56, %v866_v55 }
  0x40   : > { %561 = vmatpush.bf16.msra.mxu0 %v883_v48  ;;  %v938_v62 = vld [vmem:[%s1166_s7 + $0xb4] sm:$0xf0]  ;;  %v936_v63 = vld [vmem:[%s1166_s7 + $0xac] sm:$0xf]  ;;  %v876_v0 = vld [vmem:[%s1166_s7 + $0xb8] sm:$0xf0]  ;;  %v871_v1 = vor.u32 %v935_v58, %v868_v59 }
  0x41   : > { %574 = vmatpush.bf16.msra.mxu1 %v887_v49  ;;  %587 = vmatpush.bf16.msra.mxu2 %v891_v53  ;;  %v875_v2 = vor.u32 %v938_v62, %v874_v60  ;;  %v850_v3 = vld [vmem:[%s1166_s7 + $0x80] sm:$0xf]  ;;  %v933_v4 = vld [vmem:[%s1166_s7 + $0x8c] sm:$0xf0]  ;;  %v931_v5 = vld [vmem:[%s1166_s7 + $0x84] sm:$0xf]  ;;  %v879_v6 = vor.u32 %v936_v63, %v876_v0 }
  0x42   : > { %600 = vmatpush.bf16.msra.mxu3 %v895_v57  ;;  %v852_v7 = vld [vmem:[%s1166_s7 + $0x90] sm:$0xf0]  ;;  %v858_v8 = vld [vmem:[%s1166_s7 + $0x88] sm:$0xf]  ;;  %v934_v9 = vld [vmem:[%s1166_s7 + $0x94] sm:$0xf0]  ;;  %v851_v12 = vor.u32 %v933_v4, %v850_v3 }
  0x43   : > { %v932_v10 = vld [vmem:[%s1166_s7 + $0x8c] sm:$0xf]  ;;  %v860_v11 = vld [vmem:[%s1166_s7 + $0x98] sm:$0xf0]  ;;  %v855_v13 = vor.u32 %v931_v5, %v852_v7  ;;  %v859_v14 = vor.u32 %v934_v9, %v858_v8  ;;  %v834_v15 = vld [vmem:[%s1166_s7 + $0x60] sm:$0xf] }
  0x44   : > { %562 = vmatpush.bf16.msra.mxu0 %v867_v61  ;;  %v929_v16 = vld [vmem:[%s1166_s7 + $0x6c] sm:$0xf0]  ;;  %v927_v17 = vld [vmem:[%s1166_s7 + $0x64] sm:$0xf]  ;;  %v863_v18 = vor.u32 %v932_v10, %v860_v11  ;;  %v836_v19 = vld [vmem:[%s1166_s7 + $0x70] sm:$0xf0] }
  0x45   : > { %575 = vmatpush.bf16.msra.mxu1 %v871_v1  ;;  %588 = vmatpush.bf16.msra.mxu2 %v875_v2  ;;  %v842_v20 = vld [vmem:[%s1166_s7 + $0x68] sm:$0xf]  ;;  %v930_v21 = vld [vmem:[%s1166_s7 + $0x74] sm:$0xf0]  ;;  %v928_v22 = vld [vmem:[%s1166_s7 + $0x6c] sm:$0xf]  ;;  %v835_v24 = vor.u32 %v929_v16, %v834_v15  ;;  %v839_v25 = vor.u32 %v927_v17, %v836_v19 }
  0x46   : > { %601 = vmatpush.bf16.msra.mxu3 %v879_v6  ;;  %v844_v23 = vld [vmem:[%s1166_s7 + $0x78] sm:$0xf0]  ;;  %v843_v26 = vor.u32 %v930_v21, %v842_v20  ;;  %v818_v27 = vld [vmem:[%s1166_s7 + $0x40] sm:$0xf]  ;;  %v925_v28 = vld [vmem:[%s1166_s7 + $0x4c] sm:$0xf0] }
  0x47   : > { %v923_v29 = vld [vmem:[%s1166_s7 + $0x44] sm:$0xf]  ;;  %v847_v30 = vor.u32 %v928_v22, %v844_v23  ;;  %v820_v31 = vld [vmem:[%s1166_s7 + $0x50] sm:$0xf0]  ;;  %v826_v32 = vld [vmem:[%s1166_s7 + $0x48] sm:$0xf]  ;;  %v819_v36 = vor.u32 %v925_v28, %v818_v27 }
  0x48   : > { %563 = vmatpush.bf16.msra.mxu0 %v851_v12  ;;  %v926_v33 = vld [vmem:[%s1166_s7 + $0x54] sm:$0xf0]  ;;  %v924_v34 = vld [vmem:[%s1166_s7 + $0x4c] sm:$0xf]  ;;  %v828_v35 = vld [vmem:[%s1166_s7 + $0x58] sm:$0xf0]  ;;  %v823_v37 = vor.u32 %v923_v29, %v820_v31 }
  0x49   : > { %576 = vmatpush.bf16.msra.mxu1 %v855_v13  ;;  %589 = vmatpush.bf16.msra.mxu2 %v859_v14  ;;  %v827_v38 = vor.u32 %v926_v33, %v826_v32  ;;  %v802_v39 = vld [vmem:[%s1166_s7 + $0x20] sm:$0xf]  ;;  %v921_v40 = vld [vmem:[%s1166_s7 + $0x2c] sm:$0xf0]  ;;  %v919_v41 = vld [vmem:[%s1166_s7 + $0x24] sm:$0xf]  ;;  %v831_v42 = vor.u32 %v924_v34, %v828_v35 }
  0x4a   : > { %602 = vmatpush.bf16.msra.mxu3 %v863_v18  ;;  %v804_v43 = vld [vmem:[%s1166_s7 + $0x30] sm:$0xf0]  ;;  %v810_v44 = vld [vmem:[%s1166_s7 + $0x28] sm:$0xf]  ;;  %v922_v45 = vld [vmem:[%s1166_s7 + $0x34] sm:$0xf0]  ;;  %v803_v48 = vor.u32 %v921_v40, %v802_v39 }
  0x4b   : > { %v920_v46 = vld [vmem:[%s1166_s7 + $0x2c] sm:$0xf]  ;;  %v812_v47 = vld [vmem:[%s1166_s7 + $0x38] sm:$0xf0]  ;;  %v807_v49 = vor.u32 %v919_v41, %v804_v43  ;;  %v811_v50 = vor.u32 %v922_v45, %v810_v44  ;;  %v786_v51 = vld [vmem:[%s1166_s7] sm:$0xf] }
  0x4c   : > { %564 = vmatpush.bf16.msra.mxu0 %v835_v24  ;;  %v917_v52 = vld [vmem:[%s1166_s7 + $0xc] sm:$0xf0]  ;;  %v915_v53 = vld [vmem:[%s1166_s7 + $0x4] sm:$0xf]  ;;  %v815_v54 = vor.u32 %v920_v46, %v812_v47  ;;  %v788_v55 = vld [vmem:[%s1166_s7 + $0x10] sm:$0xf0] }
  0x4d   : > { %577 = vmatpush.bf16.msra.mxu1 %v839_v25  ;;  %590 = vmatpush.bf16.msra.mxu2 %v843_v26  ;;  %v794_v56 = vld [vmem:[%s1166_s7 + $0x8] sm:$0xf]  ;;  %v918_v57 = vld [vmem:[%s1166_s7 + $0x14] sm:$0xf0]  ;;  %v916_v58 = vld [vmem:[%s1166_s7 + $0xc] sm:$0xf]  ;;  %v787_v60 = vor.u32 %v917_v52, %v786_v51  ;;  %v791_v61 = vor.u32 %v915_v53, %v788_v55 }
  0x4e   : > { %603 = vmatpush.bf16.msra.mxu3 %v847_v30  ;;  %v796_v59 = vld [vmem:[%s1166_s7 + $0x18] sm:$0xf0]  ;;  %v795_v62 = vor.u32 %v918_v57, %v794_v56  ;;  %v367_v0 = vld [vmem:[%s1260_s0] sm:$0xf]  ;;  %s1272_s10 = smov (!%p340_p9, %s780_s10), 15 }
  0x4f   : > { %v799_v63 = vor.u32 %v916_v58, %v796_v59  ;;  %s342_s13 = scalar_lea.vmem %s1262_s2, %s1272_s10  ;;  %s347_s21 = scalar_lea.vmem %s1263_s3, %s1272_s10 }
  0x50   : > { %565 = vmatpush.bf16.msra.mxu0 %v819_v36  ;;  %v627_v1 = vld [vmem:[%s342_s13] sm:$0xf]  ;;  %s783_s17 = sshll.u32 %s1272_s10, 2 }
  0x51   : > { %578 = vmatpush.bf16.msra.mxu1 %v823_v37  ;;  %591 = vmatpush.bf16.msra.mxu2 %v827_v38  ;;  %v641_v2 = vld [vmem:[%s347_s21] sm:$0xf]  ;;  %v629_v3 = vperm.slane %v627_v1, 0  ;;  %v630_v4 = vperm.slane %v627_v1, 1  ;;  %v631_v13 = vperm.slane %v627_v1, 2  ;;  %v632_v15 = vperm.slane %v627_v1, 3  ;;  %s353_s25 = scalar_lea.vmem %s1264_s4, %s783_s17 }
  0x52   : > { %604 = vmatpush.bf16.msra.mxu3 %v831_v42  ;;  %v643_v5 = vperm.slane %v641_v2, 0  ;;  %v644_v7 = vperm.slane %v641_v2, 1  ;;  %v645_v17 = vperm.slane %v641_v2, 2  ;;  %v646_v19 = vperm.slane %v641_v2, 3 }
  0x54   : > { %566 = vmatpush.bf16.msra.mxu0 %v803_v48 }
  0x55   : > { %579 = vmatpush.bf16.msra.mxu1 %v807_v49  ;;  %592 = vmatpush.bf16.msra.mxu2 %v811_v50 }
  0x56   : > { %605 = vmatpush.bf16.msra.mxu3 %v815_v54 }
  0x58   : > { %567 = vmatpush.bf16.msra.mxu0 %v787_v60 }
  0x59   : > { %580 = vmatpush.bf16.msra.mxu1 %v791_v61  ;;  %593 = vmatpush.bf16.msra.mxu2 %v795_v62 }
  0x5a   : > { %606 = vmatpush.bf16.msra.mxu3 %v799_v63 }
  0x5b   : > { %568 = vmatmul.bf16.vlgmr.msra.gmra.mxu0 %v367_v0 }
  0x5c   : > { %581 = vmatmul.bf16.vlgmr.msra.gmra.mxu1 %v367_v0  ;;  %594 = vmatmul.bf16.vlgmr.msra.gmra.mxu2 %v367_v0 }
  0x5d   : > { %607 = vmatmul.bf16.vlgmr.msra.gmra.mxu3 %v367_v0 }
  0xd8   : > { %v569_v6 = vpop.f32.mrf.mxu0 }
  0xd9   : > { %v637_v8 = vmul.f32 %v629_v3, %v569_v6  ;;  %v582_v9 = vpop.f32.mrf.mxu1 }
  0xda   : > { %v638_v10 = vmul.f32 %v630_v4, %v582_v9 }
  0xdb   : > { %v651_v11 = vadd.f32 %v643_v5, %v637_v8 }
  0xdc   : > { %v652_v12 = vadd.f32 %v644_v7, %v638_v10 }
  0xdd   : > { %v655_v14 = vmax.f32 %v651_v11, 0.0 }
  0xde   : > { %v656_v16 = vmax.f32 %v652_v12, 0.0 }
  0xdf   : > { %v595_v18 = vpop.f32.mrf.mxu2 }
  0xe0   : > { %v659_v20 = vpack.c.bf16 %v656_v16, %v655_v14  ;;  %v639_v21 = vmul.f32 %v631_v13, %v595_v18  ;;  %v608_v22 = vpop.f32.mrf.mxu3  ;;  %v571_v23 = vpop.f32.mrf.mxu0 }
  0xe1   : > { %v640_v24 = vmul.f32 %v632_v15, %v608_v22  ;;  %v584_v25 = vpop.f32.mrf.mxu1 }
  0xe2   : > { %661 = vst [vmem:[%s353_s25] sm:$0xff] %v659_v20  ;;  %v653_v26 = vadd.f32 %v645_v17, %v639_v21 }
  0xe3   : > { %v654_v27 = vadd.f32 %v646_v19, %v640_v24 }
  0xe4   : > { %v657_v28 = vmax.f32 %v653_v26, 0.0 }
  0xe5   : > { %v658_v29 = vmax.f32 %v654_v27, 0.0 }
  0xe7   : > { %v660_v30 = vpack.c.bf16 %v658_v29, %v657_v28  ;;  %v597_v31 = vpop.f32.mrf.mxu2 }
  0xe8   : > { %v610_v32 = vpop.f32.mrf.mxu3 }
  0xe9   : > { %662 = vst [vmem:[%s353_s25 + $0x8] sm:$0xff] %v660_v30 }
  0xea PF: > { %s14_s19 = sadd.s32 1, %s1025_s19   ;;  %s1265_s15 = smov %s1013_s16 }
  0xeb   : > { %p11_p10 = scmp.ge.s32.totalorder %s14_s19, 6   ;;  %s1266_s16 = smov %s1087_s23 }
  0xec   : > { %s1267_s17 = smov %s1021_s18  ;;  %s1268_s18 = smov %s1270_s20 }
  0xed   :  { %13 = sbr.rel (!%p11_p10) target bundleno = 3 (0x3), region = 111 }

// kernel: ae_forward.19
= control target key start
LH: loop header
LB: loop body
LE: loop exit
PB: predicated region body
PF: predicated region fallthrough
CT: control target
= control target key end

     0   :  { %s1349_s15 = smov 0   ;;  %s1351_s16 = smov 0   ;;  %s1547_s0 = inlined_call_operand.vmem [shape: bf16[8,2048], index: 0, kind: input, shape index: {}]   ;;  %s1548_s1 = inlined_call_operand.vmem [shape: bf16[2048,256], index: 1, kind: input, shape index: {}]   ;;  %s1549_s2 = inlined_call_operand.vmem [shape: f32[1,256], index: 2, kind: input, shape index: {}]   ;;  %s1550_s3 = inlined_call_operand.vmem [shape: f32[1,256], index: 3, kind: input, shape index: {}]   ;;  %s1551_s4 = inlined_call_operand.vmem [shape: bf16[8,256], index: 4, kind: output, shape index: {}]  }
   0x1   :  { %s1353_s17 = smov 0  }
   0x2 LB: > { %s23_s18 = sadd.s32 1, %s1317_s16  ;;  %p941_p0 = scmp.ge.s32.totalorder %s1321_s17, 1  ;;  %s1321_s17 = sphi %s1353_s17, %s14_s17   ;;  %s1317_s16 = sphi %s1351_s16, %s1553_s16   ;;  %s1313_s15 = sphi %s1349_s15, %s1552_s15  }
   0x3   : > { %p24_p1 = scmp.ge.s32.totalorder %s23_s18, 4  ;;  %p214_p2 = scmp.lt.s32.totalorder %s1321_s17, 5 }
   0x5   : > { %s1555_s18 = smov (%p24_p1, %s23_s18), 0  ;;  %p215_p3 = pnand %p941_p0, %p214_p2 }
   0x6   : > { %s942_s19 = sshll.u32 (!%p215_p3), %s1313_s15, 2  ;;  %s944_s20 = sshll.u32 (!%p215_p3), %s1313_s15, 6 }
   0x7   : > { %218 = sbr.rel (%p215_p3) target bundleno = 244 (0xf4), region = 36  ;;  %p259_p4 = scmp.lt.s32.totalorder (!%p215_p3), %s942_s19, 15 }
   0x8   : > { %p266_p5 = scmp.lt.s32.totalorder (!%p215_p3), %s944_s20, 255  ;;  %p947_p6 = scmp.ne.s32.totalorder (!%p215_p3), %s1313_s15, 0 }
   0xc   : > { %s1557_s19 = smov (!%p259_p4, %s942_s19), 15  ;;  %s1559_s20 = smov (!%p266_p5, %s944_s20), 255 }
   0xd   : > { %s943_s21 = sshll.u32 %s1557_s19, 2  ;;  %s1209_s25 = sshll.u32 %s1559_s20, 3 }
   0xe   : > { %s1374_s24 = scalar_lea.vmem %s1547_s0, %s943_s21  ;;  %s1379_s28 = scalar_lea.vmem %s1548_s1, %s1209_s25 }
   0xf   : > { %295 = sbr.rel (%p947_p6) target bundleno = 23 (0x17), region = 40 }
  0x14   : > { %v1323_v0 = vmov 0.0  }
  0x15   : > { %296 = vst [vmem:[#allocation2] sm:$0xff] %v1323_v0 }
  0x16   : > { %297 = vst [vmem:[#allocation2 + $0x8] sm:$0xff] %v1323_v0 }
  0x17 PF: > { %v1006_v1 = vld [vmem:[%s1379_s28 + $0x70] sm:$0xf]  ;;  %v1225_v2 = vld [vmem:[%s1379_s28 + $0x74] sm:$0xf0]  ;;  %v998_v12 = vld [vmem:[%s1379_s28 + $0x60] sm:$0xf] }
  0x18   : > { %v1070_v3 = vld [vmem:[%s1379_s28 + $0xf0] sm:$0xf]  ;;  %v1007_v4 = vor.u32 %v1225_v2, %v1006_v1  ;;  %v1241_v5 = vld [vmem:[%s1379_s28 + $0xf4] sm:$0xf0]  ;;  %v1223_v14 = vld [vmem:[%s1379_s28 + $0x64] sm:$0xf0] }
  0x19   : > { %v1134_v6 = vld [vmem:[%s1379_s28 + $0x170] sm:$0xf]  ;;  %v1257_v7 = vld [vmem:[%s1379_s28 + $0x174] sm:$0xf0]  ;;  %v1071_v8 = vor.u32 %v1241_v5, %v1070_v3  ;;  %v1062_v15 = vld [vmem:[%s1379_s28 + $0xe0] sm:$0xf]  ;;  %v999_v17 = vor.u32 %v1223_v14, %v998_v12 }
  0x1a   : > { %v1135_v9 = vor.u32 %v1257_v7, %v1134_v6  ;;  %v1198_v10 = vld [vmem:[%s1379_s28 + $0x1f0] sm:$0xf]  ;;  %v1273_v11 = vld [vmem:[%s1379_s28 + $0x1f4] sm:$0xf0]  ;;  %700 = vmatpush.bf16.msra.mxu0 %v1007_v4  ;;  %v1239_v16 = vld [vmem:[%s1379_s28 + $0xe4] sm:$0xf0] }
  0x1b   : > { %v1199_v13 = vor.u32 %v1273_v11, %v1198_v10  ;;  %713 = vmatpush.bf16.msra.mxu1 %v1071_v8  ;;  %v1063_v18 = vor.u32 %v1239_v16, %v1062_v15  ;;  %v1126_v19 = vld [vmem:[%s1379_s28 + $0x160] sm:$0xf]  ;;  %v1255_v20 = vld [vmem:[%s1379_s28 + $0x164] sm:$0xf0]  ;;  %v990_v24 = vld [vmem:[%s1379_s28 + $0x50] sm:$0xf] }
  0x1c   : > { %726 = vmatpush.bf16.msra.mxu2 %v1135_v9  ;;  %v1190_v21 = vld [vmem:[%s1379_s28 + $0x1e0] sm:$0xf]  ;;  %v1127_v22 = vor.u32 %v1255_v20, %v1126_v19  ;;  %v1271_v23 = vld [vmem:[%s1379_s28 + $0x1e4] sm:$0xf0]  ;;  %v1221_v25 = vld [vmem:[%s1379_s28 + $0x54] sm:$0xf0] }
  0x1d   : > { %739 = vmatpush.bf16.msra.mxu3 %v1199_v13  ;;  %v1191_v26 = vor.u32 %v1271_v23, %v1190_v21  ;;  %v1054_v27 = vld [vmem:[%s1379_s28 + $0xd0] sm:$0xf]  ;;  %v1237_v28 = vld [vmem:[%s1379_s28 + $0xd4] sm:$0xf0]  ;;  %v991_v30 = vor.u32 %v1221_v25, %v990_v24  ;;  %v982_v36 = vld [vmem:[%s1379_s28 + $0x40] sm:$0xf] }
  0x1e   : > { %v1118_v29 = vld [vmem:[%s1379_s28 + $0x150] sm:$0xf]  ;;  %701 = vmatpush.bf16.msra.mxu0 %v999_v17  ;;  %v1253_v31 = vld [vmem:[%s1379_s28 + $0x154] sm:$0xf0]  ;;  %v1055_v34 = vor.u32 %v1237_v28, %v1054_v27  ;;  %v1219_v37 = vld [vmem:[%s1379_s28 + $0x44] sm:$0xf0] }
  0x1f   : > { %v1182_v32 = vld [vmem:[%s1379_s28 + $0x1d0] sm:$0xf]  ;;  %v1269_v33 = vld [vmem:[%s1379_s28 + $0x1d4] sm:$0xf0]  ;;  %714 = vmatpush.bf16.msra.mxu1 %v1063_v18  ;;  %v1119_v35 = vor.u32 %v1253_v31, %v1118_v29  ;;  %v1046_v38 = vld [vmem:[%s1379_s28 + $0xc0] sm:$0xf]  ;;  %v983_v45 = vor.u32 %v1219_v37, %v982_v36 }
  0x20   : > { %727 = vmatpush.bf16.msra.mxu2 %v1127_v22  ;;  %v1183_v39 = vor.u32 %v1269_v33, %v1182_v32  ;;  %v1235_v40 = vld [vmem:[%s1379_s28 + $0xc4] sm:$0xf0]  ;;  %v1110_v41 = vld [vmem:[%s1379_s28 + $0x140] sm:$0xf]  ;;  %v974_v48 = vld [vmem:[%s1379_s28 + $0x30] sm:$0xf] }
  0x21   : > { %740 = vmatpush.bf16.msra.mxu3 %v1191_v26  ;;  %v1251_v42 = vld [vmem:[%s1379_s28 + $0x144] sm:$0xf0]  ;;  %v1174_v43 = vld [vmem:[%s1379_s28 + $0x1c0] sm:$0xf]  ;;  %v1047_v46 = vor.u32 %v1235_v40, %v1046_v38  ;;  %v1217_v49 = vld [vmem:[%s1379_s28 + $0x34] sm:$0xf0] }
  0x22   : > { %v1267_v44 = vld [vmem:[%s1379_s28 + $0x1c4] sm:$0xf0]  ;;  %702 = vmatpush.bf16.msra.mxu0 %v991_v30  ;;  %v1111_v47 = vor.u32 %v1251_v42, %v1110_v41  ;;  %v1038_v50 = vld [vmem:[%s1379_s28 + $0xb0] sm:$0xf]  ;;  %v1233_v52 = vld [vmem:[%s1379_s28 + $0xb4] sm:$0xf0]  ;;  %v975_v57 = vor.u32 %v1217_v49, %v974_v48 }
  0x23   : > { %715 = vmatpush.bf16.msra.mxu1 %v1055_v34  ;;  %v1175_v51 = vor.u32 %v1267_v44, %v1174_v43  ;;  %v1102_v53 = vld [vmem:[%s1379_s28 + $0x130] sm:$0xf]  ;;  %v1249_v54 = vld [vmem:[%s1379_s28 + $0x134] sm:$0xf0]  ;;  %v1039_v58 = vor.u32 %v1233_v52, %v1038_v50  ;;  %v966_v60 = vld [vmem:[%s1379_s28 + $0x20] sm:$0xf] }
  0x24   : > { %728 = vmatpush.bf16.msra.mxu2 %v1119_v35  ;;  %v1166_v55 = vld [vmem:[%s1379_s28 + $0x1b0] sm:$0xf]  ;;  %v1265_v56 = vld [vmem:[%s1379_s28 + $0x1b4] sm:$0xf0]  ;;  %v1103_v59 = vor.u32 %v1249_v54, %v1102_v53  ;;  %v1215_v61 = vld [vmem:[%s1379_s28 + $0x24] sm:$0xf0] }
  0x25   : > { %741 = vmatpush.bf16.msra.mxu3 %v1183_v39  ;;  %v1030_v62 = vld [vmem:[%s1379_s28 + $0xa0] sm:$0xf]  ;;  %v1167_v63 = vor.u32 %v1265_v56, %v1166_v55  ;;  %v1231_v0 = vld [vmem:[%s1379_s28 + $0xa4] sm:$0xf0]  ;;  %v967_v5 = vor.u32 %v1215_v61, %v966_v60  ;;  %v958_v8 = vld [vmem:[%s1379_s28 + $0x10] sm:$0xf] }
  0x26   : > { %703 = vmatpush.bf16.msra.mxu0 %v983_v45  ;;  %v1094_v1 = vld [vmem:[%s1379_s28 + $0x120] sm:$0xf]  ;;  %v1247_v2 = vld [vmem:[%s1379_s28 + $0x124] sm:$0xf0]  ;;  %v1031_v6 = vor.u32 %v1231_v0, %v1030_v62  ;;  %v1213_v9 = vld [vmem:[%s1379_s28 + $0x14] sm:$0xf0] }
  0x27   : > { %716 = vmatpush.bf16.msra.mxu1 %v1047_v46  ;;  %v1158_v3 = vld [vmem:[%s1379_s28 + $0x1a0] sm:$0xf]  ;;  %v1263_v4 = vld [vmem:[%s1379_s28 + $0x1a4] sm:$0xf0]  ;;  %v1095_v7 = vor.u32 %v1247_v2, %v1094_v1  ;;  %v1022_v10 = vld [vmem:[%s1379_s28 + $0x90] sm:$0xf]  ;;  %v959_v17 = vor.u32 %v1213_v9, %v958_v8 }
  0x28   : > { %729 = vmatpush.bf16.msra.mxu2 %v1111_v47  ;;  %v1159_v11 = vor.u32 %v1263_v4, %v1158_v3  ;;  %v1229_v12 = vld [vmem:[%s1379_s28 + $0x94] sm:$0xf0]  ;;  %v1086_v13 = vld [vmem:[%s1379_s28 + $0x110] sm:$0xf]  ;;  %v950_v18 = vld [vmem:[%s1379_s28] sm:$0xf] }
  0x29   : > { %742 = vmatpush.bf16.msra.mxu3 %v1175_v51  ;;  %v1245_v14 = vld [vmem:[%s1379_s28 + $0x114] sm:$0xf0]  ;;  %v1150_v15 = vld [vmem:[%s1379_s28 + $0x190] sm:$0xf]  ;;  %v1211_v19 = vld [vmem:[%s1379_s28 + $0x4] sm:$0xf0]  ;;  %v1023_v21 = vor.u32 %v1229_v12, %v1022_v10 }
  0x2a   : > { %704 = vmatpush.bf16.msra.mxu0 %v975_v57  ;;  %v1261_v16 = vld [vmem:[%s1379_s28 + $0x194] sm:$0xf0]  ;;  %v1014_v20 = vld [vmem:[%s1379_s28 + $0x80] sm:$0xf]  ;;  %v1087_v22 = vor.u32 %v1245_v14, %v1086_v13  ;;  %v1227_v23 = vld [vmem:[%s1379_s28 + $0x84] sm:$0xf0]  ;;  %v951_v33 = vor.u32 %v1211_v19, %v950_v18 }
  0x2b   : > { %717 = vmatpush.bf16.msra.mxu1 %v1039_v58  ;;  %v1078_v24 = vld [vmem:[%s1379_s28 + $0x100] sm:$0xf]  ;;  %v1243_v25 = vld [vmem:[%s1379_s28 + $0x104] sm:$0xf0]  ;;  %v1151_v26 = vor.u32 %v1261_v16, %v1150_v15  ;;  %v1224_v29 = vld [vmem:[%s1379_s28 + $0x74] sm:$0xf]  ;;  %v1015_v38 = vor.u32 %v1227_v23, %v1014_v20 }
  0x2c   : > { %730 = vmatpush.bf16.msra.mxu2 %v1103_v59  ;;  %v1142_v27 = vld [vmem:[%s1379_s28 + $0x180] sm:$0xf]  ;;  %v1259_v28 = vld [vmem:[%s1379_s28 + $0x184] sm:$0xf0]  ;;  %v1008_v30 = vld [vmem:[%s1379_s28 + $0x78] sm:$0xf0]  ;;  %v1079_v39 = vor.u32 %v1243_v25, %v1078_v24 }
  0x2d   : > { %743 = vmatpush.bf16.msra.mxu3 %v1167_v63  ;;  %v1240_v31 = vld [vmem:[%s1379_s28 + $0xf4] sm:$0xf]  ;;  %v301_v32 = vld [vmem:[%s1374_s24 + $0x8] sm:$0xff]  ;;  %v1072_v34 = vld [vmem:[%s1379_s28 + $0xf8] sm:$0xf0]  ;;  %v1143_v43 = vor.u32 %v1259_v28, %v1142_v27  ;;  %v1011_v44 = vor.u32 %v1224_v29, %v1008_v30  ;;  %p1204_p7 = scmp.ne.s32.totalorder %s1313_s15, 3 }
  0x2e   : > { %705 = vmatpush.bf16.msra.mxu0 %v967_v5  ;;  %v1256_v35 = vld [vmem:[%s1379_s28 + $0x174] sm:$0xf]  ;;  %v1136_v36 = vld [vmem:[%s1379_s28 + $0x178] sm:$0xf0]  ;;  %v370_v37 = vunpack.c.l.b16 %v301_v32  ;;  %v371_v42 = vunpack.c.h.b16 %v301_v32  ;;  %v300_v45 = vld [vmem:[%s1374_s24] sm:$0xff]  ;;  %v1075_v46 = vor.u32 %v1240_v31, %v1072_v34 }
  0x2f   : > { %718 = vmatpush.bf16.msra.mxu1 %v1031_v6  ;;  %v1272_v40 = vld [vmem:[%s1379_s28 + $0x1f4] sm:$0xf]  ;;  %v1200_v41 = vld [vmem:[%s1379_s28 + $0x1f8] sm:$0xf0]  ;;  %v1139_v47 = vor.u32 %v1256_v35, %v1136_v36  ;;  %v1222_v48 = vld [vmem:[%s1379_s28 + $0x64] sm:$0xf]  ;;  %v368_v51 = vunpack.c.l.b16 %v300_v45  ;;  %v369_v52 = vunpack.c.h.b16 %v300_v45 }
  0x30   : > { %731 = vmatpush.bf16.msra.mxu2 %v1095_v7  ;;  %v1000_v49 = vld [vmem:[%s1379_s28 + $0x68] sm:$0xf0]  ;;  %v1238_v50 = vld [vmem:[%s1379_s28 + $0xe4] sm:$0xf]  ;;  %v1203_v53 = vor.u32 %v1272_v40, %v1200_v41  ;;  %v1462_v57 = vpack.c.b16 %v370_v37, %v370_v37  ;;  %v1466_v60 = vpack.c.b16 %v371_v42, %v371_v42  ;;  %v1220_v2 = vld [vmem:[%s1379_s28 + $0x54] sm:$0xf] }
  0x31   : > { %744 = vmatpush.bf16.msra.mxu3 %v1159_v11  ;;  %v1064_v54 = vld [vmem:[%s1379_s28 + $0xe8] sm:$0xf0]  ;;  %v1254_v55 = vld [vmem:[%s1379_s28 + $0x164] sm:$0xf]  ;;  %v1468_v61 = vpack.c.b16 %v368_v51, %v368_v51  ;;  %v1003_v62 = vor.u32 %v1222_v48, %v1000_v49  ;;  %v1470_v63 = vpack.c.b16 %v369_v52, %v369_v52  ;;  %v992_v3 = vld [vmem:[%s1379_s28 + $0x58] sm:$0xf0] }
  0x32   : > { %706 = vmatpush.bf16.msra.mxu0 %v959_v17  ;;  %v1128_v56 = vld [vmem:[%s1379_s28 + $0x168] sm:$0xf0]  ;;  %v1270_v58 = vld [vmem:[%s1379_s28 + $0x1e4] sm:$0xf]  ;;  %v1067_v0 = vor.u32 %v1238_v50, %v1064_v54  ;;  %v1236_v4 = vld [vmem:[%s1379_s28 + $0xd4] sm:$0xf]  ;;  %v995_v11 = vor.u32 %v1220_v2, %v992_v3 }
  0x33   : > { %719 = vmatpush.bf16.msra.mxu1 %v1023_v21  ;;  %v1192_v59 = vld [vmem:[%s1379_s28 + $0x1e8] sm:$0xf0]  ;;  %v1131_v1 = vor.u32 %v1254_v55, %v1128_v56  ;;  %v1056_v6 = vld [vmem:[%s1379_s28 + $0xd8] sm:$0xf0]  ;;  %v1252_v7 = vld [vmem:[%s1379_s28 + $0x154] sm:$0xf] }
  0x34   : > { %732 = vmatpush.bf16.msra.mxu2 %v1087_v22  ;;  %v1195_v5 = vor.u32 %v1270_v58, %v1192_v59  ;;  %v1120_v8 = vld [vmem:[%s1379_s28 + $0x158] sm:$0xf0]  ;;  %v1268_v9 = vld [vmem:[%s1379_s28 + $0x1d4] sm:$0xf]  ;;  %v1059_v12 = vor.u32 %v1236_v4, %v1056_v6  ;;  %v1218_v14 = vld [vmem:[%s1379_s28 + $0x44] sm:$0xf] }
  0x35   : > { %745 = vmatpush.bf16.msra.mxu3 %v1151_v26  ;;  %v1184_v10 = vld [vmem:[%s1379_s28 + $0x1d8] sm:$0xf0]  ;;  %v1123_v13 = vor.u32 %v1252_v7, %v1120_v8  ;;  %v984_v15 = vld [vmem:[%s1379_s28 + $0x48] sm:$0xf0]  ;;  %v1234_v16 = vld [vmem:[%s1379_s28 + $0xc4] sm:$0xf] }
  0x36   : > { %707 = vmatpush.bf16.msra.mxu0 %v951_v33  ;;  %v1187_v17 = vor.u32 %v1268_v9, %v1184_v10  ;;  %v1048_v18 = vld [vmem:[%s1379_s28 + $0xc8] sm:$0xf0]  ;;  %v1250_v19 = vld [vmem:[%s1379_s28 + $0x144] sm:$0xf]  ;;  %v987_v23 = vor.u32 %v1218_v14, %v984_v15  ;;  %v1216_v26 = vld [vmem:[%s1379_s28 + $0x34] sm:$0xf] }
  0x37   : > { %720 = vmatpush.bf16.msra.mxu1 %v1015_v38  ;;  %v1112_v20 = vld [vmem:[%s1379_s28 + $0x148] sm:$0xf0]  ;;  %v1266_v21 = vld [vmem:[%s1379_s28 + $0x1c4] sm:$0xf]  ;;  %v1051_v24 = vor.u32 %v1234_v16, %v1048_v18  ;;  %v976_v27 = vld [vmem:[%s1379_s28 + $0x38] sm:$0xf0] }
  0x38   : > { %733 = vmatpush.bf16.msra.mxu2 %v1079_v39  ;;  %v1176_v22 = vld [vmem:[%s1379_s28 + $0x1c8] sm:$0xf0]  ;;  %v1115_v25 = vor.u32 %v1250_v19, %v1112_v20  ;;  %v1232_v28 = vld [vmem:[%s1379_s28 + $0xb4] sm:$0xf]  ;;  %v1040_v30 = vld [vmem:[%s1379_s28 + $0xb8] sm:$0xf0]  ;;  %v979_v35 = vor.u32 %v1216_v26, %v976_v27 }
  0x39   : > { %746 = vmatpush.bf16.msra.mxu3 %v1143_v43  ;;  %708 = vmatmul.bf16.vlgmr.msra.gmra.mxu0 %v1468_v61  ;;  %v1179_v29 = vor.u32 %v1266_v21, %v1176_v22  ;;  %v1248_v31 = vld [vmem:[%s1379_s28 + $0x134] sm:$0xf]  ;;  %v1104_v32 = vld [vmem:[%s1379_s28 + $0x138] sm:$0xf0]  ;;  %v1043_v36 = vor.u32 %v1232_v28, %v1040_v30  ;;  %v1214_v38 = vld [vmem:[%s1379_s28 + $0x24] sm:$0xf] }
  0x3a   : > { %752 = vmatpush.bf16.msrb.mxu0 %v1011_v44  ;;  %721 = vmatmul.bf16.vlgmr.msra.gmra.mxu1 %v1470_v63  ;;  %v1264_v33 = vld [vmem:[%s1379_s28 + $0x1b4] sm:$0xf]  ;;  %v1168_v34 = vld [vmem:[%s1379_s28 + $0x1b8] sm:$0xf0]  ;;  %v1107_v37 = vor.u32 %v1248_v31, %v1104_v32  ;;  %v968_v39 = vld [vmem:[%s1379_s28 + $0x28] sm:$0xf0] }
  0x3b   : > { %765 = vmatpush.bf16.msrb.mxu1 %v1075_v46  ;;  %734 = vmatmul.bf16.vlgmr.msra.gmra.mxu2 %v1462_v57  ;;  %v1230_v40 = vld [vmem:[%s1379_s28 + $0xa4] sm:$0xf]  ;;  %v1171_v41 = vor.u32 %v1264_v33, %v1168_v34  ;;  %v1032_v42 = vld [vmem:[%s1379_s28 + $0xa8] sm:$0xf0]  ;;  %v1212_v50 = vld [vmem:[%s1379_s28 + $0x14] sm:$0xf] }
  0x3c   : > { %778 = vmatpush.bf16.msrb.mxu2 %v1139_v47  ;;  %747 = vmatmul.bf16.vlgmr.msra.gmra.mxu3 %v1466_v60  ;;  %v1246_v43 = vld [vmem:[%s1379_s28 + $0x124] sm:$0xf]  ;;  %v1096_v44 = vld [vmem:[%s1379_s28 + $0x128] sm:$0xf0]  ;;  %v971_v47 = vor.u32 %v1214_v38, %v968_v39  ;;  %v1035_v48 = vor.u32 %v1230_v40, %v1032_v42  ;;  %v960_v51 = vld [vmem:[%s1379_s28 + $0x18] sm:$0xf0] }
  0x3d   : > { %791 = vmatpush.bf16.msrb.mxu3 %v1203_v53  ;;  %v1262_v45 = vld [vmem:[%s1379_s28 + $0x1a4] sm:$0xf]  ;;  %v1160_v46 = vld [vmem:[%s1379_s28 + $0x1a8] sm:$0xf0]  ;;  %v1099_v49 = vor.u32 %v1246_v43, %v1096_v44  ;;  %v1228_v52 = vld [vmem:[%s1379_s28 + $0x94] sm:$0xf] }
  0x3e   : > { %753 = vmatpush.bf16.msrb.mxu0 %v1003_v62  ;;  %v1163_v53 = vor.u32 %v1262_v45, %v1160_v46  ;;  %v1024_v54 = vld [vmem:[%s1379_s28 + $0x98] sm:$0xf0]  ;;  %v1244_v55 = vld [vmem:[%s1379_s28 + $0x114] sm:$0xf]  ;;  %v963_v62 = vor.u32 %v1212_v50, %v960_v51  ;;  %v1210_v2 = vld [vmem:[%s1379_s28 + $0x4] sm:$0xf] }
  0x3f   : > { %766 = vmatpush.bf16.msrb.mxu1 %v1067_v0  ;;  %v1088_v56 = vld [vmem:[%s1379_s28 + $0x118] sm:$0xf0]  ;;  %v1260_v58 = vld [vmem:[%s1379_s28 + $0x194] sm:$0xf]  ;;  %v1027_v0 = vor.u32 %v1228_v52, %v1024_v54  ;;  %v952_v3 = vld [vmem:[%s1379_s28 + $0x8] sm:$0xf0] }
  0x40   : > { %779 = vmatpush.bf16.msrb.mxu2 %v1131_v1  ;;  %v1152_v59 = vld [vmem:[%s1379_s28 + $0x198] sm:$0xf0]  ;;  %v1091_v1 = vor.u32 %v1244_v55, %v1088_v56  ;;  %v1226_v4 = vld [vmem:[%s1379_s28 + $0x84] sm:$0xf]  ;;  %v1016_v6 = vld [vmem:[%s1379_s28 + $0x88] sm:$0xf0] }
  0x41   : > { %792 = vmatpush.bf16.msrb.mxu3 %v1195_v5  ;;  %v1155_v5 = vor.u32 %v1260_v58, %v1152_v59  ;;  %v1242_v7 = vld [vmem:[%s1379_s28 + $0x104] sm:$0xf]  ;;  %v1080_v8 = vld [vmem:[%s1379_s28 + $0x108] sm:$0xf0] }
  0x42   : > { %754 = vmatpush.bf16.msrb.mxu0 %v995_v11  ;;  %v1258_v9 = vld [vmem:[%s1379_s28 + $0x184] sm:$0xf]  ;;  %v1144_v10 = vld [vmem:[%s1379_s28 + $0x188] sm:$0xf0]  ;;  %v955_v11 = vor.u32 %v1210_v2, %v952_v3 }
  0x43   : > { %767 = vmatpush.bf16.msrb.mxu1 %v1059_v12  ;;  %v1019_v12 = vor.u32 %v1226_v4, %v1016_v6  ;;  %v1147_v14 = vor.u32 %v1258_v9, %v1144_v10  ;;  %v298_v21 = vld [vmem:[#allocation2] sm:$0xff]  ;;  %v299_v31 = vld [vmem:[#allocation2 + $0x8] sm:$0xff] }
  0x44   : > { %780 = vmatpush.bf16.msrb.mxu2 %v1123_v13  ;;  %v1083_v13 = vor.u32 %v1242_v7, %v1080_v8 }
  0x45   : > { %793 = vmatpush.bf16.msrb.mxu3 %v1187_v17 }
  0x46   : > { %755 = vmatpush.bf16.msrb.mxu0 %v987_v23 }
  0x47   : > { %768 = vmatpush.bf16.msrb.mxu1 %v1051_v24 }
  0x48   : > { %781 = vmatpush.bf16.msrb.mxu2 %v1115_v25 }
  0x49   : > { %794 = vmatpush.bf16.msrb.mxu3 %v1179_v29 }
  0x4a   : > { %756 = vmatpush.bf16.msrb.mxu0 %v979_v35 }
  0x4b   : > { %769 = vmatpush.bf16.msrb.mxu1 %v1043_v36 }
  0x4c   : > { %782 = vmatpush.bf16.msrb.mxu2 %v1107_v37 }
  0x4d   : > { %795 = vmatpush.bf16.msrb.mxu3 %v1171_v41 }
  0x4e   : > { %757 = vmatpush.bf16.msrb.mxu0 %v971_v47 }
  0x4f   : > { %770 = vmatpush.bf16.msrb.mxu1 %v1035_v48 }
  0x50   : > { %783 = vmatpush.bf16.msrb.mxu2 %v1099_v49 }
  0x51   : > { %796 = vmatpush.bf16.msrb.mxu3 %v1163_v53 }
  0x52   : > { %758 = vmatpush.bf16.msrb.mxu0 %v963_v62 }
  0x53   : > { %771 = vmatpush.bf16.msrb.mxu1 %v1027_v0 }
  0x54   : > { %784 = vmatpush.bf16.msrb.mxu2 %v1091_v1 }
  0x55   : > { %797 = vmatpush.bf16.msrb.mxu3 %v1155_v5 }
  0x56   : > { %759 = vmatpush.bf16.msrb.mxu0 %v955_v11 }
  0x57   : > { %772 = vmatpush.bf16.msrb.mxu1 %v1019_v12 }
  0x58   : > { %785 = vmatpush.bf16.msrb.mxu2 %v1083_v13 }
  0x59   : > { %798 = vmatpush.bf16.msrb.mxu3 %v1147_v14  ;;  %760 = vmatmul.bf16.vlgmr.msrb.gmra.mxu0 %v1468_v61 }
  0x5a   : > { %773 = vmatmul.bf16.vlgmr.msrb.gmra.mxu1 %v1470_v63 }
  0x5b   : > { %786 = vmatmul.bf16.vlgmr.msrb.gmra.mxu2 %v1462_v57 }
  0x5c   : > { %799 = vmatmul.bf16.vlgmr.msrb.gmra.mxu3 %v1466_v60 }
  0xb6   : > { %v709_v15 = vpop.f32.mrf.mxu0 }
  0xb7   : > { %v722_v16 = vpop.f32.mrf.mxu1 }
  0xb8   : > { %v723_v17 = vadd.f32 %v722_v16, %v709_v15 }
  0xbe   : > { %v735_v18 = vpop.f32.mrf.mxu2  ;;  %v711_v23 = vpop.f32.mrf.mxu0 }
  0xbf   : > { %v736_v19 = vadd.f32 %v735_v18, %v723_v17  ;;  %v748_v20 = vpop.f32.mrf.mxu3  ;;  %v724_v24 = vpop.f32.mrf.mxu1 }
  0xc1   : > { %v749_v22 = vadd.f32 %v748_v20, %v736_v19 }
  0xc3   : > { %v804_v25 = vadd.f32 %v749_v22, %v298_v21 }
  0xc5   : > { %806 = vst [vmem:[#allocation2] sm:$0xff] %v804_v25 }
  0xc6   : > { %v737_v26 = vpop.f32.mrf.mxu2 }
  0xc7   : > { %v750_v61 = vpop.f32.mrf.mxu3 }
  0xd6   : > { %v761_v27 = vpop.f32.mrf.mxu0 }
  0xd7   : > { %v774_v63 = vpop.f32.mrf.mxu1 }
  0xd8   : > { %v775_v28 = vadd.f32 %v774_v63, %v761_v27 }
  0xde   : > { %v787_v57 = vpop.f32.mrf.mxu2  ;;  %v763_v30 = vpop.f32.mrf.mxu0 }
  0xdf   : > { %v788_v29 = vadd.f32 %v787_v57, %v775_v28  ;;  %v800_v60 = vpop.f32.mrf.mxu3  ;;  %v776_v32 = vpop.f32.mrf.mxu1 }
  0xe1   : > { %v801_v33 = vadd.f32 %v800_v60, %v788_v29 }
  0xe3   : > { %v805_v34 = vadd.f32 %v801_v33, %v299_v31  ;;  %811 = sbr.rel (%p1204_p7) target bundleno = 244 (0xf4), region = 44 }
  0xe5   : > { %807 = vst [vmem:[#allocation2 + $0x8] sm:$0xff] %v805_v34 }
  0xe6   : > { %v789_v35 = vpop.f32.mrf.mxu2 }
  0xe7   : > { %v802_v36 = vpop.f32.mrf.mxu3 }
  0xe8   : > { %v812_v37 = vld [vmem:[#allocation2] sm:$0xff] }
  0xe9   : > { %v814_v39 = vld [vmem:[%s1549_s2] sm:$0x3] }
  0xea   : > { %v816_v40 = vperm.slane %v814_v39, 0  ;;  %v817_v41 = vperm.slane %v814_v39, 1  ;;  %v822_v42 = vld [vmem:[%s1550_s3] sm:$0x3] }
  0xeb   : > { %v824_v43 = vperm.slane %v822_v42, 0  ;;  %v825_v44 = vperm.slane %v822_v42, 1 }
  0xec   : > { %v813_v38 = vld [vmem:[#allocation2 + $0x8] sm:$0xff]  ;;  %v820_v45 = vmul.f32 %v816_v40, %v812_v37 }
  0xed   : > { %v821_v46 = vmul.f32 %v817_v41, %v813_v38 }
  0xee   : > { %v828_v47 = vadd.f32 %v824_v43, %v820_v45 }
  0xef   : > { %v829_v48 = vadd.f32 %v825_v44, %v821_v46 }
  0xf1   : > { %v830_v49 = vpack.c.bf16 %v829_v48, %v828_v47 }
  0xf3   : > { %831 = vst [vmem:[%s1551_s4] sm:$0xff] %v830_v49 }
  0xf4 PF: > { %s14_s17 = sadd.s32 1, %s1321_s17   ;;  %s1552_s15 = smov %s1317_s16 }
  0xf5   : > { %p11_p8 = scmp.ge.s32.totalorder %s14_s17, 6   ;;  %s1553_s16 = smov %s1555_s18 }
  0xf7   :  { %13 = sbr.rel (!%p11_p8) target bundleno = 2 (0x2), region = 83 }

// kernel: ae_forward.20
= control target key start
LH: loop header
LB: loop body
LE: loop exit
PB: predicated region body
PF: predicated region fallthrough
CT: control target
= control target key end

     0   :  { %v2563_v1 = vmov 0   ;;  %vm802_vm0 = vcmask 523264   ;;  %s3625_s1 = inlined_call_operand.vmem [shape: bf16[576,128], index: 1, kind: input, shape index: {}]   ;;  %s3626_s2 = inlined_call_operand.vmem [shape: f32[256,1], index: 2, kind: input, shape index: {}]   ;;  %s3627_s0 = inlined_call_operand.vmem [shape: bf16[256,576], index: 0, kind: input, shape index: {}]   ;;  %s3628_s3 = inlined_call_operand.vmem [shape: f32[256,1], index: 3, kind: input, shape index: {}]   ;;  %s3629_s4 = inlined_call_operand.vmem [shape: bf16[256,128], index: 4, kind: output, shape index: {}]  }
   0x1   :  { %v2411_v0 = vld [vmem:[%s3625_s1 + $0x38] sm:$0xff]  ;;  %2560 = vset.pattern.permute.xlu0 %v2563_v1  ;;  %2561 = vset.pattern.permute.xlu1 %v2563_v1  ;;  %v2410_v2 = vld [vmem:[%s3625_s1 + $0x30] sm:$0xff]  ;;  %v1296_v3 = vld [vmem:[%s3626_s2] sm:$0xff] }
   0x2   :  { %2562 = vset.pattern.permute.xlu2 %v2563_v1  ;;  %2535 = vmatpush.bf16.msra.mxu1 %v2411_v0  ;;  %v2409_v4 = vld [vmem:[%s3625_s1 + $0x28] sm:$0xff]  ;;  %v2408_v5 = vld [vmem:[%s3625_s1 + $0x20] sm:$0xff]  ;;  %v2407_v7 = vld [vmem:[%s3625_s1 + $0x18] sm:$0xff] }
   0x3   :  { %2536 = vmatpush.bf16.msra.mxu2 %v2411_v0  ;;  %2537 = vmatpush.bf16.msra.mxu3 %v2411_v0  ;;  %v1297_v6 = vld [vmem:[%s3626_s2 + $0x8] sm:$0xff]  ;;  %v2406_v8 = vld [vmem:[%s3625_s1 + $0x10] sm:$0xff]  ;;  %v2404_v12 = vld [vmem:[%s3625_s1] sm:$0xff] }
   0x4   :  { %851 = vmatpush.bf16.msra.mxu0 %v2411_v0  ;;  %1330 = vperm.xlu0 %2560, %v1296_v3   ;;  %v1298_v9 = vld [vmem:[%s3626_s2 + $0x10] sm:$0xff]  ;;  %v2405_v11 = vld [vmem:[%s3625_s1 + $0x8] sm:$0xff]  ;;  %v1926_v13 = vld [vmem:[%s3627_s0 + $0xa0] sm:$0xf] }
   0x5   :  { %1340 = vperm.xlu1 %2561, %v1298_v9   ;;  %v1302_v10 = vld [vmem:[%s3626_s2 + $0x30] sm:$0xff]  ;;  %v1299_v15 = vld [vmem:[%s3626_s2 + $0x18] sm:$0xff]  ;;  %v2006_v16 = vld [vmem:[%s3627_s0 + $0x140] sm:$0xf] }
   0x6   :  { %2538 = vmatpush.bf16.msra.mxu1 %v2410_v2  ;;  %v2346_v14 = vld [vmem:[%s3627_s0 + $0xb0] sm:$0xf0]  ;;  %v2086_v18 = vld [vmem:[%s3627_s0 + $0x1e0] sm:$0xf]  ;;  %v2427_v22 = vld [vmem:[%s3625_s1 + $0xb8] sm:$0xff] }
   0x7   :  { %2539 = vmatpush.bf16.msra.mxu2 %v2410_v2  ;;  %2540 = vmatpush.bf16.msra.mxu3 %v2410_v2  ;;  %v2366_v17 = vld [vmem:[%s3627_s0 + $0x150] sm:$0xf0]  ;;  %v1846_v20 = vld [vmem:[%s3627_s0] sm:$0xf]  ;;  %v2435_v23 = vld [vmem:[%s3625_s1 + $0xf8] sm:$0xff]  ;;  %v1927_v24 = vor.u32 %v2346_v14, %v1926_v13 }
   0x8   :  { %852 = vmatpush.bf16.msra.mxu0 %v2410_v2  ;;  %v2386_v19 = vld [vmem:[%s3627_s0 + $0x1f0] sm:$0xf0]  ;;  %v2007_v25 = vor.u32 %v2366_v17, %v2006_v16  ;;  %v2419_v28 = vld [vmem:[%s3625_s1 + $0x78] sm:$0xff]  ;;  %v1305_v32 = vld [vmem:[%s3626_s2 + $0x48] sm:$0xff] }
   0x9   :  { %v2326_v21 = vld [vmem:[%s3627_s0 + $0x10] sm:$0xf0]  ;;  %v2087_v26 = vor.u32 %v2386_v19, %v2086_v18  ;;  %v2439_v29 = vld [vmem:[%s3625_s1 + $0x118] sm:$0xff]  ;;  %v1300_v33 = vld [vmem:[%s3626_s2 + $0x20] sm:$0xff] }
   0xa   :  { %2541 = vmatpush.bf16.msra.mxu1 %v2409_v4  ;;  %v1847_v27 = vor.u32 %v2326_v21, %v1846_v20  ;;  %v2426_v30 = vld [vmem:[%s3625_s1 + $0xb0] sm:$0xff]  ;;  %v1303_v36 = vld [vmem:[%s3626_s2 + $0x38] sm:$0xff]  ;;  %v2425_v37 = vld [vmem:[%s3625_s1 + $0xa8] sm:$0xff]  ;;  %1350 = vperm.xlu2 %2562, %v1300_v33  }
   0xb   :  { %2542 = vmatpush.bf16.msra.mxu2 %v2409_v4  ;;  %2543 = vmatpush.bf16.msra.mxu3 %v2409_v4  ;;  %v2434_v31 = vld [vmem:[%s3625_s1 + $0xf0] sm:$0xff]  ;;  %v2433_v38 = vld [vmem:[%s3625_s1 + $0xe8] sm:$0xff]  ;;  %v2351_v42 = vld [vmem:[%s3627_s0 + $0xd8] sm:$0xf0] }
   0xc   :  { %853 = vmatpush.bf16.msra.mxu0 %v2409_v4  ;;  %1335 = vperm.xlu0 %2560, %v1297_v6   ;;  %v2418_v34 = vld [vmem:[%s3625_s1 + $0x70] sm:$0xff]  ;;  %v2417_v39 = vld [vmem:[%s3625_s1 + $0x68] sm:$0xff]  ;;  %v2424_v44 = vld [vmem:[%s3625_s1 + $0xa0] sm:$0xff] }
   0xd   :  { %1345 = vperm.xlu1 %2561, %v1299_v15   ;;  %v2438_v35 = vld [vmem:[%s3625_s1 + $0x110] sm:$0xff]  ;;  %v2437_v40 = vld [vmem:[%s3625_s1 + $0x108] sm:$0xff]  ;;  %v2432_v45 = vld [vmem:[%s3625_s1 + $0xe0] sm:$0xff] }
   0xe   :  { %2544 = vmatpush.bf16.msra.mxu1 %v2408_v5  ;;  %v1946_v41 = vld [vmem:[%s3627_s0 + $0xc8] sm:$0xf]  ;;  %v2371_v46 = vld [vmem:[%s3627_s0 + $0x178] sm:$0xf0]  ;;  %v1308_v50 = vld [vmem:[%s3626_s2 + $0x60] sm:$0xff] }
   0xf   :  { %2545 = vmatpush.bf16.msra.mxu2 %v2408_v5  ;;  %2546 = vmatpush.bf16.msra.mxu3 %v2408_v5  ;;  %v2026_v43 = vld [vmem:[%s3627_s0 + $0x168] sm:$0xf]  ;;  %v2391_v48 = vld [vmem:[%s3627_s0 + $0x218] sm:$0xf0]  ;;  %v2416_v53 = vld [vmem:[%s3625_s1 + $0x60] sm:$0xff]  ;;  %v1947_v57 = vor.u32 %v2351_v42, %v1946_v41 }
  0x10   :  { %854 = vmatpush.bf16.msra.mxu0 %v2408_v5  ;;  %v2106_v47 = vld [vmem:[%s3627_s0 + $0x208] sm:$0xf]  ;;  %v2331_v52 = vld [vmem:[%s3627_s0 + $0x38] sm:$0xf0]  ;;  %v1306_v54 = vld [vmem:[%s3626_s2 + $0x50] sm:$0xff]  ;;  %v2027_v58 = vor.u32 %v2371_v46, %v2026_v43 }
  0x11   :  { %v1866_v49 = vld [vmem:[%s3627_s0 + $0x28] sm:$0xf]  ;;  %v2423_v55 = vld [vmem:[%s3625_s1 + $0x98] sm:$0xff]  ;;  %v2107_v59 = vor.u32 %v2391_v48, %v2106_v47  ;;  %v2422_v62 = vld [vmem:[%s3625_s1 + $0x90] sm:$0xff] }
  0x12   :  { %2547 = vmatpush.bf16.msra.mxu1 %v2407_v7  ;;  %v1301_v51 = vld [vmem:[%s3626_s2 + $0x28] sm:$0xff]  ;;  %v2431_v56 = vld [vmem:[%s3625_s1 + $0xd8] sm:$0xff]  ;;  %v1867_v60 = vor.u32 %v2331_v52, %v1866_v49  ;;  %v2430_v63 = vld [vmem:[%s3625_s1 + $0xd0] sm:$0xff] }
  0x13   :  { %2548 = vmatpush.bf16.msra.mxu2 %v2407_v7  ;;  %2549 = vmatpush.bf16.msra.mxu3 %v2407_v7  ;;  %v2415_v61 = vld [vmem:[%s3625_s1 + $0x58] sm:$0xff]  ;;  %v1304_v1 = vld [vmem:[%s3626_s2 + $0x40] sm:$0xff]  ;;  %v2414_v2 = vld [vmem:[%s3625_s1 + $0x50] sm:$0xff] }
  0x14   :  { %855 = vmatpush.bf16.msra.mxu0 %v2407_v7  ;;  %1360 = vperm.xlu0 %2560, %v1302_v10   ;;  %v1311_v0 = vld [vmem:[%s3626_s2 + $0x78] sm:$0xff]  ;;  %v1309_v3 = vld [vmem:[%s3626_s2 + $0x68] sm:$0xff]  ;;  %v2436_v6 = vld [vmem:[%s3625_s1 + $0x100] sm:$0xff] }
  0x15   :  { %1365 = vperm.xlu1 %2561, %v1303_v36   ;;  %1355 = vperm.xlu2 %2562, %v1301_v51   ;;  %v2421_v4 = vld [vmem:[%s3625_s1 + $0x88] sm:$0xff]  ;;  %v2356_v9 = vld [vmem:[%s3627_s0 + $0x100] sm:$0xf0]  ;;  %v2046_v10 = vld [vmem:[%s3627_s0 + $0x190] sm:$0xf] }
  0x16   :  { %2550 = vmatpush.bf16.msra.mxu1 %v2406_v8  ;;  %v2429_v5 = vld [vmem:[%s3625_s1 + $0xc8] sm:$0xff]  ;;  %v2376_v13 = vld [vmem:[%s3627_s0 + $0x1a0] sm:$0xf0]  ;;  %v2126_v14 = vld [vmem:[%s3627_s0 + $0x230] sm:$0xf] }
  0x17   :  { %2551 = vmatpush.bf16.msra.mxu2 %v2406_v8  ;;  %2552 = vmatpush.bf16.msra.mxu3 %v2406_v8  ;;  %v2413_v7 = vld [vmem:[%s3625_s1 + $0x48] sm:$0xff]  ;;  %v2396_v15 = vld [vmem:[%s3627_s0 + $0x240] sm:$0xf0]  ;;  %v1886_v16 = vld [vmem:[%s3627_s0 + $0x50] sm:$0xf] }
  0x18   :  { %856 = vmatpush.bf16.msra.mxu0 %v2406_v8  ;;  %v1966_v8 = vld [vmem:[%s3627_s0 + $0xf0] sm:$0xf]  ;;  %v1307_v18 = vld [vmem:[%s3626_s2 + $0x58] sm:$0xff]  ;;  %v2336_v19 = vld [vmem:[%s3627_s0 + $0x60] sm:$0xf0] }
  0x19   :  { %v1314_v17 = vld [vmem:[%s3626_s2 + $0x90] sm:$0xff]  ;;  %v1312_v20 = vld [vmem:[%s3626_s2 + $0x80] sm:$0xff]  ;;  %v2146_v33 = vld [vmem:[%s3627_s0 + $0x258] sm:$0xf] }
  0x1a   :  { %2553 = vmatpush.bf16.msra.mxu1 %v2405_v11  ;;  %v2412_v21 = vld [vmem:[%s3625_s1 + $0x40] sm:$0xff]  ;;  %v1313_v36 = vld [vmem:[%s3626_s2 + $0x88] sm:$0xff]  ;;  %v1848_v48 = vld [vmem:[%s3627_s0 + $0x14] sm:$0xf0] }
  0x1b   :  { %2554 = vmatpush.bf16.msra.mxu2 %v2405_v11  ;;  %2555 = vmatpush.bf16.msra.mxu3 %v2405_v11  ;;  %v1321_v46 = vld [vmem:[%s3626_s2 + $0xc8] sm:$0xff]  ;;  %v2324_v47 = vld [vmem:[%s3627_s0 + $0x4] sm:$0xf]  ;;  %v1856_v52 = vld [vmem:[%s3627_s0 + $0x1c] sm:$0xf0] }
  0x1c   :  { %857 = vmatpush.bf16.msra.mxu0 %v2405_v11  ;;  %1375 = vperm.xlu0 %2560, %v1305_v32   ;;  %v2420_v11 = vld [vmem:[%s3625_s1 + $0x80] sm:$0xff]  ;;  %v2381_v32 = vld [vmem:[%s3627_s0 + $0x1c8] sm:$0xf0]  ;;  %v1854_v49 = vld [vmem:[%s3627_s0 + $0x8] sm:$0xf] }
  0x1d   :  { %1380 = vperm.xlu1 %2561, %v1306_v54   ;;  %1370 = vperm.xlu2 %2562, %v1304_v1   ;;  %v2325_v51 = vld [vmem:[%s3627_s0 + $0xc] sm:$0xf]  ;;  %v1319_v54 = vld [vmem:[%s3626_s2 + $0xb8] sm:$0xff] }
  0x1e   :  { %2556 = vmatpush.bf16.msra.mxu1 %v2404_v12  ;;  %v2329_v1 = vld [vmem:[%s3627_s0 + $0x2c] sm:$0xf] }
  0x1f   :  { %2557 = vmatpush.bf16.msra.mxu2 %v2404_v12  ;;  %2558 = vmatpush.bf16.msra.mxu3 %v2404_v12 }
  0x20   :  { %858 = vmatpush.bf16.msra.mxu0 %v2404_v12  ;;  %v2428_v12 = vld [vmem:[%s3625_s1 + $0xc0] sm:$0xff] }
  0x21   :  { %879 = vmatmul.bf16.vlgmr.msra.gmra.mxu1 %v1927_v24  ;;  %v2127_v24 = vor.u32 %v2396_v15, %v2126_v14 }
  0x22   :  { %899 = vmatmul.bf16.vlgmr.msra.gmra.mxu2 %v2007_v25  ;;  %919 = vmatmul.bf16.vlgmr.msra.gmra.mxu3 %v2087_v26  ;;  %v1887_v25 = vor.u32 %v2336_v19, %v1886_v16  ;;  %v1317_v26 = vld [vmem:[%s3626_s2 + $0xa8] sm:$0xff]  ;;  %v1527_v16 = vld [vmem:[%s3628_s3 + $0x38] sm:$0xff]  ;;  %v2334_v19 = vld [vmem:[%s3627_s0 + $0x54] sm:$0xf] }
  0x23   :  { %1029 = vmatpush.bf16.msrb.mxu2 %v2427_v22  ;;  %1118 = vmatpush.bf16.msrb.mxu3 %v2435_v23  ;;  %v1967_v22 = vor.u32 %v2356_v9, %v1966_v8  ;;  %v2047_v23 = vor.u32 %v2376_v13, %v2046_v10  ;;  %v1325_v8 = vld [vmem:[%s3626_s2 + $0xe8] sm:$0xff]  ;;  %v1882_v9 = vld [vmem:[%s3627_s0 + $0x38] sm:$0xf] }
  0x24   :  { %859 = vmatmul.bf16.vlgmr.msra.gmra.mxu0 %v1847_v27  ;;  %940 = vmatpush.bf16.msrb.mxu1 %v2419_v28  ;;  %v1310_v27 = vld [vmem:[%s3626_s2 + $0x70] sm:$0xff]  ;;  %v1315_v28 = vld [vmem:[%s3626_s2 + $0x98] sm:$0xff]  ;;  %v2333_v10 = vld [vmem:[%s3627_s0 + $0x48] sm:$0xf0] }
  0x25   :  { %1211 = vmatpush.bf16.msrb.mxu0 %v2439_v29  ;;  %1390 = vperm.xlu0 %2560, %v1308_v50   ;;  %v1986_v29 = vld [vmem:[%s3627_s0 + $0x118] sm:$0xf]  ;;  %v2327_v50 = vld [vmem:[%s3627_s0 + $0x18] sm:$0xf0]  ;;  %v1883_v15 = vor.u32 %v2333_v10, %v1882_v9 }
  0x26   :  { %1395 = vperm.xlu1 %2561, %v1309_v3   ;;  %1385 = vperm.xlu2 %2562, %v1307_v18   ;;  %v1874_v3 = vld [vmem:[%s3627_s0 + $0x30] sm:$0xf]  ;;  %v1525_v18 = vld [vmem:[%s3628_s3 + $0x28] sm:$0xff] }
  0x27   :  { %1030 = vmatpush.bf16.msrb.mxu2 %v2426_v30  ;;  %1119 = vmatpush.bf16.msrb.mxu3 %v2434_v31  ;;  %v2361_v30 = vld [vmem:[%s3627_s0 + $0x128] sm:$0xf0]  ;;  %v2066_v31 = vld [vmem:[%s3627_s0 + $0x1b8] sm:$0xf] }
  0x28   :  { %941 = vmatpush.bf16.msrb.mxu1 %v2418_v34  ;;  %v2401_v34 = vld [vmem:[%s3627_s0 + $0x268] sm:$0xf0]  ;;  %v2067_v41 = vor.u32 %v2381_v32, %v2066_v31 }
  0x29   :  { %1212 = vmatpush.bf16.msrb.mxu0 %v2438_v35  ;;  %v1320_v35 = vld [vmem:[%s3626_s2 + $0xc0] sm:$0xff]  ;;  %v2147_v42 = vor.u32 %v2401_v34, %v2146_v33  ;;  %v1533_v33 = vld [vmem:[%s3628_s3 + $0x68] sm:$0xff]  ;;  %v1523_v34 = vld [vmem:[%s3628_s3 + $0x18] sm:$0xff] }
  0x2b   :  { %1031 = vmatpush.bf16.msrb.mxu2 %v2425_v37  ;;  %1120 = vmatpush.bf16.msrb.mxu3 %v2433_v38  ;;  %v1906_v37 = vld [vmem:[%s3627_s0 + $0x78] sm:$0xf]  ;;  %v2341_v38 = vld [vmem:[%s3627_s0 + $0x88] sm:$0xf0] }
  0x2c   :  { %942 = vmatpush.bf16.msrb.mxu1 %v2417_v39  ;;  %v1318_v39 = vld [vmem:[%s3626_s2 + $0xb0] sm:$0xff]  ;;  %v1907_v43 = vor.u32 %v2341_v38, %v1906_v37  ;;  %v2339_v37 = vld [vmem:[%s3627_s0 + $0x7c] sm:$0xf] }
  0x2d   :  { %1213 = vmatpush.bf16.msrb.mxu0 %v2437_v40  ;;  %1405 = vperm.xlu0 %2560, %v1311_v0   ;;  %v1987_v40 = vor.u32 %v2361_v30, %v1986_v29  ;;  %v1327_v0 = vld [vmem:[%s3626_s2 + $0xf8] sm:$0xff]  ;;  %v1526_v38 = vld [vmem:[%s3628_s3 + $0x30] sm:$0xff] }
  0x2e   :  { %1410 = vperm.xlu1 %2561, %v1312_v20   ;;  %1400 = vperm.xlu2 %2562, %v1310_v27   ;;  %v1888_v20 = vld [vmem:[%s3627_s0 + $0x64] sm:$0xf0]  ;;  %v2338_v27 = vld [vmem:[%s3627_s0 + $0x70] sm:$0xf0] }
  0x2f   :  { %1032 = vmatpush.bf16.msrb.mxu2 %v2424_v44  ;;  %1121 = vmatpush.bf16.msrb.mxu3 %v2432_v45  ;;  %v1323_v44 = vld [vmem:[%s3626_s2 + $0xd8] sm:$0xff]  ;;  %v1316_v45 = vld [vmem:[%s3626_s2 + $0xa0] sm:$0xff]  ;;  %v1891_v29 = vor.u32 %v2334_v19, %v1888_v20 }
  0x30   :  { %943 = vmatpush.bf16.msrb.mxu1 %v2416_v53  ;;  %v1326_v53 = vld [vmem:[%s3626_s2 + $0xf0] sm:$0xff] }
  0x31   :  { %884 = vmatmul.bf16.gmra.mxu1 %v1947_v57  ;;  %1214 = vmatpush.bf16.msrb.mxu0 %v2436_v6  ;;  %v1324_v57 = vld [vmem:[%s3626_s2 + $0xe0] sm:$0xff]  ;;  %v1876_v6 = vld [vmem:[%s3627_s0 + $0x44] sm:$0xf0] }
  0x32   :  { %904 = vmatmul.bf16.gmra.mxu2 %v2027_v58  ;;  %924 = vmatmul.bf16.gmra.mxu3 %v2107_v59  ;;  %v1851_v58 = vor.u32 %v2324_v47, %v1848_v48  ;;  %v1855_v59 = vor.u32 %v2327_v50, %v1854_v49  ;;  %v1534_v47 = vld [vmem:[%s3628_s3 + $0x70] sm:$0xff] }
  0x33   :  { %1033 = vmatpush.bf16.msrb.mxu2 %v2423_v55  ;;  %1122 = vmatpush.bf16.msrb.mxu3 %v2431_v56  ;;  %v1862_v55 = vld [vmem:[%s3627_s0 + $0x10] sm:$0xf]  ;;  %v2328_v56 = vld [vmem:[%s3627_s0 + $0x20] sm:$0xf0] }
  0x34   :  { %864 = vmatmul.bf16.gmra.mxu0 %v1867_v60  ;;  %944 = vmatpush.bf16.msrb.mxu1 %v2415_v61  ;;  %v1859_v60 = vor.u32 %v2325_v51, %v1856_v52  ;;  %v1863_v61 = vor.u32 %v2328_v56, %v1862_v55  ;;  %v1539_v55 = vld [vmem:[%s3628_s3 + $0x98] sm:$0xff]  ;;  %v1529_v56 = vld [vmem:[%s3628_s3 + $0x48] sm:$0xff] }
  0x35   :  { %1420 = vperm.xlu0 %2560, %v1314_v17   ;;  %v1520_v17 = vld [vmem:[%s3628_s3] sm:$0xff] }
  0x36   :  { %1425 = vperm.xlu1 %2561, %v1315_v28   ;;  %1415 = vperm.xlu2 %2562, %v1313_v36   ;;  %v1528_v28 = vld [vmem:[%s3628_s3 + $0x40] sm:$0xff] }
  0x37   :  { %1034 = vmatpush.bf16.msrb.mxu2 %v2422_v62  ;;  %1123 = vmatpush.bf16.msrb.mxu3 %v2430_v63  ;;  %v1521_v62 = vld [vmem:[%s3628_s3 + $0x8] sm:$0xff]  ;;  %v1322_v63 = vld [vmem:[%s3626_s2 + $0xd0] sm:$0xff] }
  0x38   :  { %945 = vmatpush.bf16.msrb.mxu1 %v2414_v2  ;;  %v1868_v2 = vld [vmem:[%s3627_s0 + $0x3c] sm:$0xf0] }
  0x3b   :  { %1035 = vmatpush.bf16.msrb.mxu2 %v2421_v4  ;;  %1124 = vmatpush.bf16.msrb.mxu3 %v2429_v5  ;;  %v2332_v4 = vld [vmem:[%s3627_s0 + $0x40] sm:$0xf0]  ;;  %v2330_v5 = vld [vmem:[%s3627_s0 + $0x34] sm:$0xf] }
  0x3c   :  { %946 = vmatpush.bf16.msrb.mxu1 %v2413_v7  ;;  %v1524_v7 = vld [vmem:[%s3628_s3 + $0x20] sm:$0xff]  ;;  %v1875_v13 = vor.u32 %v2332_v4, %v1874_v3  ;;  %v1879_v14 = vor.u32 %v2330_v5, %v1876_v6  ;;  %v1542_v3 = vld [vmem:[%s3628_s3 + $0xb0] sm:$0xff] }
  0x3d   :  { %1435 = vperm.xlu0 %2560, %v1317_v26   ;;  %v1902_v26 = vld [vmem:[%s3627_s0 + $0x60] sm:$0xf]  ;;  %v1942_v4 = vld [vmem:[%s3627_s0 + $0xb0] sm:$0xf]  ;;  %v2348_v5 = vld [vmem:[%s3627_s0 + $0xc0] sm:$0xf0] }
  0x3e   :  { %1440 = vperm.xlu1 %2561, %v1318_v39   ;;  %1430 = vperm.xlu2 %2562, %v1316_v45   ;;  %v1903_v32 = vor.u32 %v2338_v27, %v1902_v26  ;;  %v1908_v39 = vld [vmem:[%s3627_s0 + $0x8c] sm:$0xf0]  ;;  %v1922_v45 = vld [vmem:[%s3627_s0 + $0x88] sm:$0xf]  ;;  %v1540_v6 = vld [vmem:[%s3628_s3 + $0xa0] sm:$0xff] }
  0x3f   :  { %1036 = vmatpush.bf16.msrb.mxu2 %v2420_v11  ;;  %1125 = vmatpush.bf16.msrb.mxu3 %v2428_v12  ;;  %v1522_v11 = vld [vmem:[%s3628_s3 + $0x10] sm:$0xff]  ;;  %v1871_v12 = vor.u32 %v2329_v1, %v1868_v2  ;;  %v1911_v49 = vor.u32 %v2339_v37, %v1908_v39  ;;  %v1936_v1 = vld [vmem:[%s3627_s0 + $0xbc] sm:$0xf0] }
  0x40   :  { %947 = vmatpush.bf16.msrb.mxu1 %v2412_v21  ;;  %v1894_v21 = vld [vmem:[%s3627_s0 + $0x58] sm:$0xf]  ;;  %v1948_v26 = vld [vmem:[%s3627_s0 + $0xdc] sm:$0xf0]  ;;  %v1954_v27 = vld [vmem:[%s3627_s0 + $0xd0] sm:$0xf] }
  0x41   :  { %889 = vmatmul.bf16.gmra.mxu1 %v1967_v22  ;;  %v2337_v22 = vld [vmem:[%s3627_s0 + $0x68] sm:$0xf0] }
  0x42   :  { %909 = vmatmul.bf16.gmra.mxu2 %v2047_v23  ;;  %929 = vmatmul.bf16.gmra.mxu3 %v2127_v24  ;;  %v2335_v23 = vld [vmem:[%s3627_s0 + $0x5c] sm:$0xf]  ;;  %v1896_v24 = vld [vmem:[%s3627_s0 + $0x6c] sm:$0xf0]  ;;  %v1895_v30 = vor.u32 %v2337_v22, %v1894_v21 }
  0x43   :  { %v1899_v31 = vor.u32 %v2335_v23, %v1896_v24  ;;  %v2349_v24 = vld [vmem:[%s3627_s0 + $0xcc] sm:$0xf] }
  0x44   :  { %869 = vmatmul.bf16.gmra.mxu0 %v1887_v25  ;;  %v1530_v25 = vld [vmem:[%s3628_s3 + $0x50] sm:$0xff]  ;;  %v1951_v39 = vor.u32 %v2349_v24, %v1948_v26 }
  0x45   :  { %1450 = vperm.xlu0 %2560, %v1320_v35   ;;  %v1531_v35 = vld [vmem:[%s3628_s3 + $0x58] sm:$0xff] }
  0x46   :  { %1455 = vperm.xlu1 %2561, %v1321_v46   ;;  %1445 = vperm.xlu2 %2562, %v1319_v54   ;;  %v2343_v46 = vld [vmem:[%s3627_s0 + $0x98] sm:$0xf0] }
  0x47   :  { %v1923_v52 = vor.u32 %v2343_v46, %v1922_v45 }
  0x4d   :  { %1465 = vperm.xlu0 %2560, %v1323_v44   ;;  %v1536_v44 = vld [vmem:[%s3628_s3 + $0x80] sm:$0xff] }
  0x4e   :  { %1470 = vperm.xlu1 %2561, %v1324_v57   ;;  %1460 = vperm.xlu2 %2562, %v1322_v63   ;;  %v1537_v57 = vld [vmem:[%s3628_s3 + $0x88] sm:$0xff]  ;;  %v2347_v63 = vld [vmem:[%s3627_s0 + $0xb8] sm:$0xf0] }
  0x51   :  { %894 = vmatmul.bf16.gmra.mxu1 %v1987_v40  ;;  %v1914_v40 = vld [vmem:[%s3627_s0 + $0x80] sm:$0xf] }
  0x52   :  { %914 = vmatmul.bf16.gmra.mxu2 %v2067_v41  ;;  %934 = vmatmul.bf16.gmra.mxu3 %v2147_v42  ;;  %v2342_v41 = vld [vmem:[%s3627_s0 + $0x90] sm:$0xf0]  ;;  %v2340_v42 = vld [vmem:[%s3627_s0 + $0x84] sm:$0xf] }
  0x53   :  { %v1915_v50 = vor.u32 %v2342_v41, %v1914_v40 }
  0x54   :  { %874 = vmatmul.bf16.gmra.mxu0 %v1907_v43  ;;  %v1916_v43 = vld [vmem:[%s3627_s0 + $0x94] sm:$0xf0] }
  0x55   :  { %1480 = vperm.xlu0 %2560, %v1326_v53   ;;  %v1919_v51 = vor.u32 %v2340_v42, %v1916_v43 }
  0x56   :  { %1485 = vperm.xlu1 %2561, %v1327_v0   ;;  %1475 = vperm.xlu2 %2562, %v1325_v8   ;;  %v2345_v0 = vld [vmem:[%s3627_s0 + $0xac] sm:$0xf] }
  0x5d   :  { %1559 = vperm.xlu0 %2560, %v1521_v62   ;;  %v1934_v62 = vld [vmem:[%s3627_s0 + $0xa8] sm:$0xf] }
  0x5e   :  { %1564 = vperm.xlu1 %2561, %v1522_v11   ;;  %1554 = vperm.xlu2 %2562, %v1520_v17   ;;  %v1935_v9 = vor.u32 %v2347_v63, %v1934_v62  ;;  %v1939_v11 = vor.u32 %v2345_v0, %v1936_v1  ;;  %v1543_v17 = vld [vmem:[%s3628_s3 + $0xb8] sm:$0xff]  ;;  %v1968_v62 = vld [vmem:[%s3627_s0 + $0x104] sm:$0xf0]  ;;  %v2357_v0 = vld [vmem:[%s3627_s0 + $0x108] sm:$0xf0] }
  0x5f   :  { %v1974_v63 = vld [vmem:[%s3627_s0 + $0xf8] sm:$0xf]  ;;  %v2355_v1 = vld [vmem:[%s3627_s0 + $0xfc] sm:$0xf] }
  0x61   :  { %948 = vmatmul.bf16.vlgmr.msrb.gmra.mxu1 %v1851_v58 }
  0x62   :  { %1037 = vmatmul.bf16.vlgmr.msrb.gmra.mxu2 %v1855_v59  ;;  %1126 = vmatmul.bf16.vlgmr.msrb.gmra.mxu3 %v1859_v60  ;;  %v2344_v59 = vld [vmem:[%s3627_s0 + $0xa4] sm:$0xf] }
  0x63   :  { %v1532_v60 = vld [vmem:[%s3628_s3 + $0x60] sm:$0xff] }
  0x64   :  { %2308 = vmatmul.msk.bf16.vlgmr.msrb.gmra.mxu0 %vm802_vm0, %v1863_v61  ;;  %v3032_v48 = vpop.permute.xlu2 %1350  ;;  %v1928_v61 = vld [vmem:[%s3627_s0 + $0xb4] sm:$0xf0] }
  0x65   :  { %1574 = vperm.xlu0 %2560, %v1524_v7   ;;  %v1931_v8 = vor.u32 %v2344_v59, %v1928_v61  ;;  %v2354_v61 = vld [vmem:[%s3627_s0 + $0xf4] sm:$0xf] }
  0x66   :  { %1579 = vperm.xlu1 %2561, %v1525_v18   ;;  %1569 = vperm.xlu2 %2562, %v1523_v34   ;;  %v2353_v34 = vld [vmem:[%s3627_s0 + $0xe8] sm:$0xf0] }
  0x6d   :  { %1589 = vperm.xlu0 %2560, %v1527_v16   ;;  %v1535_v16 = vld [vmem:[%s3628_s3 + $0x78] sm:$0xff] }
  0x6e   :  { %1594 = vperm.xlu1 %2561, %v1528_v28   ;;  %1584 = vperm.xlu2 %2562, %v1526_v38   ;;  %v2352_v28 = vld [vmem:[%s3627_s0 + $0xe0] sm:$0xf0] }
  0x6f   :  { %v3048_v58 = vpop.permute.xlu2 %1355  ;;  %v1955_v40 = vor.u32 %v2352_v28, %v1954_v27  ;;  %v1547_v27 = vld [vmem:[%s3628_s3 + $0xd8] sm:$0xff] }
  0x71   :  { %953 = vmatmul.bf16.gmra.mxu1 %v1871_v12  ;;  %v1943_v12 = vor.u32 %v2348_v5, %v1942_v4  ;;  %v1976_v4 = vld [vmem:[%s3627_s0 + $0x10c] sm:$0xf0]  ;;  %v1982_v5 = vld [vmem:[%s3627_s0 + $0x100] sm:$0xf] }
  0x72   :  { %1042 = vmatmul.bf16.gmra.mxu2 %v1875_v13  ;;  %1131 = vmatmul.bf16.gmra.mxu3 %v1879_v14 }
  0x74   :  { %2309 = vmatmul.msk.bf16.gmra.mxu0 %vm802_vm0, %v1883_v15  ;;  %v1545_v15 = vld [vmem:[%s3628_s3 + $0xc8] sm:$0xff] }
  0x75   :  { %1604 = vperm.xlu0 %2560, %v1530_v25   ;;  %v1538_v25 = vld [vmem:[%s3628_s3 + $0x90] sm:$0xff] }
  0x76   :  { %v2997_v36 = vpop.permute.xlu0 %1330  ;;  %1609 = vperm.xlu1 %2561, %v1531_v35   ;;  %1599 = vperm.xlu2 %2562, %v1529_v56   ;;  %v1546_v35 = vld [vmem:[%s3628_s3 + $0xd0] sm:$0xff] }
  0x77   :  { %v3037_v54 = vpop.permute.xlu1 %1340  ;;  %v3091_v14 = vpop.permute.xlu2 %1370 }
  0x7d   :  { %1619 = vperm.xlu0 %2560, %v1533_v33   ;;  %v1962_v33 = vld [vmem:[%s3627_s0 + $0xd8] sm:$0xf] }
  0x7e   :  { %1624 = vperm.xlu1 %2561, %v1534_v47   ;;  %v3034_v53 = vpop.permute.xlu0 %1335  ;;  %1614 = vperm.xlu2 %2562, %v1532_v60   ;;  %v1963_v43 = vor.u32 %v2353_v34, %v1962_v33  ;;  %v1551_v47 = vld [vmem:[%s3628_s3 + $0xf8] sm:$0xff]  ;;  %v1544_v60 = vld [vmem:[%s3628_s3 + $0xc0] sm:$0xff] }
  0x7f   :  { %v3085_v7 = vpop.permute.xlu1 %1345 }
  0x81   :  { %958 = vmatmul.bf16.gmra.mxu1 %v1891_v29  ;;  %v2350_v29 = vld [vmem:[%s3627_s0 + $0xd4] sm:$0xf] }
  0x82   :  { %1047 = vmatmul.bf16.gmra.mxu2 %v1895_v30  ;;  %1136 = vmatmul.bf16.gmra.mxu3 %v1899_v31  ;;  %v1956_v30 = vld [vmem:[%s3627_s0 + $0xe4] sm:$0xf0]  ;;  %v3136_v31 = vpop.permute.xlu2 %1385 }
  0x83   :  { %v1959_v42 = vor.u32 %v2350_v29, %v1956_v30 }
  0x84   :  { %2310 = vmatmul.msk.bf16.gmra.mxu0 %vm802_vm0, %v1903_v32  ;;  %v1548_v32 = vld [vmem:[%s3628_s3 + $0xe0] sm:$0xff] }
  0x85   :  { %1634 = vperm.xlu0 %2560, %v1536_v44  }
  0x86   :  { %1639 = vperm.xlu1 %2561, %v1537_v57   ;;  %v3071_v2 = vpop.permute.xlu0 %1360  ;;  %1629 = vperm.xlu2 %2562, %v1535_v16   ;;  %v1979_v16 = vor.u32 %v2355_v1, %v1976_v4 }
  0x87   :  { %v3111_v22 = vpop.permute.xlu1 %1365 }
  0x8d   :  { %1649 = vperm.xlu0 %2560, %v1539_v55  }
  0x8e   :  { %1654 = vperm.xlu1 %2561, %v1540_v6   ;;  %v3105_v19 = vpop.permute.xlu0 %1375  ;;  %1644 = vperm.xlu2 %2562, %v1538_v25   ;;  %v2358_v6 = vld [vmem:[%s3627_s0 + $0x110] sm:$0xf0] }
  0x8f   :  { %v3160_v46 = vpop.permute.xlu1 %1380 }
  0x91   :  { %963 = vmatmul.bf16.gmra.mxu1 %v1911_v49  ;;  %v1541_v49 = vld [vmem:[%s3628_s3 + $0xa8] sm:$0xff] }
  0x92   :  { %1052 = vmatmul.bf16.gmra.mxu2 %v1915_v50  ;;  %1141 = vmatmul.bf16.gmra.mxu3 %v1919_v51  ;;  %v1549_v50 = vld [vmem:[%s3628_s3 + $0xe8] sm:$0xff] }
  0x94   :  { %2311 = vmatmul.msk.bf16.gmra.mxu0 %vm802_vm0, %v1923_v52  ;;  %v3174_v52 = vpop.permute.xlu2 %1400 }
  0x95   :  { %1664 = vperm.xlu0 %2560, %v1542_v3  }
  0x96   :  { %1669 = vperm.xlu1 %2561, %v1543_v17   ;;  %1659 = vperm.xlu2 %2562, %v1541_v49   ;;  %v1983_v17 = vor.u32 %v2358_v6, %v1982_v5  ;;  %v1996_v49 = vld [vmem:[%s3627_s0 + $0x134] sm:$0xf0] }
  0x97   :  { %v3156_v44 = vpop.permute.xlu0 %1390 }
  0x98   :  { %v3202_v3 = vpop.permute.xlu1 %1395 }
  0x9c   :  { %v3219_v24 = vpop.permute.xlu2 %1415 }
  0x9d   :  { %1679 = vperm.xlu0 %2560, %v1545_v15  }
  0x9e   :  { %v3087_v10 = vpop.f32.mrf.mxu1  ;;  %1684 = vperm.xlu1 %2561, %v1546_v35   ;;  %1674 = vperm.xlu2 %2562, %v1544_v60   ;;  %v2359_v35 = vld [vmem:[%s3627_s0 + $0x11c] sm:$0xf] }
  0x9f   :  { %v3182_v59 = vpop.permute.xlu0 %1405  ;;  %v2363_v60 = vld [vmem:[%s3627_s0 + $0x138] sm:$0xf0] }
  0xa0   :  { %v3231_v29 = vpop.permute.xlu1 %1410 }
  0xa1   :  { %v3089_v13 = vpop.f32.mrf.mxu0  ;;  %968 = vmatmul.bf16.gmra.mxu1 %v1931_v8 }
  0xa2   :  { %1057 = vmatmul.bf16.gmra.mxu2 %v1935_v9  ;;  %1146 = vmatmul.bf16.gmra.mxu3 %v1939_v11  ;;  %v1971_v11 = vor.u32 %v2354_v61, %v1968_v62 }
  0xa4   :  { %2312 = vmatmul.msk.bf16.gmra.mxu0 %vm802_vm0, %v1943_v12  ;;  %v1975_v12 = vor.u32 %v2357_v0, %v1974_v63  ;;  %v3239_v34 = vpop.permute.xlu2 %1430 }
  0xa5   :  { %v3103_v18 = vpop.f32.mrf.mxu2  ;;  %v3107_v20 = vpop.f32.mrf.mxu3  ;;  %1694 = vperm.xlu0 %2560, %v1548_v32   ;;  %3635 = vst [vmem:[#allocation7_spill] sm:$0xff] %v3239_v34 }
  0xa6   :  { %3630 = vst [vmem:[#allocation2_spill] sm:$0xff] %v3107_v20  ;;  %v3109_v21 = vpop.f32.mrf.mxu1  ;;  %1699 = vperm.xlu1 %2561, %v1549_v50   ;;  %1689 = vperm.xlu2 %2562, %v1547_v27   ;;  %v2002_v50 = vld [vmem:[%s3627_s0 + $0x128] sm:$0xf] }
  0xa7   :  { %v3224_v26 = vpop.permute.xlu0 %1420  ;;  %v2003_v6 = vor.u32 %v2363_v60, %v2002_v50  ;;  %v2367_v50 = vld [vmem:[%s3627_s0 + $0x158] sm:$0xf0]  ;;  %v2365_v60 = vld [vmem:[%s3627_s0 + $0x14c] sm:$0xf] }
  0xa9   :  { %v3113_v23 = vpop.f32.mrf.mxu0 }
  0xad   :  { %v3150_v37 = vpop.f32.mrf.mxu2  ;;  %v3152_v38 = vpop.f32.mrf.mxu3  ;;  %1709 = vperm.xlu0 %2560, %v1551_v47   ;;  %v2360_v47 = vld [vmem:[%s3627_s0 + $0x124] sm:$0xf] }
  0xae   :  { %3631 = vst [vmem:[#allocation3_spill] sm:$0xff] %v3152_v38  ;;  %v3154_v41 = vpop.f32.mrf.mxu1  ;;  %v1999_v5 = vor.u32 %v2360_v47, %v1996_v49  ;;  %v2008_v47 = vld [vmem:[%s3627_s0 + $0x154] sm:$0xf0]  ;;  %v2014_v49 = vld [vmem:[%s3627_s0 + $0x148] sm:$0xf] }
  0xaf   :  { %v3268_v61 = vpop.permute.xlu0 %1435 }
  0xb0   :  { %3636 = vst [vmem:[#allocation8_spill] sm:$0xff] %v3268_v61 }
  0xb1   :  { %v3158_v45 = vpop.f32.mrf.mxu0  ;;  %973 = vmatmul.bf16.gmra.mxu1 %v1951_v39  ;;  %v1988_v39 = vld [vmem:[%s3627_s0 + $0x12c] sm:$0xf0] }
  0xb2   :  { %1062 = vmatmul.bf16.gmra.mxu2 %v1955_v40  ;;  %1151 = vmatmul.bf16.gmra.mxu3 %v1959_v42  ;;  %v1550_v40 = vld [vmem:[%s3628_s3 + $0xf0] sm:$0xff]  ;;  %v1994_v42 = vld [vmem:[%s3627_s0 + $0x120] sm:$0xf]  ;;  %v1991_v0 = vor.u32 %v2359_v35, %v1988_v39 }
  0xb3   :  { %1704 = vperm.xlu2 %2562, %v1550_v40  }
  0xb4   :  { %2313 = vmatmul.msk.bf16.gmra.mxu0 %vm802_vm0, %v1963_v43  ;;  %v2362_v43 = vld [vmem:[%s3627_s0 + $0x130] sm:$0xf0] }
  0xb5   :  { %v3172_v51 = vpop.f32.mrf.mxu2  ;;  %v3176_v55 = vpop.f32.mrf.mxu3  ;;  %v1995_v1 = vor.u32 %v2362_v43, %v1994_v42  ;;  %v2364_v43 = vld [vmem:[%s3627_s0 + $0x144] sm:$0xf] }
  0xb6   :  { %3632 = vst [vmem:[#allocation4_spill] sm:$0xff] %v3176_v55  ;;  %v3178_v56 = vpop.f32.mrf.mxu1 }
  0xb7   :  { %v3287_v35 = vpop.permute.xlu0 %1450 }
  0xb8   :  { %3642 = vst [vmem:[#allocation14_spill] sm:$0xff] %v3287_v35 }
  0xb9   :  { %v3180_v57 = vpop.f32.mrf.mxu0 }
  0xbd   :  { %v3213_v8 = vpop.f32.mrf.mxu2  ;;  %v3215_v9 = vpop.f32.mrf.mxu3 }
  0xbe   :  { %3633 = vst [vmem:[#allocation5_spill] sm:$0xff] %v3215_v9  ;;  %v3217_v15 = vpop.f32.mrf.mxu1  ;;  %v2015_v9 = vor.u32 %v2367_v50, %v2014_v49 }
  0xc1   :  { %v3221_v25 = vpop.f32.mrf.mxu0  ;;  %978 = vmatmul.bf16.gmra.mxu1 %v1971_v11  ;;  %v3276_v11 = vpop.permute.xlu1 %1425 }
  0xc2   :  { %1067 = vmatmul.bf16.gmra.mxu2 %v1975_v12  ;;  %1156 = vmatmul.bf16.gmra.mxu3 %v1979_v16  ;;  %v3281_v16 = vpop.permute.xlu2 %1445 }
  0xc3   :  { %3639 = vst [vmem:[#allocation11_spill] sm:$0xff] %v3281_v16  ;;  %v3325_v16 = vpop.permute.xlu0 %1465 }
  0xc4   :  { %2314 = vmatmul.msk.bf16.gmra.mxu0 %vm802_vm0, %v1983_v17  ;;  %3647 = vst [vmem:[#allocation19_spill] sm:$0xff] %v3325_v16 }
  0xc5   :  { %v3229_v28 = vpop.f32.mrf.mxu2  ;;  %v3233_v30 = vpop.f32.mrf.mxu3 }
  0xc6   :  { %3634 = vst [vmem:[#allocation6_spill] sm:$0xff] %v3233_v30  ;;  %v3235_v32 = vpop.f32.mrf.mxu1  ;;  %v2011_v30 = vor.u32 %v2364_v43, %v2008_v47 }
  0xc9   :  { %v3237_v33 = vpop.f32.mrf.mxu0  ;;  %v3293_v42 = vpop.permute.xlu1 %1440 }
  0xca   :  { %3643 = vst [vmem:[#allocation15_spill] sm:$0xff] %v3293_v42 }
  0xcd   :  { %v3270_v62 = vpop.f32.mrf.mxu2  ;;  %v3272_v63 = vpop.f32.mrf.mxu3 }
  0xce   :  { %3637 = vst [vmem:[#allocation9_spill] sm:$0xff] %v3270_v62  ;;  %v3274_v4 = vpop.f32.mrf.mxu1 }
  0xcf   :  { %3638 = vst [vmem:[#allocation10_spill] sm:$0xff] %v3272_v63 }
  0xd1   :  { %v3278_v12 = vpop.f32.mrf.mxu0  ;;  %983 = vmatmul.bf16.gmra.mxu1 %v1991_v0  ;;  %v2016_v0 = vld [vmem:[%s3627_s0 + $0x15c] sm:$0xf0]  ;;  %v3328_v42 = vpop.permute.xlu1 %1455 }
  0xd2   :  { %1072 = vmatmul.bf16.gmra.mxu2 %v1995_v1  ;;  %1161 = vmatmul.bf16.gmra.mxu3 %v1999_v5  ;;  %v2022_v1 = vld [vmem:[%s3627_s0 + $0x150] sm:$0xf]  ;;  %v2368_v5 = vld [vmem:[%s3627_s0 + $0x160] sm:$0xf0]  ;;  %v2019_v35 = vor.u32 %v2365_v60, %v2016_v0  ;;  %3648 = vst [vmem:[#allocation20_spill] sm:$0xff] %v3328_v42 }
  0xd3   :  { %v2023_v38 = vor.u32 %v2368_v5, %v2022_v1  ;;  %v2042_v60 = vld [vmem:[%s3627_s0 + $0x178] sm:$0xf]  ;;  %v2373_v0 = vld [vmem:[%s3627_s0 + $0x188] sm:$0xf0] }
  0xd4   :  { %2315 = vmatmul.msk.bf16.gmra.mxu0 %vm802_vm0, %v2003_v6  ;;  %v3319_v6 = vpop.permute.xlu2 %1460 }
  0xd5   :  { %v3283_v17 = vpop.f32.mrf.mxu2  ;;  %v3285_v27 = vpop.f32.mrf.mxu3  ;;  %3644 = vst [vmem:[#allocation16_spill] sm:$0xff] %v3319_v6 }
  0xd6   :  { %3640 = vst [vmem:[#allocation12_spill] sm:$0xff] %v3283_v17  ;;  %v3289_v39 = vpop.f32.mrf.mxu1 }
  0xd7   :  { %3641 = vst [vmem:[#allocation13_spill] sm:$0xff] %v3285_v27 }
  0xd9   :  { %v3291_v40 = vpop.f32.mrf.mxu0  ;;  %v3360_v1 = vpop.permute.xlu1 %1470 }
  0xda   :  { %3651 = vst [vmem:[#allocation23_spill] sm:$0xff] %v3360_v1 }
  0xdc   :  { %v3331_v43 = vpop.permute.xlu2 %1475 }
  0xdd   :  { %v3321_v27 = vpop.f32.mrf.mxu2  ;;  %v3323_v63 = vpop.f32.mrf.mxu3  ;;  %3649 = vst [vmem:[#allocation21_spill] sm:$0xff] %v3331_v43  ;;  %v2043_v43 = vor.u32 %v2373_v0, %v2042_v60 }
  0xde   :  { %3645 = vst [vmem:[#allocation17_spill] sm:$0xff] %v3321_v27  ;;  %v949_v55 = vpop.f32.mrf.mxu1 }
  0xdf   :  { %3646 = vst [vmem:[#allocation18_spill] sm:$0xff] %v3323_v63  ;;  %v950_v6 = vadd.f32 %v949_v55, %v3089_v13  ;;  %v2034_v13 = vld [vmem:[%s3627_s0 + $0x170] sm:$0xf]  ;;  %v2372_v55 = vld [vmem:[%s3627_s0 + $0x180] sm:$0xf0] }
  0xe1   :  { %v1216_v20 = vpop.f32.mrf.mxu0  ;;  %988 = vmatmul.bf16.gmra.mxu1 %v2011_v30  ;;  %v2369_v30 = vld [vmem:[%s3627_s0 + $0x16c] sm:$0xf] }
  0xe2   :  { %1077 = vmatmul.bf16.gmra.mxu2 %v2015_v9  ;;  %1166 = vmatmul.bf16.gmra.mxu3 %v2019_v35  ;;  %v3339_v9 = vpop.permute.xlu0 %1480  ;;  %v2036_v35 = vld [vmem:[%s3627_s0 + $0x184] sm:$0xf0] }
  0xe3   :  { %3650 = vst [vmem:[#allocation22_spill] sm:$0xff] %v3339_v9 }
  0xe4   :  { %2316 = vmatmul.msk.bf16.gmra.mxu0 %vm802_vm0, %v2023_v38  ;;  %v2028_v38 = vld [vmem:[%s3627_s0 + $0x17c] sm:$0xf0]  ;;  %v1555_v34 = vpop.permute.xlu2 %1554 }
  0xe5   :  { %v1038_v27 = vpop.f32.mrf.mxu2  ;;  %v1127_v63 = vpop.f32.mrf.mxu3 }
  0xe6   :  { %v1039_v17 = vadd.f32 %v1038_v27, %v950_v6  ;;  %v951_v47 = vpop.f32.mrf.mxu1 }
  0xe7   :  { %v952_v27 = vadd.f32 %v951_v47, %v3113_v23 }
  0xe8   :  { %v1128_v49 = vadd.f32 %v1127_v63, %v1039_v17  ;;  %v2370_v63 = vld [vmem:[%s3627_s0 + $0x174] sm:$0xf] }
  0xe9   :  { %v1218_v50 = vpop.f32.mrf.mxu0  ;;  %v2039_v47 = vor.u32 %v2370_v63, %v2036_v35 }
  0xea   :  { %v1217_v17 = vadd.f32 %v1216_v20, %v1128_v49  ;;  %v2031_v20 = vor.u32 %v2369_v30, %v2028_v38  ;;  %v2035_v49 = vor.u32 %v2372_v55, %v2034_v13  ;;  %v1560_v38 = vpop.permute.xlu0 %1559 }
  0xec   :  { %v1488_v16 = vmul.f32 %v2997_v36, %v1217_v17  ;;  %v3366_v36 = vpop.permute.xlu1 %1485 }
  0xed   :  { %v1040_v5 = vpop.f32.mrf.mxu2  ;;  %v1129_v9 = vpop.f32.mrf.mxu3 }
  0xee   :  { %v1041_v6 = vadd.f32 %v1040_v5, %v952_v27  ;;  %v954_v23 = vpop.f32.mrf.mxu1  ;;  %v1712_v1 = vadd.f32 %v1555_v34, %v1488_v16  ;;  %v2374_v34 = vld [vmem:[%s3627_s0 + $0x194] sm:$0xf]  ;;  %v2375_v16 = vld [vmem:[%s3627_s0 + $0x19c] sm:$0xf]  ;;  %v2056_v5 = vld [vmem:[%s3627_s0 + $0x1ac] sm:$0xf0] }
  0xef   :  { %v955_v30 = vadd.f32 %v954_v23, %v3158_v45  ;;  %v2054_v45 = vld [vmem:[%s3627_s0 + $0x198] sm:$0xf] }
  0xf0   :  { %v1130_v42 = vadd.f32 %v1129_v9, %v1041_v6  ;;  %v1744_v17 = vmax.f32 %v1712_v1, 0.0  ;;  %v2062_v6 = vld [vmem:[%s3627_s0 + $0x1a0] sm:$0xf] }
  0xf1   :  { %v1221_v61 = vpop.f32.mrf.mxu0  ;;  %993 = vmatmul.bf16.gmra.mxu1 %v2031_v20  ;;  %v2378_v20 = vld [vmem:[%s3627_s0 + $0x1b0] sm:$0xf0] }
  0xf2   :  { %v1219_v62 = vadd.f32 %v1218_v50, %v1130_v42  ;;  %1082 = vmatmul.bf16.gmra.mxu2 %v2035_v49  ;;  %1171 = vmatmul.bf16.gmra.mxu3 %v2039_v47 }
  0xf4   :  { %2317 = vmatmul.msk.bf16.gmra.mxu0 %vm802_vm0, %v2043_v43  ;;  %v1489_v27 = vmul.f32 %v3034_v53, %v1219_v62  ;;  %v2048_v53 = vld [vmem:[%s3627_s0 + $0x1a4] sm:$0xf0]  ;;  %v2377_v62 = vld [vmem:[%s3627_s0 + $0x1a8] sm:$0xf0] }
  0xf5   :  { %v1043_v13 = vpop.f32.mrf.mxu2  ;;  %v1132_v35 = vpop.f32.mrf.mxu3 }
  0xf6   :  { %v1713_v55 = vadd.f32 %v1560_v38, %v1489_v27  ;;  %v1044_v63 = vadd.f32 %v1043_v13, %v955_v30  ;;  %v956_v9 = vpop.f32.mrf.mxu1  ;;  %v2051_v27 = vor.u32 %v2374_v34, %v2048_v53  ;;  %v2055_v30 = vor.u32 %v2377_v62, %v2054_v45 }
  0xf7   :  { %v957_v1 = vadd.f32 %v956_v9, %v3180_v57  ;;  %v2059_v38 = vor.u32 %v2375_v16, %v2056_v5  ;;  %v2063_v57 = vor.u32 %v2378_v20, %v2062_v6  ;;  %v2379_v6 = vld [vmem:[%s3627_s0 + $0x1bc] sm:$0xf]  ;;  %v2382_v20 = vld [vmem:[%s3627_s0 + $0x1d0] sm:$0xf0] }
  0xf8   :  { %v1745_v42 = vmax.f32 %v1713_v55, 0.0  ;;  %v1133_v50 = vadd.f32 %v1132_v35, %v1044_v63  ;;  %v1565_v35 = vpop.permute.xlu1 %1564 }
  0xf9   :  { %v1223_v60 = vpop.f32.mrf.mxu0 }
  0xfa   :  { %v2443_v0 = vpack.c.bf16 %v1745_v42, %v1744_v17  ;;  %v1222_v43 = vadd.f32 %v1221_v61, %v1133_v50 }
  0xfc   :  { %2444 = vst [vmem:[%s3629_s4] sm:$0xff] %v2443_v0   ;;  %v1490_v13 = vmul.f32 %v3037_v54, %v1222_v43  ;;  %v1570_v0 = vpop.permute.xlu2 %1569 }
  0xfd   :  { %v1045_v49 = vpop.f32.mrf.mxu2  ;;  %v1134_v47 = vpop.f32.mrf.mxu3 }
  0xfe   :  { %v1046_v23 = vadd.f32 %v1045_v49, %v957_v1  ;;  %v959_v61 = vpop.f32.mrf.mxu1  ;;  %v1714_v17 = vadd.f32 %v1565_v35, %v1490_v13  ;;  %v2380_v49 = vld [vmem:[%s3627_s0 + $0x1c4] sm:$0xf] }
  0xff   :  { %v960_v50 = vadd.f32 %v959_v61, %v3221_v25  ;;  %v2074_v25 = vld [vmem:[%s3627_s0 + $0x1c0] sm:$0xf]  ;;  %v2383_v61 = vld [vmem:[%s3627_s0 + $0x1d8] sm:$0xf0] }
 0x100   :  { %v1135_v55 = vadd.f32 %v1134_v47, %v1046_v23  ;;  %v1746_v16 = vmax.f32 %v1714_v17, 0.0  ;;  %v2076_v23 = vld [vmem:[%s3627_s0 + $0x1d4] sm:$0xf0]  ;;  %v2075_v35 = vor.u32 %v2382_v20, %v2074_v25 }
 0x101   :  { %v1226_v63 = vpop.f32.mrf.mxu0  ;;  %998 = vmatmul.bf16.gmra.mxu1 %v2051_v27  ;;  %v2079_v17 = vor.u32 %v2380_v49, %v2076_v23  ;;  %v2384_v49 = vld [vmem:[%s3627_s0 + $0x1e4] sm:$0xf]  ;;  %v2387_v23 = vld [vmem:[%s3627_s0 + $0x1f8] sm:$0xf0] }
 0x102   :  { %v1224_v9 = vadd.f32 %v1223_v60, %v1135_v55  ;;  %1087 = vmatmul.bf16.gmra.mxu2 %v2055_v30  ;;  %1176 = vmatmul.bf16.gmra.mxu3 %v2059_v38  ;;  %v2082_v30 = vld [vmem:[%s3627_s0 + $0x1c8] sm:$0xf] }
 0x104   :  { %2318 = vmatmul.msk.bf16.gmra.mxu0 %vm802_vm0, %v2063_v57  ;;  %v1491_v42 = vmul.f32 %v3085_v7, %v1224_v9  ;;  %v2068_v7 = vld [vmem:[%s3627_s0 + $0x1cc] sm:$0xf0] }
 0x105   :  { %v1048_v34 = vpop.f32.mrf.mxu2  ;;  %v1137_v62 = vpop.f32.mrf.mxu3  ;;  %v2071_v55 = vor.u32 %v2379_v6, %v2068_v7 }
 0x106   :  { %v1715_v53 = vadd.f32 %v1570_v0, %v1491_v42  ;;  %v1049_v45 = vadd.f32 %v1048_v34, %v960_v50  ;;  %v961_v54 = vpop.f32.mrf.mxu1  ;;  %v2083_v42 = vor.u32 %v2383_v61, %v2082_v30  ;;  %v1575_v34 = vpop.permute.xlu0 %1574 }
 0x107   :  { %v962_v27 = vadd.f32 %v961_v54, %v3237_v33  ;;  %v1580_v54 = vpop.permute.xlu1 %1579 }
 0x108   :  { %v1747_v43 = vmax.f32 %v1715_v53, 0.0  ;;  %v1138_v1 = vadd.f32 %v1137_v62, %v1049_v45 }
 0x109   :  { %v1228_v60 = vpop.f32.mrf.mxu0 }
 0x10a   :  { %v2448_v5 = vpack.c.bf16 %v1747_v43, %v1746_v16  ;;  %v1227_v47 = vadd.f32 %v1226_v63, %v1138_v1 }
 0x10c   :  { %2520 = vst [vmem:[%s3629_s4 + $0x8] sm:$0xff] %v2448_v5   ;;  %v1492_v63 = vmul.f32 %v3032_v48, %v1227_v47  ;;  %v2385_v47 = vld [vmem:[%s3627_s0 + $0x1ec] sm:$0xf] }
 0x10d   :  { %v1050_v38 = vpop.f32.mrf.mxu2  ;;  %v1139_v13 = vpop.f32.mrf.mxu3 }
 0x10e   :  { %v1051_v57 = vadd.f32 %v1050_v38, %v962_v27  ;;  %v964_v9 = vpop.f32.mrf.mxu1  ;;  %v1716_v53 = vadd.f32 %v1575_v34, %v1492_v63  ;;  %v2096_v27 = vld [vmem:[%s3627_s0 + $0x1fc] sm:$0xf0]  ;;  %v2102_v38 = vld [vmem:[%s3627_s0 + $0x1f0] sm:$0xf] }
 0x10f   :  { %v965_v62 = vadd.f32 %v964_v9, %v3278_v12  ;;  %v2094_v12 = vld [vmem:[%s3627_s0 + $0x1e8] sm:$0xf]  ;;  %v2099_v63 = vor.u32 %v2385_v47, %v2096_v27 }
 0x110   :  { %v1140_v50 = vadd.f32 %v1139_v13, %v1051_v57  ;;  %v1748_v6 = vmax.f32 %v1716_v53, 0.0  ;;  %v2388_v57 = vld [vmem:[%s3627_s0 + $0x200] sm:$0xf0]  ;;  %v1585_v53 = vpop.permute.xlu2 %1584 }
 0x111   :  { %v1231_v33 = vpop.f32.mrf.mxu0  ;;  %1003 = vmatmul.bf16.gmra.mxu1 %v2071_v55 }
 0x112   :  { %v1229_v0 = vadd.f32 %v1228_v60, %v1140_v50  ;;  %1092 = vmatmul.bf16.gmra.mxu2 %v2075_v35  ;;  %1181 = vmatmul.bf16.gmra.mxu3 %v2079_v17  ;;  %v2095_v17 = vor.u32 %v2387_v23, %v2094_v12  ;;  %v2103_v50 = vor.u32 %v2388_v57, %v2102_v38  ;;  %v2390_v12 = vld [vmem:[%s3627_s0 + $0x214] sm:$0xf]  ;;  %v2116_v23 = vld [vmem:[%s3627_s0 + $0x224] sm:$0xf0] }
 0x114   :  { %2319 = vmatmul.msk.bf16.gmra.mxu0 %vm802_vm0, %v2083_v42  ;;  %v1493_v45 = vmul.f32 %v3048_v58, %v1229_v0  ;;  %v2088_v58 = vld [vmem:[%s3627_s0 + $0x1f4] sm:$0xf0] }
 0x115   :  { %v1053_v16 = vpop.f32.mrf.mxu2  ;;  %v1142_v5 = vpop.f32.mrf.mxu3  ;;  %v2091_v9 = vor.u32 %v2384_v49, %v2088_v58  ;;  %v2389_v49 = vld [vmem:[%s3627_s0 + $0x20c] sm:$0xf]  ;;  %v2392_v58 = vld [vmem:[%s3627_s0 + $0x220] sm:$0xf0] }
 0x116   :  { %v1717_v43 = vadd.f32 %v1580_v54, %v1493_v45  ;;  %v1054_v1 = vadd.f32 %v1053_v16, %v965_v62  ;;  %v966_v48 = vpop.f32.mrf.mxu1  ;;  %v1590_v16 = vpop.permute.xlu0 %1589 }
 0x117   :  { %v967_v61 = vadd.f32 %v966_v48, %v3291_v40 }
 0x118   :  { %v1749_v7 = vmax.f32 %v1717_v43, 0.0  ;;  %v1143_v60 = vadd.f32 %v1142_v5, %v1054_v1 }
 0x119   :  { %v1233_v25 = vpop.f32.mrf.mxu0 }
 0x11a   :  { %v2453_v20 = vpack.c.bf16 %v1749_v7, %v1748_v6  ;;  %v1232_v30 = vadd.f32 %v1231_v33, %v1143_v60 }
 0x11c   :  { %2521 = vst [vmem:[%s3629_s4 + $0x10] sm:$0xff] %v2453_v20   ;;  %v1494_v33 = vmul.f32 %v3071_v2, %v1232_v30  ;;  %v2122_v30 = vld [vmem:[%s3627_s0 + $0x218] sm:$0xf] }
 0x11d   :  { %v1055_v13 = vpop.f32.mrf.mxu2  ;;  %v1144_v35 = vpop.f32.mrf.mxu3 }
 0x11e   :  { %v1056_v55 = vadd.f32 %v1055_v13, %v967_v61  ;;  %v969_v42 = vpop.f32.mrf.mxu1  ;;  %v1718_v45 = vadd.f32 %v1585_v53, %v1494_v33  ;;  %v2393_v61 = vld [vmem:[%s3627_s0 + $0x228] sm:$0xf0] }
 0x11f   :  { %v970_v54 = vadd.f32 %v969_v42, %v3087_v10  ;;  %v2114_v10 = vld [vmem:[%s3627_s0 + $0x210] sm:$0xf]  ;;  %v2123_v42 = vor.u32 %v2393_v61, %v2122_v30 }
 0x120   :  { %v1145_v0 = vadd.f32 %v1144_v35, %v1056_v55  ;;  %v1750_v6 = vmax.f32 %v1718_v45, 0.0  ;;  %v2115_v35 = vor.u32 %v2392_v58, %v2114_v10  ;;  %v1600_v45 = vpop.permute.xlu2 %1599  ;;  %v2142_v10 = vld [vmem:[%s3627_s0 + $0x240] sm:$0xf]  ;;  %v2398_v58 = vld [vmem:[%s3627_s0 + $0x250] sm:$0xf0] }
 0x121   :  { %v1236_v40 = vpop.f32.mrf.mxu0  ;;  %1008 = vmatmul.bf16.gmra.mxu1 %v2091_v9 }
 0x122   :  { %v1234_v34 = vadd.f32 %v1233_v25, %v1145_v0  ;;  %1097 = vmatmul.bf16.gmra.mxu2 %v2095_v17  ;;  %1186 = vmatmul.bf16.gmra.mxu3 %v2099_v63  ;;  %v2119_v17 = vor.u32 %v2390_v12, %v2116_v23  ;;  %v1595_v0 = vpop.permute.xlu1 %1594 }
 0x124   :  { %2320 = vmatmul.msk.bf16.gmra.mxu0 %vm802_vm0, %v2103_v50  ;;  %v1495_v62 = vmul.f32 %v3111_v22, %v1234_v34  ;;  %v2108_v22 = vld [vmem:[%s3627_s0 + $0x21c] sm:$0xf0] }
 0x125   :  { %v1058_v43 = vpop.f32.mrf.mxu2  ;;  %v1147_v48 = vpop.f32.mrf.mxu3  ;;  %v2111_v55 = vor.u32 %v2389_v49, %v2108_v22 }
 0x126   :  { %v1719_v1 = vadd.f32 %v1590_v16, %v1495_v62  ;;  %v1059_v5 = vadd.f32 %v1058_v43, %v970_v54  ;;  %v971_v2 = vpop.f32.mrf.mxu1 }
 0x127   :  { %v972_v27 = vadd.f32 %v971_v2, %v3109_v21 }
 0x128   :  { %v1751_v7 = vmax.f32 %v1719_v1, 0.0  ;;  %v1148_v60 = vadd.f32 %v1147_v48, %v1059_v5 }
 0x129   :  { %v1238_v25 = vpop.f32.mrf.mxu0 }
 0x12a   :  { %v2458_v20 = vpack.c.bf16 %v1751_v7, %v1750_v6  ;;  %v1237_v47 = vadd.f32 %v1236_v40, %v1148_v60  ;;  %v2394_v7 = vld [vmem:[%s3627_s0 + $0x234] sm:$0xf]  ;;  %v2397_v60 = vld [vmem:[%s3627_s0 + $0x248] sm:$0xf0] }
 0x12c   :  { %2522 = vst [vmem:[%s3629_s4 + $0x18] sm:$0xff] %v2458_v20   ;;  %v1496_v63 = vmul.f32 %v3091_v14, %v1237_v47  ;;  %v2136_v20 = vld [vmem:[%s3627_s0 + $0x24c] sm:$0xf0] }
 0x12d   :  { %v1060_v38 = vpop.f32.mrf.mxu2  ;;  %v1149_v13 = vpop.f32.mrf.mxu3 }
 0x12e   :  { %v1061_v57 = vadd.f32 %v1060_v38, %v972_v27  ;;  %v974_v9 = vpop.f32.mrf.mxu1  ;;  %v1720_v40 = vadd.f32 %v1595_v0, %v1496_v63 }
 0x12f   :  { %v975_v53 = vadd.f32 %v974_v9, %v3154_v41  ;;  %v2134_v41 = vld [vmem:[%s3627_s0 + $0x238] sm:$0xf]  ;;  %v1605_v9 = vpop.permute.xlu0 %1604 }
 0x130   :  { %v1150_v50 = vadd.f32 %v1149_v13, %v1061_v57  ;;  %v1752_v1 = vmax.f32 %v1720_v40, 0.0  ;;  %v2135_v30 = vor.u32 %v2397_v60, %v2134_v41  ;;  %v2143_v57 = vor.u32 %v2398_v58, %v2142_v10 }
 0x131   :  { %v1241_v21 = vpop.f32.mrf.mxu0  ;;  %1013 = vmatmul.bf16.gmra.mxu1 %v2111_v55 }
 0x132   :  { %v1239_v33 = vadd.f32 %v1238_v25, %v1150_v50  ;;  %1102 = vmatmul.bf16.gmra.mxu2 %v2115_v35  ;;  %1191 = vmatmul.bf16.gmra.mxu3 %v2119_v17  ;;  %v2395_v25 = vld [vmem:[%s3627_s0 + $0x23c] sm:$0xf]  ;;  %v1610_v50 = vpop.permute.xlu1 %1609 }
 0x133   :  { %v2139_v38 = vor.u32 %v2395_v25, %v2136_v20 }
 0x134   :  { %2321 = vmatmul.msk.bf16.gmra.mxu0 %vm802_vm0, %v2123_v42  ;;  %v1497_v34 = vmul.f32 %v3105_v19, %v1239_v33  ;;  %v2128_v19 = vld [vmem:[%s3627_s0 + $0x244] sm:$0xf0] }
 0x135   :  { %v1063_v62 = vpop.f32.mrf.mxu2  ;;  %v1152_v43 = vpop.f32.mrf.mxu3  ;;  %v2131_v27 = vor.u32 %v2394_v7, %v2128_v19 }
 0x136   :  { %v1721_v54 = vadd.f32 %v1600_v45, %v1497_v34  ;;  %v1064_v16 = vadd.f32 %v1063_v62, %v975_v53  ;;  %v976_v14 = vpop.f32.mrf.mxu1 }
 0x137   :  { %v977_v22 = vadd.f32 %v976_v14, %v3178_v56  ;;  %v2400_v14 = vld [vmem:[%s3627_s0 + $0x264] sm:$0xf] }
 0x138   :  { %v1753_v5 = vmax.f32 %v1721_v54, 0.0  ;;  %v1153_v48 = vadd.f32 %v1152_v43, %v1064_v16  ;;  %v2399_v16 = vld [vmem:[%s3627_s0 + $0x25c] sm:$0xf]  ;;  %v2402_v43 = vld [vmem:[%s3627_s0 + $0x270] sm:$0xf0] }
 0x139   :  { %v1243_v2 = vpop.f32.mrf.mxu0 }
 0x13a   :  { %v2463_v6 = vpack.c.bf16 %v1753_v5, %v1752_v1  ;;  %v1242_v49 = vadd.f32 %v1241_v21, %v1153_v48  ;;  %v2156_v1 = vld [vmem:[%s3627_s0 + $0x274] sm:$0xf0] }
 0x13c   :  { %2523 = vst [vmem:[%s3629_s4 + $0x20] sm:$0xff] %v2463_v6   ;;  %v1498_v13 = vmul.f32 %v3160_v46, %v1242_v49  ;;  %v2403_v6 = vld [vmem:[%s3627_s0 + $0x278] sm:$0xf0]  ;;  %v2159_v49 = vor.u32 %v2400_v14, %v2156_v1 }
 0x13d   :  { %v1065_v12 = vpop.f32.mrf.mxu2  ;;  %v1154_v47 = vpop.f32.mrf.mxu3 }
 0x13e   :  { %v1066_v23 = vadd.f32 %v1065_v12, %v977_v22  ;;  %v979_v61 = vpop.f32.mrf.mxu1  ;;  %v1722_v17 = vadd.f32 %v1605_v9, %v1498_v13 }
 0x13f   :  { %v980_v63 = vadd.f32 %v979_v61, %v3217_v15  ;;  %v2154_v15 = vld [vmem:[%s3627_s0 + $0x260] sm:$0xf]  ;;  %v1620_v61 = vpop.permute.xlu0 %1619 }
 0x140   :  { %v1155_v55 = vadd.f32 %v1154_v47, %v1066_v23  ;;  %v1754_v34 = vmax.f32 %v1722_v17, 0.0  ;;  %v2155_v25 = vor.u32 %v2402_v43, %v2154_v15  ;;  %v1615_v23 = vpop.permute.xlu2 %1614 }
 0x141   :  { %v1246_v56 = vpop.f32.mrf.mxu0  ;;  %1018 = vmatmul.bf16.gmra.mxu1 %v2131_v27 }
 0x142   :  { %v1244_v35 = vadd.f32 %v1243_v2, %v1155_v55  ;;  %1107 = vmatmul.bf16.gmra.mxu2 %v2135_v30  ;;  %1196 = vmatmul.bf16.gmra.mxu3 %v2139_v38  ;;  %v2162_v2 = vld [vmem:[%s3627_s0 + $0x268] sm:$0xf] }
 0x143   :  { %v2163_v22 = vor.u32 %v2403_v6, %v2162_v2 }
 0x144   :  { %2322 = vmatmul.msk.bf16.gmra.mxu0 %vm802_vm0, %v2143_v57  ;;  %v1499_v42 = vmul.f32 %v3136_v31, %v1244_v35  ;;  %v2148_v31 = vld [vmem:[%s3627_s0 + $0x26c] sm:$0xf0] }
 0x145   :  { %v1068_v21 = vpop.f32.mrf.mxu2  ;;  %v1157_v40 = vpop.f32.mrf.mxu3  ;;  %v2151_v60 = vor.u32 %v2399_v16, %v2148_v31 }
 0x146   :  { %v1723_v33 = vadd.f32 %v1610_v50, %v1499_v42  ;;  %v1069_v0 = vadd.f32 %v1068_v21, %v980_v63  ;;  %v981_v46 = vpop.f32.mrf.mxu1 }
 0x147   :  { %v982_v48 = vadd.f32 %v981_v46, %v3235_v32 }
 0x148   :  { %v1755_v53 = vmax.f32 %v1723_v33, 0.0  ;;  %v1158_v45 = vadd.f32 %v1157_v40, %v1069_v0  ;;  %v1630_v16 = vpop.permute.xlu2 %1629 }
 0x149   :  { %v1248_v62 = vpop.f32.mrf.mxu0 }
 0x14a   :  { %v2468_v54 = vpack.c.bf16 %v1755_v53, %v1754_v34  ;;  %v1247_v5 = vadd.f32 %v1246_v56, %v1158_v45  ;;  %v1625_v53 = vpop.permute.xlu1 %1624 }
 0x14c   :  { %2524 = vst [vmem:[%s3629_s4 + $0x28] sm:$0xff] %v2468_v54   ;;  %v1500_v10 = vmul.f32 %v3156_v44, %v1247_v5 }
 0x14d   :  { %v1070_v7 = vpop.f32.mrf.mxu2  ;;  %v1159_v41 = vpop.f32.mrf.mxu3 }
 0x14e   :  { %v1071_v19 = vadd.f32 %v1070_v7, %v982_v48  ;;  %v984_v20 = vpop.f32.mrf.mxu1  ;;  %v1724_v47 = vadd.f32 %v1615_v23, %v1500_v10 }
 0x14f   :  { %v985_v30 = vadd.f32 %v984_v20, %v3274_v4 }
 0x150   :  { %v1160_v58 = vadd.f32 %v1159_v41, %v1071_v19  ;;  %v1756_v56 = vmax.f32 %v1724_v47, 0.0 }
 0x151   :  { %v1251_v32 = vpop.f32.mrf.mxu0  ;;  %1023 = vmatmul.bf16.gmra.mxu1 %v2151_v60 }
 0x152   :  { %v1249_v12 = vadd.f32 %v1248_v62, %v1160_v58  ;;  %1112 = vmatmul.bf16.gmra.mxu2 %v2155_v25  ;;  %1201 = vmatmul.bf16.gmra.mxu3 %v2159_v49 }
 0x154   :  { %2323 = vmatmul.msk.bf16.gmra.mxu0 %vm802_vm0, %v2163_v22  ;;  %v1501_v27 = vmul.f32 %v3202_v3, %v1249_v12  ;;  %v1635_v22 = vpop.permute.xlu0 %1634  ;;  %v1640_v12 = vpop.permute.xlu1 %1639 }
 0x155   :  { %v1073_v38 = vpop.f32.mrf.mxu2  ;;  %v1162_v55 = vpop.f32.mrf.mxu3 }
 0x156   :  { %v1725_v57 = vadd.f32 %v1620_v61, %v1501_v27  ;;  %v1074_v13 = vadd.f32 %v1073_v38, %v985_v30  ;;  %v986_v44 = vpop.f32.mrf.mxu1 }
 0x157   :  { %v987_v3 = vadd.f32 %v986_v44, %v3289_v39 }
 0x158   :  { %v1757_v35 = vmax.f32 %v1725_v57, 0.0  ;;  %v1163_v9 = vadd.f32 %v1162_v55, %v1074_v13 }
 0x159   :  { %v1253_v17 = vpop.f32.mrf.mxu0 }
 0x15a   :  { %v2473_v42 = vpack.c.bf16 %v1757_v35, %v1756_v56  ;;  %v1252_v63 = vadd.f32 %v1251_v32, %v1163_v9 }
 0x15c   :  { %2525 = vst [vmem:[%s3629_s4 + $0x30] sm:$0xff] %v2473_v42   ;;  %v1502_v0 = vmul.f32 %v3174_v52, %v1252_v63 }
 0x15d   :  { %v1075_v50 = vpop.f32.mrf.mxu2  ;;  %v1164_v21 = vpop.f32.mrf.mxu3 }
 0x15e   :  { %v1076_v4 = vadd.f32 %v1075_v50, %v987_v3  ;;  %v989_v33 = vpop.f32.mrf.mxu1  ;;  %v1726_v45 = vadd.f32 %v1625_v53, %v1502_v0  ;;  %v1645_v3 = vpop.permute.xlu2 %1644 }
 0x15f   :  { %v990_v54 = vadd.f32 %v989_v33, %v3103_v18  ;;  %v1650_v33 = vpop.permute.xlu0 %1649 }
 0x160   :  { %v1165_v40 = vadd.f32 %v1164_v21, %v1076_v4  ;;  %v1758_v1 = vmax.f32 %v1726_v45, 0.0 }
 0x161   :  { %v1256_v46 = vpop.f32.mrf.mxu0 }
 0x162   :  { %v1254_v34 = vadd.f32 %v1253_v17, %v1165_v40 }
 0x164   :  { %v1503_v62 = vmul.f32 %v3182_v59, %v1254_v34 }
 0x165   :  { %v1078_v31 = vpop.f32.mrf.mxu2  ;;  %v1167_v39 = vpop.f32.mrf.mxu3 }
 0x166   :  { %v1727_v15 = vadd.f32 %v1630_v16, %v1503_v62  ;;  %v1079_v43 = vadd.f32 %v1078_v31, %v990_v54  ;;  %v991_v14 = vpop.f32.mrf.mxu1  ;;  %v3652_v31 = vld [vmem:[#allocation9_spill] sm:$0xff] }
 0x167   :  { %v992_v59 = vadd.f32 %v991_v14, %v3150_v37  ;;  %v3653_v14 = vld [vmem:[#allocation7_spill] sm:$0xff] }
 0x168   :  { %v1759_v5 = vmax.f32 %v1727_v15, 0.0  ;;  %v1168_v48 = vadd.f32 %v1167_v39, %v1079_v43 }
 0x169   :  { %v1258_v2 = vpop.f32.mrf.mxu0 }
 0x16a   :  { %v2478_v52 = vpack.c.bf16 %v1759_v5, %v1758_v1  ;;  %v1257_v6 = vadd.f32 %v1256_v46, %v1168_v48 }
 0x16c   :  { %2526 = vst [vmem:[%s3629_s4 + $0x38] sm:$0xff] %v2478_v52   ;;  %v1504_v60 = vmul.f32 %v3231_v29, %v1257_v6  ;;  %v1655_v52 = vpop.permute.xlu1 %1654 }
 0x16d   :  { %v1080_v7 = vpop.f32.mrf.mxu2  ;;  %v1169_v19 = vpop.f32.mrf.mxu3 }
 0x16e   :  { %v1081_v18 = vadd.f32 %v1080_v7, %v992_v59  ;;  %v994_v41 = vpop.f32.mrf.mxu1  ;;  %v1728_v10 = vadd.f32 %v1635_v22, %v1504_v60  ;;  %v3654_v59 = vld [vmem:[#allocation8_spill] sm:$0xff] }
 0x16f   :  { %v995_v32 = vadd.f32 %v994_v41, %v3172_v51  ;;  %v1660_v41 = vpop.permute.xlu2 %1659 }
 0x170   :  { %v1170_v25 = vadd.f32 %v1169_v19, %v1081_v18  ;;  %v1760_v61 = vmax.f32 %v1728_v10, 0.0  ;;  %v3655_v18 = vld [vmem:[#allocation12_spill] sm:$0xff] }
 0x171   :  { %v1261_v20 = vpop.f32.mrf.mxu0 }
 0x172   :  { %v1259_v49 = vadd.f32 %v1258_v2, %v1170_v25 }
 0x174   :  { %v1505_v58 = vmul.f32 %v3219_v24, %v1259_v49 }
 0x175   :  { %v1083_v23 = vpop.f32.mrf.mxu2  ;;  %v1172_v37 = vpop.f32.mrf.mxu3 }
 0x176   :  { %v1729_v47 = vadd.f32 %v1640_v12, %v1505_v58  ;;  %v1084_v27 = vadd.f32 %v1083_v23, %v995_v32  ;;  %v996_v30 = vpop.f32.mrf.mxu1 }
 0x177   :  { %v997_v24 = vadd.f32 %v996_v30, %v3213_v8 }
 0x178   :  { %v1761_v38 = vmax.f32 %v1729_v47, 0.0  ;;  %v1173_v57 = vadd.f32 %v1172_v37, %v1084_v27  ;;  %v3656_v27 = vld [vmem:[#allocation17_spill] sm:$0xff] }
 0x179   :  { %v1263_v13 = vpop.f32.mrf.mxu0 }
 0x17a   :  { %v2483_v29 = vpack.c.bf16 %v1761_v38, %v1760_v61  ;;  %v1262_v55 = vadd.f32 %v1261_v20, %v1173_v57 }
 0x17c   :  { %2527 = vst [vmem:[%s3629_s4 + $0x40] sm:$0xff] %v2483_v29   ;;  %v1506_v9 = vmul.f32 %v3224_v26, %v1262_v55 }
 0x17d   :  { %v1085_v44 = vpop.f32.mrf.mxu2  ;;  %v1174_v56 = vpop.f32.mrf.mxu3 }
 0x17e   :  { %v1086_v51 = vadd.f32 %v1085_v44, %v997_v24  ;;  %v999_v35 = vpop.f32.mrf.mxu1  ;;  %v1730_v50 = vadd.f32 %v1645_v3, %v1506_v9 }
 0x17f   :  { %v1000_v21 = vadd.f32 %v999_v35, %v3229_v28  ;;  %v3658_v35 = vld [vmem:[#allocation11_spill] sm:$0xff] }
 0x180   :  { %v1175_v17 = vadd.f32 %v1174_v56, %v1086_v51  ;;  %v1762_v53 = vmax.f32 %v1730_v50, 0.0  ;;  %v1665_v51 = vpop.permute.xlu0 %1664 }
 0x181   :  { %v1266_v42 = vpop.f32.mrf.mxu0 }
 0x182   :  { %v1264_v63 = vadd.f32 %v1263_v13, %v1175_v17  ;;  %v3657_v13 = vld [vmem:[#allocation15_spill] sm:$0xff]  ;;  %v3659_v17 = vld [vmem:[#allocation2_spill] sm:$0xff] }
 0x184   :  { %v1507_v4 = vmul.f32 %v3276_v11, %v1264_v63  ;;  %v1670_v63 = vpop.permute.xlu1 %1669 }
 0x185   :  { %v1088_v0 = vpop.f32.mrf.mxu2  ;;  %v1177_v8 = vpop.f32.mrf.mxu3 }
 0x186   :  { %v1731_v40 = vadd.f32 %v1650_v33, %v1507_v4  ;;  %v1089_v46 = vadd.f32 %v1088_v0, %v1000_v21  ;;  %v1001_v34 = vpop.f32.mrf.mxu1 }
 0x187   :  { %v1002_v11 = vadd.f32 %v1001_v34, %v3652_v31 }
 0x188   :  { %v1763_v45 = vmax.f32 %v1731_v40, 0.0  ;;  %v1178_v62 = vadd.f32 %v1177_v8, %v1089_v46 }
 0x189   :  { %v1268_v54 = vpop.f32.mrf.mxu0 }
 0x18a   :  { %v2488_v26 = vpack.c.bf16 %v1763_v45, %v1762_v53  ;;  %v1267_v16 = vadd.f32 %v1266_v42, %v1178_v62  ;;  %v3660_v45 = vld [vmem:[#allocation3_spill] sm:$0xff] }
 0x18c   :  { %2528 = vst [vmem:[%s3629_s4 + $0x48] sm:$0xff] %v2488_v26   ;;  %v1508_v1 = vmul.f32 %v3653_v14, %v1267_v16  ;;  %v1675_v14 = vpop.permute.xlu2 %1674 }
 0x18d   :  { %v1090_v15 = vpop.f32.mrf.mxu2  ;;  %v1179_v43 = vpop.f32.mrf.mxu3 }
 0x18e   :  { %v1091_v28 = vadd.f32 %v1090_v15, %v1002_v11  ;;  %v1004_v39 = vpop.f32.mrf.mxu1  ;;  %v1732_v6 = vadd.f32 %v1655_v52, %v1508_v1  ;;  %v3661_v11 = vld [vmem:[#allocation14_spill] sm:$0xff] }
 0x18f   :  { %v1005_v19 = vadd.f32 %v1004_v39, %v3655_v18 }
 0x190   :  { %v1180_v5 = vadd.f32 %v1179_v43, %v1091_v28  ;;  %v1764_v10 = vmax.f32 %v1732_v6, 0.0  ;;  %v1680_v6 = vpop.permute.xlu0 %1679 }
 0x191   :  { %v1271_v48 = vpop.f32.mrf.mxu0 }
 0x192   :  { %v1269_v2 = vadd.f32 %v1268_v54, %v1180_v5  ;;  %v3662_v5 = vld [vmem:[#allocation20_spill] sm:$0xff] }
 0x194   :  { %v1509_v7 = vmul.f32 %v3654_v59, %v1269_v2  ;;  %v3663_v2 = vld [vmem:[#allocation4_spill] sm:$0xff] }
 0x195   :  { %v1093_v60 = vpop.f32.mrf.mxu2  ;;  %v1182_v49 = vpop.f32.mrf.mxu3 }
 0x196   :  { %v1733_v25 = vadd.f32 %v1660_v41, %v1509_v7  ;;  %v1094_v20 = vadd.f32 %v1093_v60, %v1005_v19  ;;  %v1006_v22 = vpop.f32.mrf.mxu1 }
 0x197   :  { %v1007_v37 = vadd.f32 %v1006_v22, %v3656_v27 }
 0x198   :  { %v1765_v58 = vmax.f32 %v1733_v25, 0.0  ;;  %v1183_v32 = vadd.f32 %v1182_v49, %v1094_v20 }
 0x199   :  { %v1273_v12 = vpop.f32.mrf.mxu0 }
 0x19a   :  { %v2493_v23 = vpack.c.bf16 %v1765_v58, %v1764_v10  ;;  %v1272_v47 = vadd.f32 %v1271_v48, %v1183_v32  ;;  %v3664_v58 = vld [vmem:[#allocation5_spill] sm:$0xff] }
 0x19c   :  { %2529 = vst [vmem:[%s3629_s4 + $0x50] sm:$0xff] %v2493_v23   ;;  %v1510_v29 = vmul.f32 %v3657_v13, %v1272_v47 }
 0x19d   :  { %v1095_v30 = vpop.f32.mrf.mxu2  ;;  %v1184_v38 = vpop.f32.mrf.mxu3 }
 0x19e   :  { %v1096_v61 = vadd.f32 %v1095_v30, %v1007_v37  ;;  %v1009_v57 = vpop.f32.mrf.mxu1  ;;  %v1734_v56 = vadd.f32 %v1665_v51, %v1510_v29  ;;  %v3665_v37 = vld [vmem:[#allocation16_spill] sm:$0xff] }
 0x19f   :  { %v1010_v42 = vadd.f32 %v1009_v57, %v3659_v17  ;;  %v1685_v57 = vpop.permute.xlu1 %1684 }
 0x1a0   :  { %v1185_v55 = vadd.f32 %v1184_v38, %v1096_v61  ;;  %v1766_v0 = vmax.f32 %v1734_v56, 0.0  ;;  %v1690_v56 = vpop.permute.xlu2 %1689 }
 0x1a1   :  { %v1276_v24 = vpop.f32.mrf.mxu0 }
 0x1a2   :  { %v1274_v44 = vadd.f32 %v1273_v12, %v1185_v55  ;;  %v3666_v55 = vld [vmem:[#allocation19_spill] sm:$0xff] }
 0x1a4   :  { %v1511_v9 = vmul.f32 %v3658_v35, %v1274_v44  ;;  %v3667_v44 = vld [vmem:[#allocation6_spill] sm:$0xff] }
 0x1a5   :  { %v1098_v3 = vpop.f32.mrf.mxu2  ;;  %v1187_v21 = vpop.f32.mrf.mxu3 }
 0x1a6   :  { %v1735_v50 = vadd.f32 %v1670_v63, %v1511_v9  ;;  %v1099_v4 = vadd.f32 %v1098_v3, %v1010_v42  ;;  %v1011_v33 = vpop.f32.mrf.mxu1 }
 0x1a7   :  { %v1012_v62 = vadd.f32 %v1011_v33, %v3660_v45 }
 0x1a8   :  { %v1767_v40 = vmax.f32 %v1735_v50, 0.0  ;;  %v1188_v46 = vadd.f32 %v1187_v21, %v1099_v4 }
 0x1a9   :  { %v1278_v8 = vpop.f32.mrf.mxu0 }
 0x1aa   :  { %v2498_v34 = vpack.c.bf16 %v1767_v40, %v1766_v0  ;;  %v1277_v53 = vadd.f32 %v1276_v24, %v1188_v46  ;;  %v3668_v0 = vld [vmem:[#allocation10_spill] sm:$0xff] }
 0x1ac   :  { %2530 = vst [vmem:[%s3629_s4 + $0x58] sm:$0xff] %v2498_v34   ;;  %v1512_v15 = vmul.f32 %v3661_v11, %v1277_v53 }
 0x1ad   :  { %v1100_v54 = vpop.f32.mrf.mxu2  ;;  %v1189_v16 = vpop.f32.mrf.mxu3 }
 0x1ae   :  { %v1101_v26 = vadd.f32 %v1100_v54, %v1012_v62  ;;  %v1014_v31 = vpop.f32.mrf.mxu1  ;;  %v1736_v1 = vadd.f32 %v1675_v14, %v1512_v15  ;;  %v3669_v62 = vld [vmem:[#allocation23_spill] sm:$0xff]  ;;  %v3670_v15 = vld [vmem:[#allocation21_spill] sm:$0xff]  ;;  %v1700_v14 = vpop.permute.xlu1 %1699 }
 0x1af   :  { %v1015_v52 = vadd.f32 %v1014_v31, %v3663_v2  ;;  %v1695_v31 = vpop.permute.xlu0 %1694 }
 0x1b0   :  { %v1190_v28 = vadd.f32 %v1189_v16, %v1101_v26  ;;  %v1768_v60 = vmax.f32 %v1736_v1, 0.0 }
 0x1b1   :  { %v1281_v43 = vpop.f32.mrf.mxu0 }
 0x1b2   :  { %v1279_v39 = vadd.f32 %v1278_v8, %v1190_v28 }
 0x1b4   :  { %v1513_v48 = vmul.f32 %v3662_v5, %v1279_v39 }
 0x1b5   :  { %v1103_v59 = vpop.f32.mrf.mxu2  ;;  %v1192_v19 = vpop.f32.mrf.mxu3 }
 0x1b6   :  { %v1737_v7 = vadd.f32 %v1680_v6, %v1513_v48  ;;  %v1104_v18 = vadd.f32 %v1103_v59, %v1015_v52  ;;  %v1016_v41 = vpop.f32.mrf.mxu1 }
 0x1b7   :  { %v1017_v32 = vadd.f32 %v1016_v41, %v3664_v58 }
 0x1b8   :  { %v1769_v25 = vmax.f32 %v1737_v7, 0.0  ;;  %v1193_v20 = vadd.f32 %v1192_v19, %v1104_v18 }
 0x1b9   :  { %v1283_v49 = vpop.f32.mrf.mxu0 }
 0x1ba   :  { %v2503_v22 = vpack.c.bf16 %v1769_v25, %v1768_v60  ;;  %v1282_v10 = vadd.f32 %v1281_v43, %v1193_v20  ;;  %v3671_v43 = vld [vmem:[#allocation13_spill] sm:$0xff]  ;;  %v3672_v60 = vld [vmem:[#allocation18_spill] sm:$0xff] }
 0x1bc   :  { %2531 = vst [vmem:[%s3629_s4 + $0x60] sm:$0xff] %v2503_v22   ;;  %v1514_v30 = vmul.f32 %v3665_v37, %v1282_v10  ;;  %v3673_v10 = vld [vmem:[#allocation22_spill] sm:$0xff] }
 0x1bd   :  { %v1105_v12 = vpop.f32.mrf.mxu2  ;;  %v1194_v47 = vpop.f32.mrf.mxu3 }
 0x1be   :  { %v1106_v23 = vadd.f32 %v1105_v12, %v1017_v32  ;;  %v1019_v27 = vpop.f32.mrf.mxu1  ;;  %v1738_v29 = vadd.f32 %v1685_v57, %v1514_v30  ;;  %v1710_v30 = vpop.permute.xlu0 %1709 }
 0x1bf   :  { %v1020_v51 = vadd.f32 %v1019_v27, %v3667_v44 }
 0x1c0   :  { %v1195_v61 = vadd.f32 %v1194_v47, %v1106_v23  ;;  %v1770_v3 = vmax.f32 %v1738_v29, 0.0  ;;  %v1705_v47 = vpop.permute.xlu2 %1704 }
 0x1c1   :  { %v1286_v13 = vpop.f32.mrf.mxu0 }
 0x1c2   :  { %v1284_v38 = vadd.f32 %v1283_v49, %v1195_v61 }
 0x1c4   :  { %v1515_v24 = vmul.f32 %v3666_v55, %v1284_v38 }
 0x1c5   :  { %v1108_v35 = vpop.f32.mrf.mxu2  ;;  %v1197_v42 = vpop.f32.mrf.mxu3 }
 0x1c6   :  { %v1739_v9 = vadd.f32 %v1690_v56, %v1515_v24  ;;  %v1109_v17 = vadd.f32 %v1108_v35, %v1020_v51  ;;  %v1021_v63 = vpop.f32.mrf.mxu1 }
 0x1c7   :  { %v1022_v40 = vadd.f32 %v1021_v63, %v3668_v0 }
 0x1c8   :  { %v1771_v50 = vmax.f32 %v1739_v9, 0.0  ;;  %v1198_v4 = vadd.f32 %v1197_v42, %v1109_v17 }
 0x1c9   :  { %v1288_v46 = vpop.f32.mrf.mxu0 }
 0x1ca   :  { %v2508_v21 = vpack.c.bf16 %v1771_v50, %v1770_v3  ;;  %v1287_v33 = vadd.f32 %v1286_v13, %v1198_v4 }
 0x1cc   :  { %2532 = vst [vmem:[%s3629_s4 + $0x68] sm:$0xff] %v2508_v21   ;;  %v1516_v54 = vmul.f32 %v3669_v62, %v1287_v33 }
 0x1cd   :  { %v1110_v8 = vpop.f32.mrf.mxu2  ;;  %v1199_v53 = vpop.f32.mrf.mxu3 }
 0x1ce   :  { %v1111_v34 = vadd.f32 %v1110_v8, %v1022_v40  ;;  %v1024_v45 = vpop.f32.mrf.mxu1  ;;  %v1740_v11 = vadd.f32 %v1695_v31, %v1516_v54 }
 0x1cf   :  { %v1025_v39 = vadd.f32 %v1024_v45, %v3671_v43 }
 0x1d0   :  { %v1200_v26 = vadd.f32 %v1199_v53, %v1111_v34  ;;  %v1772_v6 = vmax.f32 %v1740_v11, 0.0 }
 0x1d1   :  { %v1291_v52 = vpop.f32.mrf.mxu0 }
 0x1d2   :  { %v1289_v16 = vadd.f32 %v1288_v46, %v1200_v26 }
 0x1d4   :  { %v1517_v28 = vmul.f32 %v3670_v15, %v1289_v16 }
 0x1d5   :  { %v1113_v1 = vpop.f32.mrf.mxu2  ;;  %v1202_v2 = vpop.f32.mrf.mxu3 }
 0x1d6   :  { %v1741_v5 = vadd.f32 %v1700_v14, %v1517_v28  ;;  %v1114_v48 = vadd.f32 %v1113_v1, %v1025_v39  ;;  %v1026_v18 = vpop.f32.mrf.mxu1 }
 0x1d7   :  { %v1027_v25 = vadd.f32 %v1026_v18, %v3672_v60 }
 0x1d8   :  { %v1773_v59 = vmax.f32 %v1741_v5, 0.0  ;;  %v1203_v7 = vadd.f32 %v1202_v2, %v1114_v48 }
 0x1d9   :  { %v1293_v12 = vpop.f32.mrf.mxu0 }
 0x1da   :  { %v2513_v19 = vpack.c.bf16 %v1773_v59, %v1772_v6  ;;  %v1292_v41 = vadd.f32 %v1291_v52, %v1203_v7 }
 0x1dc   :  { %2533 = vst [vmem:[%s3629_s4 + $0x70] sm:$0xff] %v2513_v19   ;;  %v1518_v58 = vmul.f32 %v3673_v10, %v1292_v41 }
 0x1dd   :  { %v1115_v20 = vpop.f32.mrf.mxu2  ;;  %v1204_v22 = vpop.f32.mrf.mxu3 }
 0x1de   :  { %v1116_v49 = vadd.f32 %v1115_v20, %v1027_v25  ;;  %v1742_v27 = vadd.f32 %v1705_v47, %v1518_v58 }
 0x1e0   :  { %v1205_v32 = vadd.f32 %v1204_v22, %v1116_v49  ;;  %v1774_v38 = vmax.f32 %v1742_v27, 0.0 }
 0x1e2   :  { %v1294_v23 = vadd.f32 %v1293_v12, %v1205_v32 }
 0x1e4   :  { %v1519_v37 = vmul.f32 %v3366_v36, %v1294_v23 }
 0x1e6   :  { %v1743_v61 = vadd.f32 %v1710_v30, %v1519_v37 }
 0x1e8   :  { %v1775_v57 = vmax.f32 %v1743_v61, 0.0 }
 0x1ea   :  { %v2518_v13 = vpack.c.bf16 %v1775_v57, %v1774_v38 }
 0x1ec   :  { %2534 = vst [vmem:[%s3629_s4 + $0x78] sm:$0xff] %v2518_v13  }

// kernel: ae_forward.21
= control target key start
LH: loop header
LB: loop body
LE: loop exit
PB: predicated region body
PF: predicated region fallthrough
CT: control target
= control target key end

     0   :  { %v1563_v5 = vmov 0   ;;  %vm554_vm0 = vcmask 523264   ;;  %s2143_s1 = inlined_call_operand.vmem [shape: bf16[576,128], index: 1, kind: input, shape index: {}]   ;;  %s2144_s2 = inlined_call_operand.vmem [shape: f32[128,1], index: 2, kind: input, shape index: {}]   ;;  %s2145_s0 = inlined_call_operand.vmem [shape: bf16[128,576], index: 0, kind: input, shape index: {}]   ;;  %s2146_s3 = inlined_call_operand.vmem [shape: f32[128,1], index: 3, kind: input, shape index: {}]   ;;  %s2147_s4 = inlined_call_operand.vmem [shape: bf16[128,128], index: 4, kind: output, shape index: {}]  }
   0x1   :  { %v1459_v0 = vld [vmem:[%s2143_s1 + $0x38] sm:$0xff]  ;;  %v1458_v1 = vld [vmem:[%s2143_s1 + $0x30] sm:$0xff]  ;;  %v1457_v2 = vld [vmem:[%s2143_s1 + $0x28] sm:$0xff]  ;;  %1561 = vset.pattern.permute.xlu1 %v1563_v5  ;;  %1560 = vset.pattern.permute.xlu0 %v1563_v5 }
   0x2   :  { %1535 = vmatpush.bf16.msra.mxu1 %v1459_v0  ;;  %1536 = vmatpush.bf16.msra.mxu2 %v1459_v0  ;;  %v1456_v3 = vld [vmem:[%s2143_s1 + $0x20] sm:$0xff]  ;;  %v1455_v4 = vld [vmem:[%s2143_s1 + $0x18] sm:$0xff]  ;;  %v1454_v6 = vld [vmem:[%s2143_s1 + $0x10] sm:$0xff] }
   0x3   :  { %1537 = vmatpush.bf16.msra.mxu3 %v1459_v0  ;;  %579 = vmatpush.bf16.msra.mxu0 %v1459_v0  ;;  %v826_v7 = vld [vmem:[%s2144_s2 + $0x10] sm:$0xff]  ;;  %v824_v8 = vld [vmem:[%s2144_s2] sm:$0xff]  ;;  %v1453_v9 = vld [vmem:[%s2143_s1 + $0x8] sm:$0xff] }
   0x4   :  { %1562 = vset.pattern.permute.xlu2 %v1563_v5  ;;  %852 = vperm.xlu1 %1561, %v826_v7   ;;  %v1452_v10 = vld [vmem:[%s2143_s1] sm:$0xff]  ;;  %v1142_v11 = vld [vmem:[%s2145_s0 + $0x50] sm:$0xf]  ;;  %v827_v13 = vld [vmem:[%s2144_s2 + $0x18] sm:$0xff] }
   0x5   :  { %842 = vperm.xlu0 %1560, %v824_v8   ;;  %v1424_v12 = vld [vmem:[%s2145_s0 + $0x60] sm:$0xf0]  ;;  %v825_v14 = vld [vmem:[%s2144_s2 + $0x8] sm:$0xff]  ;;  %v1182_v15 = vld [vmem:[%s2145_s0 + $0xa0] sm:$0xf] }
   0x6   :  { %1538 = vmatpush.bf16.msra.mxu1 %v1458_v1  ;;  %1539 = vmatpush.bf16.msra.mxu2 %v1458_v1  ;;  %v1434_v16 = vld [vmem:[%s2145_s0 + $0xb0] sm:$0xf0]  ;;  %v1222_v17 = vld [vmem:[%s2145_s0 + $0xf0] sm:$0xf]  ;;  %v1444_v18 = vld [vmem:[%s2145_s0 + $0x100] sm:$0xf0]  ;;  %v1143_v23 = vor.u32 %v1424_v12, %v1142_v11 }
   0x7   :  { %1540 = vmatpush.bf16.msra.mxu3 %v1458_v1  ;;  %580 = vmatpush.bf16.msra.mxu0 %v1458_v1  ;;  %v1102_v19 = vld [vmem:[%s2145_s0] sm:$0xf]  ;;  %v1414_v20 = vld [vmem:[%s2145_s0 + $0x10] sm:$0xf0]  ;;  %v1475_v21 = vld [vmem:[%s2143_s1 + $0xb8] sm:$0xff]  ;;  %v1183_v24 = vor.u32 %v1434_v16, %v1182_v15  ;;  %v1223_v25 = vor.u32 %v1444_v18, %v1222_v17 }
   0x8   :  { %v1467_v22 = vld [vmem:[%s2143_s1 + $0x78] sm:$0xff]  ;;  %v1103_v26 = vor.u32 %v1414_v20, %v1102_v19  ;;  %v1474_v29 = vld [vmem:[%s2143_s1 + $0xb0] sm:$0xff]  ;;  %v1473_v35 = vld [vmem:[%s2143_s1 + $0xa8] sm:$0xff] }
   0x9   :  { %v1483_v27 = vld [vmem:[%s2143_s1 + $0xf8] sm:$0xff]  ;;  %v1466_v30 = vld [vmem:[%s2143_s1 + $0x70] sm:$0xff]  ;;  %v1465_v36 = vld [vmem:[%s2143_s1 + $0x68] sm:$0xff] }
   0xa   :  { %1541 = vmatpush.bf16.msra.mxu1 %v1457_v2  ;;  %1542 = vmatpush.bf16.msra.mxu2 %v1457_v2  ;;  %v1487_v28 = vld [vmem:[%s2143_s1 + $0x118] sm:$0xff]  ;;  %v830_v32 = vld [vmem:[%s2144_s2 + $0x30] sm:$0xff]  ;;  %v1481_v37 = vld [vmem:[%s2143_s1 + $0xe8] sm:$0xff] }
   0xb   :  { %1543 = vmatpush.bf16.msra.mxu3 %v1457_v2  ;;  %581 = vmatpush.bf16.msra.mxu0 %v1457_v2  ;;  %v831_v31 = vld [vmem:[%s2144_s2 + $0x38] sm:$0xff]  ;;  %v1482_v33 = vld [vmem:[%s2143_s1 + $0xf0] sm:$0xff]  ;;  %v1472_v38 = vld [vmem:[%s2143_s1 + $0xa0] sm:$0xff] }
   0xc   :  { %857 = vperm.xlu1 %1561, %v827_v13   ;;  %v1486_v34 = vld [vmem:[%s2143_s1 + $0x110] sm:$0xff]  ;;  %v1485_v39 = vld [vmem:[%s2143_s1 + $0x108] sm:$0xff]  ;;  %v1464_v40 = vld [vmem:[%s2143_s1 + $0x60] sm:$0xff] }
   0xd   :  { %847 = vperm.xlu0 %1560, %v825_v14   ;;  %v1162_v41 = vld [vmem:[%s2145_s0 + $0x78] sm:$0xf]  ;;  %v1429_v42 = vld [vmem:[%s2145_s0 + $0x88] sm:$0xf0]  ;;  %v1480_v43 = vld [vmem:[%s2143_s1 + $0xe0] sm:$0xff] }
   0xe   :  { %1544 = vmatpush.bf16.msra.mxu1 %v1456_v3  ;;  %1545 = vmatpush.bf16.msra.mxu2 %v1456_v3  ;;  %v1202_v44 = vld [vmem:[%s2145_s0 + $0xc8] sm:$0xf]  ;;  %v1439_v45 = vld [vmem:[%s2145_s0 + $0xd8] sm:$0xf0]  ;;  %v1242_v46 = vld [vmem:[%s2145_s0 + $0x118] sm:$0xf]  ;;  %v1163_v55 = vor.u32 %v1429_v42, %v1162_v41 }
   0xf   :  { %1546 = vmatpush.bf16.msra.mxu3 %v1456_v3  ;;  %582 = vmatpush.bf16.msra.mxu0 %v1456_v3  ;;  %v1449_v47 = vld [vmem:[%s2145_s0 + $0x128] sm:$0xf0]  ;;  %v834_v48 = vld [vmem:[%s2144_s2 + $0x50] sm:$0xff]  ;;  %v1122_v50 = vld [vmem:[%s2145_s0 + $0x28] sm:$0xf]  ;;  %v1203_v56 = vor.u32 %v1439_v45, %v1202_v44 }
  0x10   :  { %v833_v49 = vld [vmem:[%s2144_s2 + $0x48] sm:$0xff]  ;;  %v1419_v51 = vld [vmem:[%s2145_s0 + $0x38] sm:$0xf0]  ;;  %v1484_v52 = vld [vmem:[%s2143_s1 + $0x100] sm:$0xff]  ;;  %v1243_v57 = vor.u32 %v1449_v47, %v1242_v46 }
  0x11   :  { %v1471_v53 = vld [vmem:[%s2143_s1 + $0x98] sm:$0xff]  ;;  %v1123_v58 = vor.u32 %v1419_v51, %v1122_v50  ;;  %v1470_v60 = vld [vmem:[%s2143_s1 + $0x90] sm:$0xff]  ;;  %v828_v62 = vld [vmem:[%s2144_s2 + $0x20] sm:$0xff] }
  0x12   :  { %1547 = vmatpush.bf16.msra.mxu1 %v1455_v4  ;;  %1548 = vmatpush.bf16.msra.mxu2 %v1455_v4  ;;  %v1463_v54 = vld [vmem:[%s2143_s1 + $0x58] sm:$0xff]  ;;  %v1462_v61 = vld [vmem:[%s2143_s1 + $0x50] sm:$0xff]  ;;  %v837_v63 = vld [vmem:[%s2144_s2 + $0x68] sm:$0xff] }
  0x13   :  { %1549 = vmatpush.bf16.msra.mxu3 %v1455_v4  ;;  %583 = vmatpush.bf16.msra.mxu0 %v1455_v4  ;;  %v1479_v59 = vld [vmem:[%s2143_s1 + $0xd8] sm:$0xff]  ;;  %v836_v0 = vld [vmem:[%s2144_s2 + $0x60] sm:$0xff]  ;;  %v1478_v1 = vld [vmem:[%s2143_s1 + $0xd0] sm:$0xff] }
  0x14   :  { %877 = vperm.xlu1 %1561, %v831_v31   ;;  %862 = vperm.xlu2 %1562, %v828_v62   ;;  %v1469_v2 = vld [vmem:[%s2143_s1 + $0x88] sm:$0xff]  ;;  %v1468_v5 = vld [vmem:[%s2143_s1 + $0x80] sm:$0xff]  ;;  %v1415_v12 = vld [vmem:[%s2145_s0 + $0x18] sm:$0xf0] }
  0x15   :  { %872 = vperm.xlu0 %1560, %v830_v32   ;;  %v1461_v3 = vld [vmem:[%s2143_s1 + $0x48] sm:$0xff]  ;;  %v1412_v7 = vld [vmem:[%s2145_s0 + $0x4] sm:$0xf]  ;;  %v839_v15 = vld [vmem:[%s2144_s2 + $0x78] sm:$0xff] }
  0x16   :  { %1550 = vmatpush.bf16.msra.mxu1 %v1454_v6  ;;  %1551 = vmatpush.bf16.msra.mxu2 %v1454_v6  ;;  %v1477_v4 = vld [vmem:[%s2143_s1 + $0xc8] sm:$0xff]  ;;  %v936_v14 = vld [vmem:[%s2146_s3] sm:$0xff]  ;;  %v1118_v17 = vld [vmem:[%s2145_s0 + $0x10] sm:$0xf] }
  0x17   :  { %1552 = vmatpush.bf16.msra.mxu3 %v1454_v6  ;;  %584 = vmatpush.bf16.msra.mxu0 %v1454_v6  ;;  %v1460_v6 = vld [vmem:[%s2143_s1 + $0x40] sm:$0xff]  ;;  %v829_v8 = vld [vmem:[%s2144_s2 + $0x28] sm:$0xff]  ;;  %v1418_v31 = vld [vmem:[%s2145_s0 + $0x34] sm:$0xf] }
  0x18   :  { %v1110_v11 = vld [vmem:[%s2145_s0 + $0x8] sm:$0xf]  ;;  %v1413_v13 = vld [vmem:[%s2145_s0 + $0xc] sm:$0xf]  ;;  %v1112_v16 = vld [vmem:[%s2145_s0 + $0x1c] sm:$0xf0] }
  0x19   :  { %v1416_v18 = vld [vmem:[%s2145_s0 + $0x20] sm:$0xf0]  ;;  %v1111_v20 = vor.u32 %v1415_v12, %v1110_v11  ;;  %v942_v32 = vld [vmem:[%s2146_s3 + $0x30] sm:$0xff]  ;;  %v945_v42 = vld [vmem:[%s2146_s3 + $0x48] sm:$0xff] }
  0x1a   :  { %1553 = vmatpush.bf16.msra.mxu1 %v1453_v9  ;;  %1554 = vmatpush.bf16.msra.mxu2 %v1453_v9  ;;  %v838_v41 = vld [vmem:[%s2144_s2 + $0x70] sm:$0xff]  ;;  %v937_v45 = vld [vmem:[%s2146_s3 + $0x8] sm:$0xff]  ;;  %v1150_v47 = vld [vmem:[%s2145_s0 + $0x58] sm:$0xf] }
  0x1b   :  { %1555 = vmatpush.bf16.msra.mxu3 %v1453_v9  ;;  %585 = vmatpush.bf16.msra.mxu0 %v1453_v9  ;;  %v1476_v9 = vld [vmem:[%s2143_s1 + $0xc0] sm:$0xff]  ;;  %v1422_v44 = vld [vmem:[%s2145_s0 + $0x54] sm:$0xf]  ;;  %v1144_v46 = vld [vmem:[%s2145_s0 + $0x64] sm:$0xf0] }
  0x1c   :  { %892 = vperm.xlu1 %1561, %v834_v48   ;;  %867 = vperm.xlu2 %1562, %v829_v8   ;;  %v1425_v48 = vld [vmem:[%s2145_s0 + $0x68] sm:$0xf0]  ;;  %v948_v50 = vld [vmem:[%s2146_s3 + $0x60] sm:$0xff]  ;;  %v947_v51 = vld [vmem:[%s2146_s3 + $0x58] sm:$0xff] }
  0x1d   :  { %887 = vperm.xlu0 %1560, %v833_v49   ;;  %v1423_v49 = vld [vmem:[%s2145_s0 + $0x5c] sm:$0xf]  ;;  %v946_v11 = vld [vmem:[%s2146_s3 + $0x50] sm:$0xff]  ;;  %v1432_v12 = vld [vmem:[%s2145_s0 + $0xa4] sm:$0xf] }
  0x1e   :  { %1556 = vmatpush.bf16.msra.mxu1 %v1452_v10  ;;  %1557 = vmatpush.bf16.msra.mxu2 %v1452_v10  ;;  %v1427_v62 = vld [vmem:[%s2145_s0 + $0x7c] sm:$0xf] }
  0x1f   :  { %1558 = vmatpush.bf16.msra.mxu3 %v1452_v10  ;;  %586 = vmatpush.bf16.msra.mxu0 %v1452_v10  ;;  %v1104_v10 = vld [vmem:[%s2145_s0 + $0x14] sm:$0xf0] }
  0x20   :  { %v1107_v19 = vor.u32 %v1412_v7, %v1104_v10  ;;  %v943_v10 = vld [vmem:[%s2146_s3 + $0x38] sm:$0xff] }
  0x21   :  { %597 = vmatmul.bf16.vlgmr.msra.gmra.mxu1 %v1143_v23  ;;  %607 = vmatmul.bf16.vlgmr.msra.gmra.mxu2 %v1183_v24  ;;  %v832_v23 = vld [vmem:[%s2144_s2 + $0x40] sm:$0xff]  ;;  %v939_v24 = vld [vmem:[%s2146_s3 + $0x18] sm:$0xff] }
  0x22   :  { %677 = vmatpush.bf16.msrb.mxu2 %v1475_v21  ;;  %628 = vmatpush.bf16.msrb.mxu1 %v1467_v22  ;;  %v1115_v21 = vor.u32 %v1413_v13, %v1112_v16  ;;  %v1119_v22 = vor.u32 %v1416_v18, %v1118_v17  ;;  %v1184_v13 = vld [vmem:[%s2145_s0 + $0xb4] sm:$0xf0]  ;;  %v1433_v16 = vld [vmem:[%s2145_s0 + $0xac] sm:$0xf]  ;;  %v1192_v17 = vld [vmem:[%s2145_s0 + $0xbc] sm:$0xf0] }
  0x23   :  { %617 = vmatmul.bf16.vlgmr.msra.gmra.mxu3 %v1223_v25  ;;  %587 = vmatmul.bf16.vlgmr.msra.gmra.mxu0 %v1103_v26  ;;  %v938_v25 = vld [vmem:[%s2146_s3 + $0x10] sm:$0xff]  ;;  %v1417_v26 = vld [vmem:[%s2145_s0 + $0x2c] sm:$0xf] }
  0x24   :  { %726 = vmatpush.bf16.msrb.mxu3 %v1483_v27  ;;  %779 = vmatpush.bf16.msrb.mxu0 %v1487_v28  ;;  %v835_v27 = vld [vmem:[%s2144_s2 + $0x58] sm:$0xff]  ;;  %v1124_v28 = vld [vmem:[%s2145_s0 + $0x3c] sm:$0xf0]  ;;  %v1198_v18 = vld [vmem:[%s2145_s0 + $0xb0] sm:$0xf] }
  0x25   :  { %907 = vperm.xlu1 %1561, %v837_v63   ;;  %902 = vperm.xlu0 %1560, %v836_v0   ;;  %v1164_v63 = vld [vmem:[%s2145_s0 + $0x8c] sm:$0xf0]  ;;  %v1170_v0 = vld [vmem:[%s2145_s0 + $0x80] sm:$0xf] }
  0x26   :  { %678 = vmatpush.bf16.msrb.mxu2 %v1474_v29  ;;  %629 = vmatpush.bf16.msrb.mxu1 %v1466_v30  ;;  %v1130_v29 = vld [vmem:[%s2145_s0 + $0x30] sm:$0xf]  ;;  %v1420_v30 = vld [vmem:[%s2145_s0 + $0x40] sm:$0xf0] }
  0x27   :  { %882 = vperm.xlu2 %1562, %v832_v23  }
  0x28   :  { %727 = vmatpush.bf16.msrb.mxu3 %v1482_v33  ;;  %780 = vmatpush.bf16.msrb.mxu0 %v1486_v34  ;;  %v941_v33 = vld [vmem:[%s2146_s3 + $0x28] sm:$0xff] }
  0x29   :  { %v1132_v34 = vld [vmem:[%s2145_s0 + $0x44] sm:$0xf0] }
  0x2a   :  { %679 = vmatpush.bf16.msrb.mxu2 %v1473_v35  ;;  %630 = vmatpush.bf16.msrb.mxu1 %v1465_v36  ;;  %v1138_v35 = vld [vmem:[%s2145_s0 + $0x38] sm:$0xf]  ;;  %v1421_v36 = vld [vmem:[%s2145_s0 + $0x48] sm:$0xf0] }
  0x2c   :  { %728 = vmatpush.bf16.msrb.mxu3 %v1481_v37  ;;  %781 = vmatpush.bf16.msrb.mxu0 %v1485_v39  ;;  %v1127_v37 = vor.u32 %v1417_v26, %v1124_v28  ;;  %v1135_v39 = vor.u32 %v1418_v31, %v1132_v34  ;;  %v1204_v26 = vld [vmem:[%s2145_s0 + $0xdc] sm:$0xf0]  ;;  %v1440_v28 = vld [vmem:[%s2145_s0 + $0xe0] sm:$0xf0]  ;;  %v1218_v31 = vld [vmem:[%s2145_s0 + $0xd8] sm:$0xf] }
  0x2d   :  { %954 = vperm.xlu1 %1561, %v936_v14   ;;  %917 = vperm.xlu0 %1560, %v839_v15   ;;  %v1190_v14 = vld [vmem:[%s2145_s0 + $0xa8] sm:$0xf]  ;;  %v1435_v15 = vld [vmem:[%s2145_s0 + $0xb8] sm:$0xf0] }
  0x2e   :  { %680 = vmatpush.bf16.msrb.mxu2 %v1472_v38  ;;  %631 = vmatpush.bf16.msrb.mxu1 %v1464_v40  ;;  %v1131_v38 = vor.u32 %v1420_v30, %v1130_v29  ;;  %v1139_v40 = vor.u32 %v1421_v36, %v1138_v35  ;;  %v1438_v29 = vld [vmem:[%s2145_s0 + $0xd4] sm:$0xf]  ;;  %v1212_v30 = vld [vmem:[%s2145_s0 + $0xe4] sm:$0xf0] }
  0x2f   :  { %897 = vperm.xlu2 %1562, %v835_v27   ;;  %v1210_v27 = vld [vmem:[%s2145_s0 + $0xd0] sm:$0xf]  ;;  %v1215_v35 = vor.u32 %v1438_v29, %v1212_v30 }
  0x30   :  { %729 = vmatpush.bf16.msrb.mxu3 %v1480_v43  ;;  %782 = vmatpush.bf16.msrb.mxu0 %v1484_v52  ;;  %v944_v43 = vld [vmem:[%s2146_s3 + $0x40] sm:$0xff]  ;;  %v1152_v52 = vld [vmem:[%s2145_s0 + $0x6c] sm:$0xf0]  ;;  %v1211_v34 = vor.u32 %v1440_v28, %v1210_v27 }
  0x31   :  { %602 = vmatmul.bf16.gmra.mxu1 %v1163_v55  ;;  %612 = vmatmul.bf16.gmra.mxu2 %v1203_v56  ;;  %v1147_v55 = vor.u32 %v1422_v44, %v1144_v46  ;;  %v1151_v56 = vor.u32 %v1425_v48, %v1150_v47  ;;  %v1446_v44 = vld [vmem:[%s2145_s0 + $0x110] sm:$0xf0] }
  0x32   :  { %681 = vmatpush.bf16.msrb.mxu2 %v1471_v53  ;;  %632 = vmatpush.bf16.msrb.mxu1 %v1463_v54  ;;  %v1158_v53 = vld [vmem:[%s2145_s0 + $0x60] sm:$0xf]  ;;  %v1426_v54 = vld [vmem:[%s2145_s0 + $0x70] sm:$0xf0] }
  0x33   :  { %622 = vmatmul.bf16.gmra.mxu3 %v1243_v57  ;;  %592 = vmatmul.bf16.gmra.mxu0 %v1123_v58  ;;  %v1155_v57 = vor.u32 %v1423_v49, %v1152_v52  ;;  %v1159_v58 = vor.u32 %v1426_v54, %v1158_v53 }
  0x34   :  { %730 = vmatpush.bf16.msrb.mxu3 %v1479_v59  ;;  %v951_v59 = vld [vmem:[%s2146_s3 + $0x78] sm:$0xff] }
  0x35   :  { %969 = vperm.xlu1 %1561, %v939_v24   ;;  %964 = vperm.xlu0 %1560, %v938_v25   ;;  %v949_v24 = vld [vmem:[%s2146_s3 + $0x68] sm:$0xff] }
  0x36   :  { %682 = vmatpush.bf16.msrb.mxu2 %v1470_v60  ;;  %633 = vmatpush.bf16.msrb.mxu1 %v1462_v61  ;;  %v950_v60 = vld [vmem:[%s2146_s3 + $0x70] sm:$0xff]  ;;  %v940_v61 = vld [vmem:[%s2146_s3 + $0x20] sm:$0xff]  ;;  %v1437_v25 = vld [vmem:[%s2145_s0 + $0xcc] sm:$0xf] }
  0x37   :  { %912 = vperm.xlu2 %1562, %v838_v41   ;;  %v1443_v41 = vld [vmem:[%s2145_s0 + $0xfc] sm:$0xf] }
  0x38   :  { %731 = vmatpush.bf16.msrb.mxu3 %v1478_v1  ;;  %v1430_v1 = vld [vmem:[%s2145_s0 + $0x90] sm:$0xf0] }
  0x39   :  { %v1171_v7 = vor.u32 %v1430_v1, %v1170_v0  ;;  %v1252_v1 = vld [vmem:[%s2145_s0 + $0x134] sm:$0xf0] }
  0x3a   :  { %683 = vmatpush.bf16.msrb.mxu2 %v1469_v2  ;;  %634 = vmatpush.bf16.msrb.mxu1 %v1461_v3  ;;  %v1428_v2 = vld [vmem:[%s2145_s0 + $0x84] sm:$0xf]  ;;  %v1172_v3 = vld [vmem:[%s2145_s0 + $0x94] sm:$0xf0] }
  0x3b   :  { %v1175_v8 = vor.u32 %v1428_v2, %v1172_v3  ;;  %v1258_v2 = vld [vmem:[%s2145_s0 + $0x128] sm:$0xf]  ;;  %v1451_v3 = vld [vmem:[%s2145_s0 + $0x138] sm:$0xf0] }
  0x3c   :  { %732 = vmatpush.bf16.msrb.mxu3 %v1477_v4  ;;  %v1178_v4 = vld [vmem:[%s2145_s0 + $0x88] sm:$0xf] }
  0x3d   :  { %984 = vperm.xlu1 %1561, %v942_v32   ;;  %979 = vperm.xlu0 %1560, %v941_v33   ;;  %v1441_v32 = vld [vmem:[%s2145_s0 + $0xe8] sm:$0xf0]  ;;  %v1207_v33 = vor.u32 %v1437_v25, %v1204_v26 }
  0x3e   :  { %684 = vmatpush.bf16.msrb.mxu2 %v1468_v5  ;;  %635 = vmatpush.bf16.msrb.mxu1 %v1460_v6  ;;  %v1431_v5 = vld [vmem:[%s2145_s0 + $0x98] sm:$0xf0]  ;;  %v1167_v6 = vor.u32 %v1427_v62, %v1164_v63  ;;  %v1219_v36 = vor.u32 %v1441_v32, %v1218_v31  ;;  %v1450_v62 = vld [vmem:[%s2145_s0 + $0x130] sm:$0xf0]  ;;  %v1448_v63 = vld [vmem:[%s2145_s0 + $0x124] sm:$0xf] }
  0x3f   :  { %959 = vperm.xlu2 %1562, %v937_v45  }
  0x40   :  { %733 = vmatpush.bf16.msrb.mxu3 %v1476_v9  ;;  %v1179_v9 = vor.u32 %v1431_v5, %v1178_v4 }
  0x41   :  { %636 = vmatmul.bf16.vlgmr.msrb.gmra.mxu1 %v1107_v19  ;;  %685 = vmatmul.bf16.vlgmr.msrb.gmra.mxu2 %v1111_v20  ;;  %v1436_v19 = vld [vmem:[%s2145_s0 + $0xc0] sm:$0xf0]  ;;  %v1187_v20 = vor.u32 %v1432_v12, %v1184_v13 }
  0x42   :  { %v1199_v23 = vor.u32 %v1436_v19, %v1198_v18 }
  0x43   :  { %734 = vmatmul.bf16.vlgmr.msrb.gmra.mxu3 %v1115_v21  ;;  %1404 = vmatmul.msk.bf16.vlgmr.msrb.gmra.mxu0 %vm554_vm0, %v1119_v22  ;;  %v1191_v21 = vor.u32 %v1435_v15, %v1190_v14  ;;  %v1195_v22 = vor.u32 %v1433_v16, %v1192_v17 }
  0x45   :  { %999 = vperm.xlu1 %1561, %v945_v42   ;;  %994 = vperm.xlu0 %1560, %v944_v43   ;;  %v1232_v42 = vld [vmem:[%s2145_s0 + $0x10c] sm:$0xf0]  ;;  %v1238_v43 = vld [vmem:[%s2145_s0 + $0x100] sm:$0xf] }
  0x46   :  { %v1235_v48 = vor.u32 %v1443_v41, %v1232_v42  ;;  %v1239_v49 = vor.u32 %v1446_v44, %v1238_v43 }
  0x47   :  { %974 = vperm.xlu2 %1562, %v940_v61   ;;  %v1250_v61 = vld [vmem:[%s2145_s0 + $0x120] sm:$0xf] }
  0x4d   :  { %1014 = vperm.xlu1 %1561, %v948_v50   ;;  %1009 = vperm.xlu0 %1560, %v947_v51  }
  0x4f   :  { %989 = vperm.xlu2 %1562, %v943_v10   ;;  %v1259_v10 = vor.u32 %v1451_v3, %v1258_v2 }
  0x51   :  { %641 = vmatmul.bf16.gmra.mxu1 %v1127_v37  ;;  %690 = vmatmul.bf16.gmra.mxu2 %v1131_v38  ;;  %v1442_v37 = vld [vmem:[%s2145_s0 + $0xf4] sm:$0xf]  ;;  %v1224_v38 = vld [vmem:[%s2145_s0 + $0x104] sm:$0xf0] }
  0x52   :  { %v1227_v45 = vor.u32 %v1442_v37, %v1224_v38 }
  0x53   :  { %739 = vmatmul.bf16.gmra.mxu3 %v1135_v39  ;;  %1405 = vmatmul.msk.bf16.gmra.mxu0 %vm554_vm0, %v1139_v40  ;;  %v1230_v39 = vld [vmem:[%s2145_s0 + $0xf8] sm:$0xf]  ;;  %v1445_v40 = vld [vmem:[%s2145_s0 + $0x108] sm:$0xf0] }
  0x54   :  { %v1231_v46 = vor.u32 %v1445_v40, %v1230_v39 }
  0x55   :  { %1029 = vperm.xlu1 %1561, %v951_v59   ;;  %1024 = vperm.xlu0 %1560, %v950_v60   ;;  %v1447_v59 = vld [vmem:[%s2145_s0 + $0x11c] sm:$0xf]  ;;  %v1244_v60 = vld [vmem:[%s2145_s0 + $0x12c] sm:$0xf0] }
  0x57   :  { %1004 = vperm.xlu2 %1562, %v946_v11  }
  0x5f   :  { %1019 = vperm.xlu2 %1562, %v949_v24  }
  0x61   :  { %646 = vmatmul.bf16.gmra.mxu1 %v1147_v55  ;;  %695 = vmatmul.bf16.gmra.mxu2 %v1151_v56 }
  0x63   :  { %744 = vmatmul.bf16.gmra.mxu3 %v1155_v57  ;;  %1406 = vmatmul.msk.bf16.gmra.mxu0 %vm554_vm0, %v1159_v58 }
  0x6e   :  { %v2019_v52 = vpop.permute.xlu2 %862 }
  0x71   :  { %651 = vmatmul.bf16.gmra.mxu1 %v1167_v6  ;;  %700 = vmatmul.bf16.gmra.mxu2 %v1171_v7  ;;  %v1247_v6 = vor.u32 %v1447_v59, %v1244_v60  ;;  %v1251_v7 = vor.u32 %v1450_v62, %v1250_v61 }
  0x73   :  { %749 = vmatmul.bf16.gmra.mxu3 %v1175_v8  ;;  %1407 = vmatmul.msk.bf16.gmra.mxu0 %vm554_vm0, %v1179_v9  ;;  %v1255_v9 = vor.u32 %v1448_v63, %v1252_v1 }
  0x76   :  { %v2017_v50 = vpop.permute.xlu1 %852  ;;  %v2045_v0 = vpop.permute.xlu2 %867 }
  0x77   :  { %v843_v55 = vpop.permute.xlu0 %842 }
  0x7e   :  { %v2028_v58 = vpop.permute.xlu1 %857 }
  0x7f   :  { %v848_v12 = vpop.permute.xlu0 %847 }
  0x81   :  { %656 = vmatmul.bf16.gmra.mxu1 %v1187_v20  ;;  %705 = vmatmul.bf16.gmra.mxu2 %v1191_v21  ;;  %v2067_v15 = vpop.permute.xlu2 %882 }
  0x83   :  { %754 = vmatmul.bf16.gmra.mxu3 %v1195_v22  ;;  %1408 = vmatmul.msk.bf16.gmra.mxu0 %vm554_vm0, %v1199_v23 }
  0x86   :  { %v2063_v13 = vpop.permute.xlu1 %877 }
  0x87   :  { %v2073_v19 = vpop.permute.xlu0 %872 }
  0x89   :  { %v2081_v24 = vpop.permute.xlu2 %897 }
  0x8e   :  { %v2075_v20 = vpop.permute.xlu1 %892 }
  0x8f   :  { %v2083_v27 = vpop.permute.xlu0 %887 }
  0x91   :  { %661 = vmatmul.bf16.gmra.mxu1 %v1207_v33  ;;  %710 = vmatmul.bf16.gmra.mxu2 %v1211_v34 }
  0x93   :  { %759 = vmatmul.bf16.gmra.mxu3 %v1215_v35  ;;  %1409 = vmatmul.msk.bf16.gmra.mxu0 %vm554_vm0, %v1219_v36  ;;  %v2087_v35 = vpop.permute.xlu2 %912 }
  0x97   :  { %v2085_v31 = vpop.permute.xlu1 %907  ;;  %v2089_v41 = vpop.permute.xlu0 %902 }
  0x9e   :  { %v2015_v47 = vpop.f32.mrf.mxu1 }
  0xa0   :  { %v588_v51 = vpop.f32.mrf.mxu0 }
  0xa1   :  { %666 = vmatmul.bf16.gmra.mxu1 %v1227_v45  ;;  %715 = vmatmul.bf16.gmra.mxu2 %v1231_v46  ;;  %v955_v46 = vpop.permute.xlu1 %954 }
  0xa3   :  { %764 = vmatmul.bf16.gmra.mxu3 %v1235_v48  ;;  %1410 = vmatmul.msk.bf16.gmra.mxu0 %vm554_vm0, %v1239_v49  ;;  %v960_v49 = vpop.permute.xlu2 %959 }
  0xa4   :  { %v2022_v53 = vpop.f32.mrf.mxu2 }
  0xa6   :  { %v2024_v54 = vpop.f32.mrf.mxu3  ;;  %v2026_v56 = vpop.f32.mrf.mxu1 }
  0xa8   :  { %v590_v57 = vpop.f32.mrf.mxu0 }
  0xac   :  { %v2056_v4 = vpop.f32.mrf.mxu2 }
  0xae   :  { %v2058_v5 = vpop.f32.mrf.mxu3  ;;  %v2060_v8 = vpop.f32.mrf.mxu1 }
  0xb0   :  { %v593_v11 = vpop.f32.mrf.mxu0 }
  0xb1   :  { %671 = vmatmul.bf16.gmra.mxu1 %v1247_v6  ;;  %720 = vmatmul.bf16.gmra.mxu2 %v1251_v7 }
  0xb3   :  { %769 = vmatmul.bf16.gmra.mxu3 %v1255_v9  ;;  %1411 = vmatmul.msk.bf16.gmra.mxu0 %vm554_vm0, %v1259_v10  ;;  %v2091_v9 = vpop.permute.xlu0 %917 }
  0xb4   :  { %v2065_v14 = vpop.f32.mrf.mxu2 }
  0xb6   :  { %v2069_v16 = vpop.f32.mrf.mxu3  ;;  %v2071_v17 = vpop.f32.mrf.mxu1 }
  0xb8   :  { %v595_v18 = vpop.f32.mrf.mxu0 }
  0xbc   :  { %v2077_v21 = vpop.f32.mrf.mxu2 }
  0xbe   :  { %v2079_v22 = vpop.f32.mrf.mxu3  ;;  %v637_v23 = vpop.f32.mrf.mxu1 }
  0xbf   :  { %v638_v26 = vadd.f32 %v637_v23, %v588_v51 }
  0xc0   :  { %v784_v25 = vpop.f32.mrf.mxu0 }
  0xc4   :  { %v686_v28 = vpop.f32.mrf.mxu2 }
  0xc5   :  { %v687_v29 = vadd.f32 %v686_v28, %v638_v26 }
  0xc6   :  { %v735_v30 = vpop.f32.mrf.mxu3  ;;  %v639_v32 = vpop.f32.mrf.mxu1 }
  0xc7   :  { %v736_v33 = vadd.f32 %v735_v30, %v687_v29  ;;  %v640_v37 = vadd.f32 %v639_v32, %v590_v57 }
  0xc8   :  { %v786_v34 = vpop.f32.mrf.mxu0 }
  0xc9   :  { %v785_v36 = vadd.f32 %v784_v25, %v736_v33  ;;  %v965_v33 = vpop.permute.xlu0 %964 }
  0xcb   :  { %v920_v43 = vmul.f32 %v843_v55, %v785_v36 }
  0xcc   :  { %v688_v38 = vpop.f32.mrf.mxu2 }
  0xcd   :  { %v689_v39 = vadd.f32 %v688_v38, %v640_v37  ;;  %v1032_v51 = vadd.f32 %v955_v46, %v920_v43  ;;  %v970_v38 = vpop.permute.xlu1 %969 }
  0xce   :  { %v737_v40 = vpop.f32.mrf.mxu3  ;;  %v642_v42 = vpop.f32.mrf.mxu1 }
  0xcf   :  { %v738_v44 = vadd.f32 %v737_v40, %v689_v39  ;;  %v643_v59 = vadd.f32 %v642_v42, %v593_v11  ;;  %v1048_v2 = vmax.f32 %v1032_v51, 0.0 }
  0xd0   :  { %v789_v45 = vpop.f32.mrf.mxu0 }
  0xd1   :  { %v787_v48 = vadd.f32 %v786_v34, %v738_v44 }
  0xd3   :  { %v921_v60 = vmul.f32 %v848_v12, %v787_v48 }
  0xd4   :  { %v691_v61 = vpop.f32.mrf.mxu2 }
  0xd5   :  { %v1033_v62 = vadd.f32 %v960_v49, %v921_v60  ;;  %v692_v63 = vadd.f32 %v691_v61, %v643_v59 }
  0xd6   :  { %v740_v1 = vpop.f32.mrf.mxu3  ;;  %v644_v57 = vpop.f32.mrf.mxu1 }
  0xd7   :  { %v1049_v3 = vmax.f32 %v1033_v62, 0.0  ;;  %v741_v6 = vadd.f32 %v740_v1, %v692_v63  ;;  %v645_v23 = vadd.f32 %v644_v57, %v595_v18  ;;  %v975_v57 = vpop.permute.xlu2 %974 }
  0xd8   :  { %v791_v7 = vpop.f32.mrf.mxu0 }
  0xd9   :  { %v1491_v55 = vpack.c.bf16 %v1049_v3, %v1048_v2  ;;  %v790_v10 = vadd.f32 %v789_v45, %v741_v6 }
  0xdb   :  { %1492 = vst [vmem:[%s2147_s4] sm:$0xff] %v1491_v55   ;;  %v922_v28 = vmul.f32 %v2017_v50, %v790_v10 }
  0xdc   :  { %v693_v11 = vpop.f32.mrf.mxu2 }
  0xdd   :  { %v694_v12 = vadd.f32 %v693_v11, %v645_v23  ;;  %v1034_v34 = vadd.f32 %v965_v33, %v922_v28 }
  0xde   :  { %v742_v25 = vpop.f32.mrf.mxu3  ;;  %v647_v26 = vpop.f32.mrf.mxu1 }
  0xdf   :  { %v743_v29 = vadd.f32 %v742_v25, %v694_v12  ;;  %v648_v37 = vadd.f32 %v647_v26, %v2015_v47  ;;  %v1050_v44 = vmax.f32 %v1034_v34, 0.0 }
  0xe0   :  { %v794_v30 = vpop.f32.mrf.mxu0 }
  0xe1   :  { %v792_v32 = vadd.f32 %v791_v7, %v743_v29  ;;  %v980_v7 = vpop.permute.xlu0 %979 }
  0xe3   :  { %v923_v36 = vmul.f32 %v2028_v58, %v792_v32 }
  0xe4   :  { %v696_v39 = vpop.f32.mrf.mxu2 }
  0xe5   :  { %v1035_v40 = vadd.f32 %v970_v38, %v923_v36  ;;  %v697_v42 = vadd.f32 %v696_v39, %v648_v37  ;;  %v985_v39 = vpop.permute.xlu1 %984 }
  0xe6   :  { %v745_v18 = vpop.f32.mrf.mxu3  ;;  %v649_v43 = vpop.f32.mrf.mxu1 }
  0xe7   :  { %v1051_v45 = vmax.f32 %v1035_v40, 0.0  ;;  %v746_v46 = vadd.f32 %v745_v18, %v697_v42  ;;  %v650_v47 = vadd.f32 %v649_v43, %v2026_v56  ;;  %v990_v43 = vpop.permute.xlu2 %989 }
  0xe8   :  { %v796_v48 = vpop.f32.mrf.mxu0 }
  0xe9   :  { %v1496_v50 = vpack.c.bf16 %v1051_v45, %v1050_v44  ;;  %v795_v49 = vadd.f32 %v794_v30, %v746_v46 }
  0xeb   :  { %1528 = vst [vmem:[%s2147_s4 + $0x8] sm:$0xff] %v1496_v50   ;;  %v924_v58 = vmul.f32 %v2019_v52, %v795_v49 }
  0xec   :  { %v698_v51 = vpop.f32.mrf.mxu2 }
  0xed   :  { %v699_v59 = vadd.f32 %v698_v51, %v650_v47  ;;  %v1036_v2 = vadd.f32 %v975_v57, %v924_v58 }
  0xee   :  { %v747_v60 = vpop.f32.mrf.mxu3  ;;  %v652_v61 = vpop.f32.mrf.mxu1 }
  0xef   :  { %v748_v62 = vadd.f32 %v747_v60, %v699_v59  ;;  %v653_v6 = vadd.f32 %v652_v61, %v2060_v8  ;;  %v1052_v56 = vmax.f32 %v1036_v2, 0.0  ;;  %v995_v2 = vpop.permute.xlu0 %994 }
  0xf0   :  { %v799_v63 = vpop.f32.mrf.mxu0 }
  0xf1   :  { %v797_v1 = vadd.f32 %v796_v48, %v748_v62 }
  0xf3   :  { %v925_v3 = vmul.f32 %v2045_v0, %v797_v1 }
  0xf4   :  { %v701_v55 = vpop.f32.mrf.mxu2 }
  0xf5   :  { %v1037_v10 = vadd.f32 %v980_v7, %v925_v3  ;;  %v702_v23 = vadd.f32 %v701_v55, %v653_v6  ;;  %v1000_v55 = vpop.permute.xlu1 %999 }
  0xf6   :  { %v750_v52 = vpop.f32.mrf.mxu3  ;;  %v654_v11 = vpop.f32.mrf.mxu1 }
  0xf7   :  { %v1053_v12 = vmax.f32 %v1037_v10, 0.0  ;;  %v751_v25 = vadd.f32 %v750_v52, %v702_v23  ;;  %v655_v0 = vadd.f32 %v654_v11, %v2071_v17 }
  0xf8   :  { %v801_v26 = vpop.f32.mrf.mxu0 }
  0xf9   :  { %v1501_v28 = vpack.c.bf16 %v1053_v12, %v1052_v56  ;;  %v800_v29 = vadd.f32 %v799_v63, %v751_v25 }
  0xfb   :  { %1529 = vst [vmem:[%s2147_s4 + $0x10] sm:$0xff] %v1501_v28   ;;  %v926_v34 = vmul.f32 %v2073_v19, %v800_v29 }
  0xfc   :  { %v703_v30 = vpop.f32.mrf.mxu2 }
  0xfd   :  { %v704_v8 = vadd.f32 %v703_v30, %v655_v0  ;;  %v1038_v40 = vadd.f32 %v985_v39, %v926_v34  ;;  %v1005_v34 = vpop.permute.xlu2 %1004 }
  0xfe   :  { %v752_v32 = vpop.f32.mrf.mxu3  ;;  %v657_v33 = vpop.f32.mrf.mxu1 }
  0xff   :  { %v753_v36 = vadd.f32 %v752_v32, %v704_v8  ;;  %v658_v18 = vadd.f32 %v657_v33, %v2022_v53  ;;  %v1054_v50 = vmax.f32 %v1038_v40, 0.0  ;;  %v1010_v40 = vpop.permute.xlu0 %1009 }
 0x100   :  { %v804_v37 = vpop.f32.mrf.mxu0 }
 0x101   :  { %v802_v38 = vadd.f32 %v801_v26, %v753_v36 }
 0x103   :  { %v927_v42 = vmul.f32 %v2063_v13, %v802_v38 }
 0x104   :  { %v706_v44 = vpop.f32.mrf.mxu2 }
 0x105   :  { %v1039_v45 = vadd.f32 %v990_v43, %v927_v42  ;;  %v707_v46 = vadd.f32 %v706_v44, %v658_v18 }
 0x106   :  { %v755_v17 = vpop.f32.mrf.mxu3  ;;  %v659_v48 = vpop.f32.mrf.mxu1 }
 0x107   :  { %v1055_v49 = vmax.f32 %v1039_v45, 0.0  ;;  %v756_v58 = vadd.f32 %v755_v17, %v707_v46  ;;  %v660_v13 = vadd.f32 %v659_v48, %v2056_v4 }
 0x108   :  { %v806_v47 = vpop.f32.mrf.mxu0 }
 0x109   :  { %v1506_v19 = vpack.c.bf16 %v1055_v49, %v1054_v50  ;;  %v805_v51 = vadd.f32 %v804_v37, %v756_v58 }
 0x10b   :  { %1530 = vst [vmem:[%s2147_s4 + $0x18] sm:$0xff] %v1506_v19   ;;  %v928_v62 = vmul.f32 %v2067_v15, %v805_v51 }
 0x10c   :  { %v708_v59 = vpop.f32.mrf.mxu2 }
 0x10d   :  { %v709_v53 = vadd.f32 %v708_v59, %v660_v13  ;;  %v1040_v3 = vadd.f32 %v995_v2, %v928_v62  ;;  %v1015_v59 = vpop.permute.xlu1 %1014  ;;  %v1020_v62 = vpop.permute.xlu2 %1019 }
 0x10e   :  { %v757_v60 = vpop.f32.mrf.mxu3  ;;  %v662_v61 = vpop.f32.mrf.mxu1 }
 0x10f   :  { %v758_v63 = vadd.f32 %v757_v60, %v709_v53  ;;  %v663_v7 = vadd.f32 %v662_v61, %v2065_v14  ;;  %v1056_v56 = vmax.f32 %v1040_v3, 0.0 }
 0x110   :  { %v809_v1 = vpop.f32.mrf.mxu0 }
 0x111   :  { %v807_v57 = vadd.f32 %v806_v47, %v758_v63 }
 0x113   :  { %v929_v6 = vmul.f32 %v2083_v27, %v807_v57 }
 0x114   :  { %v711_v10 = vpop.f32.mrf.mxu2 }
 0x115   :  { %v1041_v23 = vadd.f32 %v1000_v55, %v929_v6  ;;  %v712_v52 = vadd.f32 %v711_v10, %v663_v7 }
 0x116   :  { %v760_v4 = vpop.f32.mrf.mxu3  ;;  %v664_v11 = vpop.f32.mrf.mxu1 }
 0x117   :  { %v1057_v12 = vmax.f32 %v1041_v23, 0.0  ;;  %v761_v25 = vadd.f32 %v760_v4, %v712_v52  ;;  %v665_v27 = vadd.f32 %v664_v11, %v2077_v21 }
 0x118   :  { %v811_v26 = vpop.f32.mrf.mxu0 }
 0x119   :  { %v1511_v15 = vpack.c.bf16 %v1057_v12, %v1056_v56  ;;  %v810_v28 = vadd.f32 %v809_v1, %v761_v25  ;;  %v1025_v25 = vpop.permute.xlu0 %1024 }
 0x11b   :  { %1531 = vst [vmem:[%s2147_s4 + $0x20] sm:$0xff] %v1511_v15   ;;  %v930_v8 = vmul.f32 %v2075_v20, %v810_v28  ;;  %v1030_v28 = vpop.permute.xlu1 %1029 }
 0x11c   :  { %v713_v29 = vpop.f32.mrf.mxu2 }
 0x11d   :  { %v714_v14 = vadd.f32 %v713_v29, %v665_v27  ;;  %v1042_v37 = vadd.f32 %v1005_v34, %v930_v8 }
 0x11e   :  { %v762_v0 = vpop.f32.mrf.mxu3  ;;  %v667_v30 = vpop.f32.mrf.mxu1 }
 0x11f   :  { %v763_v32 = vadd.f32 %v762_v0, %v714_v14  ;;  %v668_v39 = vadd.f32 %v667_v30, %v2024_v54  ;;  %v1058_v45 = vmax.f32 %v1042_v37, 0.0 }
 0x120   :  { %v814_v36 = vpop.f32.mrf.mxu0 }
 0x121   :  { %v812_v33 = vadd.f32 %v811_v26, %v763_v32 }
 0x123   :  { %v931_v38 = vmul.f32 %v2081_v24, %v812_v33 }
 0x124   :  { %v716_v42 = vpop.f32.mrf.mxu2 }
 0x125   :  { %v1043_v18 = vadd.f32 %v1010_v40, %v931_v38  ;;  %v717_v43 = vadd.f32 %v716_v42, %v668_v39 }
 0x126   :  { %v765_v21 = vpop.f32.mrf.mxu3  ;;  %v669_v44 = vpop.f32.mrf.mxu1 }
 0x127   :  { %v1059_v46 = vmax.f32 %v1043_v18, 0.0  ;;  %v766_v17 = vadd.f32 %v765_v21, %v717_v43  ;;  %v670_v50 = vadd.f32 %v669_v44, %v2058_v5 }
 0x128   :  { %v816_v24 = vpop.f32.mrf.mxu0 }
 0x129   :  { %v1516_v48 = vpack.c.bf16 %v1059_v46, %v1058_v45  ;;  %v815_v20 = vadd.f32 %v814_v36, %v766_v17 }
 0x12b   :  { %1532 = vst [vmem:[%s2147_s4 + $0x28] sm:$0xff] %v1516_v48   ;;  %v932_v19 = vmul.f32 %v2089_v41, %v815_v20 }
 0x12c   :  { %v718_v49 = vpop.f32.mrf.mxu2 }
 0x12d   :  { %v719_v54 = vadd.f32 %v718_v49, %v670_v50  ;;  %v1044_v53 = vadd.f32 %v1015_v59, %v932_v19 }
 0x12e   :  { %v767_v58 = vpop.f32.mrf.mxu3  ;;  %v672_v47 = vpop.f32.mrf.mxu1 }
 0x12f   :  { %v768_v51 = vadd.f32 %v767_v58, %v719_v54  ;;  %v673_v61 = vadd.f32 %v672_v47, %v2069_v16  ;;  %v1060_v3 = vmax.f32 %v1044_v53, 0.0 }
 0x130   :  { %v819_v2 = vpop.f32.mrf.mxu0 }
 0x131   :  { %v817_v13 = vadd.f32 %v816_v24, %v768_v51 }
 0x133   :  { %v933_v60 = vmul.f32 %v2085_v31, %v817_v13 }
 0x134   :  { %v721_v63 = vpop.f32.mrf.mxu2 }
 0x135   :  { %v1045_v1 = vadd.f32 %v1020_v62, %v933_v60  ;;  %v722_v57 = vadd.f32 %v721_v63, %v673_v61 }
 0x136   :  { %v770_v5 = vpop.f32.mrf.mxu3  ;;  %v674_v55 = vpop.f32.mrf.mxu1 }
 0x137   :  { %v1061_v6 = vmax.f32 %v1045_v1, 0.0  ;;  %v771_v7 = vadd.f32 %v770_v5, %v722_v57  ;;  %v675_v31 = vadd.f32 %v674_v55, %v2079_v22 }
 0x138   :  { %v821_v56 = vpop.f32.mrf.mxu0 }
 0x139   :  { %v1521_v10 = vpack.c.bf16 %v1061_v6, %v1060_v3  ;;  %v820_v41 = vadd.f32 %v819_v2, %v771_v7 }
 0x13b   :  { %1533 = vst [vmem:[%s2147_s4 + $0x30] sm:$0xff] %v1521_v10   ;;  %v934_v4 = vmul.f32 %v2087_v35, %v820_v41 }
 0x13c   :  { %v723_v23 = vpop.f32.mrf.mxu2 }
 0x13d   :  { %v724_v16 = vadd.f32 %v723_v23, %v675_v31  ;;  %v1046_v26 = vadd.f32 %v1025_v25, %v934_v4 }
 0x13e   :  { %v772_v52 = vpop.f32.mrf.mxu3 }
 0x13f   :  { %v773_v11 = vadd.f32 %v772_v52, %v724_v16  ;;  %v1062_v29 = vmax.f32 %v1046_v26, 0.0 }
 0x141   :  { %v822_v12 = vadd.f32 %v821_v56, %v773_v11 }
 0x143   :  { %v935_v15 = vmul.f32 %v2091_v9, %v822_v12 }
 0x145   :  { %v1047_v27 = vadd.f32 %v1030_v28, %v935_v15 }
 0x147   :  { %v1063_v14 = vmax.f32 %v1047_v27, 0.0 }
 0x149   :  { %v1526_v0 = vpack.c.bf16 %v1063_v14, %v1062_v29 }
 0x14b   :  { %1534 = vst [vmem:[%s2147_s4 + $0x38] sm:$0xff] %v1526_v0  }

// kernel: ae_forward.22
= control target key start
LH: loop header
LB: loop body
LE: loop exit
PB: predicated region body
PF: predicated region fallthrough
CT: control target
= control target key end

     0   :  { %v675_v3 = vmov 0   ;;  %vm238_vm0 = vcmask 261120   ;;  %s922_s1 = inlined_call_operand.vmem [shape: bf16[288,128], index: 1, kind: input, shape index: {}]   ;;  %s923_s0 = inlined_call_operand.vmem [shape: bf16[64,288], index: 0, kind: input, shape index: {}]   ;;  %s924_s2 = inlined_call_operand.vmem [shape: f32[64,1], index: 2, kind: input, shape index: {}]   ;;  %s925_s3 = inlined_call_operand.vmem [shape: f32[64,1], index: 3, kind: input, shape index: {}]   ;;  %s926_s4 = inlined_call_operand.vmem [shape: bf16[64,128], index: 4, kind: output, shape index: {}]  }
   0x1   :  { %v621_v0 = vld [vmem:[%s922_s1 + $0x38] sm:$0xff]  ;;  %v631_v2 = vld [vmem:[%s922_s1 + $0x88] sm:$0xff]  ;;  %672 = vset.pattern.permute.xlu0 %v675_v3  ;;  %673 = vset.pattern.permute.xlu1 %v675_v3  ;;  %v620_v4 = vld [vmem:[%s922_s1 + $0x30] sm:$0xff] }
   0x2   :  { %v707_v1 = vld [vmem:[%s922_s1 + $0x78] sm:$0xff]  ;;  %674 = vset.pattern.permute.xlu2 %v675_v3  ;;  %251 = vmatpush.bf16.msra.mxu0 %v621_v0  ;;  %v719_v5 = vld [vmem:[%s922_s1 + $0x70] sm:$0xff]  ;;  %v630_v6 = vld [vmem:[%s922_s1 + $0x80] sm:$0xff] }
   0x3   :  { %655 = vmatpush.bf16.msra.mxu3 %v621_v0  ;;  %663 = vmatpush.bf16.msra.mxu1 %v707_v1  ;;  %v488_v7 = vld [vmem:[%s923_s0 + $0x8] sm:$0xf]  ;;  %v604_v8 = vld [vmem:[%s923_s0 + $0x10] sm:$0xf0]  ;;  %v338_v9 = vld [vmem:[%s924_s2] sm:$0xff] }
   0x4   :  { %315 = vmatpush.bf16.msra.mxu2 %v631_v2  ;;  %348 = vperm.xlu0 %672, %v338_v9   ;;  %v619_v10 = vld [vmem:[%s922_s1 + $0x28] sm:$0xff]  ;;  %v489_v12 = vor.u32 %v604_v8, %v488_v7  ;;  %v340_v13 = vld [vmem:[%s924_s2 + $0x10] sm:$0xff]  ;;  %v618_v14 = vld [vmem:[%s922_s1 + $0x20] sm:$0xff] }
   0x5   :  { %v740_v11 = vld [vmem:[%s922_s1 + $0x68] sm:$0xff]  ;;  %358 = vperm.xlu1 %673, %v340_v13   ;;  %v756_v16 = vld [vmem:[%s922_s1 + $0x60] sm:$0xff]  ;;  %v617_v17 = vld [vmem:[%s922_s1 + $0x18] sm:$0xff] }
   0x6   :  { %252 = vmatpush.bf16.msra.mxu0 %v620_v4  ;;  %v339_v15 = vld [vmem:[%s924_s2 + $0x8] sm:$0xff]  ;;  %v341_v18 = vld [vmem:[%s924_s2 + $0x18] sm:$0xff]  ;;  %v616_v20 = vld [vmem:[%s922_s1 + $0x10] sm:$0xff] }
   0x7   :  { %656 = vmatpush.bf16.msra.mxu3 %v620_v4  ;;  %664 = vmatpush.bf16.msra.mxu1 %v719_v5  ;;  %v768_v19 = vld [vmem:[%s922_s1 + $0x58] sm:$0xff]  ;;  %v344_v21 = vld [vmem:[%s924_s2 + $0x30] sm:$0xff]  ;;  %v500_v23 = vld [vmem:[%s923_s0 + $0x20] sm:$0xf] }
   0x8   :  { %316 = vmatpush.bf16.msra.mxu2 %v630_v6  ;;  %v780_v22 = vld [vmem:[%s922_s1 + $0x50] sm:$0xff]  ;;  %v607_v24 = vld [vmem:[%s923_s0 + $0x28] sm:$0xf0]  ;;  %v345_v26 = vld [vmem:[%s924_s2 + $0x38] sm:$0xff] }
   0x9   :  { %v615_v25 = vld [vmem:[%s922_s1 + $0x8] sm:$0xff]  ;;  %v501_v28 = vor.u32 %v607_v24, %v500_v23  ;;  %v342_v29 = vld [vmem:[%s924_s2 + $0x20] sm:$0xff]  ;;  %v492_v31 = vld [vmem:[%s923_s0 + $0x18] sm:$0xf] }
   0xa   :  { %253 = vmatpush.bf16.msra.mxu0 %v619_v10  ;;  %v798_v27 = vld [vmem:[%s922_s1 + $0x48] sm:$0xff]  ;;  %368 = vperm.xlu2 %674, %v342_v29   ;;  %v614_v30 = vld [vmem:[%s922_s1] sm:$0xff]  ;;  %v605_v37 = vld [vmem:[%s923_s0 + $0x1c] sm:$0xf] }
   0xb   :  { %657 = vmatpush.bf16.msra.mxu3 %v619_v10  ;;  %665 = vmatpush.bf16.msra.mxu1 %v740_v11  ;;  %v606_v32 = vld [vmem:[%s923_s0 + $0x20] sm:$0xf0]  ;;  %v395_v33 = vld [vmem:[%s925_s3 + $0x8] sm:$0xff]  ;;  %v480_v34 = vld [vmem:[%s923_s0] sm:$0xf] }
   0xc   :  { %598 = vmatmul.msk.bf16.vlgmr.msra.gmra.mxu2 %vm238_vm0, %v489_v12  ;;  %353 = vperm.xlu0 %672, %v339_v15   ;;  %v603_v35 = vld [vmem:[%s923_s0 + $0x8] sm:$0xf0]  ;;  %v622_v36 = vld [vmem:[%s922_s1 + $0x40] sm:$0xff]  ;;  %v494_v38 = vld [vmem:[%s923_s0 + $0x24] sm:$0xf0]  ;;  %v493_v39 = vor.u32 %v606_v32, %v492_v31 }
   0xd   :  { %363 = vperm.xlu1 %673, %v341_v18   ;;  %v481_v40 = vor.u32 %v603_v35, %v480_v34  ;;  %v497_v41 = vor.u32 %v605_v37, %v494_v38  ;;  %v343_v42 = vld [vmem:[%s924_s2 + $0x28] sm:$0xff]  ;;  %v396_v43 = vld [vmem:[%s925_s3 + $0x10] sm:$0xff]  ;;  %v398_v44 = vld [vmem:[%s925_s3 + $0x20] sm:$0xff] }
   0xe   :  { %254 = vmatpush.bf16.msra.mxu0 %v618_v14  ;;  %v512_v45 = vld [vmem:[%s923_s0 + $0x38] sm:$0xf]  ;;  %v610_v46 = vld [vmem:[%s923_s0 + $0x40] sm:$0xf0]  ;;  %v399_v49 = vld [vmem:[%s925_s3 + $0x28] sm:$0xff] }
   0xf   :  { %658 = vmatpush.bf16.msra.mxu3 %v618_v14  ;;  %666 = vmatpush.bf16.msra.mxu1 %v756_v16  ;;  %v394_v47 = vld [vmem:[%s925_s3] sm:$0xff]  ;;  %v513_v48 = vor.u32 %v610_v46, %v512_v45  ;;  %v504_v50 = vld [vmem:[%s923_s0 + $0x30] sm:$0xf]  ;;  %v609_v51 = vld [vmem:[%s923_s0 + $0x38] sm:$0xf0] }
  0x10   :  { %v401_v52 = vld [vmem:[%s925_s3 + $0x38] sm:$0xff]  ;;  %v608_v53 = vld [vmem:[%s923_s0 + $0x34] sm:$0xf]  ;;  %v506_v54 = vld [vmem:[%s923_s0 + $0x3c] sm:$0xf0]  ;;  %v505_v55 = vor.u32 %v609_v51, %v504_v50 }
  0x11   :  { %v397_v56 = vld [vmem:[%s925_s3 + $0x18] sm:$0xff]  ;;  %v509_v57 = vor.u32 %v608_v53, %v506_v54  ;;  %v524_v58 = vld [vmem:[%s923_s0 + $0x50] sm:$0xf]  ;;  %v602_v62 = vld [vmem:[%s923_s0 + $0x4] sm:$0xf] }
  0x12   :  { %255 = vmatpush.bf16.msra.mxu0 %v617_v17  ;;  %373 = vperm.xlu2 %674, %v343_v42   ;;  %v613_v59 = vld [vmem:[%s923_s0 + $0x58] sm:$0xf0]  ;;  %v400_v60 = vld [vmem:[%s925_s3 + $0x30] sm:$0xff]  ;;  %v611_v3 = vld [vmem:[%s923_s0 + $0x4c] sm:$0xf] }
  0x13   :  { %659 = vmatpush.bf16.msra.mxu3 %v617_v17  ;;  %667 = vmatpush.bf16.msra.mxu1 %v768_v19  ;;  %v525_v61 = vor.u32 %v613_v59, %v524_v58  ;;  %v482_v63 = vld [vmem:[%s923_s0 + $0xc] sm:$0xf0]  ;;  %v612_v2 = vld [vmem:[%s923_s0 + $0x50] sm:$0xf0]  ;;  %v518_v4 = vld [vmem:[%s923_s0 + $0x54] sm:$0xf0] }
  0x14   :  { %378 = vperm.xlu0 %672, %v344_v21   ;;  %v485_v0 = vor.u32 %v602_v62, %v482_v63  ;;  %v521_v6 = vor.u32 %v611_v3, %v518_v4 }
  0x15   :  { %383 = vperm.xlu1 %673, %v345_v26  }
  0x16   :  { %256 = vmatpush.bf16.msra.mxu0 %v616_v20 }
  0x17   :  { %660 = vmatpush.bf16.msra.mxu3 %v616_v20  ;;  %668 = vmatpush.bf16.msra.mxu1 %v780_v22 }
  0x1a   :  { %257 = vmatpush.bf16.msra.mxu0 %v615_v25  ;;  %404 = vperm.xlu2 %674, %v394_v47  }
  0x1b   :  { %661 = vmatpush.bf16.msra.mxu3 %v615_v25  ;;  %669 = vmatpush.bf16.msra.mxu1 %v798_v27 }
  0x1c   :  { %599 = vmatmul.msk.bf16.gmra.mxu2 %vm238_vm0, %v501_v28  ;;  %409 = vperm.xlu0 %672, %v395_v33  }
  0x1d   :  { %414 = vperm.xlu1 %673, %v396_v43  }
  0x1e   :  { %258 = vmatpush.bf16.msra.mxu0 %v614_v30 }
  0x1f   :  { %662 = vmatpush.bf16.msra.mxu3 %v614_v30  ;;  %670 = vmatpush.bf16.msra.mxu1 %v622_v36 }
  0x21   :  { %259 = vmatmul.bf16.vlgmr.msra.gmra.mxu0 %v481_v40 }
  0x22   :  { %280 = vmatpush.bf16.msrb.mxu0 %v707_v1  ;;  %264 = vmatmul.bf16.vlgmr.msra.gmra.mxu3 %v493_v39  ;;  %v516_v1 = vld [vmem:[%s923_s0 + $0x48] sm:$0xf] }
  0x23   :  { %293 = vmatmul.bf16.vlgmr.msra.gmra.mxu1 %v497_v41  ;;  %419 = vperm.xlu2 %674, %v397_v56  }
  0x24   :  { %424 = vperm.xlu0 %672, %v398_v44  }
  0x25   :  { %429 = vperm.xlu1 %673, %v399_v49  }
  0x26   :  { %281 = vmatpush.bf16.msrb.mxu0 %v719_v5  ;;  %v517_v5 = vor.u32 %v612_v2, %v516_v1 }
  0x2a   :  { %282 = vmatpush.bf16.msrb.mxu0 %v740_v11 }
  0x2b   :  { %434 = vperm.xlu2 %674, %v400_v60  }
  0x2c   :  { %600 = vmatmul.msk.bf16.gmra.mxu2 %vm238_vm0, %v513_v48  ;;  %439 = vperm.xlu0 %672, %v401_v52  }
  0x2e   :  { %283 = vmatpush.bf16.msrb.mxu0 %v756_v16 }
  0x32   :  { %284 = vmatpush.bf16.msrb.mxu0 %v768_v19  ;;  %269 = vmatmul.bf16.gmra.mxu3 %v505_v55 }
  0x33   :  { %298 = vmatmul.bf16.gmra.mxu1 %v509_v57 }
  0x36   :  { %285 = vmatpush.bf16.msrb.mxu0 %v780_v22 }
  0x3a   :  { %286 = vmatpush.bf16.msrb.mxu0 %v798_v27 }
  0x3c   :  { %601 = vmatmul.msk.bf16.gmra.mxu2 %vm238_vm0, %v525_v61 }
  0x3e   :  { %287 = vmatpush.bf16.msrb.mxu0 %v622_v36 }
  0x41   :  { %288 = vmatmul.bf16.vlgmr.msrb.gmra.mxu0 %v485_v0 }
  0x42   :  { %274 = vmatmul.bf16.gmra.mxu3 %v517_v5 }
  0x43   :  { %303 = vmatmul.bf16.gmra.mxu1 %v521_v6 }
  0x64   :  { %v369_v9 = vpop.permute.xlu2 %368 }
  0x6c   :  { %v374_v13 = vpop.permute.xlu2 %373 }
  0x74   :  { %v405_v23 = vpop.permute.xlu2 %404 }
  0x76   :  { %v349_v11 = vpop.permute.xlu0 %348 }
  0x77   :  { %v359_v8 = vpop.permute.xlu1 %358 }
  0x7d   :  { %v420_v36 = vpop.permute.xlu2 %419 }
  0x7e   :  { %v354_v16 = vpop.permute.xlu0 %353 }
  0x7f   :  { %v364_v12 = vpop.permute.xlu1 %363 }
  0x86   :  { %v379_v25 = vpop.permute.xlu0 %378 }
  0x87   :  { %v907_v17 = vpop.permute.xlu1 %383 }
  0x8e   :  { %v410_v42 = vpop.permute.xlu0 %409 }
  0x8f   :  { %v318_v7 = vpop.f32.mrf.mxu2  ;;  %v415_v29 = vpop.permute.xlu1 %414 }
  0x96   :  { %v425_v53 = vpop.permute.xlu0 %424 }
  0x97   :  { %v320_v10 = vpop.f32.mrf.mxu2  ;;  %v430_v57 = vpop.permute.xlu1 %429 }
  0x9e   :  { %v260_v22 = vpop.f32.mrf.mxu0 }
  0x9f   :  { %v323_v14 = vpop.f32.mrf.mxu2 }
  0xa0   :  { %v294_v15 = vpop.f32.mrf.mxu1 }
  0xa5   :  { %v265_v18 = vpop.f32.mrf.mxu3 }
  0xa6   :  { %v295_v19 = vadd.f32 %v294_v15, %v265_v18  ;;  %v262_v35 = vpop.f32.mrf.mxu0 }
  0xa7   :  { %v325_v20 = vpop.f32.mrf.mxu2 }
  0xa8   :  { %v296_v21 = vpop.f32.mrf.mxu1  ;;  %v324_v24 = vadd.f32 %v323_v14, %v295_v19 }
  0xaa   :  { %v388_v27 = vmul.f32 %v359_v8, %v324_v24 }
  0xac   :  { %v444_v33 = vadd.f32 %v415_v29, %v388_v27 }
  0xad   :  { %v267_v26 = vpop.f32.mrf.mxu3 }
  0xae   :  { %v297_v28 = vadd.f32 %v296_v21, %v267_v26  ;;  %v452_v39 = vmax.f32 %v444_v33, 0.0 }
  0xaf   :  { %v328_v32 = vpop.f32.mrf.mxu2 }
  0xb0   :  { %v326_v30 = vadd.f32 %v325_v20, %v297_v28  ;;  %v299_v31 = vpop.f32.mrf.mxu1 }
  0xb2   :  { %v389_v34 = vmul.f32 %v364_v12, %v326_v30 }
  0xb4   :  { %v445_v37 = vadd.f32 %v420_v36, %v389_v34 }
  0xb5   :  { %v270_v38 = vpop.f32.mrf.mxu3 }
  0xb6   :  { %v453_v40 = vmax.f32 %v445_v37, 0.0  ;;  %v300_v41 = vadd.f32 %v299_v31, %v270_v38 }
  0xb7   :  { %v330_v46 = vpop.f32.mrf.mxu2 }
  0xb8   :  { %v640_v43 = vpack.c.bf16 %v453_v40, %v452_v39  ;;  %v301_v44 = vpop.f32.mrf.mxu1  ;;  %v329_v45 = vadd.f32 %v328_v32, %v300_v41 }
  0xba   :  { %652 = vst [vmem:[%s926_s4 + $0x8] sm:$0xff] %v640_v43   ;;  %v390_v50 = vmul.f32 %v369_v9, %v329_v45 }
  0xbc   :  { %v446_v55 = vadd.f32 %v425_v53, %v390_v50 }
  0xbd   :  { %v272_v49 = vpop.f32.mrf.mxu3 }
  0xbe   :  { %v289_v47 = vpop.f32.mrf.mxu0  ;;  %v302_v51 = vadd.f32 %v301_v44, %v272_v49  ;;  %v454_v1 = vmax.f32 %v446_v55, 0.0 }
  0xbf   :  { %v290_v48 = vadd.f32 %v289_v47, %v260_v22  ;;  %v333_v62 = vpop.f32.mrf.mxu2  ;;  %v435_v22 = vpop.permute.xlu2 %434 }
  0xc0   :  { %v331_v52 = vadd.f32 %v330_v46, %v302_v51  ;;  %v304_v58 = vpop.f32.mrf.mxu1 }
  0xc1   :  { %v319_v54 = vadd.f32 %v318_v7, %v290_v48 }
  0xc2   :  { %v391_v56 = vmul.f32 %v374_v13, %v331_v52 }
  0xc3   :  { %v386_v61 = vmul.f32 %v349_v11, %v319_v54 }
  0xc4   :  { %v447_v59 = vadd.f32 %v430_v57, %v391_v56 }
  0xc5   :  { %v275_v0 = vpop.f32.mrf.mxu3  ;;  %v442_v6 = vadd.f32 %v405_v23, %v386_v61  ;;  %v440_v23 = vpop.permute.xlu0 %439 }
  0xc6   :  { %v291_v60 = vpop.f32.mrf.mxu0  ;;  %v455_v2 = vmax.f32 %v447_v59, 0.0  ;;  %v305_v3 = vadd.f32 %v304_v58, %v275_v0 }
  0xc7   :  { %v292_v63 = vadd.f32 %v291_v60, %v262_v35  ;;  %v450_v12 = vmax.f32 %v442_v6, 0.0  ;;  %v335_v20 = vpop.f32.mrf.mxu2 }
  0xc8   :  { %v645_v5 = vpack.c.bf16 %v455_v2, %v454_v1  ;;  %v334_v7 = vadd.f32 %v333_v62, %v305_v3  ;;  %v306_v14 = vpop.f32.mrf.mxu1 }
  0xc9   :  { %v321_v4 = vadd.f32 %v320_v10, %v292_v63 }
  0xca   :  { %653 = vst [vmem:[%s926_s4 + $0x10] sm:$0xff] %v645_v5   ;;  %v392_v15 = vmul.f32 %v379_v25, %v334_v7 }
  0xcb   :  { %v387_v8 = vmul.f32 %v354_v16, %v321_v4 }
  0xcc   :  { %v448_v10 = vadd.f32 %v435_v22, %v392_v15 }
  0xcd   :  { %v443_v9 = vadd.f32 %v410_v42, %v387_v8  ;;  %v277_v11 = vpop.f32.mrf.mxu3 }
  0xce   :  { %v307_v18 = vadd.f32 %v306_v14, %v277_v11  ;;  %v456_v26 = vmax.f32 %v448_v10, 0.0 }
  0xcf   :  { %v451_v13 = vmax.f32 %v443_v9, 0.0 }
  0xd0   :  { %v336_v21 = vadd.f32 %v335_v20, %v307_v18 }
  0xd1   :  { %v635_v19 = vpack.c.bf16 %v451_v13, %v450_v12 }
  0xd2   :  { %v393_v16 = vmul.f32 %v907_v17, %v336_v21 }
  0xd3   :  { %636 = vst [vmem:[%s926_s4] sm:$0xff] %v635_v19  }
  0xd4   :  { %v449_v24 = vadd.f32 %v440_v23, %v393_v16 }
  0xd6   :  { %v457_v27 = vmax.f32 %v449_v24, 0.0 }
  0xd8   :  { %v650_v28 = vpack.c.bf16 %v457_v27, %v456_v26 }
  0xda   :  { %654 = vst [vmem:[%s926_s4 + $0x18] sm:$0xff] %v650_v28  }

// kernel: ae_forward.23
= control target key start
LH: loop header
LB: loop body
LE: loop exit
PB: predicated region body
PF: predicated region fallthrough
CT: control target
= control target key end

     0   :  { %s741_s15 = smov 0   ;;  %s743_s16 = smov 0   ;;  %s882_s0 = inlined_call_operand.vmem [shape: bf16[4,144], index: 0, kind: input, shape index: {}]   ;;  %s883_s1 = inlined_call_operand.vmem [shape: bf16[144,512], index: 1, kind: input, shape index: {}]   ;;  %s884_s2 = inlined_call_operand.vmem [shape: f32[4,1], index: 2, kind: input, shape index: {}]   ;;  %s885_s3 = inlined_call_operand.vmem [shape: f32[4,1], index: 3, kind: input, shape index: {}]   ;;  %s886_s4 = inlined_call_operand.vmem [shape: f32[4,512], index: 4, kind: output, shape index: {}]  }
   0x1   :  { %s745_s17 = smov 0  }
   0x2 LB: > { %s559_s18 = sadd.s32 4294967295, %s713_s17   ;;  %s758_s19 = sadd.s32 1, %s713_s17   ;;  %s713_s17 = sphi %s745_s17, %s889_s17   ;;  %s709_s16 = sphi %s743_s16, %s888_s16   ;;  %s705_s15 = sphi %s741_s15, %s887_s15  }
   0x3   : > { %s39_s20 = ssub.s32 %s713_s17, %s758_s19  ;;  %s42_s21 = sadd.s32 1, %s709_s16 }
   0x4   : > { %p40_p0 = scmp.eq.s32.totalorder %s39_s20, 0  ;;  %p49_p1 = scmp.ne.s32.totalorder %s709_s16, %s705_s15 }
   0x5   : > { %p50_p2 = scmp.eq.s32.totalorder %s713_s17, 0  ;;  %p562_p4 = scmp.ge.s32.totalorder %s713_s17, 2 }
   0x6   : > { %s767_s22 = scalar_select %p40_p0, %s709_s16, %s42_s21  }
   0x7   : > { %p51_p3 = por %p50_p2, %p49_p1  ;;  %152 = sbr.rel (%p562_p4) target bundleno = 34 (0x22), region = 28 }
   0xc   : > { %155 = sbr.rel (!%p51_p3) target bundleno = 34 (0x22), region = 32  ;;  %s157_s23 = sand.u32 (%p51_p3), 1, %s709_s16  }
   0xd   : > { %s644_s24 = sshll.u32 (%p51_p3), %s713_s17, 3  ;;  %s663_s25 = smul.u32 (%p51_p3), 144, %s157_s23 }
   0xe   : > { %s775_s28 = scalar_lea.vmem (%p51_p3), %s883_s1, %s644_s24 }
   0xf   : > { %v225_v0 = vld [vmem:[%s775_s28] sm:$0xff] (%p51_p3)  ;;  %v227_v1 = vld [vmem:[%s775_s28 + $0x10] sm:$0xff] (%p51_p3)  ;;  %s780_s29 = scalar_lea.vmem (%p51_p3), [#allocation2], %s663_s25 }
  0x10   : > { %v229_v2 = vld [vmem:[%s775_s28 + $0x20] sm:$0xff] (%p51_p3)  ;;  %226 = vst [vmem:[%s780_s29] sm:$0xff] (%p51_p3), %v225_v0  ;;  %v231_v3 = vld [vmem:[%s775_s28 + $0x30] sm:$0xff] (%p51_p3) }
  0x11   : > { %228 = vst [vmem:[%s780_s29 + $0x8] sm:$0xff] %v227_v1  ;;  %v233_v4 = vld [vmem:[%s775_s28 + $0x40] sm:$0xff]  ;;  %v235_v5 = vld [vmem:[%s775_s28 + $0x50] sm:$0xff] }
  0x12   : > { %230 = vst [vmem:[%s780_s29 + $0x10] sm:$0xff] %v229_v2  ;;  %v237_v6 = vld [vmem:[%s775_s28 + $0x60] sm:$0xff]  ;;  %v239_v7 = vld [vmem:[%s775_s28 + $0x70] sm:$0xff] }
  0x13   : > { %232 = vst [vmem:[%s780_s29 + $0x18] sm:$0xff] %v231_v3  ;;  %v241_v8 = vld [vmem:[%s775_s28 + $0x80] sm:$0xff]  ;;  %v243_v9 = vld [vmem:[%s775_s28 + $0x90] sm:$0xff] }
  0x14   : > { %234 = vst [vmem:[%s780_s29 + $0x20] sm:$0xff] %v233_v4  ;;  %v245_v10 = vld [vmem:[%s775_s28 + $0xa0] sm:$0xff]  ;;  %v247_v11 = vld [vmem:[%s775_s28 + $0xb0] sm:$0xff] }
  0x15   : > { %236 = vst [vmem:[%s780_s29 + $0x28] sm:$0xff] %v235_v5  ;;  %v249_v12 = vld [vmem:[%s775_s28 + $0xc0] sm:$0xff]  ;;  %v251_v13 = vld [vmem:[%s775_s28 + $0xd0] sm:$0xff] }
  0x16   : > { %238 = vst [vmem:[%s780_s29 + $0x30] sm:$0xff] %v237_v6  ;;  %v253_v14 = vld [vmem:[%s775_s28 + $0xe0] sm:$0xff]  ;;  %v255_v15 = vld [vmem:[%s775_s28 + $0xf0] sm:$0xff] }
  0x17   : > { %240 = vst [vmem:[%s780_s29 + $0x38] sm:$0xff] %v239_v7  ;;  %v257_v16 = vld [vmem:[%s775_s28 + $0x100] sm:$0xff]  ;;  %v259_v17 = vld [vmem:[%s775_s28 + $0x110] sm:$0xff] }
  0x18   : > { %242 = vst [vmem:[%s780_s29 + $0x40] sm:$0xff] %v241_v8 }
  0x19   : > { %244 = vst [vmem:[%s780_s29 + $0x48] sm:$0xff] %v243_v9 }
  0x1a   : > { %246 = vst [vmem:[%s780_s29 + $0x50] sm:$0xff] %v245_v10 }
  0x1b   : > { %248 = vst [vmem:[%s780_s29 + $0x58] sm:$0xff] %v247_v11 }
  0x1c   : > { %250 = vst [vmem:[%s780_s29 + $0x60] sm:$0xff] %v249_v12 }
  0x1d   : > { %252 = vst [vmem:[%s780_s29 + $0x68] sm:$0xff] %v251_v13 }
  0x1e   : > { %254 = vst [vmem:[%s780_s29 + $0x70] sm:$0xff] %v253_v14 }
  0x1f   : > { %256 = vst [vmem:[%s780_s29 + $0x78] sm:$0xff] %v255_v15 }
  0x20   : > { %258 = vst [vmem:[%s780_s29 + $0x80] sm:$0xff] %v257_v16 }
  0x21   : > { %260 = vst [vmem:[%s780_s29 + $0x88] sm:$0xff] %v259_v17 }
  0x22 PF: > { %p565_p5 = scmp.ge.s32.totalorder %s713_s17, 1  ;;  %p265_p6 = scmp.lt.s32.totalorder %s713_s17, 3 }
  0x24   : > { %p266_p7 = pnand %p565_p5, %p265_p6 }
  0x25   : > { %s272_s30 = sand.u32 (!%p266_p7), 1, %s705_s15   ;;  %s566_s13 = sshll.u32 (!%p266_p7), %s559_s18, 1 }
  0x26   : > { %269 = sbr.rel (%p266_p7) target bundleno = 220 (0xdc), region = 70  ;;  %p299_p8 = scmp.lt.s32.totalorder (!%p266_p7), %s566_s13, 3 }
  0x27   : > { %s664_s7 = smul.u32 (!%p266_p7), 144, %s272_s30 }
  0x29   : > { %s821_s8 = scalar_lea.vmem (!%p266_p7), [#allocation2], %s664_s7 }
  0x2b   : > { %v305_v18 = vld [vmem:[%s882_s0] sm:$0xf]  ;;  %v626_v19 = vld [vmem:[%s821_s8 + $0x70] sm:$0xf]  ;;  %v659_v21 = vld [vmem:[%s821_s8 + $0x74] sm:$0xf] }
  0x2c   : > { %325 = vst [vmem:[#allocation1] ss:$4 sm:$0xff] %v305_v18  ;;  %v660_v20 = vld [vmem:[%s821_s8 + $0x74] sm:$0xf0]  ;;  %v628_v23 = vld [vmem:[%s821_s8 + $0x78] sm:$0xf0] }
  0x2d   : > { %v627_v22 = vor.u32 %v660_v20, %v626_v19  ;;  %v618_v24 = vld [vmem:[%s821_s8 + $0x60] sm:$0xf]  ;;  %v658_v25 = vld [vmem:[%s821_s8 + $0x64] sm:$0xf0]  ;;  %v631_v26 = vor.u32 %v659_v21, %v628_v23  ;;  %v657_v27 = vld [vmem:[%s821_s8 + $0x64] sm:$0xf] }
  0x2e   : > { %v620_v28 = vld [vmem:[%s821_s8 + $0x68] sm:$0xf0]  ;;  %v619_v29 = vor.u32 %v658_v25, %v618_v24  ;;  %v610_v31 = vld [vmem:[%s821_s8 + $0x50] sm:$0xf]  ;;  %v656_v32 = vld [vmem:[%s821_s8 + $0x54] sm:$0xf0] }
  0x2f   : > { %422 = vmatpush.bf16.msra.mxu0 %v627_v22  ;;  %448 = vmatpush.bf16.msra.mxu2 %v631_v26  ;;  %v623_v30 = vor.u32 %v657_v27, %v620_v28  ;;  %v655_v33 = vld [vmem:[%s821_s8 + $0x54] sm:$0xf]  ;;  %v612_v34 = vld [vmem:[%s821_s8 + $0x58] sm:$0xf0]  ;;  %v611_v35 = vor.u32 %v656_v32, %v610_v31  ;;  %v602_v36 = vld [vmem:[%s821_s8 + $0x40] sm:$0xf] }
  0x30   : > { %v615_v37 = vor.u32 %v655_v33, %v612_v34  ;;  %v654_v38 = vld [vmem:[%s821_s8 + $0x44] sm:$0xf0]  ;;  %v661_v39 = vld [vmem:[%s821_s8 + $0x84] sm:$0xf]  ;;  %v636_v40 = vld [vmem:[%s821_s8 + $0x88] sm:$0xf0] }
  0x31   : > { %v653_v41 = vld [vmem:[%s821_s8 + $0x44] sm:$0xf]  ;;  %v604_v42 = vld [vmem:[%s821_s8 + $0x48] sm:$0xf0]  ;;  %v639_v43 = vor.u32 %v661_v39, %v636_v40  ;;  %v715_v45 = vmov 0   ;;  %v603_v46 = vor.u32 %v654_v38, %v602_v36  ;;  %vm419_vm0 = vcmask 130048  }
  0x32   : > { %690 = vset.pattern.permute.xlu0 %v715_v45  ;;  %v634_v47 = vld [vmem:[%s821_s8 + $0x80] sm:$0xf]  ;;  %v662_v48 = vld [vmem:[%s821_s8 + $0x84] sm:$0xf0]  ;;  %v607_v49 = vor.u32 %v653_v41, %v604_v42  ;;  %v594_v50 = vld [vmem:[%s821_s8 + $0x30] sm:$0xf] }
  0x33   : > { %423 = vmatpush.bf16.msra.mxu0 %v619_v29  ;;  %449 = vmatpush.bf16.msra.mxu2 %v623_v30  ;;  %v327_v44 = vld.sshfl [vmem:[#allocation1 + $0x8] sm:$0xff pattern:$0x73625140]  ;;  %v652_v51 = vld [vmem:[%s821_s8 + $0x34] sm:$0xf0]  ;;  %v635_v52 = vor.u32 %v662_v48, %v634_v47  ;;  %s891_s13 = smov (!%p299_p8, %s566_s13), 3 }
  0x34   : > { %468 = vmatpush.bf16.msra.mxu3 %v639_v43  ;;  %v474_v53 = vld [vmem:[%s884_s2] sm:$0xf]  ;;  %v651_v54 = vld [vmem:[%s821_s8 + $0x34] sm:$0xf]  ;;  %v596_v55 = vld [vmem:[%s821_s8 + $0x38] sm:$0xf0]  ;;  %v595_v56 = vor.u32 %v652_v51, %v594_v50 }
  0x35   : > { %477 = vperm.xlu0 %690, %v474_v53   ;;  %442 = vmatpush.bf16.msra.mxu1 %v635_v52  ;;  %v599_v57 = vor.u32 %v651_v54, %v596_v55  ;;  %v586_v58 = vld [vmem:[%s821_s8 + $0x20] sm:$0xf]  ;;  %v650_v59 = vld [vmem:[%s821_s8 + $0x24] sm:$0xf0]  ;;  %v649_v60 = vld [vmem:[%s821_s8 + $0x24] sm:$0xf] }
  0x36   : > { %v588_v61 = vld [vmem:[%s821_s8 + $0x28] sm:$0xf0]  ;;  %v482_v62 = vld [vmem:[%s885_s3] sm:$0xf]  ;;  %v587_v63 = vor.u32 %v650_v59, %v586_v58  ;;  %v578_v1 = vld [vmem:[%s821_s8 + $0x10] sm:$0xf] }
  0x37   : > { %424 = vmatpush.bf16.msra.mxu0 %v611_v35  ;;  %450 = vmatpush.bf16.msra.mxu2 %v615_v37  ;;  %v591_v0 = vor.u32 %v649_v60, %v588_v61  ;;  %v648_v2 = vld [vmem:[%s821_s8 + $0x14] sm:$0xf0]  ;;  %v647_v3 = vld [vmem:[%s821_s8 + $0x14] sm:$0xf]  ;;  %v580_v4 = vld [vmem:[%s821_s8 + $0x18] sm:$0xf0] }
  0x38   : > { %641 = vmatmul.msk.bf16.vlgmr.msra.gmra.mxu3 %vm419_vm0, %v327_v44  ;;  %640 = vmatmul.msk.bf16.vlgmr.msra.gmra.mxu1 %vm419_vm0, %v327_v44  ;;  %v579_v5 = vor.u32 %v648_v2, %v578_v1  ;;  %v583_v6 = vor.u32 %v647_v3, %v580_v4  ;;  %v570_v7 = vld [vmem:[%s821_s8] sm:$0xf]  ;;  %v646_v8 = vld [vmem:[%s821_s8 + $0x4] sm:$0xf0]  ;;  %v645_v9 = vld [vmem:[%s821_s8 + $0x4] sm:$0xf] }
  0x39   : > { %v572_v10 = vld [vmem:[%s821_s8 + $0x8] sm:$0xf0]  ;;  %v571_v11 = vor.u32 %v646_v8, %v570_v7  ;;  %s567_s14 = sshll.u32 %s891_s13, 2  ;;  %vm493_vm1 = vcmask 1043456  }
  0x3a   : > { %v575_v12 = vor.u32 %v645_v9, %v572_v10  ;;  %v326_v13 = vld.sshfl [vmem:[#allocation1] sm:$0xff pattern:$0x73625140]  ;;  %s302_s21 = scalar_lea.vmem %s886_s4, %s567_s14 }
  0x3b   : > { %425 = vmatpush.bf16.msra.mxu0 %v603_v46  ;;  %451 = vmatpush.bf16.msra.mxu2 %v607_v49 }
  0x3d   : > { %485 = vperm.xlu0 %690, %v482_v62  }
  0x3f   : > { %426 = vmatpush.bf16.msra.mxu0 %v595_v56  ;;  %452 = vmatpush.bf16.msra.mxu2 %v599_v57 }
  0x43   : > { %427 = vmatpush.bf16.msra.mxu0 %v587_v63  ;;  %453 = vmatpush.bf16.msra.mxu2 %v591_v0 }
  0x47   : > { %428 = vmatpush.bf16.msra.mxu0 %v579_v5  ;;  %454 = vmatpush.bf16.msra.mxu2 %v583_v6 }
  0x4b   : > { %429 = vmatpush.bf16.msra.mxu0 %v571_v11  ;;  %455 = vmatpush.bf16.msra.mxu2 %v575_v12 }
  0x4e   : > { %430 = vmatmul.bf16.vlgmr.msra.gmra.mxu0 %v326_v13  ;;  %456 = vmatmul.bf16.vlgmr.msra.gmra.mxu2 %v326_v13 }
  0xa7   : > { %v478_v19 = vpop.permute.xlu0 %477 }
  0xaf   : > { %v486_v26 = vpop.permute.xlu0 %485 }
  0xb5   : > { %v444_v14 = vpop.f32.mrf.mxu1 }
  0xbb   : > { %v470_v15 = vpop.f32.mrf.mxu3 }
  0xbd   : > { %v446_v16 = vpop.f32.mrf.mxu1 }
  0xc3   : > { %v472_v17 = vpop.f32.mrf.mxu3 }
  0xcb   : > { %v431_v18 = vpop.f32.mrf.mxu0 }
  0xcc   : > { %v445_v20 = vadd.f32 %v444_v14, %v431_v18 }
  0xce   : > { %v480_v24 = vmul.f32 %v478_v19, %v445_v20 }
  0xd0   : > { %v488_v28 = vadd.f32 %v486_v26, %v480_v24 }
  0xd1   : > { %v457_v21 = vpop.f32.mrf.mxu2 }
  0xd2   : > { %v471_v22 = vadd.f32 %v470_v15, %v457_v21 }
  0xd3   : > { %v433_v23 = vpop.f32.mrf.mxu0 }
  0xd4   : > { %v481_v25 = vmul.f32 %v478_v19, %v471_v22 }
  0xd6   : > { %v489_v27 = vadd.f32 %v486_v26, %v481_v25 }
  0xd8   : > { %v492_v29 = vrot.slane %v489_v27, 4 }
  0xd9   : > { %v459_v30 = vpop.f32.mrf.mxu2 }
  0xda   : > { %v494_v31 = vsel %vm493_vm1, %v488_v28, %v492_v29 }
  0xdb   : > { %496 = vst [vmem:[%s302_s21] sm:$0xff] %v494_v31 }
  0xdc PF: > { %p11_p9 = scmp.ge.s32.totalorder %s758_s19, 4   ;;  %s887_s15 = smov %s709_s16 }
  0xdd   : > { %s888_s16 = smov %s767_s22  ;;  %s889_s17 = smov %s758_s19 }
  0xde   :  { %13 = sbr.rel (!%p11_p9) target bundleno = 2 (0x2), region = 109 }

</bundles_post_ra>
